<compile_context>
chip_gen: v7x
topology: tpu7x:2x2x1
jax: 0.10.0
libtpu: 0.0.40
codegen_flags: <defaults>
</compile_context>

<pallas_src>
import jax
import jax.numpy as jnp
from jax import lax
from jax.experimental import pallas as pl
from jax.experimental.pallas import tpu as pltpu

C_PAD = 128          # lane-dense channel padding (one full vreg lane dim)
BN_EPS = 1e-5
LRELU_SLOPE = 0.2


# ------------------------------ Pallas kernel -------------------------------- #

def _fused_rgb2coordconv_kernel(x_hbm_ref, w_ref, b_ref, g_ref, beta_ref,
                                o_ref, act_ref, dma_sem):
    """One grid step == one conv layer of the 5-layer network.

    x_hbm_ref: (B, H+2, W+2, C_PAD) bf16  halo'd, channel-padded input (raw HBM ref)
    w_ref:     (L*9, C_PAD, C_PAD)  bf16  all layers' per-tap conv weights (resident)
    b_ref:     (L, 1, C_PAD)        f32   conv biases  (resident)
    g_ref:     (L, 1, C_PAD)        f32   BN gammas    (resident, dummy for tail)
    beta_ref:  (L, 1, C_PAD)        f32   BN betas     (resident, dummy for tail)
    o_ref:     (M, C_PAD)           f32   final output (written on last step only)
    act_ref:   (B, H+2, W+2, C_PAD) bf16  persistent halo'd activation scratch
    dma_sem:   DMA semaphore for the one-shot input seed copy
    """
    layer = pl.program_id(0)
    n_layers = pl.num_programs(0)
    B, Hp, Wp, C = act_ref.shape
    H, W = Hp - 2, Wp - 2
    M = B * H * W

    # Layer 0: one manual DMA seeds the persistent activation buffer straight from
    # HBM -- the input never occupies an auto-pipelined VMEM block of its own.
    @pl.when(layer == 0)
    def _seed():
        cp = pltpu.make_async_copy(x_hbm_ref, act_ref, dma_sem)
        cp.start()
        cp.wait()

    # 3x3 conv as 9 accumulated MXU dots straight from the halo'd bf16 activations;
    # K = C_PAD = 128 per dot (single pass on v5e's 128-wide MXU), f32 accumulation.
    # NOTE(item 11): the shifted-window slice + reshape may relayout one (M, C) bf16
    # tile per tap; that traffic is bounded by the tap read itself and is far cheaper
    # than the (M, 9*C_PAD) im2col scratch it replaces.
    # TODO(synk): on v6e/v7x, pair taps (K=256) to fill the 256-wide MXU contraction.
    acc = None
    for k in range(9):                                   # static unroll over 3x3 taps
        kh, kw = k // 3, k % 3
        tap = act_ref[:, kh:kh + H, kw:kw + W, :].reshape(M, C)      # bf16 (M, C)
        part = jnp.dot(tap, w_ref[layer * 9 + k],
                       preferred_element_type=jnp.float32)           # f32  (M, C)
        acc = part if acc is None else acc + part

    # ConvBlock layers: training-mode BatchNorm2d (one-pass biased batch stats over
    # N,H,W; the conv bias is cancelled exactly by the mean subtraction so it is
    # skipped) + LeakyReLU(0.2); result written back into the interior of the halo'd
    # buffer (halo rows/cols and padded channels remain exactly zero).
    @pl.when(layer < n_layers - 1)
    def _conv_block_epilogue():
        inv_m = 1.0 / float(M)
        mean = jnp.sum(acc, axis=0, keepdims=True) * inv_m
        ex2 = jnp.sum(acc * acc, axis=0, keepdims=True) * inv_m
        var = jnp.maximum(ex2 - mean * mean, 0.0)
        y = (acc - mean) * lax.rsqrt(var + BN_EPS)
        y = y * g_ref[layer] + beta_ref[layer]
        y = jnp.where(y >= 0.0, y, LRELU_SLOPE * y)
        act_ref[:, 1:H + 1, 1:W + 1, :] = y.reshape(B, H, W, C).astype(act_ref.dtype)

    # Tail layer: plain conv + bias, stored lane-dense (C_PAD wide); wrapper slices.
    @pl.when(layer == n_layers - 1)
    def _tail_epilogue():
        o_ref[...] = acc + b_ref[layer]


# ------------------------------ JAX wrapper ---------------------------------- #

def _pack_params(params):
    """PyTorch-layout params -> per-tap, channel-padded, layer-stacked kernel params."""
    convs = list(params["blocks"])                       # (w, b, gamma, beta)
    tw, tb = params["tail"]
    out_c = int(tw.shape[0])
    convs.append((tw, tb,
                  jnp.ones((out_c,), jnp.float32),       # dummy BN params (unused)
                  jnp.zeros((out_c,), jnp.float32)))

    w_l, b_l, g_l, bt_l = [], [], [], []
    for (w, b, g, beta) in convs:
        cout, cin = int(w.shape[0]), int(w.shape[1])
        # (Cout, Cin, 3, 3) -> (kh, kw, Cin, Cout) -> pad channels -> (9, C_PAD, C_PAD)
        w9 = jnp.transpose(w, (2, 3, 1, 0))
        w9 = jnp.pad(w9, ((0, 0), (0, 0), (0, C_PAD - cin), (0, C_PAD - cout)))
        w_l.append(w9.reshape(9, C_PAD, C_PAD).astype(jnp.bfloat16))
        b_l.append(jnp.pad(b, (0, C_PAD - cout)).reshape(1, C_PAD))
        g_l.append(jnp.pad(g, (0, C_PAD - cout)).reshape(1, C_PAD))
        bt_l.append(jnp.pad(beta, (0, C_PAD - cout)).reshape(1, C_PAD))

    w_all = jnp.concatenate(w_l, axis=0)                 # (L*9, C_PAD, C_PAD) bf16
    return (w_all, jnp.stack(b_l), jnp.stack(g_l), jnp.stack(bt_l), out_c)


def _vmem_budget_bytes():
    """Generation-aware scoped-VMEM budget (feedback items 6/7): ~3/4 of physical
    VMEM, capped at 100 MiB => ~48 MiB on 64 MiB v7x, ~96 MiB on 128 MiB v5e/v6e."""
    try:
        cap = int(pltpu.get_tpu_info().vmem_capacity_bytes)
    except Exception:                                    # non-TPU backend / interpret
        cap = 64 * 1024 * 1024
    return min((cap * 3) // 4, 100 * 1024 * 1024)


def rgb2coordconv_forward(x_nchw, params):
    """NCHW f32 -> NCHW f32; matches the PyTorch module's forward (BN in train mode)."""
    w_all, b_all, g_all, beta_all, out_c = _pack_params(params)
    B, Cin, H, W = map(int, x_nchw.shape)
    n_layers = int(b_all.shape[0])
    M = B * H * W

    # NCHW -> NHWC, add the 3x3 halo, pad channels to C_PAD and quantize to bf16 once
    # (the reference quantizes every conv input to bf16 the same way).
    x_nhwc = jnp.transpose(x_nchw, (0, 2, 3, 1))
    x_pad = jnp.pad(x_nhwc, ((0, 0), (1, 1), (1, 1), (0, C_PAD - Cin)))
    x_pad = x_pad.astype(jnp.bfloat16)

    # VMEM footprint of the fused single-block kernel: count ALL live buffers.
    vmem_budget = _vmem_budget_bytes()
    act_bytes = B * (H + 2) * (W + 2) * C_PAD * 2               # bf16 activation scratch
    w_bytes = 2 * n_layers * 9 * C_PAD * C_PAD * 2              # resident weights (x2)
    out_bytes = 2 * M * C_PAD * 4                               # output block (x2)
    misc_bytes = 2 * 3 * n_layers * 8 * C_PAD * 4 + (2 << 20)   # bias/BN blocks + slack
    assert act_bytes + w_bytes + out_bytes + misc_bytes <= vmem_budget, (
        "activation footprint too large for the fused single-block kernel")
    # TODO(synk): for inputs that do not fit, add a tiled variant: grid over M marked
    # "parallel" (or core_map over v7x's 2 TensorCores) + two-pass (sum/sumsq) BN.

    out = pl.pallas_call(
        _fused_rgb2coordconv_kernel,
        out_shape=jax.ShapeDtypeStruct((M, C_PAD), jnp.float32),
        grid_spec=pltpu.PrefetchScalarGridSpec(
            num_scalar_prefetch=0,
            grid=(n_layers,),
            in_specs=[
                # Input: raw HBM ref; copied once into act_ref by an in-kernel DMA.
                pl.BlockSpec(memory_space=pl.ANY),
                # All layers' weights / biases / BN params: constant block index ->
                # DMA'd once before the first step, resident afterwards.
                pl.BlockSpec((n_layers * 9, C_PAD, C_PAD), lambda l: (0, 0, 0)),
                pl.BlockSpec((n_layers, 1, C_PAD), lambda l: (0, 0, 0)),
                pl.BlockSpec((n_layers, 1, C_PAD), lambda l: (0, 0, 0)),
                pl.BlockSpec((n_layers, 1, C_PAD), lambda l: (0, 0, 0)),
            ],
            out_specs=pl.BlockSpec((M, C_PAD), lambda l: (0, 0)),
            scratch_shapes=[
                pltpu.VMEM((B, H + 2, W + 2, C_PAD), jnp.bfloat16),  # activations
                pltpu.SemaphoreType.DMA,                             # input-seed DMA
            ],
        ),
        compiler_params=pltpu.CompilerParams(
            # Strict sequential layer dependency -> arbitrary.
            dimension_semantics=("arbitrary",),
            vmem_limit_bytes=vmem_budget,
        ),
    )(x_pad, w_all, b_all, g_all, beta_all)

    y = out.reshape(B, H, W, C_PAD)[..., :out_c]
    return jnp.transpose(y, (0, 3, 1, 2))


# ----------------------- parameters & pure-JAX reference --------------------- #

def init_params(key, in_c=2, out_c=3, nfc=32, min_nfc=32, num_layers=5):
    # Channel schedule identical to the PyTorch __init__: [2, 32, 32, 32, 32], tail->3.
    chans = [in_c, nfc]
    N = nfc
    for i in range(num_layers - 2):
        N = int(nfc / (2 ** (i + 1)))
        chans.append(max(N, min_nfc))

    keys = jax.random.split(key, len(chans))
    blocks = []
    for li in range(len(chans) - 1):
        cin, cout = chans[li], chans[li + 1]
        k1, k2, k3, k4 = jax.random.split(keys[li], 4)
        w = 0.1 * jax.random.normal(k1, (cout, cin, 3, 3), jnp.float32)
        b = 0.1 * jax.random.normal(k2, (cout,), jnp.float32)
        gamma = 1.0 + 0.1 * jax.random.normal(k3, (cout,), jnp.float32)
        beta = 0.1 * jax.random.normal(k4, (cout,), jnp.float32)
        blocks.append((w, b, gamma, beta))

    cin_tail = chans[-1]
    ktw, ktb = jax.random.split(keys[-1])
    tw = 0.1 * jax.random.normal(ktw, (out_c, cin_tail, 3, 3), jnp.float32)
    tb = 0.1 * jax.random.normal(ktb, (out_c,), jnp.float32)
    return {"blocks": blocks, "tail": (tw, tb)}


def reference_forward(x_nchw, params):
    """Pure-JAX reference with the same numerics (bf16 conv operands, f32 epilogue)."""
    def conv(x, w, b):
        xb = x.astype(jnp.bfloat16).astype(jnp.float32)
        wb = w.astype(jnp.bfloat16).astype(jnp.float32)
        y = lax.conv_general_dilated(xb, wb, window_strides=(1, 1),
                                     padding=((1, 1), (1, 1)),
                                     dimension_numbers=("NCHW", "OIHW", "NCHW"),
                                     precision=lax.Precision.HIGHEST)
        return y + b.reshape(1, -1, 1, 1)

    x = x_nchw
    for (w, b, g, beta) in params["blocks"]:
        y = conv(x, w, b)
        mean = jnp.mean(y, axis=(0, 2, 3), keepdims=True)
        var = jnp.mean(jnp.square(y - mean), axis=(0, 2, 3), keepdims=True)
        y = (y - mean) * lax.rsqrt(var + BN_EPS)
        y = y * g.reshape(1, -1, 1, 1) + beta.reshape(1, -1, 1, 1)
        x = jnp.where(y >= 0.0, y, LRELU_SLOPE * y)
    tw, tb = params["tail"]
    return conv(x, tw, tb)


# ---------------------------------- main -------------------------------------- #

if __name__ == "__main__":
    key = jax.random.PRNGKey(0)
    kx, kp = jax.random.split(key)

    B, Cin, H, W = 2, 2, 16, 16                 # matches RGB2CoordConv(in_c=2)
    x = jax.random.normal(kx, (B, Cin, H, W), jnp.float32)
    params = init_params(kp)

    y = rgb2coordconv_forward(x, params)
    jax.block_until_ready(y)

    assert y.shape == (B, 3, H, W), y.shape
    assert y.dtype == jnp.float32

    y_ref = reference_forward(x, params)
    # Both pipelines quantize every conv input/weight to bf16 and re-normalize with
    # training-mode BatchNorm each layer, which amplifies ulp-level bf16 divergence
    # between two non-bit-identical implementations into the ~1e-2 range after 5
    # layers.  Use scale-aware bounds with ~8x margin over the measured divergence.
    abs_err = float(jnp.max(jnp.abs(y - y_ref)))
    rel_err = float(jnp.linalg.norm(y - y_ref) / (jnp.linalg.norm(y_ref) + 1e-12))
    assert abs_err < 1e-1 and rel_err < 3e-2, (
        f"mismatch vs reference: max_abs={abs_err:.3e} rel_l2={rel_err:.3e}")

    print("KERNEL_OK")
</pallas_src>

<mosaic_0001>
module attributes {stable_mosaic.version = 11 : i64} {
  func.func @_fused_rgb2coordconv_kernel(%arg0: i32, %arg1: memref<2x18x18x128xbf16, #tpu.memory_space<any>>, %arg2: memref<45x128x128xbf16, #tpu.memory_space<vmem>>, %arg3: memref<5x1x128xf32, #tpu.memory_space<vmem>>, %arg4: memref<5x1x128xf32, #tpu.memory_space<vmem>>, %arg5: memref<5x1x128xf32, #tpu.memory_space<vmem>>, %arg6: memref<512x128xf32, #tpu.memory_space<vmem>>, %arg7: memref<2x18x18x128xbf16, #tpu.memory_space<vmem>>, %arg8: memref<!tpu.dma_semaphore, #tpu.memory_space<semaphore_mem>>) attributes {dimension_semantics = [#tpu.dimension_semantics<arbitrary>], iteration_bounds = array<i64: 5>, scalar_prefetch = 0 : i64, scratch_operands = 2 : i64, tpu.core_type = #tpu.core_type<tc>, window_params = [{}, {pipeline_mode = #tpu.pipeline_mode<synchronous>, transform_indices = @transform_1, window_bounds = array<i64: 45, 128, 128>}, {pipeline_mode = #tpu.pipeline_mode<synchronous>, transform_indices = @transform_2, window_bounds = array<i64: 5, 1, 128>}, {pipeline_mode = #tpu.pipeline_mode<synchronous>, transform_indices = @transform_3, window_bounds = array<i64: 5, 1, 128>}, {pipeline_mode = #tpu.pipeline_mode<synchronous>, transform_indices = @transform_4, window_bounds = array<i64: 5, 1, 128>}, {pipeline_mode = #tpu.pipeline_mode<synchronous>, transform_indices = @transform_5, window_bounds = array<i64: 512, 128>}]} {
    %c0_i32 = arith.constant 0 : i32
    %0 = arith.cmpi eq, %arg0, %c0_i32 : i32
    %1 = arith.extui %0 : i1 to i32
    %c0_i32_0 = arith.constant 0 : i32
    %2 = arith.cmpi ne, %1, %c0_i32_0 : i32
    scf.if %2 {
      tpu.enqueue_dma source(%arg1 : memref<2x18x18x128xbf16, #tpu.memory_space<any>>) target(%arg7 : memref<2x18x18x128xbf16, #tpu.memory_space<vmem>>) target_semaphore(%arg8 : memref<!tpu.dma_semaphore, #tpu.memory_space<semaphore_mem>>)
      tpu.wait_dma2 semaphore(%arg8 : memref<!tpu.dma_semaphore, #tpu.memory_space<semaphore_mem>>) src(%arg1 : memref<2x18x18x128xbf16, #tpu.memory_space<any>>) dst(%arg7 : memref<2x18x18x128xbf16, #tpu.memory_space<vmem>>)
    } else {
    }
    %c0 = arith.constant 0 : index
    %c0_1 = arith.constant 0 : index
    %c0_2 = arith.constant 0 : index
    %c0_3 = arith.constant 0 : index
    %3 = vector.load %arg7[%c0, %c0_1, %c0_2, %c0_3] : memref<2x18x18x128xbf16, #tpu.memory_space<vmem>>, vector<2x16x16x128xbf16>
    %4 = vector.shape_cast %3 : vector<2x16x16x128xbf16> to vector<512x128xbf16>
    %c9_i32 = arith.constant 9 : i32
    %5 = arith.muli %arg0, %c9_i32 : i32
    %c0_i32_4 = arith.constant 0 : i32
    %6 = arith.addi %5, %c0_i32_4 : i32
    %7 = arith.index_cast %6 : i32 to index
    %c0_5 = arith.constant 0 : index
    %c0_6 = arith.constant 0 : index
    %8 = vector.load %arg2[%7, %c0_5, %c0_6] : memref<45x128x128xbf16, #tpu.memory_space<vmem>>, vector<1x128x128xbf16>
    %9 = vector.shape_cast %8 : vector<1x128x128xbf16> to vector<128x128xbf16>
    %cst = arith.constant dense<0.000000e+00> : vector<512x128xf32>
    %10 = tpu.matmul %4, %9, %cst {dimension_numbers = #tpu.dot_dimension_numbers<[1], [0], [0], [1], [0, 0, 1, 1], [], []>} : vector<512x128xbf16>, vector<128x128xbf16>, vector<512x128xf32> -> vector<512x128xf32>
    %c0_7 = arith.constant 0 : index
    %c0_8 = arith.constant 0 : index
    %c1 = arith.constant 1 : index
    %c0_9 = arith.constant 0 : index
    %11 = vector.load %arg7[%c0_7, %c0_8, %c1, %c0_9] : memref<2x18x18x128xbf16, #tpu.memory_space<vmem>>, vector<2x16x16x128xbf16>
    %12 = vector.shape_cast %11 : vector<2x16x16x128xbf16> to vector<512x128xbf16>
    %c9_i32_10 = arith.constant 9 : i32
    %13 = arith.muli %arg0, %c9_i32_10 : i32
    %c1_i32 = arith.constant 1 : i32
    %14 = arith.addi %13, %c1_i32 : i32
    %15 = arith.index_cast %14 : i32 to index
    %c0_11 = arith.constant 0 : index
    %c0_12 = arith.constant 0 : index
    %16 = vector.load %arg2[%15, %c0_11, %c0_12] : memref<45x128x128xbf16, #tpu.memory_space<vmem>>, vector<1x128x128xbf16>
    %17 = vector.shape_cast %16 : vector<1x128x128xbf16> to vector<128x128xbf16>
    %cst_13 = arith.constant dense<0.000000e+00> : vector<512x128xf32>
    %18 = tpu.matmul %12, %17, %cst_13 {dimension_numbers = #tpu.dot_dimension_numbers<[1], [0], [0], [1], [0, 0, 1, 1], [], []>} : vector<512x128xbf16>, vector<128x128xbf16>, vector<512x128xf32> -> vector<512x128xf32>
    %19 = arith.addf %10, %18 : vector<512x128xf32>
    %c0_14 = arith.constant 0 : index
    %c0_15 = arith.constant 0 : index
    %c2 = arith.constant 2 : index
    %c0_16 = arith.constant 0 : index
    %20 = vector.load %arg7[%c0_14, %c0_15, %c2, %c0_16] : memref<2x18x18x128xbf16, #tpu.memory_space<vmem>>, vector<2x16x16x128xbf16>
    %21 = vector.shape_cast %20 : vector<2x16x16x128xbf16> to vector<512x128xbf16>
    %c9_i32_17 = arith.constant 9 : i32
    %22 = arith.muli %arg0, %c9_i32_17 : i32
    %c2_i32 = arith.constant 2 : i32
    %23 = arith.addi %22, %c2_i32 : i32
    %24 = arith.index_cast %23 : i32 to index
    %c0_18 = arith.constant 0 : index
    %c0_19 = arith.constant 0 : index
    %25 = vector.load %arg2[%24, %c0_18, %c0_19] : memref<45x128x128xbf16, #tpu.memory_space<vmem>>, vector<1x128x128xbf16>
    %26 = vector.shape_cast %25 : vector<1x128x128xbf16> to vector<128x128xbf16>
    %cst_20 = arith.constant dense<0.000000e+00> : vector<512x128xf32>
    %27 = tpu.matmul %21, %26, %cst_20 {dimension_numbers = #tpu.dot_dimension_numbers<[1], [0], [0], [1], [0, 0, 1, 1], [], []>} : vector<512x128xbf16>, vector<128x128xbf16>, vector<512x128xf32> -> vector<512x128xf32>
    %28 = arith.addf %19, %27 : vector<512x128xf32>
    %c0_21 = arith.constant 0 : index
    %c1_22 = arith.constant 1 : index
    %c0_23 = arith.constant 0 : index
    %c0_24 = arith.constant 0 : index
    %29 = vector.load %arg7[%c0_21, %c1_22, %c0_23, %c0_24] : memref<2x18x18x128xbf16, #tpu.memory_space<vmem>>, vector<2x16x16x128xbf16>
    %30 = vector.shape_cast %29 : vector<2x16x16x128xbf16> to vector<512x128xbf16>
    %c9_i32_25 = arith.constant 9 : i32
    %31 = arith.muli %arg0, %c9_i32_25 : i32
    %c3_i32 = arith.constant 3 : i32
    %32 = arith.addi %31, %c3_i32 : i32
    %33 = arith.index_cast %32 : i32 to index
    %c0_26 = arith.constant 0 : index
    %c0_27 = arith.constant 0 : index
    %34 = vector.load %arg2[%33, %c0_26, %c0_27] : memref<45x128x128xbf16, #tpu.memory_space<vmem>>, vector<1x128x128xbf16>
    %35 = vector.shape_cast %34 : vector<1x128x128xbf16> to vector<128x128xbf16>
    %cst_28 = arith.constant dense<0.000000e+00> : vector<512x128xf32>
    %36 = tpu.matmul %30, %35, %cst_28 {dimension_numbers = #tpu.dot_dimension_numbers<[1], [0], [0], [1], [0, 0, 1, 1], [], []>} : vector<512x128xbf16>, vector<128x128xbf16>, vector<512x128xf32> -> vector<512x128xf32>
    %37 = arith.addf %28, %36 : vector<512x128xf32>
    %c0_29 = arith.constant 0 : index
    %c1_30 = arith.constant 1 : index
    %c1_31 = arith.constant 1 : index
    %c0_32 = arith.constant 0 : index
    %38 = vector.load %arg7[%c0_29, %c1_30, %c1_31, %c0_32] : memref<2x18x18x128xbf16, #tpu.memory_space<vmem>>, vector<2x16x16x128xbf16>
    %39 = vector.shape_cast %38 : vector<2x16x16x128xbf16> to vector<512x128xbf16>
    %c9_i32_33 = arith.constant 9 : i32
    %40 = arith.muli %arg0, %c9_i32_33 : i32
    %c4_i32 = arith.constant 4 : i32
    %41 = arith.addi %40, %c4_i32 : i32
    %42 = arith.index_cast %41 : i32 to index
    %c0_34 = arith.constant 0 : index
    %c0_35 = arith.constant 0 : index
    %43 = vector.load %arg2[%42, %c0_34, %c0_35] : memref<45x128x128xbf16, #tpu.memory_space<vmem>>, vector<1x128x128xbf16>
    %44 = vector.shape_cast %43 : vector<1x128x128xbf16> to vector<128x128xbf16>
    %cst_36 = arith.constant dense<0.000000e+00> : vector<512x128xf32>
    %45 = tpu.matmul %39, %44, %cst_36 {dimension_numbers = #tpu.dot_dimension_numbers<[1], [0], [0], [1], [0, 0, 1, 1], [], []>} : vector<512x128xbf16>, vector<128x128xbf16>, vector<512x128xf32> -> vector<512x128xf32>
    %46 = arith.addf %37, %45 : vector<512x128xf32>
    %c0_37 = arith.constant 0 : index
    %c1_38 = arith.constant 1 : index
    %c2_39 = arith.constant 2 : index
    %c0_40 = arith.constant 0 : index
    %47 = vector.load %arg7[%c0_37, %c1_38, %c2_39, %c0_40] : memref<2x18x18x128xbf16, #tpu.memory_space<vmem>>, vector<2x16x16x128xbf16>
    %48 = vector.shape_cast %47 : vector<2x16x16x128xbf16> to vector<512x128xbf16>
    %c9_i32_41 = arith.constant 9 : i32
    %49 = arith.muli %arg0, %c9_i32_41 : i32
    %c5_i32 = arith.constant 5 : i32
    %50 = arith.addi %49, %c5_i32 : i32
    %51 = arith.index_cast %50 : i32 to index
    %c0_42 = arith.constant 0 : index
    %c0_43 = arith.constant 0 : index
    %52 = vector.load %arg2[%51, %c0_42, %c0_43] : memref<45x128x128xbf16, #tpu.memory_space<vmem>>, vector<1x128x128xbf16>
    %53 = vector.shape_cast %52 : vector<1x128x128xbf16> to vector<128x128xbf16>
    %cst_44 = arith.constant dense<0.000000e+00> : vector<512x128xf32>
    %54 = tpu.matmul %48, %53, %cst_44 {dimension_numbers = #tpu.dot_dimension_numbers<[1], [0], [0], [1], [0, 0, 1, 1], [], []>} : vector<512x128xbf16>, vector<128x128xbf16>, vector<512x128xf32> -> vector<512x128xf32>
    %55 = arith.addf %46, %54 : vector<512x128xf32>
    %c0_45 = arith.constant 0 : index
    %c2_46 = arith.constant 2 : index
    %c0_47 = arith.constant 0 : index
    %c0_48 = arith.constant 0 : index
    %56 = vector.load %arg7[%c0_45, %c2_46, %c0_47, %c0_48] : memref<2x18x18x128xbf16, #tpu.memory_space<vmem>>, vector<2x16x16x128xbf16>
    %57 = vector.shape_cast %56 : vector<2x16x16x128xbf16> to vector<512x128xbf16>
    %c9_i32_49 = arith.constant 9 : i32
    %58 = arith.muli %arg0, %c9_i32_49 : i32
    %c6_i32 = arith.constant 6 : i32
    %59 = arith.addi %58, %c6_i32 : i32
    %60 = arith.index_cast %59 : i32 to index
    %c0_50 = arith.constant 0 : index
    %c0_51 = arith.constant 0 : index
    %61 = vector.load %arg2[%60, %c0_50, %c0_51] : memref<45x128x128xbf16, #tpu.memory_space<vmem>>, vector<1x128x128xbf16>
    %62 = vector.shape_cast %61 : vector<1x128x128xbf16> to vector<128x128xbf16>
    %cst_52 = arith.constant dense<0.000000e+00> : vector<512x128xf32>
    %63 = tpu.matmul %57, %62, %cst_52 {dimension_numbers = #tpu.dot_dimension_numbers<[1], [0], [0], [1], [0, 0, 1, 1], [], []>} : vector<512x128xbf16>, vector<128x128xbf16>, vector<512x128xf32> -> vector<512x128xf32>
    %64 = arith.addf %55, %63 : vector<512x128xf32>
    %c0_53 = arith.constant 0 : index
    %c2_54 = arith.constant 2 : index
    %c1_55 = arith.constant 1 : index
    %c0_56 = arith.constant 0 : index
    %65 = vector.load %arg7[%c0_53, %c2_54, %c1_55, %c0_56] : memref<2x18x18x128xbf16, #tpu.memory_space<vmem>>, vector<2x16x16x128xbf16>
    %66 = vector.shape_cast %65 : vector<2x16x16x128xbf16> to vector<512x128xbf16>
    %c9_i32_57 = arith.constant 9 : i32
    %67 = arith.muli %arg0, %c9_i32_57 : i32
    %c7_i32 = arith.constant 7 : i32
    %68 = arith.addi %67, %c7_i32 : i32
    %69 = arith.index_cast %68 : i32 to index
    %c0_58 = arith.constant 0 : index
    %c0_59 = arith.constant 0 : index
    %70 = vector.load %arg2[%69, %c0_58, %c0_59] : memref<45x128x128xbf16, #tpu.memory_space<vmem>>, vector<1x128x128xbf16>
    %71 = vector.shape_cast %70 : vector<1x128x128xbf16> to vector<128x128xbf16>
    %cst_60 = arith.constant dense<0.000000e+00> : vector<512x128xf32>
    %72 = tpu.matmul %66, %71, %cst_60 {dimension_numbers = #tpu.dot_dimension_numbers<[1], [0], [0], [1], [0, 0, 1, 1], [], []>} : vector<512x128xbf16>, vector<128x128xbf16>, vector<512x128xf32> -> vector<512x128xf32>
    %73 = arith.addf %64, %72 : vector<512x128xf32>
    %c0_61 = arith.constant 0 : index
    %c2_62 = arith.constant 2 : index
    %c2_63 = arith.constant 2 : index
    %c0_64 = arith.constant 0 : index
    %74 = vector.load %arg7[%c0_61, %c2_62, %c2_63, %c0_64] : memref<2x18x18x128xbf16, #tpu.memory_space<vmem>>, vector<2x16x16x128xbf16>
    %75 = vector.shape_cast %74 : vector<2x16x16x128xbf16> to vector<512x128xbf16>
    %c9_i32_65 = arith.constant 9 : i32
    %76 = arith.muli %arg0, %c9_i32_65 : i32
    %c8_i32 = arith.constant 8 : i32
    %77 = arith.addi %76, %c8_i32 : i32
    %78 = arith.index_cast %77 : i32 to index
    %c0_66 = arith.constant 0 : index
    %c0_67 = arith.constant 0 : index
    %79 = vector.load %arg2[%78, %c0_66, %c0_67] : memref<45x128x128xbf16, #tpu.memory_space<vmem>>, vector<1x128x128xbf16>
    %80 = vector.shape_cast %79 : vector<1x128x128xbf16> to vector<128x128xbf16>
    %cst_68 = arith.constant dense<0.000000e+00> : vector<512x128xf32>
    %81 = tpu.matmul %75, %80, %cst_68 {dimension_numbers = #tpu.dot_dimension_numbers<[1], [0], [0], [1], [0, 0, 1, 1], [], []>} : vector<512x128xbf16>, vector<128x128xbf16>, vector<512x128xf32> -> vector<512x128xf32>
    %82 = arith.addf %73, %81 : vector<512x128xf32>
    %c4_i32_69 = arith.constant 4 : i32
    %83 = arith.cmpi slt, %arg0, %c4_i32_69 : i32
    %84 = arith.extui %83 : i1 to i32
    %c0_i32_70 = arith.constant 0 : i32
    %85 = arith.cmpi ne, %84, %c0_i32_70 : i32
    scf.if %85 {
      %cst_73 = arith.constant dense<0.000000e+00> : vector<128xf32>
      %89 = vector.multi_reduction <add>, %82, %cst_73 [0] : vector<512x128xf32> to vector<128xf32>
      %90 = vector.shape_cast %89 : vector<128xf32> to vector<1x128xf32>
      %cst_74 = arith.constant 0.001953125 : f32
      %91 = vector.broadcast %cst_74 : f32 to vector<1x128xf32>
      %92 = arith.mulf %90, %91 : vector<1x128xf32>
      %93 = arith.mulf %82, %82 : vector<512x128xf32>
      %cst_75 = arith.constant dense<0.000000e+00> : vector<128xf32>
      %94 = vector.multi_reduction <add>, %93, %cst_75 [0] : vector<512x128xf32> to vector<128xf32>
      %95 = vector.shape_cast %94 : vector<128xf32> to vector<1x128xf32>
      %cst_76 = arith.constant 0.001953125 : f32
      %96 = vector.broadcast %cst_76 : f32 to vector<1x128xf32>
      %97 = arith.mulf %95, %96 : vector<1x128xf32>
      %98 = arith.mulf %92, %92 : vector<1x128xf32>
      %99 = arith.subf %97, %98 : vector<1x128xf32>
      %cst_77 = arith.constant 0.000000e+00 : f32
      %100 = vector.broadcast %cst_77 : f32 to vector<1x128xf32>
      %101 = arith.maximumf %99, %100 : vector<1x128xf32>
      %102 = vector.broadcast %92 : vector<1x128xf32> to vector<512x128xf32>
      %103 = arith.subf %82, %102 : vector<512x128xf32>
      %cst_78 = arith.constant 9.99999974E-6 : f32
      %104 = vector.broadcast %cst_78 : f32 to vector<1x128xf32>
      %105 = arith.addf %101, %104 : vector<1x128xf32>
      %106 = math.rsqrt %105 : vector<1x128xf32>
      %107 = vector.broadcast %106 : vector<1x128xf32> to vector<512x128xf32>
      %108 = arith.mulf %103, %107 : vector<512x128xf32>
      %109 = arith.index_cast %arg0 : i32 to index
      %c0_79 = arith.constant 0 : index
      %c0_80 = arith.constant 0 : index
      %110 = vector.load %arg4[%109, %c0_79, %c0_80] : memref<5x1x128xf32, #tpu.memory_space<vmem>>, vector<1x1x128xf32>
      %111 = vector.shape_cast %110 : vector<1x1x128xf32> to vector<1x128xf32>
      %112 = vector.broadcast %111 : vector<1x128xf32> to vector<512x128xf32>
      %113 = arith.mulf %108, %112 : vector<512x128xf32>
      %114 = arith.index_cast %arg0 : i32 to index
      %c0_81 = arith.constant 0 : index
      %c0_82 = arith.constant 0 : index
      %115 = vector.load %arg5[%114, %c0_81, %c0_82] : memref<5x1x128xf32, #tpu.memory_space<vmem>>, vector<1x1x128xf32>
      %116 = vector.shape_cast %115 : vector<1x1x128xf32> to vector<1x128xf32>
      %117 = vector.broadcast %116 : vector<1x128xf32> to vector<512x128xf32>
      %118 = arith.addf %113, %117 : vector<512x128xf32>
      %cst_83 = arith.constant 0.000000e+00 : f32
      %119 = vector.broadcast %cst_83 : f32 to vector<512x128xf32>
      %120 = arith.cmpf oge, %118, %119 : vector<512x128xf32>
      %cst_84 = arith.constant 2.000000e-01 : f32
      %121 = vector.broadcast %cst_84 : f32 to vector<512x128xf32>
      %122 = arith.mulf %121, %118 : vector<512x128xf32>
      %123 = arith.select %120, %118, %122 : vector<512x128xi1>, vector<512x128xf32>
      %124 = vector.shape_cast %123 : vector<512x128xf32> to vector<2x16x16x128xf32>
      %125 = arith.truncf %124 : vector<2x16x16x128xf32> to vector<2x16x16x128xbf16>
      %c0_85 = arith.constant 0 : index
      %c1_86 = arith.constant 1 : index
      %c1_87 = arith.constant 1 : index
      %c0_88 = arith.constant 0 : index
      %126 = vector.load %arg7[%c0_85, %c1_86, %c1_87, %c0_88] : memref<2x18x18x128xbf16, #tpu.memory_space<vmem>>, vector<2x16x16x128xbf16>
      tpu.vector_store %arg7[%c0_85, %c1_86, %c1_87, %c0_88], %125 {strides = array<i32>} : memref<2x18x18x128xbf16, #tpu.memory_space<vmem>>, vector<2x16x16x128xbf16>,
    } else {
    }
    %c4_i32_71 = arith.constant 4 : i32
    %86 = arith.cmpi eq, %arg0, %c4_i32_71 : i32
    %87 = arith.extui %86 : i1 to i32
    %c0_i32_72 = arith.constant 0 : i32
    %88 = arith.cmpi ne, %87, %c0_i32_72 : i32
    scf.if %88 {
      %89 = arith.index_cast %arg0 : i32 to index
      %c0_73 = arith.constant 0 : index
      %c0_74 = arith.constant 0 : index
      %90 = vector.load %arg3[%89, %c0_73, %c0_74] : memref<5x1x128xf32, #tpu.memory_space<vmem>>, vector<1x1x128xf32>
      %91 = vector.shape_cast %90 : vector<1x1x128xf32> to vector<1x128xf32>
      %92 = vector.broadcast %91 : vector<1x128xf32> to vector<512x128xf32>
      %93 = arith.addf %82, %92 : vector<512x128xf32>
      %c0_75 = arith.constant 0 : index
      %c0_76 = arith.constant 0 : index
      %94 = vector.load %arg6[%c0_75, %c0_76] : memref<512x128xf32, #tpu.memory_space<vmem>>, vector<512x128xf32>
      tpu.vector_store %arg6[%c0_75, %c0_76], %93 {strides = array<i32>} : memref<512x128xf32, #tpu.memory_space<vmem>>, vector<512x128xf32>,
    } else {
    }
    return
  }
  func.func @transform_1(%arg0: i32) -> (i32, i32, i32) {
    %c0_i32 = arith.constant 0 : i32
    %c0_i32_0 = arith.constant 0 : i32
    %c0_i32_1 = arith.constant 0 : i32
    %c0_i32_2 = arith.constant 0 : i32
    return %c0_i32, %c0_i32_0, %c0_i32_1 : i32, i32, i32
  }
  func.func @transform_2(%arg0: i32) -> (i32, i32, i32) {
    %c0_i32 = arith.constant 0 : i32
    %c0_i32_0 = arith.constant 0 : i32
    %c0_i32_1 = arith.constant 0 : i32
    %c0_i32_2 = arith.constant 0 : i32
    return %c0_i32, %c0_i32_0, %c0_i32_1 : i32, i32, i32
  }
  func.func @transform_3(%arg0: i32) -> (i32, i32, i32) {
    %c0_i32 = arith.constant 0 : i32
    %c0_i32_0 = arith.constant 0 : i32
    %c0_i32_1 = arith.constant 0 : i32
    %c0_i32_2 = arith.constant 0 : i32
    return %c0_i32, %c0_i32_0, %c0_i32_1 : i32, i32, i32
  }
  func.func @transform_4(%arg0: i32) -> (i32, i32, i32) {
    %c0_i32 = arith.constant 0 : i32
    %c0_i32_0 = arith.constant 0 : i32
    %c0_i32_1 = arith.constant 0 : i32
    %c0_i32_2 = arith.constant 0 : i32
    return %c0_i32, %c0_i32_0, %c0_i32_1 : i32, i32, i32
  }
  func.func @transform_5(%arg0: i32) -> (i32, i32) {
    %c0_i32 = arith.constant 0 : i32
    %c0_i32_0 = arith.constant 0 : i32
    %c0_i32_1 = arith.constant 0 : i32
    return %c0_i32, %c0_i32_0 : i32, i32
  }
}

</mosaic_0001>

<bundles_post_ra>
// kernel: tpu_custom_call.1
= control target key start
LH: loop header
LB: loop body
LE: loop exit
PB: predicated region body
PF: predicated region fallthrough
CT: control target
= control target key end

     0   :  { %10 = vsyncpa [#allocation5], 0  ;;  %s17518_s0 = inlined_call_operand.vmem [shape: bf16[2,18,18,128], index: 0, kind: input, shape index: {}]   ;;  %s17519_s1 = inlined_call_operand.hbm [shape: bf16[45,128,128], index: 1, kind: input, shape index: {}]   ;;  %s17520_s2 = inlined_call_operand.hbm [shape: f32[5,1,128], index: 2, kind: input, shape index: {}]   ;;  %s17521_s3 = inlined_call_operand.hbm [shape: f32[5,1,128], index: 3, kind: input, shape index: {}]   ;;  %s17522_s4 = inlined_call_operand.hbm [shape: f32[5,1,128], index: 4, kind: input, shape index: {}]   ;;  %s17523_s5 = inlined_call_operand.hbm [shape: f32[512,128], index: 5, kind: output, shape index: {}]  }
   0x1   :  { %11 = vsyncpa [#allocation8], 0 }
   0x2   :  { %12 = vsyncpa [#allocation11], 0 }
   0x3   :  { %13 = vsyncpa [#allocation6], 0  ;;  %s14194_s18 = smov 0  }
   0x4 LB: > { %s14153_s19 = smov [#allocation7]   ;;  %s14200_s21 = sadd.s32 4294967295, %s14151_s18   ;;  %s14151_s18 = sphi %s14194_s18, %s19_s18  }
   0x5   : > { %s154_s20 = sshll.u32 %s14153_s19, 4  ;;  %p11150_p0 = scmp.ge.s32.totalorder %s14151_s18, 1  ;;  %s14206_s20 = int_to_ptr.vmem [resolvable:$true] %s154_s20 }
   0x6   : > { %p129_p1 = scmp.lt.s32.totalorder %s14151_s18, 6  ;;  %p17524_p3 = scmp.eq.s32.totalorder %s14200_s21, 0 }
   0x7   : > { %s14154_s23 = smov [#allocation4]   ;;  %s14155_s26 = smov [#allocation9]  }
   0x8   : > { %p14208_p4 = pnand %p11150_p0, %p129_p1  ;;  %s141_s24 = sshll.u32 %s14154_s23, 4  ;;  %s14214_s24 = int_to_ptr.vmem [resolvable:$true] %s141_s24 }
   0x9   : > { %s14222_s27 = sshll.u32 %s14155_s26, 4  ;;  %s13989_s30 = scalar_lea.hbm %s17520_s2, 80  ;;  %s168_s27 = int_to_ptr.vmem [resolvable:$true] %s14222_s27 }
   0xa   : > { %s17592_s22 = scalar_select %p14208_p4, 1, 0 }
   0xb   : > { %p13537_p5 = pneg %p14208_p4  ;;  %p13990_p7 = scmp.ne.s32.totalorder %s17520_s2, %s13989_s30 }
   0xc   : > { %p13996_p11 = scmp.lt.u32.totalorder %s13989_s30, %s17520_s2 }
   0xd   : > { %p14218_p6 = pnand %p17524_p3, %p13537_p5 }
   0xf   : > { %p14232_p8 = pneg %p14218_p6 }
  0x11   : > { %p13992_p9 = pnand %p14232_p8, %p13990_p7 }
  0x13   : > { %p13993_p10 = pneg %p13992_p9 }
  0x15   : > { %p13998_p12 = pnand %p13996_p11, %p13993_p10 }
  0x17   : > { %14001 = shalt.err (!%p13998_p12)
}
  0x18   : > { %s14002_s11 = scalar_lea.vmem %s14206_s20, 80  ;;  %s14009_s12 = scalar_lea.vmem %s14206_s20, 96 }
  0x19   : > { %p14003_p13 = scmp.ne.s32.totalorder %s14206_s20, %s14002_s11  ;;  %p14010_p5 = scmp.lt.s32.totalorder %s14206_s20, %s14206_s20 }
  0x1a   : > { %p14011_p7 = scmp.lt.s32.totalorder %s14009_s12, %s14002_s11 }
  0x1b   : > { %p14005_p0 = pnand %p14003_p13, %p14232_p8 }
  0x1c   : > { %p14012_p9 = por %p14011_p7, %p14010_p5 }
  0x1d   : > { %p14006_p1 = pneg %p14005_p0 }
  0x1f   : > { %p14013_p2 = pnand %p14012_p9, %p14006_p1 }
  0x21   : > { %14016 = shalt.err (!%p14013_p2)
}
  0x22   : > { %s14156_s13 = smov 16   ;;  %s14157_s14 = smov 1  }
  0x23   : > { %13543 = dma.hbm_to_vmem [thread:$0]  (!%p14218_p6), %s17520_s2, 80, %s14206_s20, [#allocation8], %s14156_s13, %s14156_s13, %s14157_s14  }
  0x24   : > { %s14017_s23 = scalar_lea.hbm %s17519_s1, 46080 }
  0x25   : > { %p14018_p2 = scmp.ne.s32.totalorder %s17519_s1, %s14017_s23  ;;  %p14024_p12 = scmp.lt.u32.totalorder %s14017_s23, %s17519_s1 }
  0x27   : > { %p14020_p10 = pnand %p14018_p2, %p14232_p8 }
  0x29   : > { %p14021_p11 = pneg %p14020_p10 }
  0x2b   : > { %p14026_p13 = pnand %p14024_p12, %p14021_p11 }
  0x2d   : > { %14029 = shalt.err (!%p14026_p13)
}
  0x2e   : > { %s14030_s20 = scalar_lea.vmem %s14214_s24, 46080  ;;  %p14038_p7 = scmp.lt.s32.totalorder %s14214_s24, %s14214_s24 }
  0x2f   : > { %p14031_p0 = scmp.ne.s32.totalorder %s14214_s24, %s14030_s20  ;;  %p14039_p9 = scmp.lt.s32.totalorder %s14030_s20, %s14030_s20 }
  0x31   : > { %p14033_p1 = pnand %p14031_p0, %p14232_p8  ;;  %p14040_p2 = por %p14039_p9, %p14038_p7 }
  0x33   : > { %p14034_p5 = pneg %p14033_p1 }
  0x35   : > { %p14041_p10 = pnand %p14040_p2, %p14034_p5 }
  0x37   : > { %14044 = shalt.err (!%p14041_p10)
}
  0x38   : > { %s14158_s6 = smov 64   ;;  %s14159_s7 = smov 4  }
  0x39   : > { %13540 = dma.hbm_to_vmem [thread:$0]  (!%p14218_p6), %s17519_s1, 46080, %s14214_s24, [#allocation5], %s14158_s6, %s14158_s6, %s14159_s7  }
  0x3a   : > { %s14160_s11 = smov [#allocation10]   ;;  %s14045_s17 = scalar_lea.hbm %s17521_s3, 80 }
  0x3b   : > { %s180_s12 = sshll.u32 %s14160_s11, 4  ;;  %p14046_p11 = scmp.ne.s32.totalorder %s17521_s3, %s14045_s17  ;;  %s181_s12 = int_to_ptr.vmem [resolvable:$true] %s180_s12 }
  0x3c   : > { %p14052_p0 = scmp.lt.u32.totalorder %s14045_s17, %s17521_s3 }
  0x3d   : > { %p14048_p12 = pnand %p14046_p11, %p14232_p8 }
  0x3f   : > { %p14049_p13 = pneg %p14048_p12 }
  0x41   : > { %p14054_p1 = pnand %p14052_p0, %p14049_p13 }
  0x43   : > { %14057 = shalt.err (!%p14054_p1)
}
  0x44   : > { %s14058_s24 = scalar_lea.vmem %s168_s27, 80  ;;  %s14065_s29 = scalar_lea.vmem %s168_s27, 96 }
  0x45   : > { %p14059_p5 = scmp.ne.s32.totalorder %s168_s27, %s14058_s24  ;;  %p14066_p2 = scmp.lt.s32.totalorder %s168_s27, %s168_s27 }
  0x46   : > { %p14067_p10 = scmp.lt.s32.totalorder %s14065_s29, %s14058_s24 }
  0x47   : > { %p14061_p7 = pnand %p14059_p5, %p14232_p8 }
  0x48   : > { %p14068_p3 = por %p14067_p10, %p14066_p2 }
  0x49   : > { %p14062_p9 = pneg %p14061_p7 }
  0x4b   : > { %p14069_p4 = pnand %p14068_p3, %p14062_p9 }
  0x4d   : > { %14072 = shalt.err (!%p14069_p4)
}
  0x4e   : > { %13546 = dma.hbm_to_vmem [thread:$0]  (!%p14218_p6), %s17521_s3, 80, %s168_s27, [#allocation8], %s14156_s13, %s14156_s13, %s14157_s14  }
  0x4f   : > { %s14073_s9 = scalar_lea.hbm %s17522_s4, 80 }
  0x50   : > { %p14074_p3 = scmp.ne.s32.totalorder %s17522_s4, %s14073_s9  ;;  %p14080_p12 = scmp.lt.u32.totalorder %s14073_s9, %s17522_s4 }
  0x52   : > { %p14076_p4 = pnand %p14074_p3, %p14232_p8 }
  0x54   : > { %p14077_p11 = pneg %p14076_p4 }
  0x56   : > { %p14082_p13 = pnand %p14080_p12, %p14077_p11 }
  0x58   : > { %14085 = shalt.err (!%p14082_p13)
}
  0x59   : > { %s14086_s17 = scalar_lea.vmem %s181_s12, 80  ;;  %s14093_s27 = scalar_lea.vmem %s181_s12, 96 }
  0x5a   : > { %p14087_p0 = scmp.ne.s32.totalorder %s181_s12, %s14086_s17  ;;  %p14094_p7 = scmp.lt.s32.totalorder %s181_s12, %s181_s12 }
  0x5b   : > { %p14095_p9 = scmp.lt.s32.totalorder %s14093_s27, %s14086_s17 }
  0x5c   : > { %p14089_p1 = pnand %p14087_p0, %p14232_p8 }
  0x5d   : > { %p14096_p2 = por %p14095_p9, %p14094_p7 }
  0x5e   : > { %p14090_p5 = pneg %p14089_p1 }
  0x60   : > { %p14097_p10 = pnand %p14096_p2, %p14090_p5 }
  0x62   : > { %14100 = shalt.err (!%p14097_p10)
}
  0x63   : > { %13549 = dma.hbm_to_vmem [thread:$0]  (!%p14218_p6), %s17522_s4, 80, %s181_s12, [#allocation11], %s14156_s13, %s14156_s13, %s14157_s14  }
  0x64   : > { %p17595_p3 = scmp.ne.s32.totalorder %s17592_s22, 0 }
  0x66   : > { %196 = sbr.rel (%p17595_p3) target bundleno = 1520 (0x5f0), region = 36 }
  0x6d   : > { %p17596_p8 = scmp.eq.s32.totalorder %s14200_s21, 0 }
  0x6f   : > { %14132 = dma.done.wait (%p17596_p8), [#allocation5], 46080   ;;  %p17597_p4 = pmov %p17596_p8 }
  0x71   : > { %14134 = vsyncadd (%p17597_p4), [#allocation5], 4294921216  ;;  %p17598_p11 = pmov %p17597_p4 }
  0x72   : > { %p17599_p12 = pmov %p17597_p4 }
  0x73   : > { %14136 = dma.done.wait (%p17598_p11), [#allocation8], 160  }
  0x74   : > { %14138 = vsyncadd (%p17599_p12), [#allocation8], 4294967136  ;;  %p17600_p13 = pmov %p17597_p4 }
  0x75   : > { %p17601_p6 = pmov %p17597_p4 }
  0x76   : > { %14140 = dma.done.wait (%p17600_p13), [#allocation11], 80  }
  0x77   : > { %14142 = vsyncadd (%p17601_p6), [#allocation11], 4294967216  ;;  %p17602_p0 = scmp.ne.s32.totalorder %s14200_s21, 0 }
  0x78   : > { %v261_v0 = vld [vmem:[%s17518_s0] sm:$0xff] (!%p17602_p0)  ;;  %v263_v1 = vld [vmem:[%s17518_s0 + $0x8] sm:$0xff] (!%p17602_p0)  ;;  %v265_v2 = vld [vmem:[%s17518_s0 + $0x10] sm:$0xff] (!%p17602_p0) }
  0x79   : > { %228 = sbr.rel (%p17602_p0) target bundleno = 151 (0x97), region = 56  ;;  %262 = vst [vmem:[#allocation2] sm:$0xff] (!%p17602_p0), %v261_v0  ;;  %264 = vst [vmem:[#allocation2 + $0x8] sm:$0xff] (!%p17602_p0), %v263_v1  ;;  %v267_v3 = vld [vmem:[%s17518_s0 + $0x18] sm:$0xff] (!%p17602_p0)  ;;  %v269_v4 = vld [vmem:[%s17518_s0 + $0x20] sm:$0xff] (!%p17602_p0) }
  0x7a   : > { %266 = vst [vmem:[#allocation2 + $0x10] sm:$0xff] (!%p17602_p0), %v265_v2  ;;  %v271_v5 = vld [vmem:[%s17518_s0 + $0x28] sm:$0xff] (!%p17602_p0)  ;;  %268 = vst [vmem:[#allocation2 + $0x18] sm:$0xff] (!%p17602_p0), %v267_v3  ;;  %v273_v6 = vld [vmem:[%s17518_s0 + $0x30] sm:$0xff] (!%p17602_p0) }
  0x7b   : > { %270 = vst [vmem:[#allocation2 + $0x20] sm:$0xff] (!%p17602_p0), %v269_v4  ;;  %272 = vst [vmem:[#allocation2 + $0x28] sm:$0xff] (!%p17602_p0), %v271_v5  ;;  %v275_v7 = vld [vmem:[%s17518_s0 + $0x38] sm:$0xff] (!%p17602_p0)  ;;  %v277_v8 = vld [vmem:[%s17518_s0 + $0x40] sm:$0xff] (!%p17602_p0) }
  0x7c   : > { %274 = vst [vmem:[#allocation2 + $0x30] sm:$0xff] (!%p17602_p0), %v273_v6  ;;  %276 = vst [vmem:[#allocation2 + $0x38] sm:$0xff] (!%p17602_p0), %v275_v7  ;;  %v279_v9 = vld [vmem:[%s17518_s0 + $0x48] sm:$0xff] (!%p17602_p0)  ;;  %v281_v10 = vld [vmem:[%s17518_s0 + $0x50] sm:$0xff] (!%p17602_p0) }
  0x7d   : > { %278 = vst [vmem:[#allocation2 + $0x40] sm:$0xff] (!%p17602_p0), %v277_v8  ;;  %v283_v11 = vld [vmem:[%s17518_s0 + $0x58] sm:$0xff] (!%p17602_p0)  ;;  %280 = vst [vmem:[#allocation2 + $0x48] sm:$0xff] (!%p17602_p0), %v279_v9  ;;  %v285_v12 = vld [vmem:[%s17518_s0 + $0x60] sm:$0xff] (!%p17602_p0) }
  0x7e   : > { %282 = vst [vmem:[#allocation2 + $0x50] sm:$0xff] (!%p17602_p0), %v281_v10  ;;  %284 = vst [vmem:[#allocation2 + $0x58] sm:$0xff] (!%p17602_p0), %v283_v11  ;;  %v287_v13 = vld [vmem:[%s17518_s0 + $0x68] sm:$0xff] (!%p17602_p0)  ;;  %v289_v14 = vld [vmem:[%s17518_s0 + $0x70] sm:$0xff] (!%p17602_p0) }
  0x7f   : > { %286 = vst [vmem:[#allocation2 + $0x60] sm:$0xff] (!%p17602_p0), %v285_v12  ;;  %288 = vst [vmem:[#allocation2 + $0x68] sm:$0xff] (!%p17602_p0), %v287_v13  ;;  %v291_v15 = vld [vmem:[%s17518_s0 + $0x78] sm:$0xff] (!%p17602_p0)  ;;  %v293_v16 = vld [vmem:[%s17518_s0 + $0x80] sm:$0xff] (!%p17602_p0) }
  0x80   : > { %290 = vst [vmem:[#allocation2 + $0x70] sm:$0xff] %v289_v14  ;;  %v295_v17 = vld [vmem:[%s17518_s0 + $0x88] sm:$0xff]  ;;  %292 = vst [vmem:[#allocation2 + $0x78] sm:$0xff] %v291_v15  ;;  %v297_v18 = vld [vmem:[%s17518_s0 + $0x90] sm:$0xff] }
  0x81   : > { %294 = vst [vmem:[#allocation2 + $0x80] sm:$0xff] %v293_v16  ;;  %296 = vst [vmem:[#allocation2 + $0x88] sm:$0xff] %v295_v17  ;;  %v299_v19 = vld [vmem:[%s17518_s0 + $0x98] sm:$0xff]  ;;  %v301_v20 = vld [vmem:[%s17518_s0 + $0xa0] sm:$0xff] }
  0x82   : > { %298 = vst [vmem:[#allocation2 + $0x90] sm:$0xff] %v297_v18  ;;  %300 = vst [vmem:[#allocation2 + $0x98] sm:$0xff] %v299_v19  ;;  %v303_v21 = vld [vmem:[%s17518_s0 + $0xa8] sm:$0xff]  ;;  %v305_v22 = vld [vmem:[%s17518_s0 + $0xb0] sm:$0xff] }
  0x83   : > { %302 = vst [vmem:[#allocation2 + $0xa0] sm:$0xff] %v301_v20  ;;  %v307_v23 = vld [vmem:[%s17518_s0 + $0xb8] sm:$0xff]  ;;  %304 = vst [vmem:[#allocation2 + $0xa8] sm:$0xff] %v303_v21  ;;  %v309_v24 = vld [vmem:[%s17518_s0 + $0xc0] sm:$0xff] }
  0x84   : > { %306 = vst [vmem:[#allocation2 + $0xb0] sm:$0xff] %v305_v22  ;;  %308 = vst [vmem:[#allocation2 + $0xb8] sm:$0xff] %v307_v23  ;;  %v311_v25 = vld [vmem:[%s17518_s0 + $0xc8] sm:$0xff]  ;;  %v313_v26 = vld [vmem:[%s17518_s0 + $0xd0] sm:$0xff] }
  0x85   : > { %310 = vst [vmem:[#allocation2 + $0xc0] sm:$0xff] %v309_v24  ;;  %312 = vst [vmem:[#allocation2 + $0xc8] sm:$0xff] %v311_v25  ;;  %v315_v27 = vld [vmem:[%s17518_s0 + $0xd8] sm:$0xff]  ;;  %v317_v28 = vld [vmem:[%s17518_s0 + $0xe0] sm:$0xff] }
  0x86   : > { %314 = vst [vmem:[#allocation2 + $0xd0] sm:$0xff] %v313_v26  ;;  %v319_v29 = vld [vmem:[%s17518_s0 + $0xe8] sm:$0xff]  ;;  %316 = vst [vmem:[#allocation2 + $0xd8] sm:$0xff] %v315_v27  ;;  %v321_v30 = vld [vmem:[%s17518_s0 + $0xf0] sm:$0xff] }
  0x87   : > { %318 = vst [vmem:[#allocation2 + $0xe0] sm:$0xff] %v317_v28  ;;  %320 = vst [vmem:[#allocation2 + $0xe8] sm:$0xff] %v319_v29  ;;  %v323_v31 = vld [vmem:[%s17518_s0 + $0xf8] sm:$0xff]  ;;  %v325_v32 = vld [vmem:[%s17518_s0 + $0x100] sm:$0xff] }
  0x88   : > { %322 = vst [vmem:[#allocation2 + $0xf0] sm:$0xff] %v321_v30  ;;  %324 = vst [vmem:[#allocation2 + $0xf8] sm:$0xff] %v323_v31  ;;  %v327_v33 = vld [vmem:[%s17518_s0 + $0x108] sm:$0xff]  ;;  %v329_v34 = vld [vmem:[%s17518_s0 + $0x110] sm:$0xff] }
  0x89   : > { %326 = vst [vmem:[#allocation2 + $0x100] sm:$0xff] %v325_v32  ;;  %v331_v35 = vld [vmem:[%s17518_s0 + $0x118] sm:$0xff]  ;;  %328 = vst [vmem:[#allocation2 + $0x108] sm:$0xff] %v327_v33  ;;  %v333_v36 = vld [vmem:[%s17518_s0 + $0x120] sm:$0xff] }
  0x8a   : > { %330 = vst [vmem:[#allocation2 + $0x110] sm:$0xff] %v329_v34  ;;  %332 = vst [vmem:[#allocation2 + $0x118] sm:$0xff] %v331_v35  ;;  %v335_v37 = vld [vmem:[%s17518_s0 + $0x128] sm:$0xff]  ;;  %v337_v38 = vld [vmem:[%s17518_s0 + $0x130] sm:$0xff] }
  0x8b   : > { %334 = vst [vmem:[#allocation2 + $0x120] sm:$0xff] %v333_v36  ;;  %336 = vst [vmem:[#allocation2 + $0x128] sm:$0xff] %v335_v37  ;;  %v339_v39 = vld [vmem:[%s17518_s0 + $0x138] sm:$0xff]  ;;  %v341_v40 = vld [vmem:[%s17518_s0 + $0x140] sm:$0xff] }
  0x8c   : > { %338 = vst [vmem:[#allocation2 + $0x130] sm:$0xff] %v337_v38  ;;  %v343_v41 = vld [vmem:[%s17518_s0 + $0x148] sm:$0xff]  ;;  %340 = vst [vmem:[#allocation2 + $0x138] sm:$0xff] %v339_v39  ;;  %v345_v42 = vld [vmem:[%s17518_s0 + $0x150] sm:$0xff] }
  0x8d   : > { %342 = vst [vmem:[#allocation2 + $0x140] sm:$0xff] %v341_v40  ;;  %344 = vst [vmem:[#allocation2 + $0x148] sm:$0xff] %v343_v41  ;;  %v347_v43 = vld [vmem:[%s17518_s0 + $0x158] sm:$0xff]  ;;  %v349_v44 = vld [vmem:[%s17518_s0 + $0x160] sm:$0xff] }
  0x8e   : > { %346 = vst [vmem:[#allocation2 + $0x150] sm:$0xff] %v345_v42  ;;  %348 = vst [vmem:[#allocation2 + $0x158] sm:$0xff] %v347_v43  ;;  %v351_v45 = vld [vmem:[%s17518_s0 + $0x168] sm:$0xff]  ;;  %v353_v46 = vld [vmem:[%s17518_s0 + $0x170] sm:$0xff] }
  0x8f   : > { %350 = vst [vmem:[#allocation2 + $0x160] sm:$0xff] %v349_v44  ;;  %v355_v47 = vld [vmem:[%s17518_s0 + $0x178] sm:$0xff]  ;;  %352 = vst [vmem:[#allocation2 + $0x168] sm:$0xff] %v351_v45  ;;  %v357_v48 = vld [vmem:[%s17518_s0 + $0x180] sm:$0xff] }
  0x90   : > { %354 = vst [vmem:[#allocation2 + $0x170] sm:$0xff] %v353_v46  ;;  %356 = vst [vmem:[#allocation2 + $0x178] sm:$0xff] %v355_v47  ;;  %v359_v49 = vld [vmem:[%s17518_s0 + $0x188] sm:$0xff]  ;;  %v361_v50 = vld [vmem:[%s17518_s0 + $0x190] sm:$0xff] }
  0x91   : > { %358 = vst [vmem:[#allocation2 + $0x180] sm:$0xff] %v357_v48  ;;  %360 = vst [vmem:[#allocation2 + $0x188] sm:$0xff] %v359_v49  ;;  %v363_v51 = vld [vmem:[%s17518_s0 + $0x198] sm:$0xff]  ;;  %v365_v52 = vld [vmem:[%s17518_s0 + $0x1a0] sm:$0xff] }
  0x92   : > { %362 = vst [vmem:[#allocation2 + $0x190] sm:$0xff] %v361_v50  ;;  %v367_v53 = vld [vmem:[%s17518_s0 + $0x1a8] sm:$0xff]  ;;  %364 = vst [vmem:[#allocation2 + $0x198] sm:$0xff] %v363_v51 }
  0x93   : > { %366 = vst [vmem:[#allocation2 + $0x1a0] sm:$0xff] %v365_v52  ;;  %368 = vst [vmem:[#allocation2 + $0x1a8] sm:$0xff] %v367_v53 }
  0x94   : > { %376 = vsyncadd [#allocation3], 6912 }
  0x95   : > { %14143 = dma.done.wait [#allocation3], 6912 }
  0x96   : > { %14144 = vsyncadd [#allocation3], 4294960384 }
  0x97 PF: > { %s11832_s11 = smul.u32 576, %s14200_s21  ;;  %v383_v54 = vld [vmem:[#allocation2] sm:$0xf]  ;;  %v384_v55 = vld [vmem:[#allocation2 + $0x4] sm:$0xf]  ;;  %vm2380_vm3 = vcmask 1042432  }
  0x98   : > { %v467_v56 = vld [vmem:[#allocation2 + $0x8] sm:$0x1]  ;;  %vm499_vm0 = vsmask.f32 3328  ;;  %vm500_vm1 = vsmask.f32 7440 }
  0x99   : > { %vm14502_vm2 = vmor %vm499_vm0, %vm500_vm1  ;;  %v503_v58 = vshrl.u32 %v383_v54, 16  ;;  %v506_v59 = vshll.u32 %v383_v54, 16  ;;  %v512_v60 = vshll.u32 %v384_v55, 16  ;;  %v516_v61 = vshrl.u32 %v384_v55, 16  ;;  %s14506_s15 = scalar_lea.vmem [#allocation4], %s11832_s11  ;;  %p11755_p1 = scmp.ge.s32.totalorder %s14200_s21, 4 }
  0x9a   : > { %v13579_v62 = vld [vmem:[%s14506_s15 + $0x40] sm:$0xff]   ;;  %v522_v63 = vshll.u32 %v467_v56, 16  ;;  %v13581_v2 = vld [vmem:[%s14506_s15 + $0x48] sm:$0xff]   ;;  %v13583_v6 = vld [vmem:[%s14506_s15 + $0x50] sm:$0xff]   ;;  %vm2381_vm4 = vcmask 1046532   ;;  %s11833_s16 = scalar_lea.vmem (!%p11755_p1), [#allocation9], %s14151_s18 }
  0x9b   : > { %v13580_v0 = vld [vmem:[%s14506_s15 + $0x100] sm:$0xff]   ;;  %v505_v1 = vrot.slane %v503_v58, 4  ;;  %12269 = vmatprep.subr.bf16.mxu1 %v13579_v62  ;;  %v508_v3 = vrot.slane %v506_v59, 5  ;;  %v13582_v4 = vld [vmem:[%s14506_s15 + $0x108] sm:$0xff]   ;;  %v514_v5 = vrot.slane %v512_v60, 5  ;;  %v518_v8 = vrot.slane %v516_v61, 4  ;;  %vm14685_vm5 = vmor %vm2380_vm3, %vm2381_vm4 }
  0x9c   : > { %12589 = vmatprep.subr.bf16.mxu0 %v13580_v0  ;;  %12270 = vmatpush3.bf16.msra.mxu1 %v13579_v62  ;;  %v13584_v9 = vld [vmem:[%s14506_s15 + $0x110] sm:$0xff]   ;;  %v524_v12 = vrot.slane %v522_v63, 5  ;;  %v13585_v13 = vld [vmem:[%s14506_s15 + $0x58] sm:$0xff]   ;;  %v13587_v19 = vld [vmem:[%s14506_s15 + $0x60] sm:$0xff]   ;;  %s11837_s17 = scalar_lea.vmem (!%p11755_p1), [#allocation10], %s14151_s18  ;;  %vm10652_vm6 = vcmask (!%p11755_p1), 1043456  }
  0x9d   : > { %12590 = vmatpush3.bf16.msra.mxu0 %v13580_v0  ;;  %12271 = vmatprep.subr.bf16.mxu1 %v13581_v2  ;;  %v509_v7 = vor.u32 %v508_v3, %v505_v1  ;;  %v519_v11 = vor.u32 %v518_v8, %v514_v5  ;;  %v13586_v16 = vld [vmem:[%s14506_s15 + $0x118] sm:$0xff]   ;;  %v13588_v20 = vld [vmem:[%s14506_s15 + $0x120] sm:$0xff]   ;;  %v13589_v21 = vld [vmem:[%s14506_s15 + $0x68] sm:$0xff]   ;;  %vm10653_vm7 = vsmask.f32 (!%p11755_p1), 7938  ;;  %vm10659_vm10 = vcmask (!%p11755_p1), 1040384  }
  0x9e   : > { %12591 = vmatprep.subr.bf16.mxu0 %v13582_v4  ;;  %v13590_v22 = vld [vmem:[%s14506_s15 + $0x128] sm:$0xff]   ;;  %v3835_v24 = vld [vmem:[#allocation2 + $0x10] sm:$0xf]  ;;  %v14524_v25 = vld [vmem:[#allocation2 + $0x14] sm:$0x1] }
  0x9f   : > { %v510_v10 = vrot.slane %v509_v7, 4  ;;  %v520_v15 = vrot.slane %v519_v11, 4  ;;  %v3834_v23 = vld [vmem:[#allocation2 + $0xc] sm:$0xf]  ;;  %v3940_v28 = vshll.u32 %v3835_v24, 16  ;;  %v3944_v29 = vshrl.u32 %v3835_v24, 16  ;;  %vm16812_vm1 = vmand (!%p11755_p1), %vm10652_vm6, %vm10653_vm7 }
  0xa0   : > { %12272 = vmatpush3.bf16.msra.mxu1 %v13581_v2  ;;  %v3931_v26 = vshrl.u32 %v3834_v23, 16  ;;  %v3934_v27 = vshll.u32 %v3834_v23, 16  ;;  %v385_v30 = vld [vmem:[#allocation2 + $0xc] sm:$0xf]  ;;  %v13591_v31 = vld [vmem:[%s14506_s15 + $0x70] sm:$0xff]   ;;  %v3950_v32 = vshll.u32 %v14524_v25, 16 }
  0xa1   : > { %12592 = vmatpush3.bf16.msra.mxu0 %v13582_v4  ;;  %12273 = vmatprep.subr.bf16.mxu1 %v13583_v6  ;;  %v515_v14 = vsel %vm14502_vm2, %v510_v10, %v514_v5  ;;  %v525_v17 = vsel %vm14502_vm2, %v520_v15, %v524_v12  ;;  %v386_v33 = vld [vmem:[#allocation2 + $0x10] sm:$0xf]  ;;  %v468_v34 = vld [vmem:[#allocation2 + $0x14] sm:$0x1]  ;;  %v3942_v37 = vrot.slane %v3940_v28, 5  ;;  %v3946_v38 = vrot.slane %v3944_v29, 4 }
  0xa2   : > { %12593 = vmatprep.subr.bf16.mxu0 %v13584_v9  ;;  %v11180_v18 = vcombine.low %v515_v14, %v525_v17  ;;  %v3933_v35 = vrot.slane %v3931_v26, 4  ;;  %v3936_v36 = vrot.slane %v3934_v27, 5  ;;  %v3952_v39 = vrot.slane %v3950_v32, 5  ;;  %v13592_v43 = vld [vmem:[%s14506_s15 + $0x130] sm:$0xff]   ;;  %v3837_v48 = vld [vmem:[#allocation2 + $0x18] sm:$0xf] }
  0xa3   : > { %v527_v40 = vshrl.u32 %v385_v30, 16  ;;  %v530_v41 = vshll.u32 %v385_v30, 16  ;;  %v536_v42 = vshll.u32 %v386_v33, 16  ;;  %v3947_v45 = vor.u32 %v3946_v38, %v3942_v37  ;;  %v14530_v53 = vld [vmem:[#allocation2 + $0x1c] sm:$0xf] }
  0xa4   : > { %12274 = vmatpush3.bf16.msra.mxu1 %v13583_v6  ;;  %12285 = vmatprep.mubr.bf16.mxu1 %v11180_v18  ;;  %v3937_v44 = vor.u32 %v3936_v36, %v3933_v35  ;;  %v540_v46 = vshrl.u32 %v386_v33, 16  ;;  %v546_v47 = vshll.u32 %v468_v34, 16  ;;  %v5380_v49 = vrot.slane %v14524_v25, 5  ;;  %v14532_v59 = vld [vmem:[#allocation2 + $0x20] sm:$0x1]  ;;  %v13593_v60 = vld [vmem:[%s14506_s15 + $0x78] sm:$0xff]  }
  0xa5   : > { %12594 = vmatpush3.bf16.msra.mxu0 %v13584_v9  ;;  %12275 = vmatprep.subr.bf16.mxu1 %v13585_v13  ;;  %v529_v50 = vrot.slane %v527_v40, 4  ;;  %v532_v51 = vrot.slane %v530_v41, 5  ;;  %v538_v52 = vrot.slane %v536_v42, 5  ;;  %v3948_v55 = vrot.slane %v3947_v45, 4  ;;  %v13594_v1 = vld [vmem:[%s14506_s15 + $0x138] sm:$0xff]  }
  0xa6   : > { %12595 = vmatprep.subr.bf16.mxu0 %v13586_v16  ;;  %v3938_v54 = vrot.slane %v3937_v44, 4  ;;  %v542_v56 = vrot.slane %v540_v46, 4  ;;  %v548_v58 = vrot.slane %v546_v47, 5  ;;  %v3955_v62 = vshrl.u32 %v3837_v48, 16  ;;  %v387_v10 = vld [vmem:[#allocation2 + $0x18] sm:$0xf] }
  0xa7   : > { %v533_v61 = vor.u32 %v532_v51, %v529_v50  ;;  %v3958_v63 = vshll.u32 %v3837_v48, 16  ;;  %v3964_v0 = vshll.u32 %v14530_v53, 16  ;;  %v3953_v3 = vsel %vm14502_vm2, %v3948_v55, %v3952_v39  ;;  %v469_v26 = vld [vmem:[#allocation2 + $0x20] sm:$0x1]  ;;  %v3840_v28 = vld [vmem:[#allocation2 + $0x24] sm:$0xf] }
  0xa8   : > { %12276 = vmatpush3.bf16.msra.mxu1 %v13585_v13  ;;  %v3943_v2 = vsel %vm14502_vm2, %v3938_v54, %v3942_v37  ;;  %v543_v4 = vor.u32 %v542_v56, %v538_v52  ;;  %v3968_v5 = vshrl.u32 %v14530_v53, 16  ;;  %v3957_v8 = vrot.slane %v3955_v62, 4  ;;  %v3841_v37 = vld [vmem:[#allocation2 + $0x28] sm:$0xf]  ;;  %v3842_v41 = vld [vmem:[#allocation2 + $0x2c] sm:$0x1] }
  0xa9   : > { %12596 = vmatpush3.bf16.msra.mxu0 %v13586_v16  ;;  %12277 = vmatprep.subr.bf16.mxu1 %v13587_v19  ;;  %v11423_v6 = vcombine.low %v3943_v2, %v3953_v3  ;;  %v534_v7 = vrot.slane %v533_v61, 4  ;;  %v3960_v9 = vrot.slane %v3958_v63, 5  ;;  %v3966_v12 = vrot.slane %v3964_v0, 5  ;;  %v13595_v16 = vld [vmem:[%s14506_s15] sm:$0xff]   ;;  %v13597_v50 = vld [vmem:[%s14506_s15 + $0x148] sm:$0xff]   ;;  %v13601_v3 = vld [vmem:[%s14506_s15 + $0x10] sm:$0xff]  }
  0xaa   : > { %12597 = vmatprep.subr.bf16.mxu0 %v13588_v20  ;;  %v544_v11 = vrot.slane %v543_v4, 4  ;;  %v3970_v13 = vrot.slane %v3968_v5, 4  ;;  %v3974_v14 = vshll.u32 %v14532_v59, 16  ;;  %v5384_v18 = vrot.slane %v14530_v53, 5  ;;  %v389_v48 = vld [vmem:[#allocation2 + $0x24] sm:$0xf] }
  0xab   : > { %v539_v15 = vsel %vm14502_vm2, %v534_v7, %v538_v52  ;;  %v3961_v17 = vor.u32 %v3960_v9, %v3957_v8  ;;  %12605 = vmatprep.mubr.bf16.mxu0 %v11423_v6  ;;  %v551_v27 = vshrl.u32 %v387_v10, 16  ;;  %v554_v32 = vshll.u32 %v387_v10, 16  ;;  %v390_v56 = vld [vmem:[#allocation2 + $0x28] sm:$0xf]  ;;  %v470_v8 = vld [vmem:[#allocation2 + $0x2c] sm:$0x1] }
  0xac   : > { %12278 = vmatpush3.bf16.msra.mxu1 %v13587_v19  ;;  %v5387_v19 = vrot.slane %v14532_v59, 5  ;;  %v3971_v23 = vor.u32 %v3970_v13, %v3966_v12  ;;  %v3976_v24 = vrot.slane %v3974_v14, 5  ;;  %v570_v40 = vshll.u32 %v469_v26, 16  ;;  %v3843_v13 = vld [vmem:[#allocation2 + $0x30] sm:$0xf] }
  0xad   : > { %12598 = vmatpush3.bf16.msra.mxu0 %v13588_v20  ;;  %12279 = vmatprep.subr.bf16.mxu1 %v13589_v21  ;;  %v13596_v20 = vld [vmem:[%s14506_s15 + $0x140] sm:$0xff]   ;;  %v3962_v30 = vrot.slane %v3961_v17, 4  ;;  %v553_v34 = vrot.slane %v551_v27, 4  ;;  %v556_v39 = vrot.slane %v554_v32, 5  ;;  %v3979_v42 = vshrl.u32 %v3840_v28, 16  ;;  %v13599_v14 = vld [vmem:[%s14506_s15 + $0x150] sm:$0xff]  }
  0xae   : > { %12599 = vmatprep.subr.bf16.mxu0 %v13590_v22  ;;  %v3972_v33 = vrot.slane %v3971_v23, 4  ;;  %v3982_v47 = vshll.u32 %v3840_v28, 16  ;;  %v572_v54 = vrot.slane %v570_v40, 5  ;;  %v3988_v61 = vshll.u32 %v3841_v37, 16  ;;  %v3845_v27 = vld [vmem:[#allocation2 + $0x38] sm:$0x1] }
  0xaf   : > { %v3967_v38 = vsel %vm14502_vm2, %v3962_v30, %v3966_v12  ;;  %v557_v52 = vor.u32 %v556_v39, %v553_v34  ;;  %v3981_v55 = vrot.slane %v3979_v42, 4  ;;  %v3992_v62 = vshrl.u32 %v3841_v37, 16  ;;  %v13604_v28 = vld [vmem:[%s14506_s15 + $0x18] sm:$0xff]   ;;  %v391_v34 = vld [vmem:[#allocation2 + $0x30] sm:$0xf] }
  0xb0   : > { %12280 = vmatpush3.bf16.msra.mxu1 %v13589_v21  ;;  %v388_v21 = vld [vmem:[#allocation2 + $0x1c] sm:$0xf]  ;;  %v3977_v44 = vsel %vm14502_vm2, %v3972_v33, %v3976_v24  ;;  %v3998_v0 = vshll.u32 %v3842_v41, 16  ;;  %v578_v2 = vshll.u32 %v389_v48, 16  ;;  %v3990_v6 = vrot.slane %v3988_v61, 5 }
  0xb1   : > { %12600 = vmatpush3.bf16.msra.mxu0 %v13590_v22  ;;  %12281 = vmatprep.subr.bf16.mxu1 %v13591_v31  ;;  %v549_v22 = vsel %vm14502_vm2, %v544_v11, %v548_v58  ;;  %v560_v35 = vshll.u32 %v388_v21, 16  ;;  %v564_v36 = vshrl.u32 %v388_v21, 16  ;;  %v11424_v51 = vcombine.low %v3967_v38, %v3977_v44  ;;  %v3844_v21 = vld [vmem:[#allocation2 + $0x34] sm:$0xf]  ;;  %v5249_v59 = vld [vmem:[#allocation2 + $0x24] sm:$0xe] }
  0xb2   : > { %12601 = vmatprep.subr.bf16.mxu0 %v13592_v43  ;;  %v11181_v29 = vcombine.low %v539_v15, %v549_v22  ;;  %v558_v63 = vrot.slane %v557_v52, 4  ;;  %v3994_v7 = vrot.slane %v3992_v62, 4  ;;  %v4000_v10 = vrot.slane %v3998_v0, 5  ;;  %v392_v40 = vld [vmem:[#allocation2 + $0x34] sm:$0xf] }
  0xb3   : > { %v562_v45 = vrot.slane %v560_v35, 5  ;;  %v566_v46 = vrot.slane %v564_v36, 4  ;;  %v580_v12 = vrot.slane %v578_v2, 5  ;;  %v588_v24 = vshrl.u32 %v390_v56, 16  ;;  %v13600_v35 = vld [vmem:[%s14506_s15 + $0x158] sm:$0xff]  }
  0xb4   : > { %12282 = vmatpush3.bf16.msra.mxu1 %v13591_v31  ;;  %v14553_v31 = vrot.slane %v5384_v18, 4  ;;  %v3995_v17 = vor.u32 %v3994_v7, %v3990_v6  ;;  %v594_v26 = vshll.u32 %v470_v8, 16  ;;  %v4003_v33 = vshrl.u32 %v3843_v13, 16  ;;  %v3847_v0 = vld [vmem:[#allocation2 + $0x40] sm:$0xf] }
  0xb5   : > { %12602 = vmatpush3.bf16.msra.mxu0 %v13592_v43  ;;  %12283 = vmatprep.subr.bf16.mxu1 %v13593_v60  ;;  %v13598_v43 = vld [vmem:[%s14506_s15 + $0x8] sm:$0xff]   ;;  %v567_v58 = vor.u32 %v566_v46, %v562_v45  ;;  %v563_v9 = vsel %vm14502_vm2, %v558_v63, %v562_v45  ;;  %v590_v37 = vrot.slane %v588_v24, 4  ;;  %v4006_v39 = vshll.u32 %v3843_v13, 16 }
  0xb6   : > { %12603 = vmatprep.subr.bf16.mxu0 %v13594_v1  ;;  %v3996_v30 = vrot.slane %v3995_v17, 4  ;;  %v596_v38 = vrot.slane %v594_v26, 5  ;;  %v4005_v42 = vrot.slane %v4003_v33, 4  ;;  %v4016_v44 = vshrl.u32 %v3844_v21, 16  ;;  %v394_v33 = vld [vmem:[#allocation2 + $0x40] sm:$0xf] }
  0xb7   : > { %v568_v4 = vrot.slane %v567_v58, 4  ;;  %v3846_v58 = vld [vmem:[#allocation2 + $0x3c] sm:$0xf]  ;;  %v602_v62 = vshll.u32 %v391_v34, 16  ;;  %v608_v63 = vshll.u32 %v392_v40, 16  ;;  %v4036_v26 = vshll.u32 %v3847_v0, 16 }
  0xb8   : > { %12284 = vmatpush3.bf16.msra.mxu1 %v13593_v60  ;;  %v3984_v60 = vrot.slane %v3982_v47, 5  ;;  %v4001_v41 = vsel %vm14502_vm2, %v3996_v30, %v4000_v10  ;;  %v4027_v17 = vshrl.u32 %v3846_v58, 16  ;;  %vm10009_vm8 = vsmask.f32 (!%p11755_p1), 256 }
  0xb9   : > { %12604 = vmatpush3.bf16.msra.mxu0 %v13594_v1  ;;  %12349 = vmatprep.subr.bf16.mxu1 %v13595_v16  ;;  %v575_v1 = vshrl.u32 %v389_v48, 16  ;;  %v573_v15 = vsel %vm14502_vm2, %v568_v4, %v572_v54  ;;  %v4008_v48 = vrot.slane %v4006_v39, 5  ;;  %v4018_v54 = vrot.slane %v4016_v44, 4  ;;  %vm16825_vm3 = vmand (!%p11755_p1), %vm10659_vm10, %vm10009_vm8 }
  0xba   : > { %12669 = vmatprep.subr.bf16.mxu0 %v13596_v20  ;;  %v3985_v5 = vor.u32 %v3984_v60, %v3981_v55  ;;  %v11182_v22 = vcombine.low %v563_v9, %v573_v15  ;;  %v4022_v55 = vshll.u32 %v3845_v27, 16  ;;  %v604_v8 = vrot.slane %v602_v62, 5  ;;  %v393_v27 = vld [vmem:[#allocation2 + $0x3c] sm:$0xf]  ;;  %v3851_v62 = vld [vmem:[#allocation2 + $0x50] sm:$0x1] }
  0xbb   : > { %12286 = vmatmul.mubr.bf16.vlgmr.msra.gmra.mrb[0].mxu1 %v11181_v29  ;;  %v577_v11 = vrot.slane %v575_v1, 4  ;;  %v4009_v61 = vor.u32 %v4008_v48, %v4005_v42  ;;  %v13602_v1 = vld [vmem:[%s14506_s15 + $0x160] sm:$0xff]   ;;  %v610_v9 = vrot.slane %v608_v63, 5  ;;  %v4029_v30 = vrot.slane %v4027_v17, 4  ;;  %v3849_v48 = vld [vmem:[#allocation2 + $0x48] sm:$0xf] }
  0xbc   : > { %12350 = vmatpush3.bf16.msra.mxu1 %v13595_v16  ;;  %12606 = vmatmul.mubr.bf16.vlgmr.msra.gmra.mrb[0].mxu0 %v11424_v51  ;;  %v3986_v16 = vrot.slane %v3985_v5, 4  ;;  %v13607_v51 = vld [vmem:[%s14506_s15 + $0x20] sm:$0xff]   ;;  %v612_v5 = vshrl.u32 %v392_v40, 16  ;;  %v626_v42 = vshll.u32 %v393_v27, 16  ;;  %v13606_v63 = vld [vmem:[%s14506_s15 + $0x178] sm:$0xff]  }
  0xbd   : > { %12351 = vmatprep.subr.bf16.mxu1 %v13598_v43  ;;  %12670 = vmatpush3.bf16.msra.mxu0 %v13596_v20  ;;  %v584_v20 = vshll.u32 %v390_v56, 16  ;;  %v581_v23 = vor.u32 %v580_v12, %v577_v11  ;;  %v599_v56 = vshrl.u32 %v391_v34, 16  ;;  %v4010_v7 = vrot.slane %v4009_v61, 4  ;;  %v472_v40 = vld [vmem:[#allocation2 + $0x44] sm:$0x1] }
  0xbe   : > { %12671 = vmatprep.subr.bf16.mxu0 %v13597_v50  ;;  %v3991_v29 = vsel %vm14502_vm2, %v3986_v16, %v3990_v6  ;;  %12289 = vmatprep.mubr.bf16.mxu1 %v11182_v22  ;;  %v614_v12 = vrot.slane %v612_v5, 4  ;;  %v3848_v16 = vld [vmem:[#allocation2 + $0x44] sm:$0x1]  ;;  %v642_v61 = vshll.u32 %v472_v40, 16  ;;  %v396_v17 = vld [vmem:[#allocation2 + $0x4c] sm:$0xf] }
  0xbf   : > { %v586_v32 = vrot.slane %v584_v20, 5  ;;  %v582_v36 = vrot.slane %v581_v23, 4  ;;  %v11425_v45 = vcombine.low %v3991_v29, %v4001_v41  ;;  %v601_v4 = vrot.slane %v599_v56, 4 }
  0xc0   : > { %12352 = vmatpush3.bf16.msra.mxu1 %v13598_v43  ;;  %v4012_v43 = vshll.u32 %v3844_v21, 16  ;;  %v4030_v20 = vshll.u32 %v3846_v58, 16  ;;  %v13603_v21 = vld [vmem:[%s14506_s15 + $0x168] sm:$0xff]   ;;  %v615_v23 = vor.u32 %v614_v12, %v610_v9  ;;  %v623_v41 = vshrl.u32 %v393_v27, 16 }
  0xc1   : > { %12353 = vmatprep.subr.bf16.mxu1 %v13601_v3  ;;  %12672 = vmatpush3.bf16.msra.mxu0 %v13597_v50  ;;  %v587_v46 = vsel %vm14502_vm2, %v582_v36, %v586_v32  ;;  %v591_v47 = vor.u32 %v590_v37, %v586_v32  ;;  %v471_v50 = vld [vmem:[#allocation2 + $0x38] sm:$0x1]  ;;  %v605_v15 = vor.u32 %v604_v8, %v601_v4  ;;  %v4040_v36 = vshrl.u32 %v3847_v0, 16  ;;  %v395_v12 = vld [vmem:[#allocation2 + $0x48] sm:$0xf] }
  0xc2   : > { %12673 = vmatprep.subr.bf16.mxu0 %v13599_v14  ;;  %v4014_v52 = vrot.slane %v4012_v43, 5  ;;  %12609 = vmatprep.mubr.bf16.mxu0 %v11425_v45  ;;  %v618_v13 = vshll.u32 %v471_v50, 16  ;;  %v4032_v32 = vrot.slane %v4030_v20, 5  ;;  %v616_v34 = vrot.slane %v615_v23, 4  ;;  %v13605_v43 = vld [vmem:[%s14506_s15 + $0x170] sm:$0xff]  }
  0xc3   : > { %v592_v60 = vrot.slane %v591_v47, 4  ;;  %v606_v29 = vrot.slane %v605_v15, 4  ;;  %v4046_v37 = vshll.u32 %v3848_v16, 16  ;;  %v4042_v45 = vrot.slane %v4040_v36, 4  ;;  %v3852_v36 = vld [vmem:[#allocation2 + $0x54] sm:$0xf] }
  0xc4   : > { %12354 = vmatpush3.bf16.msra.mxu1 %v13601_v3  ;;  %v4019_v2 = vor.u32 %v4018_v54, %v4014_v52  ;;  %v4024_v3 = vrot.slane %v4022_v55, 5  ;;  %v620_v24 = vrot.slane %v618_v13, 5  ;;  %v4033_v39 = vor.u32 %v4032_v32, %v4029_v30  ;;  %v3850_v55 = vld [vmem:[#allocation2 + $0x4c] sm:$0xf] }
  0xc5   : > { %12355 = vmatprep.subr.bf16.mxu1 %v13604_v28  ;;  %12674 = vmatpush3.bf16.msra.mxu0 %v13599_v14  ;;  %v597_v6 = vsel %vm14502_vm2, %v592_v60, %v596_v38  ;;  %v4015_v14 = vsel %vm14502_vm2, %v4010_v7, %v4014_v52  ;;  %v611_v38 = vsel %vm14502_vm2, %v606_v29, %v610_v9  ;;  %v632_v47 = vshll.u32 %v394_v33, 16 }
  0xc6   : > { %12675 = vmatprep.subr.bf16.mxu0 %v13600_v35  ;;  %v11183_v10 = vcombine.low %v587_v46, %v597_v6  ;;  %v4020_v11 = vrot.slane %v4019_v2, 4  ;;  %v621_v44 = vsel %vm14502_vm2, %v616_v34, %v620_v24  ;;  %v4048_v46 = vrot.slane %v4046_v37, 5  ;;  %v473_v24 = vld [vmem:[#allocation2 + $0x50] sm:$0x1]  ;;  %v13609_v37 = vld [vmem:[%s14506_s15 + $0x28] sm:$0xff]  }
  0xc7   : > { %v11184_v50 = vcombine.low %v611_v38, %v621_v44  ;;  %v625_v52 = vrot.slane %v623_v41, 4  ;;  %v628_v54 = vrot.slane %v626_v42, 5  ;;  %v634_v58 = vrot.slane %v632_v47, 5  ;;  %v3853_v42 = vld [vmem:[#allocation2 + $0x58] sm:$0xf] }
  0xc8   : > { %12356 = vmatpush3.bf16.msra.mxu1 %v13604_v28  ;;  %v4025_v22 = vsel %vm14502_vm2, %v4020_v11, %v4024_v3  ;;  %v636_v60 = vshrl.u32 %v394_v33, 16  ;;  %v4051_v2 = vshrl.u32 %v3849_v48, 16  ;;  %v4054_v3 = vshll.u32 %v3849_v48, 16 }
  0xc9   : > { %12357 = vmatprep.subr.bf16.mxu1 %v13607_v51  ;;  %12676 = vmatpush3.bf16.msra.mxu0 %v13600_v35  ;;  %v11426_v28 = vcombine.low %v4015_v14, %v4025_v22  ;;  %v4038_v35 = vrot.slane %v4036_v26, 5  ;;  %v644_v6 = vrot.slane %v642_v61, 5  ;;  %v4060_v7 = vshll.u32 %v3850_v55, 16  ;;  %v13608_v26 = vld [vmem:[%s14506_s15 + $0x180] sm:$0xff]  }
  0xca   : > { %12677 = vmatprep.subr.bf16.mxu0 %v13602_v1  ;;  %12290 = vmatmul.mubr.bf16.gmra.mrb[4].mxu1 %v11183_v10  ;;  %v638_v5 = vrot.slane %v636_v60, 4  ;;  %v4053_v9 = vrot.slane %v4051_v2, 4  ;;  %v4056_v10 = vrot.slane %v4054_v3, 5  ;;  %v4064_v11 = vshrl.u32 %v3850_v55, 16  ;;  %v397_v60 = vld [vmem:[#allocation2 + $0x54] sm:$0xf] }
  0xcb   : > { %12610 = vmatmul.mubr.bf16.gmra.mrb[4].mxu0 %v11426_v28  ;;  %v4043_v56 = vor.u32 %v4042_v45, %v4038_v35  ;;  %12293 = vmatprep.mubr.bf16.mxu1 %v11184_v50  ;;  %v4062_v15 = vrot.slane %v4060_v7, 5  ;;  %v4070_v16 = vshll.u32 %v3851_v62, 16  ;;  %v647_v29 = vshrl.u32 %v395_v12, 16 }
  0xcc   : > { %12358 = vmatpush3.bf16.msra.mxu1 %v13607_v51  ;;  %v4034_v51 = vrot.slane %v4033_v39, 4  ;;  %v639_v14 = vor.u32 %v638_v5, %v634_v58  ;;  %v4057_v22 = vor.u32 %v4056_v10, %v4053_v9  ;;  %v4066_v23 = vrot.slane %v4064_v11, 4 }
  0xcd   : > { %12678 = vmatpush3.bf16.msra.mxu0 %v13602_v1  ;;  %v629_v1 = vor.u32 %v628_v54, %v625_v52  ;;  %v4044_v4 = vrot.slane %v4043_v56, 4  ;;  %v4072_v28 = vrot.slane %v4070_v16, 5  ;;  %v650_v30 = vshll.u32 %v395_v12, 16  ;;  %12359 = vmatprep.subr.bf16.mxu1 %v13609_v37 }
  0xce   : > { %12679 = vmatprep.subr.bf16.mxu0 %v13603_v21  ;;  %v4039_v0 = vsel %vm14502_vm2, %v4034_v51, %v4038_v35  ;;  %v640_v27 = vrot.slane %v639_v14, 4  ;;  %v4058_v32 = vrot.slane %v4057_v22, 4  ;;  %v4067_v33 = vor.u32 %v4066_v23, %v4062_v15  ;;  %v3854_v51 = vld [vmem:[#allocation2 + $0x5c] sm:$0x1]  ;;  %v3856_v22 = vld [vmem:[#allocation2 + $0x64] sm:$0xf] }
  0xcf   : > { %v630_v8 = vrot.slane %v629_v1, 4  ;;  %v4049_v13 = vsel %vm14502_vm2, %v4044_v4, %v4048_v46  ;;  %v656_v34 = vshll.u32 %v396_v17, 16  ;;  %v660_v35 = vshrl.u32 %v396_v17, 16  ;;  %v398_v1 = vld [vmem:[#allocation2 + $0x58] sm:$0xf] }
  0xd0   : > { %v11427_v20 = vcombine.low %v4039_v0, %v4049_v13  ;;  %v645_v38 = vsel %vm14502_vm2, %v640_v27, %v644_v6  ;;  %v649_v39 = vrot.slane %v647_v29, 4  ;;  %v652_v40 = vrot.slane %v650_v30, 5  ;;  %12360 = vmatpush3.bf16.msra.mxu1 %v13609_v37  ;;  %v474_v13 = vld [vmem:[#allocation2 + $0x5c] sm:$0x1] }
  0xd1   : > { %12680 = vmatpush3.bf16.msra.mxu0 %v13603_v21  ;;  %v635_v21 = vsel %vm14502_vm2, %v630_v8, %v634_v58  ;;  %v666_v41 = vshll.u32 %v473_v24, 16  ;;  %v4063_v44 = vsel %vm14502_vm2, %v4058_v32, %v4062_v15  ;;  %v4068_v45 = vrot.slane %v4067_v33, 4  ;;  %v3855_v15 = vld [vmem:[#allocation2 + $0x60] sm:$0xf] }
  0xd2   : > { %12681 = vmatprep.subr.bf16.mxu0 %v13605_v43  ;;  %12613 = vmatprep.mubr.bf16.mxu0 %v11427_v20  ;;  %v658_v46 = vrot.slane %v656_v34, 5  ;;  %v653_v47 = vor.u32 %v652_v40, %v649_v39  ;;  %v662_v48 = vrot.slane %v660_v35, 4  ;;  %v4075_v52 = vshrl.u32 %v3852_v36, 16  ;;  %v3857_v35 = vld [vmem:[#allocation2 + $0x68] sm:$0x1] }
  0xd3   : > { %v668_v50 = vrot.slane %v666_v41, 5  ;;  %v4073_v54 = vsel %vm14502_vm2, %v4068_v45, %v4072_v28  ;;  %v4078_v55 = vshll.u32 %v3852_v36, 16  ;;  %v4084_v56 = vshll.u32 %v3853_v42, 16 }
  0xd4   : > { %v4088_v58 = vshrl.u32 %v3853_v42, 16  ;;  %v11428_v61 = vcombine.low %v4063_v44, %v4073_v54  ;;  %v654_v62 = vrot.slane %v653_v47, 4  ;;  %v4077_v0 = vrot.slane %v4075_v52, 4 }
  0xd5   : > { %12682 = vmatpush3.bf16.msra.mxu0 %v13605_v43  ;;  %v11185_v43 = vcombine.low %v635_v21, %v645_v38  ;;  %v4080_v2 = vrot.slane %v4078_v55, 5  ;;  %v4086_v3 = vrot.slane %v4084_v56, 5  ;;  %v4094_v5 = vshll.u32 %v3854_v51, 16  ;;  %v399_v38 = vld [vmem:[#allocation2 + $0x60] sm:$0xf] }
  0xd6   : > { %12683 = vmatprep.subr.bf16.mxu0 %v13606_v63  ;;  %v4090_v4 = vrot.slane %v4088_v58, 4  ;;  %12614 = vmatmul.mubr.bf16.gmra.mrb[8].mxu0 %v11428_v61  ;;  %v659_v6 = vsel %vm14502_vm2, %v654_v62, %v658_v46  ;;  %v671_v8 = vshrl.u32 %v397_v60, 16  ;;  %v674_v9 = vshll.u32 %v397_v60, 16  ;;  %v3858_v55 = vld [vmem:[#allocation2 + $0x6c] sm:$0xf] }
  0xd7   : > { %12294 = vmatmul.mubr.bf16.gmra.mrb[8].mxu1 %v11185_v43  ;;  %v4081_v10 = vor.u32 %v4080_v2, %v4077_v0  ;;  %v4096_v12 = vrot.slane %v4094_v5, 5  ;;  %v680_v14 = vshll.u32 %v398_v1, 16  ;;  %v684_v21 = vshrl.u32 %v398_v1, 16  ;;  %v400_v43 = vld [vmem:[#allocation2 + $0x64] sm:$0xf] }
  0xd8   : > { %v4091_v11 = vor.u32 %v4090_v4, %v4086_v3  ;;  %v673_v17 = vrot.slane %v671_v8, 4  ;;  %v676_v20 = vrot.slane %v674_v9, 5  ;;  %v690_v30 = vshll.u32 %v474_v13, 16 }
  0xd9   : > { %12684 = vmatpush3.bf16.msra.mxu0 %v13606_v63  ;;  %v663_v63 = vor.u32 %v662_v48, %v658_v46  ;;  %v4082_v24 = vrot.slane %v4081_v10, 4  ;;  %v682_v27 = vrot.slane %v680_v14, 5  ;;  %v686_v29 = vrot.slane %v684_v21, 4  ;;  %v475_v48 = vld [vmem:[#allocation2 + $0x68] sm:$0x1] }
  0xda   : > { %12749 = vmatprep.subr.bf16.mxu0 %v13608_v26  ;;  %v4092_v26 = vrot.slane %v4091_v11, 4  ;;  %v677_v28 = vor.u32 %v676_v20, %v673_v17  ;;  %v4099_v32 = vshrl.u32 %v3855_v15, 16  ;;  %v4102_v36 = vshll.u32 %v3855_v15, 16  ;;  %v3860_v14 = vld [vmem:[#allocation2 + $0x74] sm:$0x1] }
  0xdb   : > { %v664_v7 = vrot.slane %v663_v63, 4  ;;  %v4087_v33 = vsel %vm14502_vm2, %v4082_v24, %v4086_v3  ;;  %v4108_v37 = vshll.u32 %v3856_v22, 16  ;;  %v687_v41 = vor.u32 %v686_v29, %v682_v27  ;;  %v13611_v29 = vld [vmem:[%s14506_s15 + $0x30] sm:$0xff]  }
  0xdc   : > { %v4097_v34 = vsel %vm14502_vm2, %v4092_v26, %v4096_v12  ;;  %v678_v40 = vrot.slane %v677_v28, 4  ;;  %v692_v42 = vrot.slane %v690_v30, 5  ;;  %v4101_v44 = vrot.slane %v4099_v32, 4  ;;  %v402_v28 = vld [vmem:[#allocation2 + $0x70] sm:$0xf]  ;;  %12361 = vmatprep.subr.bf16.mxu1 %v13611_v29 }
  0xdd   : > { %v669_v16 = vsel %vm14502_vm2, %v664_v7, %v668_v50  ;;  %v11429_v39 = vcombine.low %v4087_v33, %v4097_v34  ;;  %v4104_v45 = vrot.slane %v4102_v36, 5  ;;  %v4110_v46 = vrot.slane %v4108_v37, 5  ;;  %12362 = vmatpush3.bf16.msra.mxu1 %v13611_v29  ;;  %v3864_v29 = vld [vmem:[#allocation2 + $0x84] sm:$0xf] }
  0xde   : > { %v11186_v23 = vcombine.low %v659_v6, %v669_v16  ;;  %v4112_v47 = vshrl.u32 %v3856_v22, 16  ;;  %v683_v50 = vsel %vm14502_vm2, %v678_v40, %v682_v27  ;;  %v688_v51 = vrot.slane %v687_v41, 4  ;;  %v3859_v6 = vld [vmem:[#allocation2 + $0x70] sm:$0xf]  ;;  %v401_v22 = vld [vmem:[#allocation2 + $0x6c] sm:$0xf] }
  0xdf   : > { %12617 = vmatprep.mubr.bf16.mxu0 %v11429_v39  ;;  %v4118_v52 = vshll.u32 %v3857_v35, 16  ;;  %v695_v54 = vshrl.u32 %v399_v38, 16  ;;  %v4105_v56 = vor.u32 %v4104_v45, %v4101_v44  ;;  %v698_v60 = vshll.u32 %v399_v38, 16  ;;  %v476_v35 = vld [vmem:[#allocation2 + $0x74] sm:$0x1] }
  0xe0   : > { %12297 = vmatprep.mubr.bf16.mxu1 %v11186_v23  ;;  %v4114_v58 = vrot.slane %v4112_v47, 4  ;;  %v704_v61 = vshll.u32 %v400_v43, 16  ;;  %v693_v62 = vsel %vm14502_vm2, %v688_v51, %v692_v42  ;;  %v708_v1 = vshrl.u32 %v400_v43, 16  ;;  %v3861_v40 = vld [vmem:[#allocation2 + $0x78] sm:$0xf] }
  0xe1   : > { %v4120_v63 = vrot.slane %v4118_v52, 5  ;;  %v697_v0 = vrot.slane %v695_v54, 4  ;;  %v11187_v2 = vcombine.low %v683_v50, %v693_v62  ;;  %v4106_v3 = vrot.slane %v4105_v56, 4  ;;  %v3862_v50 = vld [vmem:[#allocation2 + $0x7c] sm:$0xf] }
  0xe2   : > { %v4115_v4 = vor.u32 %v4114_v58, %v4110_v46  ;;  %v700_v5 = vrot.slane %v698_v60, 5  ;;  %v706_v7 = vrot.slane %v704_v61, 5  ;;  %v710_v8 = vrot.slane %v708_v1, 4  ;;  %v3863_v56 = vld [vmem:[#allocation2 + $0x80] sm:$0x1] }
  0xe3   : > { %v714_v9 = vshll.u32 %v475_v48, 16  ;;  %v4123_v10 = vshrl.u32 %v3858_v55, 16  ;;  %12298 = vmatmul.mubr.bf16.gmra.mrb[12].mxu1 %v11187_v2  ;;  %v4111_v11 = vsel %vm14502_vm2, %v4106_v3, %v4110_v46  ;;  %v4126_v15 = vshll.u32 %v3858_v55, 16  ;;  %v403_v58 = vld [vmem:[#allocation2 + $0x78] sm:$0xf] }
  0xe4   : > { %v4116_v12 = vrot.slane %v4115_v4, 4  ;;  %v701_v13 = vor.u32 %v700_v5, %v697_v0  ;;  %v711_v16 = vor.u32 %v710_v8, %v706_v7  ;;  %v4132_v21 = vshll.u32 %v3859_v6, 16  ;;  %v404_v8 = vld [vmem:[#allocation2 + $0x7c] sm:$0xf] }
  0xe5   : > { %v716_v17 = vrot.slane %v714_v9, 5  ;;  %v4125_v20 = vrot.slane %v4123_v10, 4  ;;  %v4128_v26 = vrot.slane %v4126_v15, 5  ;;  %v4136_v27 = vshrl.u32 %v3859_v6, 16 }
  0xe6   : > { %v4121_v23 = vsel %vm14502_vm2, %v4116_v12, %v4120_v63  ;;  %v702_v24 = vrot.slane %v701_v13, 4  ;;  %v712_v32 = vrot.slane %v711_v16, 4  ;;  %v4134_v33 = vrot.slane %v4132_v21, 5  ;;  %v477_v21 = vld [vmem:[#allocation2 + $0x80] sm:$0x1] }
  0xe7   : > { %v11430_v30 = vcombine.low %v4111_v11, %v4121_v23  ;;  %v4142_v34 = vshll.u32 %v3860_v14, 16  ;;  %v4129_v37 = vor.u32 %v4128_v26, %v4125_v20  ;;  %v4138_v38 = vrot.slane %v4136_v27, 4 }
  0xe8   : > { %v707_v36 = vsel %vm14502_vm2, %v702_v24, %v706_v7  ;;  %v719_v39 = vshrl.u32 %v401_v22, 16  ;;  %v717_v41 = vsel %vm14502_vm2, %v712_v32, %v716_v17  ;;  %v722_v43 = vshll.u32 %v401_v22, 16 }
  0xe9   : > { %12618 = vmatmul.mubr.bf16.gmra.mrb[12].mxu0 %v11430_v30  ;;  %v4144_v42 = vrot.slane %v4142_v34, 5  ;;  %v728_v44 = vshll.u32 %v402_v28, 16  ;;  %v11188_v45 = vcombine.low %v707_v36, %v717_v41  ;;  %v4130_v46 = vrot.slane %v4129_v37, 4 }
  0xea   : > { %v4139_v47 = vor.u32 %v4138_v38, %v4134_v33  ;;  %v721_v48 = vrot.slane %v719_v39, 4  ;;  %v724_v51 = vrot.slane %v722_v43, 5  ;;  %v732_v54 = vshrl.u32 %v402_v28, 16 }
  0xeb   : > { %v730_v52 = vrot.slane %v728_v44, 5  ;;  %v738_v55 = vshll.u32 %v476_v35, 16  ;;  %12301 = vmatprep.mubr.bf16.mxu1 %v11188_v45  ;;  %v4135_v60 = vsel %vm14502_vm2, %v4130_v46, %v4134_v33  ;;  %v4147_v62 = vshrl.u32 %v3861_v40, 16  ;;  %v3865_v35 = vld [vmem:[#allocation2 + $0x88] sm:$0xf] }
  0xec   : > { %v4140_v61 = vrot.slane %v4139_v47, 4  ;;  %v4150_v63 = vshll.u32 %v3861_v40, 16  ;;  %v725_v0 = vor.u32 %v724_v51, %v721_v48  ;;  %v734_v1 = vrot.slane %v732_v54, 4 }
  0xed   : > { %v740_v2 = vrot.slane %v738_v55, 5  ;;  %v4156_v3 = vshll.u32 %v3862_v50, 16  ;;  %v4149_v5 = vrot.slane %v4147_v62, 4  ;;  %v4160_v7 = vshrl.u32 %v3862_v50, 16  ;;  %v405_v50 = vld [vmem:[#allocation2 + $0x84] sm:$0xf] }
  0xee   : > { %v4145_v4 = vsel %vm14502_vm2, %v4140_v61, %v4144_v42  ;;  %v4152_v6 = vrot.slane %v4150_v63, 5  ;;  %v726_v10 = vrot.slane %v725_v0, 4  ;;  %v735_v11 = vor.u32 %v734_v1, %v730_v52  ;;  %v3866_v42 = vld [vmem:[#allocation2 + $0x8c] sm:$0x1] }
  0xef   : > { %v11431_v9 = vcombine.low %v4135_v60, %v4145_v4  ;;  %v4158_v12 = vrot.slane %v4156_v3, 5  ;;  %v4162_v14 = vrot.slane %v4160_v7, 4  ;;  %v4166_v15 = vshll.u32 %v3863_v56, 16  ;;  %v406_v56 = vld [vmem:[#allocation2 + $0x88] sm:$0xf] }
  0xf0   : > { %v4153_v13 = vor.u32 %v4152_v6, %v4149_v5  ;;  %v743_v16 = vshrl.u32 %v403_v58, 16  ;;  %v731_v17 = vsel %vm14502_vm2, %v726_v10, %v730_v52  ;;  %v736_v20 = vrot.slane %v735_v11, 4  ;;  %v478_v6 = vld [vmem:[#allocation2 + $0x8c] sm:$0x1] }
  0xf1   : > { %12621 = vmatprep.mubr.bf16.mxu0 %v11431_v9  ;;  %v746_v22 = vshll.u32 %v403_v58, 16  ;;  %v752_v23 = vshll.u32 %v404_v8, 16  ;;  %v4163_v26 = vor.u32 %v4162_v14, %v4158_v12  ;;  %v4168_v27 = vrot.slane %v4166_v15, 5 }
  0xf2   : > { %v4154_v24 = vrot.slane %v4153_v13, 4  ;;  %v745_v28 = vrot.slane %v743_v16, 4  ;;  %v741_v30 = vsel %vm14502_vm2, %v736_v20, %v740_v2  ;;  %v756_v34 = vshrl.u32 %v404_v8, 16  ;;  %v3867_v8 = vld [vmem:[#allocation2 + $0x90] sm:$0xf] }
  0xf3   : > { %v748_v32 = vrot.slane %v746_v22, 5  ;;  %v754_v33 = vrot.slane %v752_v23, 5  ;;  %v11189_v36 = vcombine.low %v731_v17, %v741_v30  ;;  %v4164_v38 = vrot.slane %v4163_v26, 4  ;;  %v3868_v13 = vld [vmem:[#allocation2 + $0x94] sm:$0xf] }
  0xf4   : > { %v4159_v37 = vsel %vm14502_vm2, %v4154_v24, %v4158_v12  ;;  %v762_v39 = vshll.u32 %v477_v21, 16  ;;  %v758_v41 = vrot.slane %v756_v34, 4  ;;  %v4171_v43 = vshrl.u32 %v3864_v29, 16  ;;  %v3869_v23 = vld [vmem:[#allocation2 + $0x98] sm:$0x1] }
  0xf5   : > { %v749_v40 = vor.u32 %v748_v32, %v745_v28  ;;  %v4174_v44 = vshll.u32 %v3864_v29, 16  ;;  %12302 = vmatmul.mubr.bf16.gmra.mrb[16].mxu1 %v11189_v36  ;;  %v4169_v45 = vsel %vm14502_vm2, %v4164_v38, %v4168_v27  ;;  %v4180_v47 = vshll.u32 %v3865_v35, 16  ;;  %v407_v30 = vld [vmem:[#allocation2 + $0x90] sm:$0xf]  ;;  %v408_v36 = vld [vmem:[#allocation2 + $0x94] sm:$0xf] }
  0xf6   : > { %v764_v46 = vrot.slane %v762_v39, 5  ;;  %v4184_v48 = vshrl.u32 %v3865_v35, 16  ;;  %v11432_v51 = vcombine.low %v4159_v37, %v4169_v45  ;;  %v759_v54 = vor.u32 %v758_v41, %v754_v33  ;;  %v479_v41 = vld [vmem:[#allocation2 + $0x98] sm:$0x1] }
  0xf7   : > { %v750_v52 = vrot.slane %v749_v40, 4  ;;  %v4173_v55 = vrot.slane %v4171_v43, 4  ;;  %v4176_v58 = vrot.slane %v4174_v44, 5  ;;  %v4182_v60 = vrot.slane %v4180_v47, 5 }
  0xf8   : > { %v4186_v61 = vrot.slane %v4184_v48, 4  ;;  %v4190_v62 = vshll.u32 %v3866_v42, 16  ;;  %12622 = vmatmul.mubr.bf16.gmra.mrb[16].mxu0 %v11432_v51  ;;  %v760_v0 = vrot.slane %v759_v54, 4  ;;  %v767_v1 = vshrl.u32 %v405_v50, 16 }
  0xf9   : > { %v755_v63 = vsel %vm14502_vm2, %v750_v52, %v754_v33  ;;  %v770_v2 = vshll.u32 %v405_v50, 16  ;;  %v4177_v3 = vor.u32 %v4176_v58, %v4173_v55  ;;  %v776_v7 = vshll.u32 %v406_v56, 16  ;;  %v3870_v52 = vld [vmem:[#allocation2 + $0x9c] sm:$0xf] }
  0xfa   : > { %v4187_v4 = vor.u32 %v4186_v61, %v4182_v60  ;;  %v4192_v5 = vrot.slane %v4190_v62, 5  ;;  %v765_v9 = vsel %vm14502_vm2, %v760_v0, %v764_v46  ;;  %v769_v10 = vrot.slane %v767_v1, 4  ;;  %v13613_v46 = vld [vmem:[%s14506_s15 + $0x38] sm:$0xff]   ;;  %v3871_v0 = vld [vmem:[#allocation2 + $0xa0] sm:$0xf] }
  0xfb   : > { %v772_v11 = vrot.slane %v770_v2, 5  ;;  %v780_v12 = vshrl.u32 %v406_v56, 16  ;;  %v11190_v14 = vcombine.low %v755_v63, %v765_v9  ;;  %v4178_v15 = vrot.slane %v4177_v3, 4  ;;  %12363 = vmatprep.subr.bf16.mxu1 %v13613_v46 }
  0xfc   : > { %v4188_v16 = vrot.slane %v4187_v4, 4  ;;  %v778_v17 = vrot.slane %v776_v7, 5  ;;  %v786_v22 = vshll.u32 %v478_v6, 16  ;;  %v4195_v24 = vshrl.u32 %v3867_v8, 16  ;;  %12364 = vmatpush3.bf16.msra.mxu1 %v13613_v46 }
  0xfd   : > { %v773_v20 = vor.u32 %v772_v11, %v769_v10  ;;  %v782_v21 = vrot.slane %v780_v12, 4  ;;  %12305 = vmatprep.mubr.bf16.mxu1 %v11190_v14  ;;  %v4183_v26 = vsel %vm14502_vm2, %v4178_v15, %v4182_v60  ;;  %v4198_v28 = vshll.u32 %v3867_v8, 16  ;;  %v3872_v8 = vld [vmem:[#allocation2 + $0xa4] sm:$0x1]  ;;  %v409_v14 = vld [vmem:[#allocation2 + $0x9c] sm:$0xf] }
  0xfe   : > { %v4193_v27 = vsel %vm14502_vm2, %v4188_v16, %v4192_v5  ;;  %v4204_v29 = vshll.u32 %v3868_v13, 16  ;;  %v788_v35 = vrot.slane %v786_v22, 5  ;;  %v4197_v37 = vrot.slane %v4195_v24, 4 }
  0xff   : > { %v11433_v32 = vcombine.low %v4183_v26, %v4193_v27  ;;  %v774_v33 = vrot.slane %v773_v20, 4  ;;  %v783_v34 = vor.u32 %v782_v21, %v778_v17  ;;  %v4200_v38 = vrot.slane %v4198_v28, 5  ;;  %v410_v21 = vld [vmem:[#allocation2 + $0xa0] sm:$0xf] }
 0x100   : > { %v4206_v39 = vrot.slane %v4204_v29, 5  ;;  %v4208_v40 = vshrl.u32 %v3868_v13, 16  ;;  %v4214_v44 = vshll.u32 %v3869_v23, 16  ;;  %v791_v45 = vshrl.u32 %v407_v30, 16 }
 0x101   : > { %12625 = vmatprep.mubr.bf16.mxu0 %v11433_v32  ;;  %v779_v42 = vsel %vm14502_vm2, %v774_v33, %v778_v17  ;;  %v784_v43 = vrot.slane %v783_v34, 4  ;;  %v4201_v47 = vor.u32 %v4200_v38, %v4197_v37  ;;  %v794_v50 = vshll.u32 %v407_v30, 16  ;;  %v480_v30 = vld [vmem:[#allocation2 + $0xa4] sm:$0x1]  ;;  %v3873_v37 = vld [vmem:[#allocation2 + $0xa8] sm:$0xf] }
 0x102   : > { %v4210_v48 = vrot.slane %v4208_v40, 4  ;;  %v800_v51 = vshll.u32 %v408_v36, 16  ;;  %v4216_v55 = vrot.slane %v4214_v44, 5  ;;  %v793_v56 = vrot.slane %v791_v45, 4 }
 0x103   : > { %v789_v54 = vsel %vm14502_vm2, %v784_v43, %v788_v35  ;;  %v804_v58 = vshrl.u32 %v408_v36, 16  ;;  %v4202_v61 = vrot.slane %v4201_v47, 4  ;;  %v796_v63 = vrot.slane %v794_v50, 5  ;;  %v3875_v47 = vld [vmem:[#allocation2 + $0xb0] sm:$0x1] }
 0x104   : > { %v11191_v60 = vcombine.low %v779_v42, %v789_v54  ;;  %v4211_v62 = vor.u32 %v4210_v48, %v4206_v39  ;;  %v802_v1 = vrot.slane %v800_v51, 5  ;;  %v810_v3 = vshll.u32 %v479_v41, 16  ;;  %v3874_v42 = vld [vmem:[#allocation2 + $0xac] sm:$0xf]  ;;  %v411_v48 = vld [vmem:[#allocation2 + $0xa8] sm:$0xf] }
 0x105   : > { %v806_v2 = vrot.slane %v804_v58, 4  ;;  %v4219_v4 = vshrl.u32 %v3870_v52, 16  ;;  %v4207_v5 = vsel %vm14502_vm2, %v4202_v61, %v4206_v39  ;;  %v797_v7 = vor.u32 %v796_v63, %v793_v56  ;;  %v412_v61 = vld [vmem:[#allocation2 + $0xac] sm:$0xf] }
 0x106   : > { %12306 = vmatmul.mubr.bf16.gmra.mrb[20].mxu1 %v11191_v60  ;;  %v4212_v6 = vrot.slane %v4211_v62, 4  ;;  %v4222_v9 = vshll.u32 %v3870_v52, 16  ;;  %v812_v11 = vrot.slane %v810_v3, 5  ;;  %v4228_v13 = vshll.u32 %v3871_v0, 16 }
 0x107   : > { %v807_v10 = vor.u32 %v806_v2, %v802_v1  ;;  %v4221_v12 = vrot.slane %v4219_v4, 4  ;;  %v798_v16 = vrot.slane %v797_v7, 4  ;;  %v4232_v20 = vshrl.u32 %v3871_v0, 16 }
 0x108   : > { %v4217_v15 = vsel %vm14502_vm2, %v4212_v6, %v4216_v55  ;;  %v4224_v17 = vrot.slane %v4222_v9, 5  ;;  %v4230_v24 = vrot.slane %v4228_v13, 5  ;;  %v4238_v26 = vshll.u32 %v3872_v8, 16  ;;  %v481_v13 = vld [vmem:[#allocation2 + $0xb0] sm:$0x1] }
 0x109   : > { %v11434_v22 = vcombine.low %v4207_v5, %v4217_v15  ;;  %v808_v23 = vrot.slane %v807_v10, 4  ;;  %v803_v27 = vsel %vm14502_vm2, %v798_v16, %v802_v1  ;;  %v4234_v29 = vrot.slane %v4232_v20, 4  ;;  %v13617_v10 = vld [vmem:[%s14506_s15 + $0x80] sm:$0xff]  }
 0x10a   : > { %v4225_v28 = vor.u32 %v4224_v17, %v4221_v12  ;;  %v815_v32 = vshrl.u32 %v409_v14, 16  ;;  %v4240_v34 = vrot.slane %v4238_v26, 5  ;;  %v818_v35 = vshll.u32 %v409_v14, 16  ;;  %12429 = vmatprep.subr.bf16.mxu1 %v13617_v10 }
 0x10b   : > { %12626 = vmatmul.mubr.bf16.gmra.mrb[20].mxu0 %v11434_v22  ;;  %v813_v33 = vsel %vm14502_vm2, %v808_v23, %v812_v11  ;;  %v824_v36 = vshll.u32 %v410_v21, 16  ;;  %v4235_v40 = vor.u32 %v4234_v29, %v4230_v24  ;;  %v828_v45 = vshrl.u32 %v410_v21, 16  ;;  %v3876_v22 = vld [vmem:[#allocation2 + $0xb4] sm:$0xf] }
 0x10c   : > { %v11192_v38 = vcombine.low %v803_v27, %v813_v33  ;;  %v4226_v39 = vrot.slane %v4225_v28, 4  ;;  %v817_v41 = vrot.slane %v815_v32, 4  ;;  %v820_v43 = vrot.slane %v818_v35, 5  ;;  %v3877_v28 = vld [vmem:[#allocation2 + $0xb8] sm:$0xf] }
 0x10d   : > { %v826_v44 = vrot.slane %v824_v36, 5  ;;  %v834_v46 = vshll.u32 %v480_v30, 16  ;;  %v4236_v51 = vrot.slane %v4235_v40, 4  ;;  %v4243_v52 = vshrl.u32 %v3873_v37, 16  ;;  %v3878_v36 = vld [vmem:[#allocation2 + $0xbc] sm:$0x1] }
 0x10e   : > { %12309 = vmatprep.mubr.bf16.mxu1 %v11192_v38  ;;  %v4231_v50 = vsel %vm14502_vm2, %v4226_v39, %v4230_v24  ;;  %v4246_v54 = vshll.u32 %v3873_v37, 16  ;;  %v821_v55 = vor.u32 %v820_v43, %v817_v41  ;;  %v830_v56 = vrot.slane %v828_v45, 4  ;;  %v413_v43 = vld [vmem:[#allocation2 + $0xb4] sm:$0xf] }
 0x10f   : > { %v836_v58 = vrot.slane %v834_v46, 5  ;;  %v4252_v60 = vshll.u32 %v3874_v42, 16  ;;  %v4241_v62 = vsel %vm14502_vm2, %v4236_v51, %v4240_v34  ;;  %v4245_v63 = vrot.slane %v4243_v52, 4 }
 0x110   : > { %v4248_v0 = vrot.slane %v4246_v54, 5  ;;  %v4256_v1 = vshrl.u32 %v3874_v42, 16  ;;  %v11435_v2 = vcombine.low %v4231_v50, %v4241_v62  ;;  %v822_v3 = vrot.slane %v821_v55, 4 }
 0x111   : > { %v831_v4 = vor.u32 %v830_v56, %v826_v44  ;;  %v4254_v5 = vrot.slane %v4252_v60, 5  ;;  %v4262_v8 = vshll.u32 %v3875_v47, 16  ;;  %v839_v9 = vshrl.u32 %v411_v48, 16 }
 0x112   : > { %v4249_v6 = vor.u32 %v4248_v0, %v4245_v63  ;;  %v4258_v7 = vrot.slane %v4256_v1, 4  ;;  %12629 = vmatprep.mubr.bf16.mxu0 %v11435_v2  ;;  %v827_v11 = vsel %vm14502_vm2, %v822_v3, %v826_v44  ;;  %v842_v14 = vshll.u32 %v411_v48, 16  ;;  %v414_v48 = vld [vmem:[#allocation2 + $0xb8] sm:$0xf]  ;;  %v3879_v2 = vld [vmem:[#allocation2 + $0xc0] sm:$0xf] }
 0x113   : > { %v832_v12 = vrot.slane %v831_v4, 4  ;;  %v848_v15 = vshll.u32 %v412_v61, 16  ;;  %v4264_v20 = vrot.slane %v4262_v8, 5  ;;  %v841_v21 = vrot.slane %v839_v9, 4  ;;  %v3880_v3 = vld [vmem:[#allocation2 + $0xc4] sm:$0xf] }
 0x114   : > { %v4250_v16 = vrot.slane %v4249_v6, 4  ;;  %v4259_v17 = vor.u32 %v4258_v7, %v4254_v5  ;;  %v844_v24 = vrot.slane %v842_v14, 5  ;;  %v852_v27 = vshrl.u32 %v412_v61, 16 }
 0x115   : > { %v837_v23 = vsel %vm14502_vm2, %v832_v12, %v836_v58  ;;  %v850_v26 = vrot.slane %v848_v15, 5  ;;  %v858_v33 = vshll.u32 %v481_v13, 16  ;;  %v4267_v37 = vshrl.u32 %v3876_v22, 16  ;;  %v482_v58 = vld [vmem:[#allocation2 + $0xbc] sm:$0x1] }
 0x116   : > { %v11193_v29 = vcombine.low %v827_v11, %v837_v23  ;;  %v4255_v30 = vsel %vm14502_vm2, %v4250_v16, %v4254_v5  ;;  %v4260_v32 = vrot.slane %v4259_v17, 4  ;;  %v845_v34 = vor.u32 %v844_v24, %v841_v21  ;;  %v3881_v12 = vld [vmem:[#allocation2 + $0xc8] sm:$0x1]  ;;  %v415_v17 = vld [vmem:[#allocation2 + $0xd8] sm:$0xf] }
 0x117   : > { %v854_v35 = vrot.slane %v852_v27, 4  ;;  %v4270_v38 = vshll.u32 %v3876_v22, 16  ;;  %v860_v40 = vrot.slane %v858_v33, 5  ;;  %v4276_v41 = vshll.u32 %v3877_v28, 16 }
 0x118   : > { %12310 = vmatmul.mubr.bf16.gmra.mrb[24].mxu1 %v11193_v29  ;;  %v4265_v39 = vsel %vm14502_vm2, %v4260_v32, %v4264_v20  ;;  %v4280_v42 = vshrl.u32 %v3877_v28, 16  ;;  %v846_v45 = vrot.slane %v845_v34, 4  ;;  %v4269_v47 = vrot.slane %v4267_v37, 4  ;;  %v416_v29 = vld [vmem:[#allocation2 + $0xdc] sm:$0xf] }
 0x119   : > { %v11436_v44 = vcombine.low %v4255_v30, %v4265_v39  ;;  %v855_v46 = vor.u32 %v854_v35, %v850_v26  ;;  %v4272_v50 = vrot.slane %v4270_v38, 5  ;;  %v4278_v51 = vrot.slane %v4276_v41, 5  ;;  %v483_v41 = vld [vmem:[#allocation2 + $0xe0] sm:$0x1] }
 0x11a   : > { %v4282_v52 = vrot.slane %v4280_v42, 4  ;;  %v4286_v54 = vshll.u32 %v3878_v36, 16  ;;  %v851_v55 = vsel %vm14502_vm2, %v846_v45, %v850_v26  ;;  %v863_v60 = vshrl.u32 %v413_v43, 16 }
 0x11b   : > { %12630 = vmatmul.mubr.bf16.gmra.mrb[24].mxu0 %v11436_v44  ;;  %v856_v56 = vrot.slane %v855_v46, 4  ;;  %v866_v61 = vshll.u32 %v413_v43, 16  ;;  %v4273_v62 = vor.u32 %v4272_v50, %v4269_v47  ;;  %v872_v1 = vshll.u32 %v414_v48, 16 }
 0x11c   : > { %v4283_v63 = vor.u32 %v4282_v52, %v4278_v51  ;;  %v4288_v0 = vrot.slane %v4286_v54, 5  ;;  %v865_v5 = vrot.slane %v863_v60, 4  ;;  %v876_v7 = vshrl.u32 %v414_v48, 16  ;;  %v5247_v54 = vld [vmem:[#allocation2 + $0xc] sm:$0xe] }
 0x11d   : > { %v861_v4 = vsel %vm14502_vm2, %v856_v56, %v860_v40  ;;  %v868_v6 = vrot.slane %v866_v61, 5  ;;  %v4274_v9 = vrot.slane %v4273_v62, 4  ;;  %v874_v11 = vrot.slane %v872_v1, 5  ;;  %v417_v60 = vld [vmem:[#allocation2 + $0xe4] sm:$0xf] }
 0x11e   : > { %v11194_v8 = vcombine.low %v851_v55, %v861_v4  ;;  %v4284_v10 = vrot.slane %v4283_v63, 4  ;;  %v878_v14 = vrot.slane %v876_v7, 4  ;;  %v882_v15 = vshll.u32 %v482_v58, 16  ;;  %v484_v7 = vld [vmem:[#allocation2 + $0xec] sm:$0x1] }
 0x11f   : > { %v869_v13 = vor.u32 %v868_v6, %v865_v5  ;;  %v4291_v16 = vshrl.u32 %v3879_v2, 16  ;;  %v4279_v20 = vsel %vm14502_vm2, %v4274_v9, %v4278_v51  ;;  %v4294_v22 = vshll.u32 %v3879_v2, 16  ;;  %v13747_v5 = vld [vmem:[#allocation2 + $0x10] sm:$0xf] }
 0x120   : > { %12313 = vmatprep.mubr.bf16.mxu1 %v11194_v8  ;;  %v4289_v21 = vsel %vm14502_vm2, %v4284_v10, %v4288_v0  ;;  %v4300_v23 = vshll.u32 %v3880_v3, 16  ;;  %v879_v27 = vor.u32 %v878_v14, %v874_v11  ;;  %v884_v28 = vrot.slane %v882_v15, 5  ;;  %v418_v0 = vld [vmem:[#allocation2 + $0xe8] sm:$0xf] }
 0x121   : > { %v11437_v24 = vcombine.low %v4279_v20, %v4289_v21  ;;  %v870_v26 = vrot.slane %v869_v13, 4  ;;  %v4293_v30 = vrot.slane %v4291_v16, 4  ;;  %v4296_v32 = vrot.slane %v4294_v22, 5  ;;  %v420_v20 = vld [vmem:[#allocation2 + $0xf4] sm:$0xf] }
 0x122   : > { %v4302_v33 = vrot.slane %v4300_v23, 5  ;;  %v4304_v34 = vshrl.u32 %v3880_v3, 16  ;;  %v880_v36 = vrot.slane %v879_v27, 4  ;;  %v4310_v37 = vshll.u32 %v3881_v12, 16  ;;  %v5248_v12 = vld [vmem:[#allocation2 + $0x18] sm:$0xe] }
 0x123   : > { %12633 = vmatprep.mubr.bf16.mxu0 %v11437_v24  ;;  %v875_v35 = vsel %vm14502_vm2, %v870_v26, %v874_v11  ;;  %v887_v38 = vshrl.u32 %v415_v17, 16  ;;  %v4297_v39 = vor.u32 %v4296_v32, %v4293_v30  ;;  %v890_v42 = vshll.u32 %v415_v17, 16  ;;  %v419_v17 = vld [vmem:[#allocation2 + $0xf0] sm:$0xf]  ;;  %v485_v30 = vld [vmem:[#allocation2 + $0xf8] sm:$0x1] }
 0x124   : > { %v4306_v40 = vrot.slane %v4304_v34, 4  ;;  %v896_v43 = vshll.u32 %v416_v29, 16  ;;  %v885_v44 = vsel %vm14502_vm2, %v880_v36, %v884_v28  ;;  %v4312_v45 = vrot.slane %v4310_v37, 5 }
 0x125   : > { %v889_v46 = vrot.slane %v887_v38, 4  ;;  %v900_v47 = vshrl.u32 %v416_v29, 16  ;;  %v11195_v48 = vcombine.low %v875_v35, %v885_v44  ;;  %v4298_v50 = vrot.slane %v4297_v39, 4 }
 0x126   : > { %v4307_v51 = vor.u32 %v4306_v40, %v4302_v33  ;;  %v892_v52 = vrot.slane %v890_v42, 5  ;;  %v898_v55 = vrot.slane %v896_v43, 5  ;;  %v906_v58 = vshll.u32 %v483_v41, 16 }
 0x127   : > { %v902_v56 = vrot.slane %v900_v47, 4  ;;  %12314 = vmatmul.mubr.bf16.gmra.mrb[28].mxu1 %v11195_v48  ;;  %v4303_v61 = vsel %vm14502_vm2, %v4298_v50, %v4302_v33  ;;  %v11463_v4 = vrot.slane %v5247_v54, 9  ;;  %v5377_v6 = vrot.slane %v13747_v5, 5  ;;  %v421_v48 = vld [vmem:[#allocation2 + $0xfc] sm:$0xf]  ;;  %v13612_v5 = vld [vmem:[%s14506_s15 + $0x190] sm:$0xff]  }
 0x128   : > { %v4308_v62 = vrot.slane %v4307_v51, 4  ;;  %v893_v63 = vor.u32 %v892_v52, %v889_v46  ;;  %v908_v2 = vrot.slane %v906_v58, 5  ;;  %v911_v10 = vshrl.u32 %v417_v60, 16 }
 0x129   : > { %v903_v1 = vor.u32 %v902_v56, %v898_v55  ;;  %v914_v11 = vshll.u32 %v417_v60, 16  ;;  %v5378_v15 = vsel %vm14685_vm5, %v11463_v4, %v5377_v6  ;;  %v5379_v16 = vrot.slane %v5377_v6, 4  ;;  %v13749_v60 = vld [vmem:[#allocation2 + $0x2c] sm:$0x1] }
 0x12a   : > { %v4313_v8 = vsel %vm14502_vm2, %v4308_v62, %v4312_v45  ;;  %v894_v9 = vrot.slane %v893_v63, 4  ;;  %v913_v22 = vrot.slane %v911_v10, 4  ;;  %v920_v24 = vshll.u32 %v418_v0, 16  ;;  %v422_v62 = vld [vmem:[#allocation2 + $0x100] sm:$0xf] }
 0x12b   : > { %v11438_v13 = vcombine.low %v4303_v61, %v4313_v8  ;;  %v904_v14 = vrot.slane %v903_v1, 4  ;;  %v916_v23 = vrot.slane %v914_v11, 5  ;;  %v5381_v27 = vsel %vm14685_vm5, %v5379_v16, %v5380_v49  ;;  %v486_v1 = vld [vmem:[#allocation2 + $0x104] sm:$0x1]  ;;  %v5250_v11 = vld [vmem:[#allocation2 + $0x30] sm:$0xe] }
 0x12c   : > { %v899_v21 = vsel %vm14502_vm2, %v894_v9, %v898_v55  ;;  %v924_v28 = vshrl.u32 %v418_v0, 16  ;;  %v930_v29 = vshll.u32 %v484_v7, 16  ;;  %v11512_v33 = vcombine.low %v5378_v15, %v5381_v27  ;;  %v13610_v55 = vld [vmem:[%s14506_s15 + $0x188] sm:$0xff]   ;;  %v13750_v7 = vld [vmem:[%s14506_s15 + $0x180] sm:$0xff]  }
 0x12d   : > { %12634 = vmatmul.mubr.bf16.gmra.mrb[28].mxu0 %v11438_v13  ;;  %v909_v26 = vsel %vm14502_vm2, %v904_v14, %v908_v2  ;;  %v917_v34 = vor.u32 %v916_v23, %v913_v22  ;;  %v922_v35 = vrot.slane %v920_v24, 5  ;;  %v11464_v38 = vrot.slane %v5248_v12, 9  ;;  %v423_v22 = vld [vmem:[#allocation2 + $0x108] sm:$0xf] }
 0x12e   : > { %v11196_v32 = vcombine.low %v899_v21, %v909_v26  ;;  %v926_v36 = vrot.slane %v924_v28, 4  ;;  %v932_v37 = vrot.slane %v930_v29, 5  ;;  %v5388_v39 = vsel %vm14685_vm5, %v14553_v31, %v5387_v19  ;;  %12685 = vmatprep.mubr.bf16.mxu0 %v11512_v33  ;;  %v424_v28 = vld [vmem:[#allocation2 + $0x10c] sm:$0xf] }
 0x12f   : > { %v918_v25 = vrot.slane %v917_v34, 4  ;;  %v935_v49 = vshrl.u32 %v419_v17, 16  ;;  %v938_v40 = vshll.u32 %v419_v17, 16  ;;  %v944_v41 = vshll.u32 %v420_v20, 16  ;;  %v13614_v34 = vld [vmem:[%s14506_s15 + $0x198] sm:$0xff]  }
 0x130   : > { %12317 = vmatprep.mubr.bf16.mxu1 %v11196_v32  ;;  %v927_v42 = vor.u32 %v926_v36, %v922_v35  ;;  %v5385_v43 = vsel %vm14685_vm5, %v11464_v38, %v5384_v18  ;;  %v948_v44 = vshrl.u32 %v420_v20, 16  ;;  %v954_v45 = vshll.u32 %v485_v30, 16  ;;  %v13748_v18 = vld [vmem:[#allocation2 + $0x28] sm:$0xf]  ;;  %v13751_v36 = vld [vmem:[#allocation2 + $0x34] sm:$0xf] }
 0x131   : > { %v923_v46 = vsel %vm14502_vm2, %v918_v25, %v922_v35  ;;  %v11513_v19 = vcombine.low %v5385_v43, %v5388_v39  ;;  %v937_v31 = vrot.slane %v935_v49, 4  ;;  %v940_v47 = vrot.slane %v938_v40, 5  ;;  %v13752_v38 = vld [vmem:[#allocation2 + $0x38] sm:$0x1]  ;;  %v487_v25 = vld [vmem:[#allocation2 + $0x110] sm:$0x1] }
 0x132   : > { %v928_v50 = vrot.slane %v927_v42, 4  ;;  %v946_v51 = vrot.slane %v944_v41, 5  ;;  %v950_v52 = vrot.slane %v948_v44, 4  ;;  %v956_v54 = vrot.slane %v954_v45, 5  ;;  %v5251_v44 = vld [vmem:[#allocation2 + $0x3c] sm:$0xe] }
 0x133   : > { %v941_v53 = vor.u32 %v940_v47, %v937_v31  ;;  %v11465_v56 = vrot.slane %v5249_v59, 9  ;;  %v5391_v58 = vrot.slane %v13748_v18, 5  ;;  %v5394_v61 = vrot.slane %v13749_v60, 5 }
 0x134   : > { %v933_v63 = vsel %vm14502_vm2, %v928_v50, %v932_v37  ;;  %v951_v0 = vor.u32 %v950_v52, %v946_v51  ;;  %v959_v2 = vshrl.u32 %v421_v48, 16  ;;  %v962_v4 = vshll.u32 %v421_v48, 16 }
 0x135   : > { %12686 = vmatmul.mubr.bf16.vlgmr.msra.gmra.mrb[0].mxu0 %v11513_v19  ;;  %v11197_v6 = vcombine.low %v923_v46, %v933_v63  ;;  %v942_v8 = vrot.slane %v941_v53, 4  ;;  %v5392_v9 = vsel %vm14685_vm5, %v11465_v56, %v5391_v58  ;;  %v5393_v10 = vrot.slane %v5391_v58, 4  ;;  %v425_v56 = vld [vmem:[#allocation2 + $0x114] sm:$0xf]  ;;  %v488_v63 = vld [vmem:[#allocation2 + $0x11c] sm:$0x1] }
 0x136   : > { %12750 = vmatpush3.bf16.msra.mxu0 %v13750_v7  ;;  %v952_v12 = vrot.slane %v951_v0, 4  ;;  %v961_v13 = vrot.slane %v959_v2, 4  ;;  %v964_v14 = vrot.slane %v962_v4, 5  ;;  %v968_v15 = vshll.u32 %v422_v62, 16  ;;  %v13618_v0 = vld [vmem:[%s14506_s15 + $0x1a0] sm:$0xff]  }
 0x137   : > { %12751 = vmatprep.subr.bf16.mxu0 %v13610_v55  ;;  %12318 = vmatmul.mubr.bf16.gmra.mrb[32].mxu1 %v11197_v6  ;;  %v947_v16 = vsel %vm14502_vm2, %v942_v8, %v946_v51  ;;  %v5395_v17 = vsel %vm14685_vm5, %v5393_v10, %v5394_v61  ;;  %v972_v20 = vshrl.u32 %v422_v62, 16  ;;  %v978_v21 = vshll.u32 %v486_v1, 16  ;;  %v426_v62 = vld [vmem:[#allocation2 + $0x118] sm:$0xf]  ;;  %v13754_v8 = vld [vmem:[#allocation2 + $0x44] sm:$0x1] }
 0x138   : > { %v957_v23 = vsel %vm14502_vm2, %v952_v12, %v956_v54  ;;  %v11514_v24 = vcombine.low %v5392_v9, %v5395_v17  ;;  %v965_v26 = vor.u32 %v964_v14, %v961_v13  ;;  %v970_v27 = vrot.slane %v968_v15, 5 }
 0x139   : > { %v11198_v29 = vcombine.low %v947_v16, %v957_v23  ;;  %v974_v30 = vrot.slane %v972_v20, 4  ;;  %v980_v32 = vrot.slane %v978_v21, 5  ;;  %v11466_v33 = vrot.slane %v5250_v11, 9  ;;  %v5252_v11 = vld [vmem:[#allocation2 + $0x48] sm:$0xe] }
 0x13a   : > { %12752 = vmatpush3.bf16.msra.mxu0 %v13610_v55  ;;  %12689 = vmatprep.mubr.bf16.mxu0 %v11514_v24  ;;  %v966_v35 = vrot.slane %v965_v26, 4  ;;  %v5398_v37 = vrot.slane %v13751_v36, 5  ;;  %v5401_v39 = vrot.slane %v13752_v38, 5  ;;  %v983_v49 = vshrl.u32 %v423_v22, 16  ;;  %v13753_v55 = vld [vmem:[#allocation2 + $0x40] sm:$0xf] }
 0x13b   : > { %12753 = vmatprep.subr.bf16.mxu0 %v13612_v5  ;;  %12321 = vmatprep.mubr.bf16.mxu1 %v11198_v29  ;;  %v975_v40 = vor.u32 %v974_v30, %v970_v27  ;;  %v986_v41 = vshll.u32 %v423_v22, 16  ;;  %v992_v42 = vshll.u32 %v424_v28, 16  ;;  %v996_v43 = vshrl.u32 %v424_v28, 16  ;;  %v427_v16 = vld [vmem:[#allocation2 + $0x120] sm:$0xf]  ;;  %v13624_v29 = vld [vmem:[%s14506_s15 + $0x1a8] sm:$0xff]  }
 0x13c   : > { %v971_v45 = vsel %vm14502_vm2, %v966_v35, %v970_v27  ;;  %v5399_v59 = vsel %vm14685_vm5, %v11466_v33, %v5398_v37  ;;  %v5400_v46 = vrot.slane %v5398_v37, 4  ;;  %v985_v19 = vrot.slane %v983_v49, 4  ;;  %v428_v23 = vld [vmem:[#allocation2 + $0x124] sm:$0xf]  ;;  %v13756_v37 = vld [vmem:[#allocation2 + $0x50] sm:$0x1] }
 0x13d   : > { %v976_v31 = vrot.slane %v975_v40, 4  ;;  %v988_v47 = vrot.slane %v986_v41, 5  ;;  %v994_v48 = vrot.slane %v992_v42, 5  ;;  %v998_v50 = vrot.slane %v996_v43, 4 }
 0x13e   : > { %12754 = vmatpush3.bf16.msra.mxu0 %v13612_v5  ;;  %v5402_v51 = vsel %vm14685_vm5, %v5400_v46, %v5401_v39  ;;  %v1002_v52 = vshll.u32 %v487_v25, 16  ;;  %v11467_v54 = vrot.slane %v5251_v44, 9  ;;  %v5405_v53 = vrot.slane %v13753_v55, 5  ;;  %v489_v39 = vld [vmem:[#allocation2 + $0x128] sm:$0x1] }
 0x13f   : > { %12755 = vmatprep.subr.bf16.mxu0 %v13614_v34  ;;  %v981_v18 = vsel %vm14502_vm2, %v976_v31, %v980_v32  ;;  %v11515_v58 = vcombine.low %v5399_v59, %v5402_v51  ;;  %v989_v60 = vor.u32 %v988_v47, %v985_v19  ;;  %v999_v61 = vor.u32 %v998_v50, %v994_v48  ;;  %v5253_v44 = vld [vmem:[#allocation2 + $0x54] sm:$0xe] }
 0x140   : > { %v11199_v1 = vcombine.low %v971_v45, %v981_v18  ;;  %v1004_v2 = vrot.slane %v1002_v52, 5  ;;  %v5406_v4 = vsel %vm14685_vm5, %v11467_v54, %v5405_v53  ;;  %v5407_v5 = vrot.slane %v5405_v53, 4  ;;  %v13630_v31 = vld [vmem:[%s14506_s15 + $0x1b0] sm:$0xff]   ;;  %v429_v52 = vld [vmem:[#allocation2 + $0x12c] sm:$0xf] }
 0x141   : > { %12690 = vmatmul.mubr.bf16.gmra.mrb[4].mxu0 %v11515_v58  ;;  %v990_v6 = vrot.slane %v989_v60, 4  ;;  %v1000_v7 = vrot.slane %v999_v61, 4  ;;  %v5408_v9 = vrot.slane %v13754_v8, 5  ;;  %v1007_v10 = vshrl.u32 %v425_v56, 16  ;;  %v430_v18 = vld [vmem:[#allocation2 + $0x130] sm:$0xf] }
 0x142   : > { %12322 = vmatmul.mubr.bf16.gmra.mrb[36].mxu1 %v11199_v1  ;;  %v1010_v12 = vshll.u32 %v425_v56, 16  ;;  %v1016_v13 = vshll.u32 %v426_v62, 16  ;;  %v1020_v14 = vshrl.u32 %v426_v62, 16  ;;  %v1026_v15 = vshll.u32 %v488_v63, 16  ;;  %12756 = vmatpush3.bf16.msra.mxu0 %v13614_v34  ;;  %v13755_v34 = vld [vmem:[#allocation2 + $0x4c] sm:$0xf] }
 0x143   : > { %v995_v17 = vsel %vm14502_vm2, %v990_v6, %v994_v48  ;;  %v1005_v20 = vsel %vm14502_vm2, %v1000_v7, %v1004_v2  ;;  %v5409_v21 = vsel %vm14685_vm5, %v5407_v5, %v5408_v9  ;;  %v1009_v22 = vrot.slane %v1007_v10, 4  ;;  %12757 = vmatprep.subr.bf16.mxu0 %v13618_v0  ;;  %v490_v58 = vld [vmem:[#allocation2 + $0x134] sm:$0x1]  ;;  %v13757_v63 = vld [vmem:[#allocation2 + $0x58] sm:$0xf] }
 0x144   : > { %v11200_v24 = vcombine.low %v995_v17, %v1005_v20  ;;  %v11516_v26 = vcombine.low %v5406_v4, %v5409_v21  ;;  %v1012_v27 = vrot.slane %v1010_v12, 5  ;;  %v1018_v28 = vrot.slane %v1016_v13, 5  ;;  %v13758_v5 = vld [vmem:[#allocation2 + $0x5c] sm:$0x1]  ;;  %v5254_v12 = vld [vmem:[#allocation2 + $0x60] sm:$0xe] }
 0x145   : > { %v1022_v30 = vrot.slane %v1020_v14, 4  ;;  %v1028_v32 = vrot.slane %v1026_v15, 5  ;;  %v11468_v33 = vrot.slane %v5252_v11, 9  ;;  %v5412_v35 = vrot.slane %v13755_v34, 5  ;;  %v13636_v7 = vld [vmem:[%s14506_s15 + $0x1b8] sm:$0xff]  }
 0x146   : > { %12325 = vmatprep.mubr.bf16.mxu1 %v11200_v24  ;;  %12693 = vmatprep.mubr.bf16.mxu0 %v11516_v26  ;;  %v1013_v36 = vor.u32 %v1012_v27, %v1009_v22  ;;  %v5415_v38 = vrot.slane %v13756_v37, 5  ;;  %v1031_v25 = vshrl.u32 %v427_v16, 16  ;;  %v1034_v49 = vshll.u32 %v427_v16, 16  ;;  %v431_v17 = vld [vmem:[#allocation2 + $0x138] sm:$0xf] }
 0x147   : > { %v1023_v40 = vor.u32 %v1022_v30, %v1018_v28  ;;  %v5413_v41 = vsel %vm14685_vm5, %v11468_v33, %v5412_v35  ;;  %v5414_v42 = vrot.slane %v5412_v35, 4  ;;  %v1040_v43 = vshll.u32 %v428_v23, 16  ;;  %12758 = vmatpush3.bf16.msra.mxu0 %v13618_v0 }
 0x148   : > { %v1014_v45 = vrot.slane %v1013_v36, 4  ;;  %v1033_v59 = vrot.slane %v1031_v25, 4  ;;  %v1036_v46 = vrot.slane %v1034_v49, 5  ;;  %v1044_v19 = vshrl.u32 %v428_v23, 16  ;;  %12759 = vmatprep.subr.bf16.mxu0 %v13624_v29  ;;  %v13759_v36 = vld [vmem:[#allocation2 + $0x64] sm:$0xf] }
 0x149   : > { %v1024_v47 = vrot.slane %v1023_v40, 4  ;;  %v5416_v48 = vsel %vm14685_vm5, %v5414_v42, %v5415_v38  ;;  %v1042_v50 = vrot.slane %v1040_v43, 5  ;;  %v1050_v51 = vshll.u32 %v489_v39, 16  ;;  %v13760_v38 = vld [vmem:[#allocation2 + $0x68] sm:$0x1] }
 0x14a   : > { %v1019_v54 = vsel %vm14502_vm2, %v1014_v45, %v1018_v28  ;;  %v11517_v55 = vcombine.low %v5413_v41, %v5416_v48  ;;  %v1037_v53 = vor.u32 %v1036_v46, %v1033_v59  ;;  %v1046_v56 = vrot.slane %v1044_v19, 4  ;;  %v491_v25 = vld [vmem:[#allocation2 + $0x140] sm:$0x1] }
 0x14b   : > { %v1029_v60 = vsel %vm14502_vm2, %v1024_v47, %v1028_v32  ;;  %v1052_v61 = vrot.slane %v1050_v51, 5  ;;  %v11469_v62 = vrot.slane %v5253_v44, 9  ;;  %v5419_v0 = vrot.slane %v13757_v63, 5  ;;  %12760 = vmatpush3.bf16.msra.mxu0 %v13624_v29  ;;  %v432_v29 = vld [vmem:[#allocation2 + $0x13c] sm:$0xf] }
 0x14c   : > { %v11201_v1 = vcombine.low %v1019_v54, %v1029_v60  ;;  %12694 = vmatmul.mubr.bf16.gmra.mrb[8].mxu0 %v11517_v55  ;;  %v1038_v2 = vrot.slane %v1037_v53, 4  ;;  %v1047_v4 = vor.u32 %v1046_v56, %v1042_v50  ;;  %v5422_v6 = vrot.slane %v13758_v5, 5  ;;  %12761 = vmatprep.subr.bf16.mxu0 %v13630_v31  ;;  %v5255_v44 = vld [vmem:[#allocation2 + $0x6c] sm:$0xe]  ;;  %v492_v5 = vld [vmem:[#allocation2 + $0x14c] sm:$0x1] }
 0x14d   : > { %v5420_v8 = vsel %vm14685_vm5, %v11469_v62, %v5419_v0  ;;  %v5421_v9 = vrot.slane %v5419_v0, 4  ;;  %v1055_v10 = vshrl.u32 %v429_v52, 16  ;;  %v1058_v11 = vshll.u32 %v429_v52, 16  ;;  %v433_v52 = vld [vmem:[#allocation2 + $0x144] sm:$0xf] }
 0x14e   : > { %12326 = vmatmul.mubr.bf16.gmra.mrb[40].mxu1 %v11201_v1  ;;  %v1043_v13 = vsel %vm14502_vm2, %v1038_v2, %v1042_v50  ;;  %v1048_v14 = vrot.slane %v1047_v4, 4  ;;  %v1064_v15 = vshll.u32 %v430_v18, 16  ;;  %v1068_v16 = vshrl.u32 %v430_v18, 16  ;;  %v434_v18 = vld [vmem:[#allocation2 + $0x148] sm:$0xf] }
 0x14f   : > { %v5423_v20 = vsel %vm14685_vm5, %v5421_v9, %v5422_v6  ;;  %v1057_v21 = vrot.slane %v1055_v10, 4  ;;  %v1060_v22 = vrot.slane %v1058_v11, 5  ;;  %v1074_v23 = vshll.u32 %v490_v58, 16  ;;  %12762 = vmatpush3.bf16.msra.mxu0 %v13630_v31  ;;  %v13644_v31 = vld [vmem:[%s14506_s15 + $0x1c0] sm:$0xff]   ;;  %v13761_v0 = vld [vmem:[#allocation2 + $0x70] sm:$0xf] }
 0x150   : > { %v1053_v24 = vsel %vm14502_vm2, %v1048_v14, %v1052_v61  ;;  %v11518_v26 = vcombine.low %v5420_v8, %v5423_v20  ;;  %v1066_v27 = vrot.slane %v1064_v15, 5  ;;  %v1070_v28 = vrot.slane %v1068_v16, 4  ;;  %12763 = vmatprep.subr.bf16.mxu0 %v13636_v7  ;;  %v13762_v2 = vld [vmem:[#allocation2 + $0x74] sm:$0x1]  ;;  %v5256_v11 = vld [vmem:[#allocation2 + $0x78] sm:$0xe] }
 0x151   : > { %v11202_v30 = vcombine.low %v1043_v13, %v1053_v24  ;;  %v1061_v32 = vor.u32 %v1060_v22, %v1057_v21  ;;  %v1076_v33 = vrot.slane %v1074_v23, 5  ;;  %v11470_v34 = vrot.slane %v5254_v12, 9  ;;  %v435_v22 = vld [vmem:[#allocation2 + $0x150] sm:$0xf] }
 0x152   : > { %12697 = vmatprep.mubr.bf16.mxu0 %v11518_v26  ;;  %v1071_v35 = vor.u32 %v1070_v28, %v1066_v27  ;;  %v5426_v37 = vrot.slane %v13759_v36, 5  ;;  %v5429_v39 = vrot.slane %v13760_v38, 5  ;;  %v1079_v49 = vshrl.u32 %v431_v17, 16  ;;  %v13764_v38 = vld [vmem:[#allocation2 + $0x80] sm:$0x1] }
 0x153   : > { %12329 = vmatprep.mubr.bf16.mxu1 %v11202_v30  ;;  %v1062_v40 = vrot.slane %v1061_v32, 4  ;;  %v1082_v41 = vshll.u32 %v431_v17, 16  ;;  %v1088_v42 = vshll.u32 %v432_v29, 16  ;;  %v1092_v43 = vshrl.u32 %v432_v29, 16  ;;  %12764 = vmatpush3.bf16.msra.mxu0 %v13636_v7  ;;  %v13763_v32 = vld [vmem:[#allocation2 + $0x7c] sm:$0xf] }
 0x154   : > { %v1072_v45 = vrot.slane %v1071_v35, 4  ;;  %v5427_v59 = vsel %vm14685_vm5, %v11470_v34, %v5426_v37  ;;  %v5428_v46 = vrot.slane %v5426_v37, 4  ;;  %v1081_v19 = vrot.slane %v1079_v49, 4  ;;  %12829 = vmatprep.subr.bf16.mxu0 %v13644_v31  ;;  %v436_v34 = vld [vmem:[#allocation2 + $0x154] sm:$0xf] }
 0x155   : > { %v1067_v47 = vsel %vm14502_vm2, %v1062_v40, %v1066_v27  ;;  %v1084_v48 = vrot.slane %v1082_v41, 5  ;;  %v1090_v50 = vrot.slane %v1088_v42, 5  ;;  %v1094_v51 = vrot.slane %v1092_v43, 4  ;;  %v493_v35 = vld [vmem:[#allocation2 + $0x158] sm:$0x1] }
 0x156   : > { %v1077_v54 = vsel %vm14502_vm2, %v1072_v45, %v1076_v33  ;;  %v5430_v55 = vsel %vm14685_vm5, %v5428_v46, %v5429_v39  ;;  %v1098_v53 = vshll.u32 %v491_v25, 16  ;;  %v11471_v56 = vrot.slane %v5255_v44, 9  ;;  %v5257_v49 = vld [vmem:[#allocation2 + $0x84] sm:$0xe]  ;;  %v437_v44 = vld [vmem:[#allocation2 + $0x15c] sm:$0xf] }
 0x157   : > { %v11203_v58 = vcombine.low %v1067_v47, %v1077_v54  ;;  %v11519_v60 = vcombine.low %v5427_v59, %v5430_v55  ;;  %v1085_v61 = vor.u32 %v1084_v48, %v1081_v19  ;;  %v1095_v62 = vor.u32 %v1094_v51, %v1090_v50  ;;  %v438_v31 = vld [vmem:[#allocation2 + $0x160] sm:$0xf] }
 0x158   : > { %v1100_v63 = vrot.slane %v1098_v53, 5  ;;  %v5433_v1 = vrot.slane %v13761_v0, 5  ;;  %v5436_v4 = vrot.slane %v13762_v2, 5  ;;  %v1103_v6 = vshrl.u32 %v433_v52, 16  ;;  %v13765_v0 = vld [vmem:[#allocation2 + $0x88] sm:$0xf] }
 0x159   : > { %12330 = vmatmul.mubr.bf16.gmra.mrb[44].mxu1 %v11203_v58  ;;  %12698 = vmatmul.mubr.bf16.gmra.mrb[12].mxu0 %v11519_v60  ;;  %v1086_v7 = vrot.slane %v1085_v61, 4  ;;  %v1096_v8 = vrot.slane %v1095_v62, 4  ;;  %v1106_v9 = vshll.u32 %v433_v52, 16  ;;  %v1112_v10 = vshll.u32 %v434_v18, 16  ;;  %v494_v61 = vld [vmem:[#allocation2 + $0x164] sm:$0x1] }
 0x15a   : > { %v5434_v12 = vsel %vm14685_vm5, %v11471_v56, %v5433_v1  ;;  %v5435_v13 = vrot.slane %v5433_v1, 4  ;;  %v1105_v14 = vrot.slane %v1103_v6, 4  ;;  %v1116_v15 = vshrl.u32 %v434_v18, 16  ;;  %v5258_v62 = vld [vmem:[#allocation2 + $0x90] sm:$0xe] }
 0x15b   : > { %v1091_v16 = vsel %vm14502_vm2, %v1086_v7, %v1090_v50  ;;  %v1101_v17 = vsel %vm14502_vm2, %v1096_v8, %v1100_v63  ;;  %v1108_v20 = vrot.slane %v1106_v9, 5  ;;  %v1114_v21 = vrot.slane %v1112_v10, 5  ;;  %v13766_v2 = vld [vmem:[#allocation2 + $0x8c] sm:$0x1]  ;;  %v439_v10 = vld [vmem:[#allocation2 + $0x168] sm:$0xf] }
 0x15c   : > { %v11204_v23 = vcombine.low %v1091_v16, %v1101_v17  ;;  %v5437_v24 = vsel %vm14685_vm5, %v5435_v13, %v5436_v4  ;;  %v1118_v26 = vrot.slane %v1116_v15, 4  ;;  %v1122_v27 = vshll.u32 %v492_v5, 16  ;;  %v440_v15 = vld [vmem:[#allocation2 + $0x16c] sm:$0xf] }
 0x15d   : > { %v11520_v28 = vcombine.low %v5434_v12, %v5437_v24  ;;  %v1109_v29 = vor.u32 %v1108_v20, %v1105_v14  ;;  %v11472_v30 = vrot.slane %v5256_v11, 9  ;;  %v5440_v33 = vrot.slane %v13763_v32, 5  ;;  %v495_v32 = vld [vmem:[#allocation2 + $0x170] sm:$0x1] }
 0x15e   : > { %12333 = vmatprep.mubr.bf16.mxu1 %v11204_v23  ;;  %v1119_v36 = vor.u32 %v1118_v26, %v1114_v21  ;;  %v1124_v37 = vrot.slane %v1122_v27, 5  ;;  %v5443_v39 = vrot.slane %v13764_v38, 5  ;;  %v1127_v25 = vshrl.u32 %v435_v22, 16 }
 0x15f   : > { %12701 = vmatprep.mubr.bf16.mxu0 %v11520_v28  ;;  %v1110_v40 = vrot.slane %v1109_v29, 4  ;;  %v5441_v41 = vsel %vm14685_vm5, %v11472_v30, %v5440_v33  ;;  %v5442_v42 = vrot.slane %v5440_v33, 4  ;;  %v1130_v43 = vshll.u32 %v435_v22, 16 }
 0x160   : > { %v1120_v45 = vrot.slane %v1119_v36, 4  ;;  %v1129_v59 = vrot.slane %v1127_v25, 4  ;;  %v1136_v46 = vshll.u32 %v436_v34, 16  ;;  %v1140_v19 = vshrl.u32 %v436_v34, 16  ;;  %v13767_v34 = vld [vmem:[#allocation2 + $0x94] sm:$0xf] }
 0x161   : > { %v1115_v47 = vsel %vm14502_vm2, %v1110_v40, %v1114_v21  ;;  %v5444_v48 = vsel %vm14685_vm5, %v5442_v42, %v5443_v39  ;;  %v1132_v50 = vrot.slane %v1130_v43, 5  ;;  %v1146_v51 = vshll.u32 %v493_v35, 16  ;;  %v13768_v36 = vld [vmem:[#allocation2 + $0x98] sm:$0x1]  ;;  %v5259_v39 = vld [vmem:[#allocation2 + $0x9c] sm:$0xe] }
 0x162   : > { %v1125_v52 = vsel %vm14502_vm2, %v1120_v45, %v1124_v37  ;;  %v11521_v54 = vcombine.low %v5441_v41, %v5444_v48  ;;  %v1138_v55 = vrot.slane %v1136_v46, 5  ;;  %v1142_v53 = vrot.slane %v1140_v19, 4  ;;  %v441_v42 = vld [vmem:[#allocation2 + $0x174] sm:$0xf]  ;;  %v442_v48 = vld [vmem:[#allocation2 + $0x178] sm:$0xf] }
 0x163   : > { %v11205_v56 = vcombine.low %v1115_v47, %v1125_v52  ;;  %v1133_v18 = vor.u32 %v1132_v50, %v1129_v59  ;;  %v1148_v58 = vrot.slane %v1146_v51, 5  ;;  %v11473_v60 = vrot.slane %v5257_v49, 9 }
 0x164   : > { %12702 = vmatmul.mubr.bf16.gmra.mrb[16].mxu0 %v11521_v54  ;;  %v1143_v63 = vor.u32 %v1142_v53, %v1138_v55  ;;  %v5447_v1 = vrot.slane %v13765_v0, 5  ;;  %v5450_v4 = vrot.slane %v13766_v2, 5  ;;  %v1151_v5 = vshrl.u32 %v437_v44, 16  ;;  %v5260_v2 = vld [vmem:[#allocation2 + $0xa8] sm:$0xe] }
 0x165   : > { %12334 = vmatmul.mubr.bf16.gmra.mrb[48].mxu1 %v11205_v56  ;;  %v1134_v6 = vrot.slane %v1133_v18, 4  ;;  %v1154_v7 = vshll.u32 %v437_v44, 16  ;;  %v1160_v8 = vshll.u32 %v438_v31, 16  ;;  %v1164_v9 = vshrl.u32 %v438_v31, 16 }
 0x166   : > { %v1144_v11 = vrot.slane %v1143_v63, 4  ;;  %v5448_v12 = vsel %vm14685_vm5, %v11473_v60, %v5447_v1  ;;  %v5449_v13 = vrot.slane %v5447_v1, 4  ;;  %v1153_v14 = vrot.slane %v1151_v5, 4  ;;  %v13770_v63 = vld [vmem:[#allocation2 + $0xa4] sm:$0x1] }
 0x167   : > { %v1139_v16 = vsel %vm14502_vm2, %v1134_v6, %v1138_v55  ;;  %v1156_v17 = vrot.slane %v1154_v7, 5  ;;  %v1162_v20 = vrot.slane %v1160_v8, 5  ;;  %v1166_v21 = vrot.slane %v1164_v9, 4  ;;  %v496_v55 = vld [vmem:[#allocation2 + $0x17c] sm:$0x1] }
 0x168   : > { %v1149_v22 = vsel %vm14502_vm2, %v1144_v11, %v1148_v58  ;;  %v5451_v23 = vsel %vm14685_vm5, %v5449_v13, %v5450_v4  ;;  %v1170_v24 = vshll.u32 %v494_v61, 16  ;;  %v11474_v26 = vrot.slane %v5258_v62, 9  ;;  %v13769_v58 = vld [vmem:[#allocation2 + $0xa0] sm:$0xf] }
 0x169   : > { %v11206_v27 = vcombine.low %v1139_v16, %v1149_v22  ;;  %v11522_v28 = vcombine.low %v5448_v12, %v5451_v23  ;;  %v1157_v29 = vor.u32 %v1156_v17, %v1153_v14  ;;  %v1167_v30 = vor.u32 %v1166_v21, %v1162_v20  ;;  %v443_v8 = vld [vmem:[#allocation2 + $0x180] sm:$0xf]  ;;  %v444_v17 = vld [vmem:[#allocation2 + $0x184] sm:$0xf] }
 0x16a   : > { %v1172_v33 = vrot.slane %v1170_v24, 5  ;;  %v5454_v35 = vrot.slane %v13767_v34, 5  ;;  %v5457_v37 = vrot.slane %v13768_v36, 5  ;;  %v1175_v38 = vshrl.u32 %v439_v10, 16 }
 0x16b   : > { %12337 = vmatprep.mubr.bf16.mxu1 %v11206_v27  ;;  %12705 = vmatprep.mubr.bf16.mxu0 %v11522_v28  ;;  %v1158_v25 = vrot.slane %v1157_v29, 4  ;;  %v1168_v49 = vrot.slane %v1167_v30, 4  ;;  %v1178_v40 = vshll.u32 %v439_v10, 16  ;;  %v1184_v41 = vshll.u32 %v440_v15, 16  ;;  %v497_v29 = vld [vmem:[#allocation2 + $0x188] sm:$0x1] }
 0x16c   : > { %v5455_v43 = vsel %vm14685_vm5, %v11474_v26, %v5454_v35  ;;  %v5456_v44 = vrot.slane %v5454_v35, 4  ;;  %v1177_v45 = vrot.slane %v1175_v38, 4  ;;  %v1188_v59 = vshrl.u32 %v440_v15, 16  ;;  %v5261_v30 = vld [vmem:[#allocation2 + $0xb4] sm:$0xe] }
 0x16d   : > { %v1163_v46 = vsel %vm14502_vm2, %v1158_v25, %v1162_v20  ;;  %v1173_v19 = vsel %vm14502_vm2, %v1168_v49, %v1172_v33  ;;  %v1180_v31 = vrot.slane %v1178_v40, 5  ;;  %v1186_v47 = vrot.slane %v1184_v41, 5  ;;  %v13771_v33 = vld [vmem:[#allocation2 + $0xac] sm:$0xf]  ;;  %v13772_v35 = vld [vmem:[#allocation2 + $0xb0] sm:$0x1] }
 0x16e   : > { %v11207_v50 = vcombine.low %v1163_v46, %v1173_v19  ;;  %v5458_v51 = vsel %vm14685_vm5, %v5456_v44, %v5457_v37  ;;  %v1190_v52 = vrot.slane %v1188_v59, 4  ;;  %v1194_v54 = vshll.u32 %v495_v32, 16  ;;  %v445_v40 = vld [vmem:[#allocation2 + $0x18c] sm:$0xf] }
 0x16f   : > { %v11523_v53 = vcombine.low %v5455_v43, %v5458_v51  ;;  %v1181_v56 = vor.u32 %v1180_v31, %v1177_v45  ;;  %v11475_v18 = vrot.slane %v5259_v39, 9  ;;  %v5461_v60 = vrot.slane %v13769_v58, 5  ;;  %v14819_v51 = vld [vmem:[#allocation2 + $0x190] sm:$0xf]  ;;  %v13773_v58 = vld [vmem:[#allocation2 + $0xb8] sm:$0xf] }
 0x170   : > { %12338 = vmatmul.mubr.bf16.gmra.mrb[52].mxu1 %v11207_v50  ;;  %v1191_v61 = vor.u32 %v1190_v52, %v1186_v47  ;;  %v1196_v62 = vrot.slane %v1194_v54, 5  ;;  %v5464_v0 = vrot.slane %v13770_v63, 5  ;;  %v1199_v1 = vshrl.u32 %v441_v42, 16 }
 0x171   : > { %12706 = vmatmul.mubr.bf16.gmra.mrb[20].mxu0 %v11523_v53  ;;  %v1182_v4 = vrot.slane %v1181_v56, 4  ;;  %v5462_v5 = vsel %vm14685_vm5, %v11475_v18, %v5461_v60  ;;  %v5463_v6 = vrot.slane %v5461_v60, 4  ;;  %v1202_v7 = vshll.u32 %v441_v42, 16  ;;  %v498_v56 = vld [vmem:[#allocation2 + $0x194] sm:$0x1] }
 0x172   : > { %v1192_v9 = vrot.slane %v1191_v61, 4  ;;  %v1201_v10 = vrot.slane %v1199_v1, 4  ;;  %v1208_v11 = vshll.u32 %v442_v48, 16  ;;  %v1212_v12 = vshrl.u32 %v442_v48, 16  ;;  %v13774_v61 = vld [vmem:[#allocation2 + $0xbc] sm:$0x1] }
 0x173   : > { %v1187_v13 = vsel %vm14502_vm2, %v1182_v4, %v1186_v47  ;;  %v5465_v14 = vsel %vm14685_vm5, %v5463_v6, %v5464_v0  ;;  %v1204_v15 = vrot.slane %v1202_v7, 5  ;;  %v1218_v16 = vshll.u32 %v496_v55, 16  ;;  %v5262_v0 = vld [vmem:[#allocation2 + $0xc0] sm:$0xe] }
 0x174   : > { %v1197_v20 = vsel %vm14502_vm2, %v1192_v9, %v1196_v62  ;;  %v11524_v21 = vcombine.low %v5462_v5, %v5465_v14  ;;  %v1210_v22 = vrot.slane %v1208_v11, 5  ;;  %v1214_v23 = vrot.slane %v1212_v12, 4  ;;  %v3883_v14 = vld [vmem:[#allocation2 + $0xe8] sm:$0xf] }
 0x175   : > { %v11208_v24 = vcombine.low %v1187_v13, %v1197_v20  ;;  %v1205_v26 = vor.u32 %v1204_v15, %v1201_v10  ;;  %v1220_v27 = vrot.slane %v1218_v16, 5  ;;  %v11476_v28 = vrot.slane %v5260_v2, 9  ;;  %v5263_v15 = vld [vmem:[#allocation2 + $0xe4] sm:$0xe] }
 0x176   : > { %12709 = vmatprep.mubr.bf16.mxu0 %v11524_v21  ;;  %v1215_v32 = vor.u32 %v1214_v23, %v1210_v22  ;;  %v5468_v34 = vrot.slane %v13771_v33, 5  ;;  %v5471_v36 = vrot.slane %v13772_v35, 5  ;;  %v1223_v37 = vshrl.u32 %v443_v8, 16 }
 0x177   : > { %12341 = vmatprep.mubr.bf16.mxu1 %v11208_v24  ;;  %v1206_v38 = vrot.slane %v1205_v26, 4  ;;  %v1226_v39 = vshll.u32 %v443_v8, 16  ;;  %v1232_v25 = vshll.u32 %v444_v17, 16  ;;  %v1236_v49 = vshrl.u32 %v444_v17, 16  ;;  %v13775_v26 = vld [vmem:[#allocation2 + $0xc4] sm:$0xf] }
 0x178   : > { %v1216_v41 = vrot.slane %v1215_v32, 4  ;;  %v5469_v42 = vsel %vm14685_vm5, %v11476_v28, %v5468_v34  ;;  %v5470_v43 = vrot.slane %v5468_v34, 4  ;;  %v1225_v44 = vrot.slane %v1223_v37, 4  ;;  %v3884_v28 = vld [vmem:[#allocation2 + $0xec] sm:$0x1] }
 0x179   : > { %v1211_v45 = vsel %vm14502_vm2, %v1206_v38, %v1210_v22  ;;  %v1228_v59 = vrot.slane %v1226_v39, 5  ;;  %v1234_v46 = vrot.slane %v1232_v25, 5  ;;  %v1238_v19 = vrot.slane %v1236_v49, 4  ;;  %v13776_v32 = vld [vmem:[#allocation2 + $0xc8] sm:$0x1] }
 0x17a   : > { %v1221_v31 = vsel %vm14502_vm2, %v1216_v41, %v1220_v27  ;;  %v5472_v47 = vsel %vm14685_vm5, %v5470_v43, %v5471_v36  ;;  %v1242_v48 = vshll.u32 %v497_v29, 16  ;;  %v11477_v50 = vrot.slane %v5261_v30, 9  ;;  %v14833_v38 = vld [vmem:[#allocation2 + $0xf4] sm:$0xf]  ;;  %v14835_v39 = vld [vmem:[#allocation2 + $0xf8] sm:$0x1] }
 0x17b   : > { %v11209_v52 = vcombine.low %v1211_v45, %v1221_v31  ;;  %v11525_v54 = vcombine.low %v5469_v42, %v5472_v47  ;;  %v1229_v55 = vor.u32 %v1228_v59, %v1225_v44  ;;  %v1239_v53 = vor.u32 %v1238_v19, %v1234_v46  ;;  %v5264_v25 = vld [vmem:[#allocation2 + $0xf0] sm:$0xe]  ;;  %v13777_v44 = vld [vmem:[#allocation2] sm:$0xf]  ;;  %v14841_v45 = vld [vmem:[#allocation2 + $0x4] sm:$0xf] }
 0x17c   : > { %v1244_v18 = vrot.slane %v1242_v48, 5  ;;  %v5475_v60 = vrot.slane %v13773_v58, 5  ;;  %v5478_v62 = vrot.slane %v13774_v61, 5  ;;  %v1247_v63 = vshrl.u32 %v445_v40, 16  ;;  %v5265_v19 = vld [vmem:[#allocation2 + $0xfc] sm:$0xe] }
 0x17d   : > { %12342 = vmatmul.mubr.bf16.gmra.mrb[56].mxu1 %v11209_v52  ;;  %12710 = vmatmul.mubr.bf16.gmra.mrb[24].mxu0 %v11525_v54  ;;  %v1230_v1 = vrot.slane %v1229_v55, 4  ;;  %v1240_v2 = vrot.slane %v1239_v53, 4  ;;  %v1250_v4 = vshll.u32 %v445_v40, 16  ;;  %v1256_v5 = vshll.u32 %v14819_v51, 16  ;;  %v3890_v52 = vld [vmem:[#allocation2 + $0x104] sm:$0x1] }
 0x17e   : > { %v5476_v6 = vsel %vm14685_vm5, %v11477_v50, %v5475_v60  ;;  %v5477_v7 = vrot.slane %v5475_v60, 4  ;;  %v1249_v8 = vrot.slane %v1247_v63, 4  ;;  %v1260_v9 = vshrl.u32 %v14819_v51, 16  ;;  %v3892_v55 = vld [vmem:[#allocation2 + $0x10c] sm:$0xf] }
 0x17f   : > { %v1235_v10 = vsel %vm14502_vm2, %v1230_v1, %v1234_v46  ;;  %v1245_v11 = vsel %vm14502_vm2, %v1240_v2, %v1244_v18  ;;  %v1252_v12 = vrot.slane %v1250_v4, 5  ;;  %v1258_v13 = vrot.slane %v1256_v5, 5  ;;  %v3889_v46 = vld [vmem:[#allocation2 + $0x100] sm:$0xf]  ;;  %v5266_v53 = vld [vmem:[#allocation2 + $0x108] sm:$0xe] }
 0x180   : > { %v11210_v16 = vcombine.low %v1235_v10, %v1245_v11  ;;  %v5479_v17 = vsel %vm14685_vm5, %v5477_v7, %v5478_v62  ;;  %v1262_v20 = vrot.slane %v1260_v9, 4  ;;  %v1266_v21 = vshll.u32 %v498_v56, 16  ;;  %v3893_v62 = vld [vmem:[#allocation2 + $0x110] sm:$0x1]  ;;  %v3895_v63 = vld [vmem:[#allocation2 + $0x118] sm:$0xf] }
 0x181   : > { %v11526_v22 = vcombine.low %v5476_v6, %v5479_v17  ;;  %v1253_v23 = vor.u32 %v1252_v12, %v1249_v8  ;;  %v11478_v24 = vrot.slane %v5262_v0, 9  ;;  %v5482_v27 = vrot.slane %v13775_v26, 5  ;;  %v5267_v5 = vld [vmem:[#allocation2 + $0x114] sm:$0xe]  ;;  %v3896_v8 = vld [vmem:[#allocation2 + $0x11c] sm:$0x1] }
 0x182   : > { %12345 = vmatprep.mubr.bf16.mxu1 %v11210_v16  ;;  %v1263_v29 = vor.u32 %v1262_v20, %v1258_v13  ;;  %v1268_v30 = vrot.slane %v1266_v21, 5  ;;  %v5485_v33 = vrot.slane %v13776_v32, 5  ;;  %v11479_v37 = vrot.slane %v5263_v15, 9  ;;  %v14858_v15 = vld [vmem:[#allocation2 + $0x10] sm:$0xf]  ;;  %v13623_v32 = vld [vmem:[%s14506_s15 + $0x88] sm:$0xff]  }
 0x183   : > { %12713 = vmatprep.mubr.bf16.mxu0 %v11526_v22  ;;  %v1254_v34 = vrot.slane %v1253_v23, 4  ;;  %v5483_v35 = vsel %vm14685_vm5, %v11478_v24, %v5482_v27  ;;  %v5484_v36 = vrot.slane %v5482_v27, 4  ;;  %v5489_v40 = vrot.slane %v3883_v14, 5  ;;  %v13779_v14 = vld [vmem:[#allocation2 + $0xc] sm:$0xf] }
 0x184   : > { %v1264_v49 = vrot.slane %v1263_v29, 4  ;;  %v5492_v41 = vrot.slane %v3884_v28, 5  ;;  %v11220_v59 = vcombine.low %v13777_v44, %v14841_v45  ;;  %v11480_v18 = vrot.slane %v5264_v25, 9  ;;  %v13781_v22 = vld [vmem:[#allocation2 + $0x18] sm:$0xf] }
 0x185   : > { %v1259_v42 = vsel %vm14502_vm2, %v1254_v34, %v1258_v13  ;;  %v5486_v43 = vsel %vm14685_vm5, %v5484_v36, %v5485_v33  ;;  %v5490_v48 = vsel %vm14685_vm5, %v11479_v37, %v5489_v40  ;;  %v5491_v50 = vrot.slane %v5489_v40, 4  ;;  %v3898_v13 = vld [vmem:[#allocation2 + $0x124] sm:$0xf]  ;;  %v14861_v23 = vld [vmem:[#allocation2 + $0x1c] sm:$0xf] }
 0x186   : > { %v1269_v31 = vsel %vm14502_vm2, %v1264_v49, %v1268_v30  ;;  %v11527_v47 = vcombine.low %v5483_v35, %v5486_v43  ;;  %v5496_v58 = vrot.slane %v14833_v38, 5  ;;  %v5499_v60 = vrot.slane %v14835_v39, 5  ;;  %v3899_v33 = vld [vmem:[#allocation2 + $0x128] sm:$0x1]  ;;  %v3901_v34 = vld [vmem:[#allocation2 + $0x130] sm:$0xf] }
 0x187   : > { %v11211_v54 = vcombine.low %v1259_v42, %v1269_v31  ;;  %v5493_v56 = vsel %vm14685_vm5, %v5491_v50, %v5492_v41  ;;  %v11481_v2 = vrot.slane %v5265_v19, 9  ;;  %v5503_v4 = vrot.slane %v3889_v46, 5  ;;  %v5268_v25 = vld [vmem:[#allocation2 + $0x120] sm:$0xe]  ;;  %v5269_v43 = vld [vmem:[#allocation2 + $0x12c] sm:$0xe] }
 0x188   : > { %12714 = vmatmul.mubr.bf16.gmra.mrb[28].mxu0 %v11527_v47  ;;  %v11528_v61 = vcombine.low %v5490_v48, %v5493_v56  ;;  %v5497_v0 = vsel %vm14685_vm5, %v11480_v18, %v5496_v58  ;;  %v5498_v1 = vrot.slane %v5496_v58, 4  ;;  %v5506_v6 = vrot.slane %v3890_v52, 5  ;;  %v13783_v40 = vld [vmem:[%s14506_s15 + $0x80] sm:$0xff]   ;;  %v13629_v46 = vld [vmem:[%s14506_s15 + $0x90] sm:$0xff]   ;;  %v3904_v48 = vld [vmem:[#allocation2 + $0x13c] sm:$0xf] }
 0x189   : > { %12346 = vmatmul.mubr.bf16.gmra.mrb[60].mxu1 %v11211_v54  ;;  %v11482_v7 = vrot.slane %v5266_v53, 9  ;;  %v5504_v10 = vsel %vm14685_vm5, %v11481_v2, %v5503_v4  ;;  %v5505_v11 = vrot.slane %v5503_v4, 4  ;;  %v5510_v12 = vrot.slane %v3892_v55, 5  ;;  %v13784_v50 = vld [vmem:[#allocation2 + $0x24] sm:$0xf] }
 0x18a   : > { %12365 = vmatprep.mubr.bf16.mxu1 %v11220_v59  ;;  %12717 = vmatprep.mubr.bf16.mxu0 %v11528_v61  ;;  %v5500_v9 = vsel %vm14685_vm5, %v5498_v1, %v5499_v60  ;;  %v11221_v16 = vcombine.low %v13779_v14, %v14858_v15  ;;  %v5513_v20 = vrot.slane %v3893_v62, 5  ;;  %v11483_v21 = vrot.slane %v5267_v5, 9  ;;  %v3902_v59 = vld [vmem:[#allocation2 + $0x134] sm:$0x1]  ;;  %v14877_v52 = vld [vmem:[#allocation2 + $0x28] sm:$0xf] }
 0x18b   : > { %v11529_v17 = vcombine.low %v5497_v0, %v5500_v9  ;;  %v11222_v24 = vcombine.low %v13781_v22, %v14861_v23  ;;  %v5507_v26 = vsel %vm14685_vm5, %v5505_v11, %v5506_v6  ;;  %v5512_v27 = vrot.slane %v5510_v12, 4  ;;  %v13786_v18 = vld [vmem:[#allocation2 + $0x30] sm:$0xf]  ;;  %v14880_v58 = vld [vmem:[#allocation2 + $0x34] sm:$0xf]  ;;  %v13635_v0 = vld [vmem:[%s14506_s15 + $0x98] sm:$0xff]  }
 0x18c   : > { %v5517_v28 = vrot.slane %v3895_v63, 5  ;;  %v11530_v29 = vcombine.low %v5504_v10, %v5507_v26  ;;  %v5520_v30 = vrot.slane %v3896_v8, 5  ;;  %v5511_v36 = vsel %vm14685_vm5, %v11482_v7, %v5510_v12  ;;  %v3907_v63 = vld [vmem:[#allocation2 + $0x148] sm:$0xf]  ;;  %v3905_v1 = vld [vmem:[#allocation2 + $0x140] sm:$0x1] }
 0x18d   : > { %v5514_v37 = vsel %vm14685_vm5, %v5512_v27, %v5513_v20  ;;  %v5524_v49 = vrot.slane %v3898_v13, 5  ;;  %v5531_v44 = vrot.slane %v3901_v34, 5  ;;  %v11484_v31 = vrot.slane %v5268_v25, 9  ;;  %v5270_v5 = vld [vmem:[#allocation2 + $0x138] sm:$0xe]  ;;  %v13642_v12 = vld [vmem:[%s14506_s15 + $0xa0] sm:$0xff]  }
 0x18e   : > { %v5519_v35 = vrot.slane %v5517_v28, 4  ;;  %v5518_v41 = vsel %vm14685_vm5, %v11483_v21, %v5517_v28  ;;  %v11531_v19 = vcombine.low %v5511_v36, %v5514_v37  ;;  %v5527_v47 = vrot.slane %v3899_v33, 5  ;;  %v3908_v9 = vld [vmem:[#allocation2 + $0x14c] sm:$0x1]  ;;  %v5271_v10 = vld [vmem:[#allocation2 + $0x144] sm:$0xe] }
 0x18f   : > { %v11223_v54 = vcombine.low %v13784_v50, %v14877_v52  ;;  %v5526_v53 = vrot.slane %v5524_v49, 4  ;;  %v11485_v56 = vrot.slane %v5269_v43, 9  ;;  %v11224_v60 = vcombine.low %v13786_v18, %v14880_v58  ;;  %v13788_v20 = vld [vmem:[#allocation2 + $0x3c] sm:$0xf]  ;;  %v14893_v21 = vld [vmem:[#allocation2 + $0x40] sm:$0xf] }
 0x190   : > { %12718 = vmatmul.mubr.bf16.gmra.mrb[32].mxu0 %v11529_v17  ;;  %v5521_v42 = vsel %vm14685_vm5, %v5519_v35, %v5520_v30  ;;  %v5533_v61 = vrot.slane %v5531_v44, 4  ;;  %v5534_v62 = vrot.slane %v3902_v59, 5  ;;  %v5525_v2 = vsel %vm14685_vm5, %v11484_v31, %v5524_v49  ;;  %v3910_v17 = vld [vmem:[#allocation2 + $0x154] sm:$0xf]  ;;  %v13790_v28 = vld [vmem:[#allocation2 + $0x48] sm:$0xf] }
 0x191   : > { %12366 = vmatmul.mubr.bf16.vlgmr.msra.gmra.mrb[0].mxu1 %v11221_v16  ;;  %12721 = vmatprep.mubr.bf16.mxu0 %v11530_v29  ;;  %v11532_v55 = vcombine.low %v5518_v41, %v5521_v42  ;;  %v5528_v4 = vsel %vm14685_vm5, %v5526_v53, %v5527_v47  ;;  %v5538_v6 = vrot.slane %v3904_v48, 5  ;;  %v5532_v7 = vsel %vm14685_vm5, %v11485_v56, %v5531_v44  ;;  %v14896_v29 = vld [vmem:[#allocation2 + $0x4c] sm:$0xf]  ;;  %v3913_v34 = vld [vmem:[#allocation2 + $0x160] sm:$0xf] }
 0x192   : > { %12430 = vmatpush3.bf16.msra.mxu1 %v13783_v40  ;;  %12369 = vmatprep.mubr.bf16.mxu1 %v11222_v24  ;;  %v5535_v8 = vsel %vm14685_vm5, %v5533_v61, %v5534_v62  ;;  %v5545_v11 = vrot.slane %v3907_v63, 5  ;;  %v11533_v13 = vcombine.low %v5525_v2, %v5528_v4  ;;  %v11486_v14 = vrot.slane %v5270_v5, 9  ;;  %v13652_v35 = vld [vmem:[%s14506_s15 + $0xa8] sm:$0xff]   ;;  %v3911_v25 = vld [vmem:[#allocation2 + $0x158] sm:$0x1] }
 0x193   : > { %12431 = vmatprep.subr.bf16.mxu1 %v13623_v32  ;;  %v5541_v16 = vrot.slane %v3905_v1, 5  ;;  %v11225_v22 = vcombine.low %v13788_v20, %v14893_v21  ;;  %v11534_v24 = vcombine.low %v5532_v7, %v5535_v8  ;;  %v5540_v26 = vrot.slane %v5538_v6, 4  ;;  %v5272_v49 = vld [vmem:[#allocation2 + $0x150] sm:$0xe]  ;;  %v3914_v43 = vld [vmem:[#allocation2 + $0x164] sm:$0x1] }
 0x194   : > { %v11487_v27 = vrot.slane %v5271_v10, 9  ;;  %v11226_v30 = vcombine.low %v13790_v28, %v14896_v29  ;;  %v5548_v33 = vrot.slane %v3908_v9, 5  ;;  %v5539_v36 = vsel %vm14685_vm5, %v11486_v14, %v5538_v6  ;;  %v5273_v44 = vld [vmem:[#allocation2 + $0x15c] sm:$0xe]  ;;  %v3916_v48 = vld [vmem:[#allocation2 + $0x16c] sm:$0xf] }
 0x195   : > { %v5542_v37 = vsel %vm14685_vm5, %v5540_v26, %v5541_v16  ;;  %v5552_v40 = vrot.slane %v3910_v17, 5  ;;  %v5559_v59 = vrot.slane %v3913_v34, 5  ;;  %v11488_v31 = vrot.slane %v5272_v49, 9  ;;  %v13792_v50 = vld [vmem:[#allocation2 + $0x54] sm:$0xf]  ;;  %v13672_v4 = vld [vmem:[%s14506_s15 + $0xb8] sm:$0xff]  }
 0x196   : > { %12432 = vmatpush3.bf16.msra.mxu1 %v13623_v32  ;;  %v5547_v32 = vrot.slane %v5545_v11, 4  ;;  %v5546_v41 = vsel %vm14685_vm5, %v11487_v27, %v5545_v11  ;;  %v5555_v47 = vrot.slane %v3911_v25, 5  ;;  %v11489_v18 = vrot.slane %v5273_v44, 9  ;;  %v13794_v61 = vld [vmem:[#allocation2 + $0x60] sm:$0xf] }
 0x197   : > { %12433 = vmatprep.subr.bf16.mxu1 %v13629_v46  ;;  %v5554_v56 = vrot.slane %v5552_v40, 4  ;;  %v14912_v62 = vld [vmem:[#allocation2 + $0x64] sm:$0xf]  ;;  %v5562_v1 = vrot.slane %v3914_v43, 5  ;;  %v5274_v2 = vld [vmem:[#allocation2 + $0x168] sm:$0xe]  ;;  %v5553_v6 = vsel %vm14685_vm5, %v11488_v31, %v5552_v40 }
 0x198   : > { %12722 = vmatmul.mubr.bf16.gmra.mrb[36].mxu0 %v11531_v19  ;;  %v5549_v42 = vsel %vm14685_vm5, %v5547_v32, %v5548_v33  ;;  %v11535_v19 = vcombine.low %v5539_v36, %v5542_v37  ;;  %v11228_v63 = vcombine.low %v13794_v61, %v14912_v62  ;;  %v3917_v5 = vld [vmem:[#allocation2 + $0x170] sm:$0x1]  ;;  %v5566_v8 = vrot.slane %v3916_v48, 5  ;;  %v3920_v9 = vld [vmem:[#allocation2 + $0x17c] sm:$0x1]  ;;  %v14925_v14 = vld [vmem:[%s14506_s15 + $0xc0] sm:$0xff]  }
 0x199   : > { %12370 = vmatmul.mubr.bf16.gmra.mrb[4].mxu1 %v11223_v54  ;;  %12725 = vmatprep.mubr.bf16.mxu0 %v11532_v55  ;;  %v14909_v54 = vld [vmem:[#allocation2 + $0x58] sm:$0xf]  ;;  %v11536_v53 = vcombine.low %v5546_v41, %v5549_v42  ;;  %v5556_v7 = vsel %vm14685_vm5, %v5554_v56, %v5555_v47  ;;  %v5560_v10 = vsel %vm14685_vm5, %v11489_v18, %v5559_v59  ;;  %v13796_v16 = vld [vmem:[#allocation2 + $0x6c] sm:$0xf]  ;;  %v14927_v17 = vld [vmem:[#allocation2 + $0x70] sm:$0xf] }
 0x19a   : > { %12373 = vmatprep.mubr.bf16.mxu1 %v11224_v60  ;;  %12434 = vmatpush3.bf16.msra.mxu1 %v13629_v46  ;;  %v13662_v46 = vld [vmem:[%s14506_s15 + $0xb0] sm:$0xff]   ;;  %v11227_v55 = vcombine.low %v13792_v50, %v14909_v54  ;;  %v3919_v60 = vld [vmem:[#allocation2 + $0x178] sm:$0xf]  ;;  %v11229_v20 = vcombine.low %v13796_v16, %v14927_v17  ;;  %v3922_v26 = vld [vmem:[#allocation2 + $0x184] sm:$0xf]  ;;  %v5568_v28 = vrot.slane %v5566_v8, 4 }
 0x19b   : > { %12435 = vmatprep.subr.bf16.mxu1 %v13635_v0  ;;  %v13798_v33 = vld [vmem:[#allocation2 + $0x78] sm:$0xf]  ;;  %v14930_v34 = vld [vmem:[#allocation2 + $0x7c] sm:$0xf]  ;;  %v5576_v37 = vrot.slane %v3920_v9, 5  ;;  %v5580_v43 = vrot.slane %v3922_v26, 5 }
 0x19c   : > { %v3925_v25 = vld [vmem:[#allocation2 + $0x190] sm:$0xf]  ;;  %v3923_v41 = vld [vmem:[#allocation2 + $0x188] sm:$0x1]  ;;  %v5276_v42 = vld [vmem:[#allocation2 + $0x180] sm:$0xe] }
 0x19d   : > { %v3926_v31 = vld [vmem:[#allocation2 + $0x194] sm:$0x1]  ;;  %v11492_v48 = vrot.slane %v5276_v42, 9  ;;  %v5583_v50 = vrot.slane %v3923_v41, 5  ;;  %v14942_v56 = vld [vmem:[#allocation2 + $0x88] sm:$0xf] }
 0x19e   : > { %12436 = vmatpush3.bf16.msra.mxu1 %v13635_v0  ;;  %v5561_v0 = vrot.slane %v5559_v59, 4  ;;  %v5582_v61 = vrot.slane %v5580_v43, 4  ;;  %v13640_v41 = vld [vmem:[#allocation2 + $0x18] sm:$0xff]   ;;  %vm10010_vm9 = vsmask.f32 (!%p11755_p1), 4368 }
 0x19f   : > { %12437 = vmatprep.subr.bf16.mxu1 %v13642_v12  ;;  %v13810_v42 = vld [vmem:[#allocation2 + $0xd8] sm:$0xf] }
 0x1a0   : > { %12726 = vmatmul.mubr.bf16.gmra.mrb[40].mxu0 %v11533_v13  ;;  %v5563_v11 = vsel %vm14685_vm5, %v5561_v0, %v5562_v1  ;;  %v5573_v13 = vrot.slane %v3919_v60, 5  ;;  %v13802_v0 = vld [vmem:[#allocation2 + $0x90] sm:$0xf]  ;;  %v14945_v1 = vld [vmem:[#allocation2 + $0x94] sm:$0xf] }
 0x1a1   : > { %12374 = vmatmul.mubr.bf16.gmra.mrb[8].mxu1 %v11225_v22  ;;  %12729 = vmatprep.mubr.bf16.mxu0 %v11534_v24  ;;  %v11537_v22 = vcombine.low %v5553_v6, %v5556_v7  ;;  %v11490_v24 = vrot.slane %v5274_v2, 9  ;;  %v11538_v27 = vcombine.low %v5560_v10, %v5563_v11  ;;  %v11232_v2 = vcombine.low %v13802_v0, %v14945_v1  ;;  %v14981_v0 = vld [vmem:[#allocation2 + $0x100] sm:$0xf] }
 0x1a2   : > { %12377 = vmatprep.mubr.bf16.mxu1 %v11226_v30  ;;  %12438 = vmatpush3.bf16.msra.mxu1 %v13642_v12  ;;  %v5275_v12 = vld [vmem:[#allocation2 + $0x174] sm:$0xe]  ;;  %v5569_v30 = vrot.slane %v3917_v5, 5  ;;  %v5575_v36 = vrot.slane %v5573_v13, 4  ;;  %v5590_v5 = vrot.slane %v3926_v31, 5  ;;  %v5581_v6 = vsel %vm14685_vm5, %v11492_v48, %v5580_v43 }
 0x1a3   : > { %12439 = vmatprep.subr.bf16.mxu1 %v13652_v35  ;;  %v11491_v32 = vrot.slane %v5275_v12, 9  ;;  %v5567_v49 = vsel %vm14685_vm5, %v11490_v24, %v5566_v8  ;;  %v5584_v7 = vsel %vm14685_vm5, %v5582_v61, %v5583_v50  ;;  %v5278_v8 = vld [vmem:[#allocation2 + $0x198] sm:$0xe]  ;;  %v3929_v12 = vld [vmem:[#allocation2 + $0x1a0] sm:$0x1] }
 0x1a4   : > { %v5570_v40 = vsel %vm14685_vm5, %v5568_v28, %v5569_v30  ;;  %v5577_v59 = vsel %vm14685_vm5, %v5575_v36, %v5576_v37  ;;  %v11494_v16 = vrot.slane %v5278_v8, 9  ;;  %v5597_v28 = vrot.slane %v3929_v12, 5  ;;  %v13806_v30 = vld [vmem:[#allocation2 + $0xa8] sm:$0xf]  ;;  %v14969_v43 = vld [vmem:[#allocation2 + $0xdc] sm:$0xf] }
 0x1a5   : > { %v5574_v44 = vsel %vm14685_vm5, %v11491_v32, %v5573_v13  ;;  %v11539_v47 = vcombine.low %v5567_v49, %v5570_v40  ;;  %v11541_v13 = vcombine.low %v5581_v6, %v5584_v7  ;;  %v14959_v32 = vld [vmem:[#allocation2 + $0xac] sm:$0xf]  ;;  %v14966_v49 = vld [vmem:[#allocation2 + $0xb8] sm:$0xf]  ;;  %v14975_v48 = vld [vmem:[#allocation2 + $0xf4] sm:$0xf] }
 0x1a6   : > { %12440 = vmatpush3.bf16.msra.mxu1 %v13652_v35  ;;  %v11230_v35 = vcombine.low %v13798_v33, %v14930_v34  ;;  %v11540_v60 = vcombine.low %v5574_v44, %v5577_v59  ;;  %v11234_v33 = vcombine.low %v13806_v30, %v14959_v32  ;;  %v11236_v44 = vcombine.low %v13810_v42, %v14969_v43  ;;  %v13643_v59 = vld [vmem:[#allocation2 + $0x24] sm:$0xff]   ;;  %v13648_v61 = vld [vmem:[#allocation2 + $0x3c] sm:$0xff]   ;;  %v14984_v6 = vld [vmem:[#allocation2 + $0x10c] sm:$0xf] }
 0x1a7   : > { %12441 = vmatprep.subr.bf16.mxu1 %v13662_v46  ;;  %v13674_v8 = vld [vmem:[%s14506_s15 + $0x1d8] sm:$0xff]   ;;  %v13658_v30 = vld [vmem:[#allocation2 + $0x6c] sm:$0xff]  }
 0x1a8   : > { %12730 = vmatmul.mubr.bf16.gmra.mrb[44].mxu0 %v11535_v19  ;;  %v5587_v19 = vrot.slane %v3925_v25, 5  ;;  %v13808_v25 = vld [vmem:[#allocation2 + $0xb4] sm:$0xf]  ;;  %v14989_v12 = vld [vmem:[#allocation2 + $0x118] sm:$0xf] }
 0x1a9   : > { %12378 = vmatmul.mubr.bf16.gmra.mrb[12].mxu1 %v11227_v55  ;;  %12733 = vmatprep.mubr.bf16.mxu0 %v11536_v53  ;;  %v3928_v55 = vld [vmem:[#allocation2 + $0x19c] sm:$0xf]  ;;  %v13800_v53 = vld [vmem:[#allocation2 + $0x84] sm:$0xf]  ;;  %v11235_v40 = vcombine.low %v13808_v25, %v14966_v49  ;;  %v13827_v25 = vld [vmem:[#allocation2 + $0x138] sm:$0xf] }
 0x1aa   : > { %12381 = vmatprep.mubr.bf16.mxu1 %v11228_v63  ;;  %12442 = vmatpush3.bf16.msra.mxu1 %v13662_v46  ;;  %v5277_v46 = vld [vmem:[#allocation2 + $0x18c] sm:$0xe]  ;;  %v11231_v18 = vcombine.low %v13800_v53, %v14942_v56  ;;  %v5594_v9 = vrot.slane %v3928_v55, 5  ;;  %v13646_v55 = vld [vmem:[#allocation2 + $0x30] sm:$0xff]   ;;  %v13700_v42 = vld [vmem:[%s14506_s15 + $0x1f8] sm:$0xff]  }
 0x1ab   : > { %12443 = vmatprep.subr.bf16.mxu1 %v13672_v4  ;;  %v11493_v63 = vrot.slane %v5277_v46, 9  ;;  %v13812_v46 = vld [vmem:[#allocation2 + $0xe4] sm:$0xf]  ;;  %v13654_v53 = vld [vmem:[%s14506_s15 + $0x1c8] sm:$0xff]  }
 0x1ad   : > { %v5588_v10 = vsel %vm14685_vm5, %v11493_v63, %v5587_v19  ;;  %v13817_v63 = vld [vmem:[#allocation2 + $0xfc] sm:$0xf] }
 0x1ae   : > { %12444 = vmatpush3.bf16.msra.mxu1 %v13672_v4  ;;  %v5589_v4 = vrot.slane %v5587_v19, 4  ;;  %v14972_v19 = vld [vmem:[#allocation2 + $0xe8] sm:$0xf] }
 0x1af   : > { %12509 = vmatprep.subr.bf16.mxu1 %v14925_v14  ;;  %v11237_v31 = vcombine.low %v13812_v46, %v14972_v19  ;;  %v13829_v46 = vld [vmem:[#allocation2 + $0x144] sm:$0xf] }
 0x1b0   : > { %12734 = vmatmul.mubr.bf16.gmra.mrb[48].mxu0 %v11537_v22  ;;  %v5591_v11 = vsel %vm14685_vm5, %v5589_v4, %v5590_v5  ;;  %v14956_v22 = vld [vmem:[#allocation2 + $0xa0] sm:$0xf]  ;;  %v13650_v4 = vld [vmem:[#allocation2 + $0x48] sm:$0xff]  }
 0x1b1   : > { %12382 = vmatmul.mubr.bf16.gmra.mrb[16].mxu1 %v11229_v20  ;;  %12737 = vmatprep.mubr.bf16.mxu0 %v11538_v27  ;;  %v13804_v20 = vld [vmem:[#allocation2 + $0x9c] sm:$0xf]  ;;  %v11542_v26 = vcombine.low %v5588_v10, %v5591_v11  ;;  %v5596_v27 = vrot.slane %v5594_v9, 4  ;;  %v13819_v5 = vld [vmem:[#allocation2 + $0x108] sm:$0xf]  ;;  %v13653_v10 = vld [vmem:[#allocation2 + $0x54] sm:$0xff]  }
 0x1b2   : > { %12385 = vmatprep.mubr.bf16.mxu1 %v11230_v35  ;;  %v11233_v24 = vcombine.low %v13804_v20, %v14956_v22  ;;  %v5595_v35 = vsel %vm14685_vm5, %v11494_v16, %v5594_v9  ;;  %v11240_v7 = vcombine.low %v13819_v5, %v14984_v6  ;;  %v13682_v9 = vld [vmem:[%s14506_s15 + $0x1e0] sm:$0xff]   ;;  %v13821_v11 = vld [vmem:[#allocation2 + $0x114] sm:$0xf]  ;;  %v2392_v5 = vrot.slane %v14858_v15, 5 }
 0x1b3   : > { %v5598_v36 = vsel %vm14685_vm5, %v5596_v27, %v5597_v28  ;;  %v13656_v16 = vld [vmem:[#allocation2 + $0x60] sm:$0xff]   ;;  %v13688_v27 = vld [vmem:[%s14506_s15 + $0x1e8] sm:$0xff]   ;;  %v13694_v28 = vld [vmem:[%s14506_s15 + $0x1f0] sm:$0xff]  }
 0x1b4   : > { %v11543_v37 = vcombine.low %v5595_v35, %v5598_v36  ;;  %v13823_v20 = vld [vmem:[#allocation2 + $0x120] sm:$0xf]  ;;  %v14997_v35 = vld [vmem:[#allocation2 + $0x130] sm:$0xf]  ;;  %v2394_v15 = vrot.slane %v2392_v5, 4 }
 0x1b5   : > { %17608 = vst [vmem:[#allocation20_spill] sm:$0xff] %v14997_v35 }
 0x1b8   : > { %12738 = vmatmul.mubr.bf16.gmra.mrb[52].mxu0 %v11539_v47  ;;  %v13814_v47 = vld [vmem:[#allocation2 + $0xf0] sm:$0xf] }
 0x1b9   : > { %12386 = vmatmul.mubr.bf16.gmra.mrb[20].mxu1 %v11231_v18  ;;  %12741 = vmatprep.mubr.bf16.mxu0 %v11540_v60  ;;  %v11238_v50 = vcombine.low %v13814_v47, %v14975_v48  ;;  %v13816_v18 = vld [vmem:[%s14506_s15 + $0x1c0] sm:$0xff]   ;;  %v13664_v60 = vld [vmem:[%s14506_s15 + $0x1d0] sm:$0xff]  }
 0x1ba   : > { %12389 = vmatprep.mubr.bf16.mxu1 %v11232_v2  ;;  %v11239_v2 = vcombine.low %v13817_v63, %v14981_v0  ;;  %v2284_v63 = vld [vmem:[#allocation2] sm:$0xe] }
 0x1c0   : > { %12742 = vmatmul.mubr.bf16.gmra.mrb[56].mxu0 %v11541_v13  ;;  %v11241_v13 = vcombine.low %v13821_v11, %v14989_v12 }
 0x1c1   : > { %12390 = vmatmul.mubr.bf16.gmra.mrb[24].mxu1 %v11233_v24  ;;  %12745 = vmatprep.mubr.bf16.mxu0 %v11542_v26  ;;  %v14992_v24 = vld [vmem:[#allocation2 + $0x124] sm:$0xf] }
 0x1c2   : > { %12393 = vmatprep.mubr.bf16.mxu1 %v11234_v33  ;;  %17607 = vst [vmem:[#allocation19_spill] sm:$0xff] %v14992_v24  ;;  %v11242_v26 = vcombine.low %v13823_v20, %v14992_v24  ;;  %v13825_v33 = vld [vmem:[#allocation2 + $0x12c] sm:$0xf]  ;;  %v13668_v20 = vld [vmem:[#allocation2 + $0x9c] sm:$0xff]  }
 0x1c3   : > { %v11243_v36 = vcombine.low %v13825_v33, %v14997_v35  ;;  %v13835_v33 = vld [vmem:[#allocation2 + $0x20] sm:$0x1] }
 0x1c8   : > { %12746 = vmatmul.mubr.bf16.gmra.mrb[60].mxu0 %v11543_v37  ;;  %v13660_v37 = vld [vmem:[#allocation2 + $0x78] sm:$0xff]  }
 0x1c9   : > { %12394 = vmatmul.mubr.bf16.gmra.mrb[28].mxu1 %v11235_v40  ;;  %12765 = vmatprep.mubr.bf16.mxu0 %v13640_v41  ;;  %v15000_v40 = vld [vmem:[#allocation2 + $0x13c] sm:$0xf] }
 0x1ca   : > { %12397 = vmatprep.mubr.bf16.mxu1 %v11236_v44  ;;  %17609 = vst [vmem:[#allocation21_spill] sm:$0xff] %v15000_v40  ;;  %v11244_v41 = vcombine.low %v13827_v25, %v15000_v40  ;;  %v13704_v44 = vld [vmem:[%s14506_s15 + $0x200] sm:$0xff]   ;;  %v13836_v25 = vld [vmem:[#allocation2 + $0x15c] sm:$0xf] }
 0x1cb   : > { %v2295_v40 = vld [vmem:[#allocation2 + $0x84] sm:$0xe] }
 0x1d0   : > { %12766 = vmatmul.mubr.bf16.vlgmr.msra.gmra.mrb[0].mxu0 %v13643_v59  ;;  %v13663_v59 = vld [vmem:[#allocation2 + $0x84] sm:$0xff]  }
 0x1d1   : > { %12398 = vmatmul.mubr.bf16.gmra.mrb[32].mxu1 %v11237_v31  ;;  %12830 = vmatpush3.bf16.msra.mxu0 %v13816_v18  ;;  %v13830_v31 = vld [vmem:[#allocation2 + $0x148] sm:$0xf]  ;;  %v13831_v18 = vld [vmem:[#allocation2 + $0x150] sm:$0xf] }
 0x1d2   : > { %12401 = vmatprep.mubr.bf16.mxu1 %v11238_v50  ;;  %12769 = vmatprep.mubr.bf16.mxu0 %v13646_v55  ;;  %v11245_v47 = vcombine.low %v13829_v46, %v13830_v31  ;;  %v13666_v50 = vld [vmem:[#allocation2 + $0x90] sm:$0xff]   ;;  %v4348_v55 = vshll.u32 %v14833_v38, 16  ;;  %v13838_v31 = vld [vmem:[#allocation2 + $0x168] sm:$0xf] }
 0x1d3   : > { %12831 = vmatprep.subr.bf16.mxu0 %v13654_v53  ;;  %v13848_v46 = vld [vmem:[#allocation2 + $0x50] sm:$0x1] }
 0x1d5   : > { %12832 = vmatpush3.bf16.msra.mxu0 %v13654_v53  ;;  %v4352_v53 = vshrl.u32 %v14833_v38, 16  ;;  %v15010_v38 = vrot.slane %v4348_v55, 5 }
 0x1d6   : > { %12833 = vmatprep.subr.bf16.mxu0 %v13664_v60 }
 0x1d7   : > { %17610 = vst [vmem:[#allocation22_spill] sm:$0xff] %v15010_v38  ;;  %v15012_v11 = vrot.slane %v4352_v53, 4  ;;  %v2288_v53 = vld [vmem:[#allocation2 + $0x30] sm:$0xe] }
 0x1d8   : > { %12770 = vmatmul.mubr.bf16.gmra.mrb[4].mxu0 %v13648_v61 }
 0x1d9   : > { %12402 = vmatmul.mubr.bf16.gmra.mrb[36].mxu1 %v11239_v2  ;;  %12773 = vmatprep.mubr.bf16.mxu0 %v13650_v4  ;;  %v2385_v2 = vrot.slane %v14841_v45, 5  ;;  %v2285_v4 = vld [vmem:[#allocation2 + $0xc] sm:$0xe]  ;;  %17611 = vst [vmem:[#allocation23_spill] sm:$0xff] %v15012_v11  ;;  %v13851_v11 = vld [vmem:[#allocation2 + $0x74] sm:$0x1] }
 0x1da   : > { %12405 = vmatprep.mubr.bf16.mxu1 %v11240_v7  ;;  %12834 = vmatpush3.bf16.msra.mxu0 %v13664_v60  ;;  %v13832_v60 = vld [vmem:[#allocation2 + $0x154] sm:$0xf]  ;;  %v2286_v7 = vld [vmem:[#allocation2 + $0x18] sm:$0xe] }
 0x1db   : > { %12835 = vmatprep.subr.bf16.mxu0 %v13674_v8  ;;  %v11246_v61 = vcombine.low %v13831_v18, %v13832_v60 }
 0x1de   : > { %12836 = vmatpush3.bf16.msra.mxu0 %v13674_v8  ;;  %v2399_v8 = vrot.slane %v14861_v23, 5  ;;  %v2402_v23 = vrot.slane %v13835_v33, 5  ;;  %v2413_v33 = vrot.slane %v14880_v58, 5 }
 0x1df   : > { %12837 = vmatprep.subr.bf16.mxu0 %v13682_v9 }
 0x1e0   : > { %12774 = vmatmul.mubr.bf16.gmra.mrb[8].mxu0 %v13653_v10 }
 0x1e1   : > { %12406 = vmatmul.mubr.bf16.gmra.mrb[40].mxu1 %v11241_v13  ;;  %12777 = vmatprep.mubr.bf16.mxu0 %v13656_v16  ;;  %v11260_v13 = vrot.slane %v2284_v63, 9  ;;  %v13834_v16 = vld [vmem:[#allocation2 + $0x14] sm:$0x1] }
 0x1e2   : > { %12409 = vmatprep.mubr.bf16.mxu1 %v11242_v26  ;;  %12838 = vmatpush3.bf16.msra.mxu0 %v13682_v9  ;;  %v13833_v9 = vld [vmem:[#allocation2 + $0x8] sm:$0x1]  ;;  %v2395_v45 = vrot.slane %v13834_v16, 5  ;;  %v2387_v26 = vrot.slane %v2385_v2, 4  ;;  %v13844_v16 = vld [vmem:[#allocation2 + $0x184] sm:$0xf] }
 0x1e3   : > { %12839 = vmatprep.subr.bf16.mxu0 %v13688_v27  ;;  %v2388_v10 = vrot.slane %v13833_v9, 5  ;;  %v15020_v55 = vsel %vm14685_vm5, %v11260_v13, %v2385_v2 }
 0x1e4   : > { %v15036_v63 = vsel %vm14685_vm5, %v2394_v15, %v2395_v45  ;;  %v2290_v15 = vld [vmem:[#allocation2 + $0x48] sm:$0xe] }
 0x1e6   : > { %12840 = vmatpush3.bf16.msra.mxu0 %v13688_v27  ;;  %v11261_v27 = vrot.slane %v2285_v4, 9 }
 0x1e7   : > { %12841 = vmatprep.subr.bf16.mxu0 %v13694_v28 }
 0x1e8   : > { %12778 = vmatmul.mubr.bf16.gmra.mrb[12].mxu0 %v13658_v30  ;;  %v2401_v30 = vrot.slane %v2399_v8, 4  ;;  %v15028_v18 = vsel %vm14685_vm5, %v11261_v27, %v2392_v5  ;;  %v13841_v5 = vld [vmem:[#allocation2 + $0x174] sm:$0xf]  ;;  %v11264_v27 = vrot.slane %v2288_v53, 9  ;;  %v2292_v53 = vld [vmem:[#allocation2 + $0x60] sm:$0xe] }
 0x1e9   : > { %12410 = vmatmul.mubr.bf16.gmra.mrb[44].mxu1 %v11243_v36  ;;  %12781 = vmatprep.mubr.bf16.mxu0 %v13660_v37  ;;  %v2287_v36 = vld [vmem:[#allocation2 + $0x24] sm:$0xe]  ;;  %v2406_v37 = vrot.slane %v14877_v52, 5  ;;  %v15024_v52 = vsel %vm14685_vm5, %v2387_v26, %v2388_v10  ;;  %v13842_v10 = vld [vmem:[#allocation2 + $0x178] sm:$0xf]  ;;  %v11268_v45 = vrot.slane %v2292_v53, 9 }
 0x1ea   : > { %12413 = vmatprep.mubr.bf16.mxu1 %v11244_v41  ;;  %12842 = vmatpush3.bf16.msra.mxu0 %v13694_v28  ;;  %v11262_v28 = vrot.slane %v2286_v7, 9  ;;  %v13837_v41 = vld [vmem:[#allocation2 + $0x160] sm:$0xf]  ;;  %v15040_v2 = vsel %vm14685_vm5, %v2401_v30, %v2402_v23  ;;  %v13840_v7 = vld [vmem:[#allocation2 + $0x2c] sm:$0x1]  ;;  %v11249_v13 = vcombine.low %v13841_v5, %v13842_v10  ;;  %v2420_v23 = vrot.slane %v14893_v21, 5 }
 0x1eb   : > { %12843 = vmatprep.subr.bf16.mxu0 %v13700_v42  ;;  %v2408_v4 = vrot.slane %v2406_v37, 4  ;;  %v2409_v9 = vrot.slane %v13840_v7, 5  ;;  %v13846_v21 = vld [vmem:[#allocation2 + $0x38] sm:$0x1]  ;;  %v2441_v7 = vrot.slane %v14912_v62, 5  ;;  %v13676_v5 = vld [vmem:[#allocation2 + $0xc0] sm:$0xff]   ;;  %v15067_v10 = vsel %vm14685_vm5, %v11264_v27, %v2413_v33 }
 0x1ec   : > { %v15032_v60 = vsel %vm14685_vm5, %v11262_v28, %v2399_v8  ;;  %v13843_v8 = vld [vmem:[#allocation2 + $0x180] sm:$0xf]  ;;  %v2289_v28 = vld [vmem:[#allocation2 + $0x3c] sm:$0xe]  ;;  %v13849_v62 = vld [vmem:[#allocation2 + $0x5c] sm:$0x1] }
 0x1ed   : > { %v11250_v26 = vcombine.low %v13843_v8, %v13844_v16  ;;  %v15062_v58 = vsel %vm14685_vm5, %v2408_v4, %v2409_v9  ;;  %v11266_v8 = vrot.slane %v2290_v15, 9  ;;  %v2448_v16 = vrot.slane %v14927_v17, 5 }
 0x1ee   : > { %12844 = vmatpush3.bf16.msra.mxu0 %v13700_v42  ;;  %v11247_v42 = vcombine.low %v13836_v25, %v13837_v41  ;;  %v2291_v25 = vld [vmem:[#allocation2 + $0x54] sm:$0xe]  ;;  %v2422_v4 = vrot.slane %v2420_v23, 4  ;;  %v2437_v30 = vrot.slane %v13849_v62, 5  ;;  %v2443_v15 = vrot.slane %v2441_v7, 4 }
 0x1ef   : > { %12909 = vmatprep.subr.bf16.mxu0 %v13704_v44  ;;  %v13670_v44 = vld [vmem:[#allocation2 + $0xa8] sm:$0xff]   ;;  %v2462_v62 = vrot.slane %v14942_v56, 5  ;;  %v11271_v53 = vrot.slane %v2295_v40, 9  ;;  %v2476_v40 = vrot.slane %v14956_v22, 5  ;;  %v17614_v22 = vcombine.low %v15020_v55, %v15024_v52  ;;  %v13856_v52 = vld [vmem:[#allocation2 + $0xb0] sm:$0x1] }
 0x1f0   : > { %12782 = vmatmul.mubr.bf16.gmra.mrb[16].mxu0 %v13663_v59  ;;  %v2415_v59 = vrot.slane %v2413_v33, 4  ;;  %v2450_v33 = vrot.slane %v2448_v16, 4 }
 0x1f1   : > { %12414 = vmatmul.mubr.bf16.gmra.mrb[48].mxu1 %v11245_v47  ;;  %12785 = vmatprep.mubr.bf16.mxu0 %v13666_v50  ;;  %v13839_v47 = vld [vmem:[#allocation2 + $0x16c] sm:$0xf] }
 0x1f2   : > { %12417 = vmatprep.mubr.bf16.mxu1 %v11246_v61  ;;  %v11248_v50 = vcombine.low %v13838_v31, %v13839_v47  ;;  %v11263_v61 = vrot.slane %v2287_v36, 9  ;;  %v2427_v36 = vrot.slane %v14896_v29, 5  ;;  %v2434_v31 = vrot.slane %v14909_v54, 5  ;;  %v13673_v47 = vld [vmem:[#allocation2 + $0xb4] sm:$0xff]   ;;  %v2293_v54 = vld [vmem:[#allocation2 + $0x6c] sm:$0xe] }
 0x1f3   : > { %v2416_v29 = vrot.slane %v13846_v21, 5  ;;  %v2430_v21 = vrot.slane %v13848_v46, 5  ;;  %v11269_v17 = vrot.slane %v2293_v54, 9  ;;  %v2451_v46 = vrot.slane %v13851_v11, 5  ;;  %v2297_v54 = vld [vmem:[#allocation2 + $0x9c] sm:$0xe] }
 0x1f4   : > { %v2429_v9 = vrot.slane %v2427_v36, 4  ;;  %v2436_v41 = vrot.slane %v2434_v31, 4 }
 0x1f6   : > { %v15090_v11 = vsel %vm14685_vm5, %v2429_v9, %v2430_v21  ;;  %v15098_v56 = vsel %vm14685_vm5, %v2436_v41, %v2437_v30  ;;  %v13679_v30 = vld [vmem:[#allocation2 + $0xf0] sm:$0xff]   ;;  %v15114_v41 = vsel %vm14685_vm5, %v2450_v33, %v2451_v46  ;;  %v6826_v9 = vld [vmem:[#allocation2 + $0x18] sm:$0xf]  ;;  %v6827_v21 = vld [vmem:[#allocation2 + $0x1c] sm:$0xf]  ;;  %v2483_v46 = vrot.slane %v14959_v32, 5 }
 0x1f7   : > { %17612 = vst [vmem:[#allocation24_spill] sm:$0xff] %v15114_v41  ;;  %v11273_v32 = vrot.slane %v2297_v54, 9  ;;  %v2486_v54 = vrot.slane %v13856_v52, 5  ;;  %v13686_v41 = vld [vmem:[%s14506_s15 + $0xc8] sm:$0xff]  }
 0x1f8   : > { %12786 = vmatmul.mubr.bf16.gmra.mrb[20].mxu0 %v13668_v20  ;;  %v15042_v20 = vld [vmem:[#allocation2 + $0x18c] sm:$0xf]  ;;  %v2485_v55 = vrot.slane %v2483_v46, 4 }
 0x1f9   : > { %12418 = vmatmul.mubr.bf16.gmra.mrb[52].mxu1 %v11247_v42  ;;  %12789 = vmatprep.mubr.bf16.mxu0 %v13670_v44  ;;  %v15057_v44 = vsel %vm14685_vm5, %v11263_v61, %v2406_v37  ;;  %v13847_v37 = vld [vmem:[#allocation2 + $0x44] sm:$0x1]  ;;  %v11267_v42 = vrot.slane %v2291_v25, 9  ;;  %v2455_v25 = vrot.slane %v14930_v34, 5 }
 0x1fa   : > { %12421 = vmatprep.mubr.bf16.mxu1 %v11248_v50  ;;  %v11265_v50 = vrot.slane %v2289_v28, 9  ;;  %v2423_v61 = vrot.slane %v13847_v37, 5  ;;  %v2294_v28 = vld [vmem:[#allocation2 + $0x78] sm:$0xe]  ;;  %v13850_v37 = vld [vmem:[#allocation2 + $0x68] sm:$0x1] }
 0x1fb   : > { %v2444_v38 = vrot.slane %v13850_v37, 5  ;;  %v15094_v34 = vsel %vm14685_vm5, %v11267_v42, %v2434_v31  ;;  %v13852_v42 = vld [vmem:[#allocation2 + $0x80] sm:$0x1]  ;;  %v6923_v37 = vshrl.u32 %v6826_v9, 16 }
 0x1fc   : > { %v15072_v27 = vsel %vm14685_vm5, %v11265_v50, %v2420_v23  ;;  %v15082_v23 = vsel %vm14685_vm5, %v2422_v4, %v2423_v61  ;;  %v15110_v50 = vsel %vm14685_vm5, %v11269_v17, %v2448_v16  ;;  %v2458_v31 = vrot.slane %v13852_v42, 5  ;;  %v13853_v61 = vld [vmem:[#allocation2 + $0x8c] sm:$0x1] }
 0x1fd   : > { %v2469_v4 = vrot.slane %v14945_v1, 5  ;;  %v17613_v42 = vcombine.low %v15042_v20, %v14819_v51  ;;  %v6926_v1 = vshll.u32 %v6826_v9, 16  ;;  %v6932_v51 = vshll.u32 %v6827_v21, 16 }
 0x1fe   : > { %v6936_v20 = vshrl.u32 %v6827_v21, 16  ;;  %v13683_v21 = vld [vmem:[#allocation2 + $0x108] sm:$0xff]   ;;  %v6925_v16 = vrot.slane %v6923_v37, 4  ;;  %v15173_v37 = vsel %vm14685_vm5, %v11273_v32, %v2476_v40 }
 0x1ff   : > { %v2471_v9 = vrot.slane %v2469_v4, 4 }
 0x200   : > { %12790 = vmatmul.mubr.bf16.gmra.mrb[24].mxu0 %v13673_v47  ;;  %v15078_v47 = vsel %vm14685_vm5, %v2415_v59, %v2416_v29  ;;  %v15102_v59 = vsel %vm14685_vm5, %v11268_v45, %v2441_v7  ;;  %v13678_v29 = vld [vmem:[#allocation2 + $0xcc] sm:$0xff]   ;;  %v2457_v45 = vrot.slane %v2455_v25, 4  ;;  %v2464_v7 = vrot.slane %v2462_v62, 4 }
 0x201   : > { %12422 = vmatmul.mubr.bf16.gmra.mrb[56].mxu1 %v11249_v13  ;;  %12793 = vmatprep.mubr.bf16.mxu0 %v13676_v5  ;;  %v15086_v13 = vsel %vm14685_vm5, %v11266_v8, %v2427_v36  ;;  %v15106_v36 = vsel %vm14685_vm5, %v2443_v15, %v2444_v38  ;;  %v2296_v5 = vld [vmem:[#allocation2 + $0x90] sm:$0xe]  ;;  %v2465_v8 = vrot.slane %v13853_v61, 5  ;;  %v13855_v15 = vld [vmem:[#allocation2 + $0xa4] sm:$0x1]  ;;  %v6928_v38 = vrot.slane %v6926_v1, 5 }
 0x202   : > { %12425 = vmatprep.mubr.bf16.mxu1 %v11250_v26  ;;  %v11270_v26 = vrot.slane %v2294_v28, 9  ;;  %v11272_v33 = vrot.slane %v2296_v5, 9  ;;  %v15142_v61 = vsel %vm14685_vm5, %v2457_v45, %v2458_v31  ;;  %v13681_v5 = vld [vmem:[#allocation2 + $0xfc] sm:$0xff]   ;;  %v2479_v28 = vrot.slane %v13855_v15, 5 }
 0x203   : > { %v15149_v31 = vsel %vm14685_vm5, %v11271_v53, %v2462_v62  ;;  %v15153_v45 = vsel %vm14685_vm5, %v2464_v7, %v2465_v8  ;;  %v2490_v15 = vrot.slane %v14966_v49, 5  ;;  %v6828_v8 = vld [vmem:[#allocation2 + $0x20] sm:$0x1]  ;;  %v6938_v24 = vrot.slane %v6936_v20, 4 }
 0x204   : > { %v15130_v17 = vsel %vm14685_vm5, %v11270_v26, %v2455_v25  ;;  %v13854_v25 = vld [vmem:[#allocation2 + $0x98] sm:$0x1]  ;;  %v15165_v52 = vsel %vm14685_vm5, %v11272_v33, %v2469_v4  ;;  %v13857_v33 = vld [vmem:[#allocation2 + $0xbc] sm:$0x1]  ;;  %v6929_v32 = vor.u32 %v6928_v38, %v6925_v16  ;;  %v13859_v38 = vld [vmem:[#allocation2 + $0xec] sm:$0x1] }
 0x205   : > { %v2472_v26 = vrot.slane %v13854_v25, 5  ;;  %v2492_v4 = vrot.slane %v2490_v15, 4  ;;  %v2507_v7 = vrot.slane %v13859_v38, 5  ;;  %v17621_v38 = vcombine.low %v15057_v44, %v15062_v58  ;;  %v13687_v44 = vld [vmem:[#allocation2 + $0x12c] sm:$0xff]  }
 0x207   : > { %v15169_v49 = vsel %vm14685_vm5, %v2471_v9, %v2472_v26  ;;  %v6830_v26 = vld [vmem:[#allocation2 + $0x28] sm:$0xf]  ;;  %v17617_v9 = vcombine.low %v15028_v18, %v15036_v63  ;;  %v13692_v18 = vld [vmem:[%s14506_s15 + $0xd0] sm:$0xff]  }
 0x208   : > { %12794 = vmatmul.mubr.bf16.gmra.mrb[28].mxu0 %v13678_v29  ;;  %v2298_v29 = vld [vmem:[#allocation2 + $0xa8] sm:$0xe]  ;;  %v6960_v16 = vshrl.u32 %v6830_v26, 16 }
 0x209   : > { %12426 = vmatmul.mubr.bf16.gmra.mrb[60].mxu1 %v17613_v42  ;;  %12797 = vmatprep.mubr.bf16.mxu0 %v13679_v30  ;;  %v6829_v30 = vld [vmem:[#allocation2 + $0x24] sm:$0xf]  ;;  %v2478_v42 = vrot.slane %v2476_v40, 4  ;;  %v11274_v25 = vrot.slane %v2298_v29, 9  ;;  %v15160_v29 = vrot.slane %v6932_v51, 5  ;;  %v15188_v40 = vsel %vm14685_vm5, %v2485_v55, %v2486_v54 }
 0x20a   : > { %12445 = vmatprep.mubr.bf16.mxu1 %v17614_v22  ;;  %v2299_v22 = vld [vmem:[#allocation2 + $0xb4] sm:$0xe]  ;;  %v6947_v35 = vshrl.u32 %v6829_v30, 16  ;;  %v6950_v62 = vshll.u32 %v6829_v30, 16  ;;  %v2493_v30 = vrot.slane %v13857_v33, 5  ;;  %17618 = vst [vmem:[#allocation27_spill] sm:$0xff] %v15188_v40 }
 0x20b   : > { %v11275_v1 = vrot.slane %v2299_v22, 9  ;;  %v15177_v51 = vsel %vm14685_vm5, %v2478_v42, %v2479_v28  ;;  %v15181_v20 = vsel %vm14685_vm5, %v11274_v25, %v2483_v46  ;;  %v2300_v28 = vld [vmem:[#allocation2 + $0xd8] sm:$0xe]  ;;  %v6942_v46 = vshll.u32 %v6828_v8, 16  ;;  %v2301_v42 = vld [vmem:[#allocation2 + $0xe4] sm:$0xe] }
 0x20c   : > { %17615 = vst [vmem:[#allocation25_spill] sm:$0xff] %v15177_v51  ;;  %17616 = vst [vmem:[#allocation26_spill] sm:$0xff] %v15181_v20  ;;  %v17619_v25 = vcombine.low %v15032_v60, %v15040_v2  ;;  %v13684_v22 = vld [vmem:[#allocation2 + $0x114] sm:$0xff]   ;;  %v6939_v63 = vor.u32 %v6938_v24, %v15160_v29  ;;  %v6949_v55 = vrot.slane %v6947_v35, 4  ;;  %v6952_v54 = vrot.slane %v6950_v62, 5  ;;  %v13685_v33 = vld [vmem:[#allocation2 + $0x120] sm:$0xff]  }
 0x20d   : > { %v15206_v24 = vsel %vm14685_vm5, %v11275_v1, %v2490_v15  ;;  %v13858_v35 = vld [vmem:[#allocation2 + $0xe0] sm:$0x1]  ;;  %v6831_v62 = vld [vmem:[#allocation2 + $0x2c] sm:$0x1]  ;;  %v6832_v8 = vld [vmem:[#allocation2 + $0x30] sm:$0xf] }
 0x20e   : > { %v2500_v2 = vrot.slane %v13858_v35, 5  ;;  %v6940_v53 = vrot.slane %v6939_v63, 4  ;;  %v6944_v51 = vrot.slane %v6942_v46, 5  ;;  %v6953_v40 = vor.u32 %v6952_v54, %v6949_v55  ;;  %v6833_v35 = vld [vmem:[#allocation2 + $0x34] sm:$0xf] }
 0x20f   : > { %v6962_v1 = vrot.slane %v6960_v16, 4  ;;  %v6971_v20 = vshrl.u32 %v6832_v8, 16  ;;  %v2511_v46 = vrot.slane %v14975_v48, 5  ;;  %v6974_v63 = vshll.u32 %v6832_v8, 16  ;;  %v6836_v16 = vld [vmem:[#allocation2 + $0x40] sm:$0xf] }
 0x210   : > { %12798 = vmatmul.mubr.bf16.gmra.mrb[32].mxu0 %v13681_v5  ;;  %v2497_v5 = vrot.slane %v14969_v43, 5  ;;  %v11277_v43 = vrot.slane %v2301_v42, 9  ;;  %v2302_v42 = vld [vmem:[#allocation2 + $0xf0] sm:$0xe]  ;;  %v17620_v55 = vshll.u32 %v14835_v39, 16  ;;  %v6945_v58 = vsel %vm14502_vm2, %v6940_v53, %v6944_v51 }
 0x211   : > { %12446 = vmatmul.mubr.bf16.vlgmr.msra.gmra.mrb[0].mxu1 %v17617_v9  ;;  %12801 = vmatprep.mubr.bf16.mxu0 %v13683_v21  ;;  %v2504_v21 = vrot.slane %v14972_v19, 5  ;;  %v11276_v19 = vrot.slane %v2300_v28, 9  ;;  %v6966_v28 = vshll.u32 %v6831_v62, 16  ;;  %v6835_v39 = vld [vmem:[#allocation2 + $0x3c] sm:$0xf]  ;;  %v6973_v8 = vrot.slane %v6971_v20, 4 }
 0x212   : > { %12510 = vmatpush3.bf16.msra.mxu1 %v14925_v14  ;;  %12449 = vmatprep.mubr.bf16.mxu1 %v17619_v25  ;;  %v6956_v14 = vshll.u32 %v6830_v26, 16  ;;  %v2499_v9 = vrot.slane %v2497_v5, 4  ;;  %v6930_v25 = vrot.slane %v6929_v32, 4  ;;  %v13698_v26 = vld [vmem:[%s14506_s15 + $0xd8] sm:$0xff]   ;;  %v15213_v32 = vsel %vm14685_vm5, %v2492_v4, %v2493_v30 }
 0x213   : > { %12511 = vmatprep.subr.bf16.mxu1 %v13686_v41  ;;  %v2506_v60 = vrot.slane %v2504_v21, 4  ;;  %v15222_v54 = vrot.slane %v17620_v55, 5  ;;  %v15236_v48 = vsel %vm14685_vm5, %v11277_v43, %v2504_v21  ;;  %v13703_v21 = vld [vmem:[%s14506_s15 + $0xe0] sm:$0xff]   ;;  %v15248_v43 = vrot.slane %v6953_v40, 4  ;;  %v13860_v62 = vld [vmem:[#allocation2 + $0xf8] sm:$0x1] }
 0x214   : > { %v15209_v15 = vrot.slane %v6956_v14, 5  ;;  %v15229_v4 = vsel %vm14685_vm5, %v2499_v9, %v2500_v2  ;;  %v6935_v30 = vsel %vm14502_vm2, %v6930_v25, %v15160_v29  ;;  %v6980_v14 = vshll.u32 %v6833_v35, 16  ;;  %v6834_v51 = vld [vmem:[#allocation2 + $0x38] sm:$0x1]  ;;  %v6838_v55 = vld [vmem:[#allocation2 + $0x48] sm:$0xf] }
 0x215   : > { %v6984_v29 = vshrl.u32 %v6833_v35, 16  ;;  %v2513_v2 = vrot.slane %v2511_v46, 4  ;;  %v2514_v53 = vrot.slane %v13860_v62, 5  ;;  %v6998_v9 = vshll.u32 %v6835_v39, 16  ;;  %v6837_v62 = vld [vmem:[#allocation2 + $0x44] sm:$0x1] }
 0x216   : > { %12512 = vmatpush3.bf16.msra.mxu1 %v13686_v41  ;;  %v15217_v41 = vsel %vm14685_vm5, %v11276_v19, %v2497_v5  ;;  %v17622_v5 = vcombine.low %v15067_v10, %v15078_v47  ;;  %v13689_v19 = vld [vmem:[#allocation2 + $0x138] sm:$0xff]   ;;  %v6963_v10 = vor.u32 %v6962_v1, %v15209_v15  ;;  %v15251_v47 = vrot.slane %v6966_v28, 5 }
 0x217   : > { %12513 = vmatprep.subr.bf16.mxu1 %v13692_v18  ;;  %v7004_v25 = vshll.u32 %v6836_v16, 16  ;;  %v7008_v35 = vshrl.u32 %v6836_v16, 16  ;;  %v11324_v40 = vcombine.low %v15206_v24, %v15213_v32  ;;  %v11325_v1 = vcombine.low %v15217_v41, %v15229_v4 }
 0x218   : > { %12802 = vmatmul.mubr.bf16.gmra.mrb[36].mxu0 %v13684_v22  ;;  %v15245_v22 = vsel %vm14685_vm5, %v2506_v60, %v2507_v7  ;;  %v6976_v7 = vrot.slane %v6974_v63, 5  ;;  %v15253_v60 = vld [vmem:[#allocation2 + $0xfc] sm:$0xe]  ;;  %v15259_v28 = vrot.slane %v6980_v14, 5  ;;  %v15261_v20 = vcombine.low %v6935_v30, %v6945_v58  ;;  %v6839_v58 = vld [vmem:[#allocation2 + $0x4c] sm:$0xf] }
 0x219   : > { %12450 = vmatmul.mubr.bf16.gmra.mrb[4].mxu1 %v17621_v38  ;;  %12805 = vmatprep.mubr.bf16.mxu0 %v13685_v33  ;;  %v6995_v33 = vshrl.u32 %v6835_v39, 16  ;;  %v6964_v38 = vrot.slane %v6963_v10, 4  ;;  %v13705_v39 = vld [vmem:[%s14506_s15 + $0xe8] sm:$0xff]   ;;  %v2518_v30 = vrot.slane %v14981_v0, 5  ;;  %v17623_v16 = vcombine.low %v15072_v27, %v15082_v23 }
 0x21a   : > { %12453 = vmatprep.mubr.bf16.mxu1 %v17622_v5  ;;  %12514 = vmatpush3.bf16.msra.mxu1 %v13692_v18  ;;  %v11278_v18 = vrot.slane %v2302_v42, 9  ;;  %v6986_v42 = vrot.slane %v6984_v29, 4  ;;  %v6977_v14 = vor.u32 %v6976_v7, %v6973_v8  ;;  %v6990_v29 = vshll.u32 %v6834_v51, 16 }
 0x21b   : > { %12515 = vmatprep.subr.bf16.mxu1 %v13698_v26  ;;  %v15278_v10 = vrot.slane %v7004_v25, 5  ;;  %v15285_v0 = vsel %vm14685_vm5, %v2513_v2, %v2514_v53  ;;  %v11279_v23 = vrot.slane %v15253_v60, 9  ;;  %v7022_v51 = vshll.u32 %v6838_v55, 16  ;;  %v13861_v53 = vld [vmem:[#allocation2 + $0x104] sm:$0x1] }
 0x21c   : > { %v15272_v5 = vsel %vm14685_vm5, %v11278_v18, %v2511_v46  ;;  %v17624_v46 = vcombine.low %v15086_v13, %v15090_v11  ;;  %v6987_v27 = vor.u32 %v6986_v42, %v15259_v28  ;;  %v6969_v18 = vsel %vm14502_vm2, %v6964_v38, %v15251_v47  ;;  %v13707_v13 = vld [vmem:[%s14506_s15 + $0xf0] sm:$0xff]   ;;  %v13690_v11 = vld [vmem:[#allocation2 + $0x144] sm:$0xff]  }
 0x21d   : > { %v7028_v8 = vshll.u32 %v6839_v58, 16  ;;  %v7032_v7 = vshrl.u32 %v6839_v58, 16  ;;  %v2520_v2 = vrot.slane %v2518_v30, 4  ;;  %v7014_v25 = vshll.u32 %v6837_v62, 16  ;;  %v2304_v47 = vld [vmem:[#allocation2 + $0x108] sm:$0xe] }
 0x21e   : > { %12516 = vmatpush3.bf16.msra.mxu1 %v13698_v26  ;;  %v6959_v26 = vsel %vm14502_vm2, %v15248_v43, %v15209_v15  ;;  %v6997_v15 = vrot.slane %v6995_v33, 4  ;;  %v7000_v43 = vrot.slane %v6998_v9, 5  ;;  %v15293_v33 = vrot.slane %v6977_v14, 4  ;;  %v6841_v38 = vld [vmem:[#allocation2 + $0x54] sm:$0xf] }
 0x21f   : > { %12517 = vmatprep.subr.bf16.mxu1 %v13703_v21  ;;  %v2521_v9 = vrot.slane %v13861_v53, 5  ;;  %v15299_v58 = vcombine.low %v6959_v26, %v6969_v18  ;;  %v7024_v62 = vrot.slane %v7022_v51, 5  ;;  %v6845_v14 = vld [vmem:[#allocation2 + $0x64] sm:$0xf] }
 0x220   : > { %12806 = vmatmul.mubr.bf16.gmra.mrb[40].mxu0 %v13687_v44  ;;  %v7010_v44 = vrot.slane %v7008_v35, 4  ;;  %v15295_v35 = vrot.slane %v6990_v29, 5  ;;  %v7001_v60 = vor.u32 %v7000_v43, %v6997_v15  ;;  %v15307_v29 = vsel %vm14685_vm5, %v11279_v23, %v2518_v30  ;;  %v6842_v30 = vld [vmem:[#allocation2 + $0x58] sm:$0xf]  ;;  %v6844_v23 = vld [vmem:[#allocation2 + $0x60] sm:$0xf] }
 0x221   : > { %12454 = vmatmul.mubr.bf16.gmra.mrb[8].mxu1 %v17623_v16  ;;  %12809 = vmatprep.mubr.bf16.mxu0 %v13689_v19  ;;  %v7019_v19 = vshrl.u32 %v6838_v55, 16  ;;  %v2525_v55 = vrot.slane %v14984_v6, 5  ;;  %v15303_v16 = vrot.slane %v6987_v27, 4  ;;  %v15309_v15 = vrot.slane %v7028_v8, 5  ;;  %v13709_v6 = vld [vmem:[%s14506_s15 + $0xf8] sm:$0xff]  }
 0x222   : > { %12457 = vmatprep.mubr.bf16.mxu1 %v17624_v46  ;;  %12518 = vmatpush3.bf16.msra.mxu1 %v13703_v21  ;;  %v13691_v21 = vld [vmem:[#allocation2 + $0x150] sm:$0xff]   ;;  %v7011_v42 = vor.u32 %v7010_v44, %v15278_v10  ;;  %v7034_v43 = vrot.slane %v7032_v7, 4  ;;  %v6983_v26 = vsel %vm14502_vm2, %v15293_v33, %v15259_v28  ;;  %v15318_v44 = vsel %vm14685_vm5, %v2520_v2, %v2521_v9 }
 0x223   : > { %12519 = vmatprep.subr.bf16.mxu1 %v13705_v39  ;;  %v6840_v46 = vld [vmem:[#allocation2 + $0x50] sm:$0x1]  ;;  %v7021_v53 = vrot.slane %v7019_v19, 4  ;;  %v11280_v27 = vrot.slane %v2304_v47, 9  ;;  %v17625_v19 = vcombine.low %v15094_v34, %v15098_v56  ;;  %v7002_v18 = vrot.slane %v7001_v60, 4 }
 0x224   : > { %v7012_v51 = vrot.slane %v7011_v42, 4  ;;  %v2527_v8 = vrot.slane %v2525_v55, 4  ;;  %v13862_v7 = vld [vmem:[#allocation2 + $0x110] sm:$0x1]  ;;  %v17626_v28 = vcombine.low %v15102_v59, %v15106_v36  ;;  %v6993_v33 = vsel %vm14502_vm2, %v15303_v16, %v15295_v35  ;;  %v13693_v42 = vld [vmem:[#allocation2 + $0x15c] sm:$0xff]  }
 0x225   : > { %v7038_v2 = vshll.u32 %v6840_v46, 16  ;;  %v7043_v9 = vshrl.u32 %v6841_v38, 16  ;;  %v7046_v34 = vshll.u32 %v6841_v38, 16  ;;  %v7025_v56 = vor.u32 %v7024_v62, %v7021_v53  ;;  %v2305_v53 = vld [vmem:[#allocation2 + $0x114] sm:$0xe] }
 0x226   : > { %12520 = vmatpush3.bf16.msra.mxu1 %v13705_v39  ;;  %v7016_v39 = vrot.slane %v7014_v25, 5  ;;  %v7052_v25 = vshll.u32 %v6842_v30, 16  ;;  %v7056_v60 = vshrl.u32 %v6842_v30, 16  ;;  %v7067_v47 = vshrl.u32 %v6844_v23, 16 }
 0x227   : > { %12521 = vmatprep.subr.bf16.mxu1 %v13707_v13  ;;  %v7076_v59 = vshll.u32 %v6845_v14, 16  ;;  %v7080_v36 = vshrl.u32 %v6845_v14, 16  ;;  %v7007_v35 = vsel %vm14502_vm2, %v7002_v18, %v15278_v10  ;;  %v15338_v38 = vsel %vm14685_vm5, %v11280_v27, %v2525_v55  ;;  %v13863_v18 = vld [vmem:[%s14506_s15 + $0x100] sm:$0xff]   ;;  %v6843_v55 = vld [vmem:[#allocation2 + $0x5c] sm:$0x1] }
 0x228   : > { %12810 = vmatmul.mubr.bf16.gmra.mrb[44].mxu0 %v13690_v11  ;;  %v2528_v11 = vrot.slane %v13862_v7, 5  ;;  %v13695_v7 = vld [vmem:[#allocation2 + $0x168] sm:$0xff]   ;;  %v7040_v46 = vrot.slane %v7038_v2, 5  ;;  %v2532_v14 = vrot.slane %v14989_v12, 5  ;;  %v7045_v62 = vrot.slane %v7043_v9, 4 }
 0x229   : > { %12458 = vmatmul.mubr.bf16.gmra.mrb[12].mxu1 %v17625_v19  ;;  %12813 = vmatprep.mubr.bf16.mxu0 %v13691_v21  ;;  %v7035_v21 = vor.u32 %v7034_v43, %v15309_v15  ;;  %v7070_v19 = vshll.u32 %v6844_v23, 16  ;;  %v7048_v43 = vrot.slane %v7046_v34, 5  ;;  %v7026_v30 = vrot.slane %v7025_v56, 4  ;;  %v6846_v56 = vld [vmem:[#allocation2 + $0x68] sm:$0x1] }
 0x22a   : > { %12461 = vmatprep.mubr.bf16.mxu1 %v17626_v28  ;;  %12522 = vmatpush3.bf16.msra.mxu1 %v13707_v13  ;;  %v7017_v13 = vsel %vm14502_vm2, %v7012_v51, %v7016_v39  ;;  %v15342_v16 = vsel %vm14685_vm5, %v2527_v8, %v2528_v11  ;;  %v15345_v23 = vrot.slane %v7052_v25, 5  ;;  %v7058_v39 = vrot.slane %v7056_v60, 4  ;;  %v17627_v28 = vld [vmem:[#allocation24_spill] sm:$0xff]  ;;  %v13864_v60 = vld [vmem:[#allocation2 + $0x11c] sm:$0x1] }
 0x22b   : > { %12523 = vmatprep.subr.bf16.mxu1 %v13709_v6  ;;  %v7036_v10 = vrot.slane %v7035_v21, 4  ;;  %v7069_v27 = vrot.slane %v7067_v47, 4  ;;  %v7072_v51 = vrot.slane %v7070_v19, 5  ;;  %v15348_v8 = vrot.slane %v7076_v59, 5  ;;  %v17630_v47 = vld [vmem:[#allocation19_spill] sm:$0xff] }
 0x22c   : > { %v7082_v11 = vrot.slane %v7080_v36, 4  ;;  %v17628_v12 = vcombine.low %v15110_v50, %v17627_v28  ;;  %v15357_v9 = vcombine.low %v7007_v35, %v7017_v13  ;;  %v11281_v34 = vrot.slane %v2305_v53, 9  ;;  %v6848_v19 = vld [vmem:[#allocation2 + $0x70] sm:$0xf]  ;;  %v13865_v25 = vld [vmem:[#allocation2 + $0x128] sm:$0x1] }
 0x22d   : > { %v17629_v21 = vcombine.low %v15130_v17, %v15142_v61  ;;  %v2535_v50 = vrot.slane %v13864_v60, 5  ;;  %v7031_v59 = vsel %vm14502_vm2, %v7026_v30, %v15309_v15  ;;  %v2534_v36 = vrot.slane %v2532_v14, 4  ;;  %v2306_v17 = vld [vmem:[#allocation2 + $0x120] sm:$0xe]  ;;  %v13696_v61 = vld [vmem:[#allocation2 + $0x174] sm:$0xff]  }
 0x22e   : > { %12524 = vmatpush3.bf16.msra.mxu1 %v13709_v6  ;;  %v15353_v6 = vcombine.low %v6983_v26, %v6993_v33  ;;  %v2539_v26 = vrot.slane %v17630_v47, 5  ;;  %v6847_v33 = vld [vmem:[#allocation2 + $0x6c] sm:$0xf]  ;;  %v7062_v35 = vshll.u32 %v6843_v55, 16  ;;  %v7041_v13 = vsel %vm14502_vm2, %v7036_v10, %v7040_v46 }
 0x22f   : > { %12989 = vmatprep.subr.bf16.mxu1 %v13863_v18  ;;  %v7073_v53 = vor.u32 %v7072_v51, %v7069_v27  ;;  %v13697_v18 = vld [vmem:[#allocation2 + $0x180] sm:$0xff]   ;;  %v7091_v28 = vshrl.u32 %v6847_v33, 16  ;;  %v7104_v60 = vshrl.u32 %v6848_v19, 16  ;;  %v11282_v15 = vrot.slane %v2306_v17, 9  ;;  %v2307_v27 = vld [vmem:[#allocation2 + $0x12c] sm:$0xe] }
 0x230   : > { %12814 = vmatmul.mubr.bf16.gmra.mrb[48].mxu0 %v13693_v42  ;;  %v7049_v42 = vor.u32 %v7048_v43, %v7045_v62  ;;  %v7083_v62 = vor.u32 %v7082_v11, %v15348_v8  ;;  %v7086_v43 = vshll.u32 %v6846_v56, 16  ;;  %v2541_v30 = vrot.slane %v2539_v26, 4 }
 0x231   : > { %12462 = vmatmul.mubr.bf16.gmra.mrb[16].mxu1 %v17628_v12  ;;  %12817 = vmatprep.mubr.bf16.mxu0 %v13695_v7  ;;  %v7059_v7 = vor.u32 %v7058_v39, %v15345_v23  ;;  %v7094_v12 = vshll.u32 %v6847_v33, 16  ;;  %v2542_v39 = vrot.slane %v13865_v25, 5  ;;  %v15372_v55 = vcombine.low %v7031_v59, %v7041_v13  ;;  %v17631_v33 = vld [vmem:[#allocation20_spill] sm:$0xff]  ;;  %v6849_v25 = vld [vmem:[#allocation2 + $0x74] sm:$0x1] }
 0x232   : > { %12465 = vmatprep.mubr.bf16.mxu1 %v17629_v21  ;;  %v7100_v21 = vshll.u32 %v6848_v19, 16  ;;  %v7050_v47 = vrot.slane %v7049_v42, 4  ;;  %v15376_v2 = vsel %vm14685_vm5, %v11281_v34, %v2532_v14  ;;  %v7064_v10 = vrot.slane %v7062_v35, 5  ;;  %v6850_v42 = vld [vmem:[#allocation2 + $0x78] sm:$0xf] }
 0x233   : > { %v7060_v46 = vrot.slane %v7059_v7, 4  ;;  %v7074_v51 = vrot.slane %v7073_v53, 4  ;;  %v7084_v11 = vrot.slane %v7083_v62, 4  ;;  %v7088_v56 = vrot.slane %v7086_v43, 5  ;;  %v6851_v53 = vld [vmem:[#allocation2 + $0x7c] sm:$0xf] }
 0x234   : > { %v2546_v19 = vrot.slane %v17631_v33, 5  ;;  %v17632_v17 = vcombine.low %v15149_v31, %v15153_v45  ;;  %v7093_v59 = vrot.slane %v7091_v28, 4  ;;  %v7096_v13 = vrot.slane %v7094_v12, 5  ;;  %v2308_v12 = vld [vmem:[#allocation2 + $0x138] sm:$0xe] }
 0x235   : > { %v15382_v14 = vrot.slane %v7100_v21, 5  ;;  %v7106_v34 = vrot.slane %v7104_v60, 4  ;;  %v17633_v7 = vcombine.low %v15165_v52, %v15169_v49  ;;  %v15389_v35 = vsel %vm14685_vm5, %v2534_v36, %v2535_v50  ;;  %v13699_v36 = vld [vmem:[#allocation2 + $0x18c] sm:$0xff]   ;;  %v13701_v21 = vld [vmem:[#allocation2 + $0x198] sm:$0xff]  }
 0x236   : > { %v7055_v31 = vsel %vm14502_vm2, %v7050_v47, %v15345_v23  ;;  %v15396_v45 = vsel %vm14685_vm5, %v11282_v15, %v2539_v26  ;;  %v7065_v52 = vsel %vm14502_vm2, %v7060_v46, %v7064_v10  ;;  %v11283_v49 = vrot.slane %v2307_v27, 9 }
 0x237   : > { %v7115_v62 = vshrl.u32 %v6850_v42, 16  ;;  %v7118_v50 = vshll.u32 %v6850_v42, 16  ;;  %v7079_v23 = vsel %vm14502_vm2, %v7074_v51, %v15348_v8  ;;  %v2548_v43 = vrot.slane %v2546_v19, 4  ;;  %v13702_v8 = vld [vmem:[#allocation2 + $0x1a4] sm:$0xff]  }
 0x238   : > { %12818 = vmatmul.mubr.bf16.gmra.mrb[52].mxu0 %v13696_v61  ;;  %v15400_v61 = vsel %vm14685_vm5, %v2541_v30, %v2542_v39  ;;  %v7110_v28 = vshll.u32 %v6849_v25, 16  ;;  %v7089_v60 = vsel %vm14502_vm2, %v7084_v11, %v7088_v56  ;;  %v7097_v47 = vor.u32 %v7096_v13, %v7093_v59  ;;  %v17634_v30 = vld [vmem:[#allocation21_spill] sm:$0xff]  ;;  %v6853_v25 = vld [vmem:[#allocation2 + $0x84] sm:$0xf] }
 0x239   : > { %12466 = vmatmul.mubr.bf16.gmra.mrb[20].mxu1 %v17632_v17  ;;  %12821 = vmatprep.mubr.bf16.mxu0 %v13697_v18  ;;  %v13866_v18 = vld [vmem:[#allocation2 + $0x134] sm:$0x1]  ;;  %v7107_v15 = vor.u32 %v7106_v34, %v15382_v14  ;;  %v2553_v39 = vrot.slane %v17634_v30, 5  ;;  %v7124_v10 = vshll.u32 %v6851_v53, 16  ;;  %v7128_v27 = vshrl.u32 %v6851_v53, 16 }
 0x23a   : > { %12469 = vmatprep.mubr.bf16.mxu1 %v17633_v7  ;;  %v2549_v26 = vrot.slane %v13866_v18, 5  ;;  %v15415_v51 = vcombine.low %v7055_v31, %v7065_v52  ;;  %v11284_v33 = vrot.slane %v2308_v12, 9  ;;  %v7117_v42 = vrot.slane %v7115_v62, 4  ;;  %v6854_v34 = vld [vmem:[#allocation2 + $0x88] sm:$0xf]  ;;  %v17635_v31 = vld [vmem:[#allocation25_spill] sm:$0xff] }
 0x23b   : > { %v7120_v17 = vrot.slane %v7118_v50, 5  ;;  %v15417_v11 = vcombine.low %v7079_v23, %v7089_v60  ;;  %v15421_v56 = vsel %vm14685_vm5, %v11283_v49, %v2546_v19  ;;  %v7112_v13 = vrot.slane %v7110_v28, 5  ;;  %v6856_v7 = vld [vmem:[#allocation2 + $0x90] sm:$0xf]  ;;  %v6857_v18 = vld [vmem:[#allocation2 + $0x94] sm:$0xf] }
 0x23c   : > { %v15425_v59 = vsel %vm14685_vm5, %v2548_v43, %v2549_v26  ;;  %v17636_v52 = vcombine.low %v15173_v37, %v17635_v31  ;;  %v7098_v53 = vrot.slane %v7097_v47, 4  ;;  %v7108_v62 = vrot.slane %v7107_v15, 4  ;;  %v17637_v19 = vld [vmem:[#allocation26_spill] sm:$0xff]  ;;  %v17638_v49 = vld [vmem:[#allocation27_spill] sm:$0xff] }
 0x23d   : > { %v2555_v50 = vrot.slane %v2553_v39, 4  ;;  %v17639_v12 = vcombine.low %v17637_v19, %v17638_v49  ;;  %v6852_v43 = vld [vmem:[#allocation2 + $0x80] sm:$0x1]  ;;  %v15433_v26 = vrot.slane %v7124_v10, 5  ;;  %v7130_v28 = vrot.slane %v7128_v27, 4 }
 0x23e   : > { %v7139_v60 = vshrl.u32 %v6853_v25, 16  ;;  %v7142_v30 = vshll.u32 %v6853_v25, 16  ;;  %v15437_v37 = vsel %vm14685_vm5, %v11284_v33, %v2553_v39  ;;  %v7148_v47 = vshll.u32 %v6854_v34, 16  ;;  %v2309_v31 = vld [vmem:[#allocation2 + $0x144] sm:$0xe] }
 0x23f   : > { %v7152_v15 = vshrl.u32 %v6854_v34, 16  ;;  %v7172_v46 = vshll.u32 %v6857_v18, 16  ;;  %v7176_v19 = vshrl.u32 %v6857_v18, 16  ;;  %v7103_v10 = vsel %vm14502_vm2, %v7098_v53, %v15382_v14  ;;  %v6855_v53 = vld [vmem:[#allocation2 + $0x8c] sm:$0x1] }
 0x240   : > { %12822 = vmatmul.mubr.bf16.gmra.mrb[56].mxu0 %v13699_v36  ;;  %v13867_v36 = vld [vmem:[#allocation2 + $0x140] sm:$0x1]  ;;  %v7113_v27 = vsel %vm14502_vm2, %v7108_v62, %v7112_v13  ;;  %v7134_v39 = vshll.u32 %v6852_v43, 16  ;;  %v7131_v33 = vor.u32 %v7130_v28, %v15433_v26  ;;  %v7141_v34 = vrot.slane %v7139_v60, 4  ;;  %v6858_v60 = vld [vmem:[#allocation2 + $0x98] sm:$0x1] }
 0x241   : > { %12470 = vmatmul.mubr.bf16.gmra.mrb[24].mxu1 %v17636_v52  ;;  %12825 = vmatprep.mubr.bf16.mxu0 %v13701_v21  ;;  %v2556_v23 = vrot.slane %v13867_v36, 5  ;;  %v7121_v21 = vor.u32 %v7120_v17, %v7117_v42  ;;  %v7163_v52 = vshrl.u32 %v6856_v7, 16  ;;  %v7166_v36 = vshll.u32 %v6856_v7, 16  ;;  %v13868_v42 = vld [vmem:[#allocation2 + $0x148] sm:$0xf] }
 0x242   : > { %12473 = vmatprep.mubr.bf16.mxu1 %v17639_v12  ;;  %v2560_v17 = vrot.slane %v13868_v42, 5  ;;  %v7144_v7 = vrot.slane %v7142_v30, 5  ;;  %v11285_v18 = vrot.slane %v2309_v31, 9  ;;  %v15451_v12 = vrot.slane %v7148_v47, 5 }
 0x243   : > { %v15446_v25 = vsel %vm14685_vm5, %v2555_v50, %v2556_v23  ;;  %v15449_v49 = vrot.slane %v7121_v21, 4  ;;  %v7154_v14 = vrot.slane %v7152_v15, 4  ;;  %v7165_v13 = vrot.slane %v7163_v52, 4  ;;  %v6860_v21 = vld [vmem:[#allocation2 + $0xa0] sm:$0xf] }
 0x244   : > { %v7168_v62 = vrot.slane %v7166_v36, 5  ;;  %v15453_v63 = vrot.slane %v7172_v46, 5  ;;  %v7178_v50 = vrot.slane %v7176_v19, 4  ;;  %v11332_v23 = vcombine.low %v15421_v56, %v15425_v59  ;;  %v6859_v46 = vld [vmem:[#allocation2 + $0x9c] sm:$0xf] }
 0x245   : > { %v15461_v43 = vcombine.low %v7103_v10, %v7113_v27  ;;  %v15465_v28 = vrot.slane %v7134_v39, 5  ;;  %v15470_v24 = vrot.slane %v7131_v33, 4  ;;  %v2562_v32 = vrot.slane %v2560_v17, 4  ;;  %v2310_v52 = vld [vmem:[#allocation2 + $0x150] sm:$0xe] }
 0x246   : > { %v7145_v30 = vor.u32 %v7144_v7, %v7141_v34  ;;  %v15474_v47 = vsel %vm14685_vm5, %v11285_v18, %v2560_v17  ;;  %v7155_v15 = vor.u32 %v7154_v14, %v15451_v12  ;;  %v7158_v31 = vshll.u32 %v6855_v53, 16  ;;  %v13870_v36 = vld [vmem:[#allocation2 + $0x154] sm:$0xf]  ;;  %v13706_v17 = vld [vmem:[%s14506_s15 + $0x208] sm:$0xff]  }
 0x247   : > { %v2567_v19 = vrot.slane %v13870_v36, 5  ;;  %v7127_v41 = vsel %vm14502_vm2, %v15449_v49, %v15433_v26  ;;  %v7169_v4 = vor.u32 %v7168_v62, %v7165_v13  ;;  %v7182_v10 = vshll.u32 %v6858_v60, 16 }
 0x248   : > { %12826 = vmatmul.mubr.bf16.gmra.mrb[60].mxu0 %v13702_v8  ;;  %v7187_v27 = vshrl.u32 %v6859_v46, 16  ;;  %v7190_v39 = vshll.u32 %v6859_v46, 16  ;;  %v7196_v33 = vshll.u32 %v6860_v21, 16  ;;  %v7200_v42 = vshrl.u32 %v6860_v21, 16  ;;  %v6862_v46 = vld [vmem:[#allocation2 + $0xa8] sm:$0xf] }
 0x249   : > { %12474 = vmatmul.mubr.bf16.gmra.mrb[28].mxu1 %v11324_v40  ;;  %12845 = vmatprep.mubr.bf16.mxu0 %v15261_v20  ;;  %v13869_v40 = vld [vmem:[#allocation2 + $0x14c] sm:$0x1]  ;;  %v7137_v34 = vsel %vm14502_vm2, %v15470_v24, %v15465_v28  ;;  %v7146_v18 = vrot.slane %v7145_v30, 4  ;;  %v11286_v14 = vrot.slane %v2310_v52, 9  ;;  %v7156_v53 = vrot.slane %v7155_v15, 4 }
 0x24a   : > { %12477 = vmatprep.mubr.bf16.mxu1 %v11325_v1  ;;  %v2563_v20 = vrot.slane %v13869_v40, 5  ;;  %v7179_v1 = vor.u32 %v7178_v50, %v15453_v63  ;;  %v7160_v13 = vrot.slane %v7158_v31, 5  ;;  %v2569_v62 = vrot.slane %v2567_v19, 4  ;;  %v13871_v50 = vld [vmem:[#allocation2 + $0x158] sm:$0x1] }
 0x24b   : > { %v2570_v60 = vrot.slane %v13871_v50, 5  ;;  %v7170_v40 = vrot.slane %v7169_v4, 4  ;;  %v7184_v36 = vrot.slane %v7182_v10, 5  ;;  %v2311_v28 = vld [vmem:[#allocation2 + $0x15c] sm:$0xe]  ;;  %v7189_v15 = vrot.slane %v7187_v27, 4 }
 0x24c   : > { %v15489_v7 = vsel %vm14685_vm5, %v2562_v32, %v2563_v20  ;;  %v7180_v21 = vrot.slane %v7179_v1, 4  ;;  %v13872_v24 = vld [vmem:[#allocation2 + $0x160] sm:$0xf]  ;;  %v17640_v32 = vcombine.low %v15236_v48, %v15245_v22  ;;  %v6861_v30 = vld [vmem:[#allocation2 + $0xa4] sm:$0x1]  ;;  %v7192_v31 = vrot.slane %v7190_v39, 5 }
 0x24d   : > { %v2574_v8 = vrot.slane %v13872_v24, 5  ;;  %v13873_v20 = vld [vmem:[%s14506_s15 + $0x200] sm:$0xff]   ;;  %v15496_v52 = vrot.slane %v7196_v33, 5  ;;  %v7202_v50 = vrot.slane %v7200_v42, 4  ;;  %v7151_v4 = vsel %vm14502_vm2, %v7146_v18, %v15451_v12  ;;  %v13708_v48 = vld [vmem:[%s14506_s15 + $0x210] sm:$0xff]  }
 0x24e   : > { %v15508_v22 = vsel %vm14685_vm5, %v11286_v14, %v2567_v19  ;;  %v2312_v1 = vld [vmem:[#allocation2 + $0x168] sm:$0xe]  ;;  %v7211_v10 = vshrl.u32 %v6862_v46, 16  ;;  %v7214_v27 = vshll.u32 %v6862_v46, 16  ;;  %v7161_v39 = vsel %vm14502_vm2, %v7156_v53, %v7160_v13  ;;  %v6863_v12 = vld [vmem:[#allocation2 + $0xac] sm:$0xf] }
 0x24f   : > { %v7175_v19 = vsel %vm14502_vm2, %v7170_v40, %v15453_v63  ;;  %v7185_v42 = vsel %vm14502_vm2, %v7180_v21, %v7184_v36  ;;  %v2576_v18 = vrot.slane %v2574_v8, 4  ;;  %v7206_v14 = vshll.u32 %v6861_v30, 16  ;;  %v6865_v36 = vld [vmem:[#allocation2 + $0xb4] sm:$0xf]  ;;  %v13710_v30 = vld [vmem:[%s14506_s15 + $0x218] sm:$0xff]  }
 0x250   : > { %12846 = vmatmul.mubr.bf16.vlgmr.msra.gmra.mrb[0].mxu0 %v15299_v58  ;;  %v17641_v58 = vcombine.low %v15272_v5, %v15285_v0  ;;  %v15514_v5 = vsel %vm14685_vm5, %v2569_v62, %v2570_v60  ;;  %v11287_v0 = vrot.slane %v2311_v28, 9  ;;  %v7193_v53 = vor.u32 %v7192_v31, %v7189_v15  ;;  %v13875_v60 = vld [vmem:[#allocation2 + $0x16c] sm:$0xf] }
 0x251   : > { %12478 = vmatmul.mubr.bf16.gmra.mrb[32].mxu1 %v17640_v32  ;;  %12910 = vmatpush3.bf16.msra.mxu0 %v13873_v20  ;;  %v7203_v13 = vor.u32 %v7202_v50, %v15496_v52  ;;  %v11288_v62 = vrot.slane %v2312_v1, 9  ;;  %v2581_v46 = vrot.slane %v13875_v60, 5  ;;  %v7213_v28 = vrot.slane %v7211_v10, 4  ;;  %v13876_v1 = vld [vmem:[#allocation2 + $0x170] sm:$0x1] }
 0x252   : > { %12481 = vmatprep.mubr.bf16.mxu1 %v17641_v58  ;;  %12849 = vmatprep.mubr.bf16.mxu0 %v15353_v6  ;;  %v13874_v6 = vld [vmem:[#allocation2 + $0x164] sm:$0x1]  ;;  %v7216_v24 = vrot.slane %v7214_v27, 5  ;;  %v7220_v32 = vshll.u32 %v6863_v12, 16  ;;  %v7224_v20 = vshrl.u32 %v6863_v12, 16  ;;  %v15527_v63 = vcombine.low %v7127_v41, %v7137_v34 }
 0x253   : > { %12911 = vmatprep.subr.bf16.mxu0 %v13706_v17  ;;  %v2577_v33 = vrot.slane %v13874_v6, 5  ;;  %v15531_v40 = vcombine.low %v7151_v4, %v7161_v39  ;;  %v11335_v21 = vcombine.low %v15508_v22, %v15514_v5  ;;  %v15537_v15 = vcombine.low %v7175_v19, %v7185_v42  ;;  %v6866_v41 = vld [vmem:[#allocation2 + $0xb8] sm:$0xf]  ;;  %v6868_v34 = vld [vmem:[#allocation2 + $0xc0] sm:$0xf] }
 0x254   : > { %v15541_v31 = vsel %vm14685_vm5, %v11287_v0, %v2574_v8  ;;  %v7208_v49 = vrot.slane %v7206_v14, 5  ;;  %v17642_v50 = vcombine.low %v15307_v29, %v15318_v44  ;;  %v7204_v58 = vrot.slane %v7203_v13, 4  ;;  %v6869_v10 = vld [vmem:[#allocation2 + $0xc4] sm:$0xf]  ;;  %v6864_v29 = vld [vmem:[#allocation2 + $0xb0] sm:$0x1] }
 0x255   : > { %12912 = vmatpush3.bf16.msra.mxu0 %v13706_v17  ;;  %v11334_v17 = vcombine.low %v15474_v47, %v15489_v7  ;;  %v15545_v26 = vsel %vm14685_vm5, %v2576_v18, %v2577_v33  ;;  %v2583_v4 = vrot.slane %v2581_v46, 4  ;;  %v2584_v8 = vrot.slane %v13876_v1, 5  ;;  %v2313_v6 = vld [vmem:[#allocation2 + $0x174] sm:$0xe]  ;;  %v13713_v18 = vld [vmem:[%s14506_s15 + $0x220] sm:$0xff]  }
 0x256   : > { %12913 = vmatprep.subr.bf16.mxu0 %v13708_v48  ;;  %v17643_v27 = vcombine.low %v15338_v38, %v15342_v16  ;;  %v15556_v39 = vsel %vm14685_vm5, %v11288_v62, %v2581_v46  ;;  %v7217_v44 = vor.u32 %v7216_v24, %v7213_v28  ;;  %v15558_v0 = vrot.slane %v7220_v32, 5  ;;  %v13877_v32 = vld [vmem:[#allocation2 + $0x178] sm:$0xf]  ;;  %v6883_v7 = vld [vmem:[#allocation2 + $0x114] sm:$0xf] }
 0x257   : > { %v7235_v33 = vshrl.u32 %v6865_v36, 16  ;;  %v7238_v12 = vshll.u32 %v6865_v36, 16  ;;  %v7244_v19 = vshll.u32 %v6866_v41, 16  ;;  %v7248_v42 = vshrl.u32 %v6866_v41, 16  ;;  %v6867_v36 = vld [vmem:[#allocation2 + $0xbc] sm:$0x1] }
 0x258   : > { %12850 = vmatmul.mubr.bf16.gmra.mrb[4].mxu0 %v15357_v9  ;;  %v7194_v9 = vrot.slane %v7193_v53, 4  ;;  %v7259_v14 = vshrl.u32 %v6868_v34, 16  ;;  %v7262_v38 = vshll.u32 %v6868_v34, 16  ;;  %v7268_v16 = vshll.u32 %v6869_v10, 16 }
 0x259   : > { %12482 = vmatmul.mubr.bf16.gmra.mrb[36].mxu1 %v17642_v50  ;;  %12853 = vmatprep.mubr.bf16.mxu0 %v15372_v55  ;;  %v7226_v55 = vrot.slane %v7224_v20, 4  ;;  %v7209_v13 = vsel %vm14502_vm2, %v7204_v58, %v7208_v49  ;;  %v15568_v62 = vsel %vm14685_vm5, %v2583_v4, %v2584_v8  ;;  %v7230_v60 = vshll.u32 %v6864_v29, 16  ;;  %v13718_v49 = vld [vmem:[%s14506_s15 + $0x228] sm:$0xff]  }
 0x25a   : > { %12485 = vmatprep.mubr.bf16.mxu1 %v17643_v27  ;;  %12914 = vmatpush3.bf16.msra.mxu0 %v13708_v48  ;;  %v7272_v48 = vshrl.u32 %v6869_v10, 16  ;;  %v7199_v53 = vsel %vm14502_vm2, %v7194_v9, %v15496_v52  ;;  %v15570_v46 = vrot.slane %v7217_v44, 4  ;;  %v11289_v24 = vrot.slane %v2313_v6, 9  ;;  %v6870_v29 = vld [vmem:[#allocation2 + $0xc8] sm:$0x1] }
 0x25b   : > { %12915 = vmatprep.subr.bf16.mxu0 %v13710_v30  ;;  %v7227_v28 = vor.u32 %v7226_v55, %v15558_v0  ;;  %v2588_v20 = vrot.slane %v13877_v32, 5  ;;  %v7237_v41 = vrot.slane %v7235_v33, 4  ;;  %v7240_v52 = vrot.slane %v7238_v12, 5  ;;  %v6871_v44 = vld [vmem:[#allocation2 + $0xcc] sm:$0xf] }
 0x25c   : > { %v15573_v34 = vrot.slane %v7244_v19, 5  ;;  %v7250_v50 = vrot.slane %v7248_v42, 4  ;;  %v7261_v9 = vrot.slane %v7259_v14, 4  ;;  %v7264_v58 = vrot.slane %v7262_v38, 5  ;;  %v13878_v6 = vld [vmem:[#allocation2 + $0x17c] sm:$0x1] }
 0x25d   : > { %v15577_v4 = vrot.slane %v7268_v16, 5  ;;  %v7274_v1 = vrot.slane %v7272_v48, 4  ;;  %v17644_v8 = vcombine.low %v15376_v2, %v15389_v35  ;;  %v15585_v10 = vcombine.low %v7199_v53, %v7209_v13  ;;  %v6872_v12 = vld [vmem:[#allocation2 + $0xd0] sm:$0xf]  ;;  %v2314_v38 = vld [vmem:[#allocation2 + $0x180] sm:$0xe] }
 0x25e   : > { %12916 = vmatpush3.bf16.msra.mxu0 %v13710_v30  ;;  %v11336_v30 = vcombine.low %v15541_v31, %v15545_v26  ;;  %v11337_v27 = vcombine.low %v15556_v39, %v15568_v62  ;;  %v17645_v55 = vcombine.low %v15396_v45, %v15400_v61  ;;  %v7228_v2 = vrot.slane %v7227_v28, 4  ;;  %v13879_v16 = vld [vmem:[#allocation2 + $0x184] sm:$0xf]  ;;  %v13723_v45 = vld [vmem:[%s14506_s15 + $0x230] sm:$0xff]  }
 0x25f   : > { %12917 = vmatprep.subr.bf16.mxu0 %v13713_v18  ;;  %v2590_v35 = vrot.slane %v2588_v20, 4  ;;  %v7254_v33 = vshll.u32 %v6867_v36, 16  ;;  %v15594_v19 = vsel %vm14685_vm5, %v11289_v24, %v2588_v20  ;;  %v7241_v42 = vor.u32 %v7240_v52, %v7237_v41 }
 0x260   : > { %12854 = vmatmul.mubr.bf16.gmra.mrb[8].mxu0 %v15415_v51  ;;  %v7232_v51 = vrot.slane %v7230_v60, 5  ;;  %v7251_v14 = vor.u32 %v7250_v50, %v15573_v34  ;;  %v2595_v48 = vrot.slane %v13879_v16, 5  ;;  %v7223_v61 = vsel %vm14502_vm2, %v15570_v46, %v15558_v0 }
 0x261   : > { %12486 = vmatmul.mubr.bf16.gmra.mrb[40].mxu1 %v17644_v8  ;;  %12857 = vmatprep.mubr.bf16.mxu0 %v15417_v11  ;;  %v2591_v11 = vrot.slane %v13878_v6, 5  ;;  %v7265_v53 = vor.u32 %v7264_v58, %v7261_v9  ;;  %v7278_v13 = vshll.u32 %v6870_v29, 16  ;;  %v7283_v60 = vshrl.u32 %v6871_v44, 16  ;;  %v13880_v9 = vld [vmem:[#allocation2 + $0x188] sm:$0x1] }
 0x262   : > { %12489 = vmatprep.mubr.bf16.mxu1 %v17645_v55  ;;  %12918 = vmatpush3.bf16.msra.mxu0 %v13713_v18  ;;  %v7275_v18 = vor.u32 %v7274_v1, %v15577_v4  ;;  %v7286_v28 = vshll.u32 %v6871_v44, 16  ;;  %v7292_v24 = vshll.u32 %v6872_v12, 16  ;;  %v7296_v32 = vshrl.u32 %v6872_v12, 16  ;;  %v13728_v1 = vld [vmem:[%s14506_s15 + $0x238] sm:$0xff]   ;;  %v13881_v55 = vld [vmem:[#allocation2 + $0x190] sm:$0xf] }
 0x263   : > { %12919 = vmatprep.subr.bf16.mxu0 %v13718_v49  ;;  %v7233_v20 = vsel %vm14502_vm2, %v7228_v2, %v7232_v51  ;;  %v15607_v36 = vsel %vm14685_vm5, %v2590_v35, %v2591_v11  ;;  %v7256_v41 = vrot.slane %v7254_v33, 5  ;;  %v11290_v52 = vrot.slane %v2314_v38, 9  ;;  %v2315_v51 = vld [vmem:[#allocation2 + $0x18c] sm:$0xe]  ;;  %v17646_v33 = vld [vmem:[#allocation23_spill] sm:$0xff]  ;;  %v17647_v12 = vld [vmem:[#allocation22_spill] sm:$0xff] }
 0x264   : > { %v7242_v0 = vrot.slane %v7241_v42, 4  ;;  %v7252_v46 = vrot.slane %v7251_v14, 4  ;;  %v2597_v50 = vrot.slane %v2595_v48, 4  ;;  %v2598_v58 = vrot.slane %v13880_v9, 5 }
 0x265   : > { %v7266_v8 = vrot.slane %v7265_v53, 4  ;;  %v7276_v29 = vrot.slane %v7275_v18, 4  ;;  %v7280_v44 = vrot.slane %v7278_v13, 5  ;;  %v2602_v2 = vrot.slane %v13881_v55, 5  ;;  %v6875_v53 = vld [vmem:[#allocation2 + $0xf4] sm:$0xf] }
 0x266   : > { %12920 = vmatpush3.bf16.msra.mxu0 %v13718_v49  ;;  %v7285_v49 = vrot.slane %v7283_v60, 4  ;;  %v7288_v35 = vrot.slane %v7286_v28, 5  ;;  %v15615_v6 = vrot.slane %v7292_v24, 5  ;;  %v7298_v11 = vrot.slane %v7296_v32, 4  ;;  %v13882_v13 = vld [vmem:[#allocation2 + $0x194] sm:$0x1] }
 0x267   : > { %12921 = vmatprep.subr.bf16.mxu0 %v13723_v45  ;;  %v17649_v14 = vcombine.low %v15437_v37, %v15446_v25  ;;  %v15625_v38 = vcombine.low %v7223_v61, %v7233_v20  ;;  %v11338_v56 = vcombine.low %v15594_v19, %v15607_v36  ;;  %v15631_v59 = vsel %vm14685_vm5, %v11290_v52, %v2595_v48  ;;  %v6877_v60 = vld [vmem:[#allocation2 + $0xfc] sm:$0xf] }
 0x268   : > { %12858 = vmatmul.mubr.bf16.gmra.mrb[12].mxu0 %v15461_v43  ;;  %v17648_v43 = vor.u32 %v17646_v33, %v17647_v12  ;;  %v7247_v16 = vsel %vm14502_vm2, %v7242_v0, %v15573_v34  ;;  %v7257_v37 = vsel %vm14502_vm2, %v7252_v46, %v7256_v41  ;;  %v15640_v25 = vsel %vm14685_vm5, %v2597_v50, %v2598_v58  ;;  %v6878_v41 = vld [vmem:[#allocation2 + $0x100] sm:$0xf]  ;;  %v6876_v58 = vld [vmem:[#allocation2 + $0xf8] sm:$0x1]  ;;  %v6881_v33 = vld [vmem:[#allocation2 + $0x10c] sm:$0xf] }
 0x269   : > { %12490 = vmatmul.mubr.bf16.gmra.mrb[44].mxu1 %v11332_v23  ;;  %12861 = vmatprep.mubr.bf16.mxu0 %v15527_v63  ;;  %v6873_v23 = vld [vmem:[#allocation2 + $0xd4] sm:$0x1]  ;;  %v6874_v63 = vld [vmem:[#allocation2 + $0xf0] sm:$0xf]  ;;  %v11291_v61 = vrot.slane %v2315_v51, 9  ;;  %v7271_v48 = vsel %vm14502_vm2, %v7266_v8, %v15577_v4  ;;  %v2604_v18 = vrot.slane %v2602_v2, 4  ;;  %v7289_v28 = vor.u32 %v7288_v35, %v7285_v49 }
 0x26a   : > { %v15620_v42 = vrot.slane %v17648_v43, 4  ;;  %12493 = vmatprep.mubr.bf16.mxu1 %v17649_v14  ;;  %12922 = vmatpush3.bf16.msra.mxu0 %v13723_v45  ;;  %v7281_v45 = vsel %vm14502_vm2, %v7276_v29, %v7280_v44  ;;  %v2605_v34 = vrot.slane %v13882_v13, 5  ;;  %v7299_v24 = vor.u32 %v7298_v11, %v15615_v6  ;;  %v6893_v19 = vld [vmem:[#allocation2 + $0x13c] sm:$0xf] }
 0x26b   : > { %12923 = vmatprep.subr.bf16.mxu0 %v13728_v1  ;;  %v7302_v32 = vshll.u32 %v6873_v23, 16  ;;  %v7307_v20 = vshrl.u32 %v6874_v63, 16  ;;  %v11339_v52 = vcombine.low %v15631_v59, %v15640_v25  ;;  %v7310_v0 = vshll.u32 %v6874_v63, 16 }
 0x26c   : > { %v7316_v46 = vshll.u32 %v6875_v53, 16  ;;  %v7320_v50 = vshrl.u32 %v6875_v53, 16  ;;  %v15650_v4 = vcombine.low %v7247_v16, %v7257_v37  ;;  %v15654_v9 = vsel %vm14685_vm5, %v11291_v61, %v2602_v2  ;;  %v6884_v37 = vld [vmem:[#allocation2 + $0x118] sm:$0xf]  ;;  %v6879_v61 = vld [vmem:[#allocation2 + $0x104] sm:$0x1] }
 0x26d   : > { %v7331_v8 = vshrl.u32 %v6877_v60, 16  ;;  %v7334_v29 = vshll.u32 %v6877_v60, 16  ;;  %v15657_v44 = vcombine.low %v7271_v48, %v7281_v45  ;;  %v15661_v51 = vsel %vm14685_vm5, %v2604_v18, %v2605_v34 }
 0x26e   : > { %12924 = vmatpush3.bf16.msra.mxu0 %v13728_v1  ;;  %v7340_v55 = vshll.u32 %v6878_v41, 16  ;;  %v7344_v49 = vshrl.u32 %v6878_v41, 16  ;;  %v6880_v1 = vld [vmem:[#allocation2 + $0x108] sm:$0xf]  ;;  %v15667_v2 = vrot.slane %v7289_v28, 4  ;;  %v15669_v35 = vrot.slane %v7299_v24, 4 }
 0x26f   : > { %v7309_v11 = vrot.slane %v7307_v20, 4  ;;  %v7312_v43 = vrot.slane %v7310_v0, 5  ;;  %v15676_v14 = vrot.slane %v7316_v46, 5  ;;  %v7322_v23 = vrot.slane %v7320_v50, 4 }
 0x270   : > { %12862 = vmatmul.mubr.bf16.gmra.mrb[16].mxu0 %v15531_v40  ;;  %v15671_v40 = vrot.slane %v7302_v32, 5  ;;  %v7326_v47 = vshll.u32 %v6876_v58, 16  ;;  %v7355_v63 = vshrl.u32 %v6880_v1, 16  ;;  %v7358_v16 = vshll.u32 %v6880_v1, 16  ;;  %v6886_v32 = vld [vmem:[#allocation2 + $0x120] sm:$0xf] }
 0x271   : > { %12494 = vmatmul.mubr.bf16.gmra.mrb[48].mxu1 %v11334_v17  ;;  %12865 = vmatprep.mubr.bf16.mxu0 %v15537_v15  ;;  %v7333_v17 = vrot.slane %v7331_v8, 4  ;;  %v7336_v15 = vrot.slane %v7334_v29, 5  ;;  %v15678_v53 = vrot.slane %v7340_v55, 5  ;;  %v7346_v48 = vrot.slane %v7344_v49, 4  ;;  %v6882_v58 = vld [vmem:[#allocation2 + $0x110] sm:$0x1] }
 0x272   : > { %12497 = vmatprep.mubr.bf16.mxu1 %v11335_v21  ;;  %v7364_v45 = vshll.u32 %v6881_v33, 16  ;;  %v7368_v18 = vshrl.u32 %v6881_v33, 16  ;;  %v7295_v22 = vsel %vm14502_vm2, %v15667_v2, %v15615_v6  ;;  %v7305_v5 = vsel %vm14502_vm2, %v15669_v35, %v15671_v40  ;;  %v6887_v1 = vld [vmem:[#allocation2 + $0x124] sm:$0xf] }
 0x273   : > { %v7379_v21 = vshrl.u32 %v6883_v7, 16  ;;  %v7382_v13 = vshll.u32 %v6883_v7, 16  ;;  %v7313_v34 = vor.u32 %v7312_v43, %v7309_v11  ;;  %v7323_v60 = vor.u32 %v7322_v23, %v15676_v14 }
 0x274   : > { %v7388_v28 = vshll.u32 %v6884_v37, 16  ;;  %v7392_v24 = vshrl.u32 %v6884_v37, 16  ;;  %v7337_v20 = vor.u32 %v7336_v15, %v7333_v17  ;;  %v7350_v41 = vshll.u32 %v6879_v61, 16 }
 0x275   : > { %v7357_v0 = vrot.slane %v7355_v63, 4  ;;  %v7360_v46 = vrot.slane %v7358_v16, 5  ;;  %v7328_v6 = vrot.slane %v7326_v47, 5  ;;  %v7347_v50 = vor.u32 %v7346_v48, %v15678_v53  ;;  %v6889_v48 = vld [vmem:[#allocation2 + $0x12c] sm:$0xf] }
 0x276   : > { %v15691_v8 = vrot.slane %v7364_v45, 5  ;;  %v7370_v29 = vrot.slane %v7368_v18, 4  ;;  %v7381_v55 = vrot.slane %v7379_v21, 4  ;;  %v7384_v49 = vrot.slane %v7382_v13, 5  ;;  %v6890_v21 = vld [vmem:[#allocation2 + $0x130] sm:$0xf] }
 0x277   : > { %v7403_v2 = vshrl.u32 %v6886_v32, 16  ;;  %v7406_v35 = vshll.u32 %v6886_v32, 16  ;;  %v7324_v40 = vrot.slane %v7323_v60, 4  ;;  %v15700_v11 = vrot.slane %v7388_v28, 5  ;;  %v6888_v60 = vld [vmem:[#allocation2 + $0x128] sm:$0x1] }
 0x278   : > { %12866 = vmatmul.mubr.bf16.gmra.mrb[20].mxu0 %v15585_v10  ;;  %v7314_v10 = vrot.slane %v7313_v34, 4  ;;  %v7394_v33 = vrot.slane %v7392_v24, 4  ;;  %v7338_v43 = vrot.slane %v7337_v20, 4  ;;  %v7352_v23 = vrot.slane %v7350_v41, 5  ;;  %v6892_v34 = vld [vmem:[#allocation2 + $0x138] sm:$0xf] }
 0x279   : > { %12498 = vmatmul.mubr.bf16.gmra.mrb[52].mxu1 %v11336_v30  ;;  %12869 = vmatprep.mubr.bf16.mxu0 %v15625_v38  ;;  %v7361_v31 = vor.u32 %v7360_v46, %v7357_v0  ;;  %v7374_v26 = vshll.u32 %v6882_v58, 16  ;;  %v6885_v30 = vld [vmem:[#allocation2 + $0x11c] sm:$0x1]  ;;  %v7348_v38 = vrot.slane %v7347_v50, 4  ;;  %v7371_v47 = vor.u32 %v7370_v29, %v15691_v8 }
 0x27a   : > { %12501 = vmatprep.mubr.bf16.mxu1 %v11337_v27  ;;  %v7412_v7 = vshll.u32 %v6887_v1, 16  ;;  %v7416_v17 = vshrl.u32 %v6887_v1, 16  ;;  %v11340_v15 = vcombine.low %v15654_v9, %v15661_v51  ;;  %v7385_v39 = vor.u32 %v7384_v49, %v7381_v55  ;;  %v3885_v49 = vld [vmem:[#allocation2 + $0xf0] sm:$0xf] }
 0x27b   : > { %v7405_v62 = vrot.slane %v7403_v2, 4  ;;  %v7408_v27 = vrot.slane %v7406_v35, 5  ;;  %v11641_v63 = vcombine.low %v7295_v22, %v7305_v5  ;;  %v7319_v16 = vsel %vm14502_vm2, %v7314_v10, %v15676_v14  ;;  %v13711_v1 = vld [vmem:[#allocation2 + $0xc] sm:$0xff]  }
 0x27c   : > { %v7395_v37 = vor.u32 %v7394_v33, %v15700_v11  ;;  %v7398_v61 = vshll.u32 %v6885_v30, 16  ;;  %v7329_v45 = vsel %vm14502_vm2, %v7324_v40, %v7328_v6  ;;  %v7343_v18 = vsel %vm14502_vm2, %v7338_v43, %v15678_v53 }
 0x27d   : > { %v7362_v9 = vrot.slane %v7361_v31, 4  ;;  %v7376_v51 = vrot.slane %v7374_v26, 5  ;;  %v7353_v22 = vsel %vm14502_vm2, %v7348_v38, %v7352_v23  ;;  %v7372_v14 = vrot.slane %v7371_v47, 4  ;;  %v6895_v31 = vld [vmem:[#allocation2 + $0x144] sm:$0xf] }
 0x27e   : > { %v15717_v5 = vrot.slane %v7412_v7, 5  ;;  %v7418_v13 = vrot.slane %v7416_v17, 4  ;;  %v7386_v53 = vrot.slane %v7385_v39, 4  ;;  %v7409_v28 = vor.u32 %v7408_v27, %v7405_v62  ;;  %v6896_v27 = vld [vmem:[#allocation2 + $0x148] sm:$0xf] }
 0x27f   : > { %v7427_v24 = vshrl.u32 %v6889_v48, 16  ;;  %v7430_v32 = vshll.u32 %v6889_v48, 16  ;;  %v7400_v20 = vrot.slane %v7398_v61, 5  ;;  %v7436_v41 = vshll.u32 %v6890_v21, 16  ;;  %v6898_v61 = vld [vmem:[#allocation2 + $0x150] sm:$0xf] }
 0x280   : > { %12870 = vmatmul.mubr.bf16.gmra.mrb[24].mxu0 %v15650_v4  ;;  %v7396_v4 = vrot.slane %v7395_v37, 4  ;;  %v7440_v0 = vshrl.u32 %v6890_v21, 16  ;;  %v11642_v46 = vcombine.low %v7319_v16, %v7329_v45  ;;  %v15726_v6 = vcombine.low %v7343_v18, %v7353_v22  ;;  %v13712_v21 = vld [vmem:[#allocation2 + $0x18] sm:$0xff]  }
 0x281   : > { %12502 = vmatmul.mubr.bf16.gmra.mrb[56].mxu1 %v11338_v56  ;;  %12873 = vmatprep.mubr.bf16.mxu0 %v15657_v44  ;;  %v7451_v36 = vshrl.u32 %v6892_v34, 16  ;;  %v7454_v56 = vshll.u32 %v6892_v34, 16  ;;  %v7367_v44 = vsel %vm14502_vm2, %v7362_v9, %v15691_v8  ;;  %v7377_v50 = vsel %vm14502_vm2, %v7372_v14, %v7376_v51  ;;  %v6891_v8 = vld [vmem:[#allocation2 + $0x134] sm:$0x1]  ;;  %v13714_v34 = vld [vmem:[#allocation2 + $0x24] sm:$0xff]  }
 0x282   : > { %12505 = vmatprep.mubr.bf16.mxu1 %v11339_v52  ;;  %v7419_v59 = vor.u32 %v7418_v13, %v15717_v5  ;;  %v7422_v25 = vshll.u32 %v6888_v60, 16  ;;  %v7391_v52 = vsel %vm14502_vm2, %v7386_v53, %v15700_v11  ;;  %v15737_v58 = vrot.slane %v7409_v28, 4  ;;  %v6899_v60 = vld [vmem:[#allocation2 + $0x154] sm:$0xf] }
 0x283   : > { %v7429_v29 = vrot.slane %v7427_v24, 4  ;;  %v7432_v55 = vrot.slane %v7430_v32, 5  ;;  %v7401_v2 = vsel %vm14502_vm2, %v7396_v4, %v7400_v20  ;;  %v15741_v35 = vrot.slane %v7436_v41, 5 }
 0x284   : > { %v7442_v10 = vrot.slane %v7440_v0, 4  ;;  %v7460_v40 = vshll.u32 %v6893_v19, 16  ;;  %v7453_v33 = vrot.slane %v7451_v36, 4  ;;  %v7456_v43 = vrot.slane %v7454_v56, 5 }
 0x285   : > { %v7464_v23 = vshrl.u32 %v6893_v19, 16  ;;  %v4339_v26 = vshrl.u32 %v3885_v49, 16  ;;  %v11644_v11 = vcombine.low %v7367_v44, %v7377_v50  ;;  %v15743_v30 = vrot.slane %v7419_v59, 4  ;;  %v6897_v44 = vld [vmem:[#allocation2 + $0x14c] sm:$0x1] }
 0x286   : > { %v15745_v38 = vrot.slane %v7422_v25, 5  ;;  %v4342_v47 = vshll.u32 %v3885_v49, 16  ;;  %v15747_v7 = vcombine.low %v7391_v52, %v7401_v2  ;;  %v7415_v17 = vsel %vm14502_vm2, %v15737_v58, %v15717_v5 }
 0x287   : > { %v7433_v39 = vor.u32 %v7432_v55, %v7429_v29  ;;  %v7446_v62 = vshll.u32 %v6891_v8, 16  ;;  %v15754_v16 = vrot.slane %v7460_v40, 5  ;;  %v7475_v37 = vshrl.u32 %v6895_v31, 16  ;;  %v13884_v40 = vld [vmem:[%s14506_s15 + $0x108] sm:$0xff]  }
 0x288   : > { %12874 = vmatmul.mubr.bf16.gmra.mrb[28].mxu0 %v11641_v63  ;;  %v7443_v63 = vor.u32 %v7442_v10, %v15741_v35  ;;  %v4341_v48 = vrot.slane %v4339_v26, 4  ;;  %v7457_v45 = vor.u32 %v7456_v43, %v7453_v33  ;;  %v7466_v18 = vrot.slane %v7464_v23, 4 }
 0x289   : > { %12506 = vmatmul.mubr.bf16.gmra.mrb[60].mxu1 %v11340_v15  ;;  %12877 = vmatprep.mubr.bf16.mxu0 %v11642_v46  ;;  %v6894_v15 = vld [vmem:[#allocation2 + $0x140] sm:$0x1]  ;;  %v7478_v9 = vshll.u32 %v6895_v31, 16  ;;  %v4344_v51 = vrot.slane %v4342_v47, 5  ;;  %v7425_v22 = vsel %vm14502_vm2, %v15743_v30, %v15745_v38  ;;  %v7484_v14 = vshll.u32 %v6896_v27, 16  ;;  %v13715_v47 = vld [vmem:[#allocation2 + $0x30] sm:$0xff]  }
 0x28a   : > { %12525 = vmatprep.mubr.bf16.mxu1 %v13711_v1  ;;  %v7488_v5 = vshrl.u32 %v6896_v27, 16  ;;  %v4361_v13 = vsel %vm14502_vm2, %v15620_v42, %v15222_v54  ;;  %v15764_v53 = vrot.slane %v7446_v62, 5  ;;  %v7499_v28 = vshrl.u32 %v6898_v61, 16  ;;  %v6901_v46 = vld [vmem:[#allocation2 + $0x15c] sm:$0xf]  ;;  %v13883_v1 = vld [vmem:[%s14506_s15 + $0x100] sm:$0xff]  }
 0x28b   : > { %v7502_v24 = vshll.u32 %v6898_v61, 16  ;;  %v4345_v32 = vor.u32 %v4344_v51, %v4341_v48  ;;  %v15766_v4 = vrot.slane %v7433_v39, 4  ;;  %v15768_v20 = vrot.slane %v7443_v63, 4  ;;  %v6902_v42 = vld [vmem:[#allocation2 + $0x160] sm:$0xf] }
 0x28c   : > { %v7470_v41 = vshll.u32 %v6894_v15, 16  ;;  %v7477_v0 = vrot.slane %v7475_v37, 4  ;;  %v15770_v19 = vrot.slane %v7457_v45, 4  ;;  %v7467_v36 = vor.u32 %v7466_v18, %v15754_v16  ;;  %v6900_v30 = vld [vmem:[#allocation2 + $0x158] sm:$0x1]  ;;  %v13716_v39 = vld [vmem:[#allocation2 + $0x3c] sm:$0xff]  }
 0x28d   : > { %v7480_v54 = vrot.slane %v7478_v9, 5  ;;  %v4346_v56 = vrot.slane %v4345_v32, 4  ;;  %v15774_v50 = vrot.slane %v7484_v14, 5  ;;  %v7490_v59 = vrot.slane %v7488_v5, 4  ;;  %v6904_v37 = vld [vmem:[#allocation2 + $0x168] sm:$0xf] }
 0x28e   : > { %v7508_v25 = vshll.u32 %v6899_v60, 16  ;;  %v7512_v52 = vshrl.u32 %v6899_v60, 16  ;;  %v7501_v58 = vrot.slane %v7499_v28, 4  ;;  %v7504_v29 = vrot.slane %v7502_v24, 5  ;;  %v6905_v18 = vld [vmem:[#allocation2 + $0x16c] sm:$0xf] }
 0x28f   : > { %v7523_v55 = vshrl.u32 %v6901_v46, 16  ;;  %v4351_v49 = vsel %vm14502_vm2, %v4346_v56, %v17647_v12  ;;  %v7532_v2 = vshll.u32 %v6902_v42, 16  ;;  %v7536_v8 = vshrl.u32 %v6902_v42, 16  ;;  %v13717_v42 = vld [vmem:[#allocation2 + $0x48] sm:$0xff]  }
 0x290   : > { %12878 = vmatmul.mubr.bf16.gmra.mrb[32].mxu0 %v15726_v6  ;;  %v7526_v6 = vshll.u32 %v6901_v46, 16  ;;  %v15780_v10 = vcombine.low %v4351_v49, %v4361_v13  ;;  %v7468_v33 = vrot.slane %v7467_v36, 4  ;;  %v7472_v43 = vrot.slane %v7470_v41, 5  ;;  %v6908_v36 = vld [vmem:[#allocation2 + $0x178] sm:$0xf] }
 0x291   : > { %12526 = vmatmul.mubr.bf16.vlgmr.msra.gmra.mrb[0].mxu1 %v13712_v21  ;;  %12881 = vmatprep.mubr.bf16.mxu0 %v11644_v11  ;;  %v7481_v23 = vor.u32 %v7480_v54, %v7477_v0  ;;  %v7494_v31 = vshll.u32 %v6897_v44, 16  ;;  %v11646_v26 = vcombine.low %v7415_v17, %v7425_v22  ;;  %v7491_v11 = vor.u32 %v7490_v59, %v15774_v50  ;;  %v13885_v22 = vld [vmem:[%s14506_s15 + $0x110] sm:$0xff]   ;;  %v13886_v54 = vld [vmem:[%s14506_s15 + $0x118] sm:$0xff]   ;;  %v6911_v49 = vld [vmem:[#allocation2 + $0x184] sm:$0xf] }
 0x292   : > { %12997 = vmatpush3.bf16.msra.mxu1 %v13883_v1  ;;  %12529 = vmatprep.mubr.bf16.mxu1 %v13714_v34  ;;  %v15784_v38 = vrot.slane %v7508_v25, 5  ;;  %v7514_v12 = vrot.slane %v7512_v52, 4  ;;  %v7439_v62 = vsel %vm14502_vm2, %v15766_v4, %v15741_v35  ;;  %v7449_v27 = vsel %vm14502_vm2, %v15768_v20, %v15764_v53  ;;  %v6907_v20 = vld [vmem:[#allocation2 + $0x174] sm:$0xf]  ;;  %v6910_v52 = vld [vmem:[#allocation2 + $0x180] sm:$0xf] }
 0x293   : > { %12990 = vmatprep.subr.bf16.mxu1 %v13884_v40  ;;  %v7463_v17 = vsel %vm14502_vm2, %v15770_v19, %v15754_v16  ;;  %v7505_v63 = vor.u32 %v7504_v29, %v7501_v58  ;;  %v7525_v61 = vrot.slane %v7523_v55, 4  ;;  %v7528_v48 = vrot.slane %v7526_v6, 5  ;;  %v6903_v16 = vld [vmem:[#allocation2 + $0x164] sm:$0x1]  ;;  %v6906_v19 = vld [vmem:[#allocation2 + $0x170] sm:$0x1] }
 0x294   : > { %v15798_v15 = vrot.slane %v7532_v2, 5  ;;  %v7538_v45 = vrot.slane %v7536_v8, 4  ;;  %v7473_v35 = vsel %vm14502_vm2, %v7468_v33, %v7472_v43  ;;  %v15802_v9 = vrot.slane %v7481_v23, 4  ;;  %v13719_v1 = vld [vmem:[#allocation2 + $0x54] sm:$0xff]  }
 0x295   : > { %v15804_v51 = vrot.slane %v7494_v31, 5  ;;  %v7518_v21 = vshll.u32 %v6900_v30, 16  ;;  %v7492_v14 = vrot.slane %v7491_v11, 4  ;;  %v7515_v5 = vor.u32 %v7514_v12, %v15784_v38 }
 0x296   : > { %12998 = vmatpush3.bf16.msra.mxu1 %v13884_v40  ;;  %v7547_v13 = vshrl.u32 %v6904_v37, 16  ;;  %v7550_v34 = vshll.u32 %v6904_v37, 16  ;;  %v7556_v53 = vshll.u32 %v6905_v18, 16  ;;  %v7560_v60 = vshrl.u32 %v6905_v18, 16 }
 0x297   : > { %12991 = vmatprep.subr.bf16.mxu1 %v13885_v22  ;;  %v7506_v28 = vrot.slane %v7505_v63, 4  ;;  %v7529_v24 = vor.u32 %v7528_v48, %v7525_v61  ;;  %v7539_v32 = vor.u32 %v7538_v45, %v15798_v15  ;;  %v7542_v4 = vshll.u32 %v6903_v16, 16  ;;  %v6909_v61 = vld [vmem:[#allocation2 + $0x17c] sm:$0x1]  ;;  %v6912_v16 = vld [vmem:[#allocation2 + $0x188] sm:$0x1] }
 0x298   : > { %12882 = vmatmul.mubr.bf16.gmra.mrb[36].mxu0 %v15747_v7  ;;  %v11647_v41 = vcombine.low %v7439_v62, %v7449_v27  ;;  %v11648_v7 = vcombine.low %v7463_v17, %v7473_v35  ;;  %v7487_v0 = vsel %vm14502_vm2, %v15802_v9, %v15774_v50  ;;  %v7520_v46 = vrot.slane %v7518_v21, 5  ;;  %v6913_v9 = vld [vmem:[#allocation2 + $0x18c] sm:$0xf] }
 0x299   : > { %12530 = vmatmul.mubr.bf16.gmra.mrb[4].mxu1 %v13715_v47  ;;  %12885 = vmatprep.mubr.bf16.mxu0 %v11646_v26  ;;  %v7497_v56 = vsel %vm14502_vm2, %v7492_v14, %v15804_v51  ;;  %v7516_v44 = vrot.slane %v7515_v5, 4  ;;  %v7549_v59 = vrot.slane %v7547_v13, 4  ;;  %v7552_v25 = vrot.slane %v7550_v34, 5  ;;  %v13887_v26 = vld [vmem:[%s14506_s15 + $0x120] sm:$0xff]   ;;  %v13888_v51 = vld [vmem:[%s14506_s15 + $0x128] sm:$0xff]  }
 0x29a   : > { %12533 = vmatprep.mubr.bf16.mxu1 %v13716_v39  ;;  %12999 = vmatpush3.bf16.msra.mxu1 %v13885_v22  ;;  %v15818_v58 = vrot.slane %v7556_v53, 5  ;;  %v7562_v29 = vrot.slane %v7560_v60, 4  ;;  %v7571_v55 = vshrl.u32 %v6907_v20, 16  ;;  %v7574_v50 = vshll.u32 %v6907_v20, 16 }
 0x29b   : > { %12992 = vmatprep.subr.bf16.mxu1 %v13886_v54  ;;  %v7511_v6 = vsel %vm14502_vm2, %v7506_v28, %v15784_v38  ;;  %v7530_v2 = vrot.slane %v7529_v24, 4  ;;  %v7540_v8 = vrot.slane %v7539_v32, 4  ;;  %v7544_v40 = vrot.slane %v7542_v4, 5  ;;  %v6914_v28 = vld [vmem:[#allocation2 + $0x190] sm:$0xf] }
 0x29c   : > { %v7580_v33 = vshll.u32 %v6908_v36, 16  ;;  %v7584_v43 = vshrl.u32 %v6908_v36, 16  ;;  %v7595_v23 = vshrl.u32 %v6910_v52, 16  ;;  %v7598_v31 = vshll.u32 %v6910_v52, 16  ;;  %v13721_v24 = vld [vmem:[#allocation2 + $0x6c] sm:$0xff]  }
 0x29d   : > { %v7521_v11 = vsel %vm14502_vm2, %v7516_v44, %v7520_v46  ;;  %v7566_v30 = vshll.u32 %v6906_v19, 16  ;;  %v7604_v12 = vshll.u32 %v6911_v49, 16  ;;  %v7608_v47 = vshrl.u32 %v6911_v49, 16  ;;  %v6917_v46 = vld [vmem:[#allocation2 + $0x19c] sm:$0xf]  ;;  %v13889_v19 = vld [vmem:[%s14506_s15 + $0x130] sm:$0xff]  }
 0x29e   : > { %13000 = vmatpush3.bf16.msra.mxu1 %v13886_v54  ;;  %v7553_v38 = vor.u32 %v7552_v25, %v7549_v59  ;;  %v7563_v39 = vor.u32 %v7562_v29, %v15818_v58  ;;  %v7573_v62 = vrot.slane %v7571_v55, 4  ;;  %v7576_v27 = vrot.slane %v7574_v50, 5 }
 0x29f   : > { %12993 = vmatprep.subr.bf16.mxu1 %v13887_v26  ;;  %v11649_v17 = vcombine.low %v7487_v0, %v7497_v56  ;;  %v7535_v63 = vsel %vm14502_vm2, %v7530_v2, %v15798_v15  ;;  %v7545_v37 = vsel %vm14502_vm2, %v7540_v8, %v7544_v40  ;;  %v15832_v48 = vrot.slane %v7580_v33, 5  ;;  %v13720_v15 = vld [vmem:[#allocation2 + $0x60] sm:$0xff]   ;;  %v6916_v0 = vld [vmem:[#allocation2 + $0x198] sm:$0xf] }
 0x2a0   : > { %12886 = vmatmul.mubr.bf16.gmra.mrb[40].mxu0 %v11647_v41  ;;  %v7586_v45 = vrot.slane %v7584_v43, 4  ;;  %v7597_v18 = vrot.slane %v7595_v23, 4  ;;  %v7600_v35 = vrot.slane %v7598_v31, 5  ;;  %v11650_v21 = vcombine.low %v7511_v6, %v7521_v11  ;;  %v13890_v40 = vld [vmem:[%s14506_s15 + $0x138] sm:$0xff]  }
 0x2a1   : > { %12534 = vmatmul.mubr.bf16.gmra.mrb[8].mxu1 %v13717_v42  ;;  %12889 = vmatprep.mubr.bf16.mxu0 %v11648_v7  ;;  %v7568_v22 = vrot.slane %v7566_v30, 5  ;;  %v15835_v14 = vrot.slane %v7604_v12, 5  ;;  %v7610_v5 = vrot.slane %v7608_v47, 4  ;;  %v7554_v13 = vrot.slane %v7553_v38, 4  ;;  %v13722_v33 = vld [vmem:[#allocation2 + $0x78] sm:$0xff]  }
 0x2a2   : > { %12537 = vmatprep.mubr.bf16.mxu1 %v13719_v1  ;;  %13001 = vmatpush3.bf16.msra.mxu1 %v13887_v26  ;;  %v7564_v34 = vrot.slane %v7563_v39, 4  ;;  %v7577_v53 = vor.u32 %v7576_v27, %v7573_v62  ;;  %v7590_v60 = vshll.u32 %v6909_v61, 16  ;;  %v11651_v32 = vcombine.low %v7535_v63, %v7545_v37  ;;  %v13724_v26 = vld [vmem:[#allocation2 + $0x84] sm:$0xff]   ;;  %v6915_v30 = vld [vmem:[#allocation2 + $0x194] sm:$0x1] }
 0x2a3   : > { %12994 = vmatprep.subr.bf16.mxu1 %v13888_v51  ;;  %v7587_v4 = vor.u32 %v7586_v45, %v15832_v48  ;;  %v7601_v20 = vor.u32 %v7600_v35, %v7597_v18  ;;  %v7614_v41 = vshll.u32 %v6912_v16, 16  ;;  %v7619_v7 = vshrl.u32 %v6913_v9, 16  ;;  %v6919_v12 = vld [vmem:[#allocation2 + $0x1a4] sm:$0xf]  ;;  %v6920_v27 = vld [vmem:[#allocation2 + $0x1a8] sm:$0xf] }
 0x2a4   : > { %v7611_v36 = vor.u32 %v7610_v5, %v15835_v14  ;;  %v7622_v54 = vshll.u32 %v6913_v9, 16  ;;  %v7628_v42 = vshll.u32 %v6914_v28, 16  ;;  %v7632_v56 = vshrl.u32 %v6914_v28, 16  ;;  %v6918_v61 = vld [vmem:[#allocation2 + $0x1a0] sm:$0x1]  ;;  %v13725_v28 = vld [vmem:[#allocation2 + $0x90] sm:$0xff]  }
 0x2a5   : > { %v7559_v44 = vsel %vm14502_vm2, %v7554_v13, %v15818_v58  ;;  %v7569_v59 = vsel %vm14502_vm2, %v7564_v34, %v7568_v22  ;;  %v7578_v25 = vrot.slane %v7577_v53, 4  ;;  %v7592_v52 = vrot.slane %v7590_v60, 5 }
 0x2a6   : > { %13002 = vmatpush3.bf16.msra.mxu1 %v13888_v51  ;;  %v7643_v29 = vshrl.u32 %v6916_v0, 16  ;;  %v7646_v55 = vshll.u32 %v6916_v0, 16  ;;  %v7652_v50 = vshll.u32 %v6917_v46, 16  ;;  %v7656_v49 = vshrl.u32 %v6917_v46, 16 }
 0x2a7   : > { %12995 = vmatprep.subr.bf16.mxu1 %v13889_v19  ;;  %v7588_v1 = vrot.slane %v7587_v4, 4  ;;  %v7602_v6 = vrot.slane %v7601_v20, 4  ;;  %v7616_v2 = vrot.slane %v7614_v41, 5  ;;  %v7621_v8 = vrot.slane %v7619_v7, 4  ;;  %v13726_v41 = vld [vmem:[#allocation2 + $0x9c] sm:$0xff]  }
 0x2a8   : > { %12890 = vmatmul.mubr.bf16.gmra.mrb[44].mxu0 %v11649_v17  ;;  %v7612_v43 = vrot.slane %v7611_v36, 4  ;;  %v7624_v58 = vrot.slane %v7622_v54, 5  ;;  %v7630_v23 = vrot.slane %v7628_v42, 5  ;;  %v7634_v31 = vrot.slane %v7632_v56, 4 }
 0x2a9   : > { %12538 = vmatmul.mubr.bf16.gmra.mrb[12].mxu1 %v13720_v15  ;;  %12893 = vmatprep.mubr.bf16.mxu0 %v11650_v21  ;;  %v11652_v11 = vcombine.low %v7559_v44, %v7569_v59  ;;  %v7645_v47 = vrot.slane %v7643_v29, 4  ;;  %v7648_v38 = vrot.slane %v7646_v55, 5  ;;  %v7654_v39 = vrot.slane %v7652_v50, 5  ;;  %v8239_v55 = vld [vmem:[#allocation2 + $0x18] sm:$0xe] }
 0x2aa   : > { %12541 = vmatprep.mubr.bf16.mxu1 %v13721_v24  ;;  %13003 = vmatpush3.bf16.msra.mxu1 %v13889_v19  ;;  %v7658_v62 = vrot.slane %v7656_v49, 4  ;;  %v7583_v17 = vsel %vm14502_vm2, %v7578_v25, %v15832_v48  ;;  %v7593_v63 = vsel %vm14502_vm2, %v7588_v1, %v7592_v52  ;;  %v7607_v37 = vsel %vm14502_vm2, %v7602_v6, %v15835_v14  ;;  %v6921_v19 = vld [vmem:[#allocation2 + $0x1ac] sm:$0x1]  ;;  %v13891_v52 = vld [vmem:[#allocation2 + $0x1c] sm:$0xf] }
 0x2ab   : > { %12996 = vmatprep.subr.bf16.mxu1 %v13890_v40  ;;  %v7617_v45 = vsel %vm14502_vm2, %v7612_v43, %v7616_v2  ;;  %v7625_v18 = vor.u32 %v7624_v58, %v7621_v8  ;;  %v7635_v35 = vor.u32 %v7634_v31, %v7630_v23  ;;  %v7638_v9 = vshll.u32 %v6915_v30, 16  ;;  %v13727_v49 = vld [vmem:[#allocation2 + $0xa8] sm:$0xff]   ;;  %v13892_v58 = vld [vmem:[#allocation2 + $0x20] sm:$0x1] }
 0x2ac   : > { %v7667_v51 = vshrl.u32 %v6919_v12, 16  ;;  %v7670_v21 = vshll.u32 %v6919_v12, 16  ;;  %v7676_v48 = vshll.u32 %v6920_v27, 16  ;;  %v7680_v22 = vshrl.u32 %v6920_v27, 16  ;;  %v13893_v31 = vld [vmem:[#allocation2 + $0x28] sm:$0xf] }
 0x2ad   : > { %v7649_v16 = vor.u32 %v7648_v38, %v7645_v47  ;;  %v7659_v5 = vor.u32 %v7658_v62, %v7654_v39  ;;  %v7662_v15 = vshll.u32 %v6918_v61, 16  ;;  %v11653_v13 = vcombine.low %v7583_v17, %v7593_v63  ;;  %v8240_v12 = vld [vmem:[#allocation2 + $0x24] sm:$0xe]  ;;  %v8241_v27 = vld [vmem:[#allocation2 + $0x30] sm:$0xe] }
 0x2ae   : > { %13004 = vmatpush3.bf16.msra.mxu1 %v13890_v40  ;;  %v11654_v14 = vcombine.low %v7607_v37, %v7617_v45  ;;  %v7626_v34 = vrot.slane %v7625_v18, 4  ;;  %v7636_v53 = vrot.slane %v7635_v35, 4  ;;  %v7640_v60 = vrot.slane %v7638_v9, 5  ;;  %v13729_v40 = vld [vmem:[#allocation2 + $0xb4] sm:$0xff]   ;;  %v13895_v61 = vld [vmem:[#allocation2 + $0x2c] sm:$0x1] }
 0x2af   : > { %v7669_v24 = vrot.slane %v7667_v51, 4  ;;  %v7678_v4 = vrot.slane %v7676_v48, 5  ;;  %v7682_v20 = vrot.slane %v7680_v22, 4  ;;  %v7650_v7 = vrot.slane %v7649_v16, 4  ;;  %v13730_v18 = vld [vmem:[#allocation2 + $0xc0] sm:$0xff]  }
 0x2b0   : > { %12894 = vmatmul.mubr.bf16.gmra.mrb[48].mxu0 %v11651_v32  ;;  %v7672_v32 = vrot.slane %v7670_v21, 5  ;;  %v7660_v0 = vrot.slane %v7659_v5, 4  ;;  %v7664_v46 = vrot.slane %v7662_v15, 5  ;;  %v7631_v36 = vsel %vm14502_vm2, %v7626_v34, %v7630_v23  ;;  %v13731_v9 = vld [vmem:[#allocation2 + $0xe4] sm:$0xff]   ;;  %v13896_v48 = vld [vmem:[#allocation2 + $0x38] sm:$0x1] }
 0x2b1   : > { %12542 = vmatmul.mubr.bf16.gmra.mrb[16].mxu1 %v13722_v33  ;;  %12897 = vmatprep.mubr.bf16.mxu0 %v11652_v11  ;;  %v7641_v54 = vsel %vm14502_vm2, %v7636_v53, %v7640_v60  ;;  %v7683_v56 = vor.u32 %v7682_v20, %v7678_v4  ;;  %v7686_v44 = vshll.u32 %v6921_v19, 16  ;;  %v7655_v59 = vsel %vm14502_vm2, %v7650_v7, %v7654_v39  ;;  %v13894_v39 = vld [vmem:[#allocation2 + $0x34] sm:$0xf]  ;;  %v8242_v15 = vld [vmem:[#allocation2 + $0x3c] sm:$0xe] }
 0x2b2   : > { %12545 = vmatprep.mubr.bf16.mxu1 %v13724_v26  ;;  %v7673_v42 = vor.u32 %v7672_v32, %v7669_v24  ;;  %v7665_v25 = vsel %vm14502_vm2, %v7660_v0, %v7664_v46  ;;  %v8369_v29 = vrot.slane %v13891_v52, 5  ;;  %v11655_v50 = vcombine.low %v7631_v36, %v7641_v54  ;;  %v8243_v34 = vld [vmem:[#allocation2 + $0x48] sm:$0xe]  ;;  %v13898_v53 = vld [vmem:[#allocation2 + $0x4c] sm:$0xf] }
 0x2b3   : > { %v11656_v1 = vcombine.low %v7655_v59, %v7665_v25  ;;  %v7684_v2 = vrot.slane %v7683_v56, 4  ;;  %v7688_v8 = vrot.slane %v7686_v44, 5  ;;  %v11666_v33 = vrot.slane %v8239_v55, 9  ;;  %v13899_v24 = vld [vmem:[#allocation2 + $0x58] sm:$0xf] }
 0x2b4   : > { %v7674_v6 = vrot.slane %v7673_v42, 4  ;;  %v8371_v43 = vrot.slane %v8369_v29, 4  ;;  %v8372_v23 = vrot.slane %v13892_v58, 5  ;;  %v8376_v26 = vrot.slane %v13893_v31, 5  ;;  %v13900_v7 = vld [vmem:[#allocation2 + $0x64] sm:$0xf] }
 0x2b5   : > { %v7689_v30 = vsel %vm14502_vm2, %v7684_v2, %v7688_v8  ;;  %v8370_v47 = vsel %vm14685_vm5, %v11666_v33, %v8369_v29  ;;  %v8383_v62 = vrot.slane %v13894_v39, 5  ;;  %v11667_v63 = vrot.slane %v8240_v12, 9  ;;  %v13901_v36 = vld [vmem:[#allocation2 + $0x44] sm:$0x1]  ;;  %v13902_v59 = vld [vmem:[#allocation2 + $0x50] sm:$0x1] }
 0x2b6   : > { %v7679_v11 = vsel %vm14502_vm2, %v7674_v6, %v7678_v4  ;;  %v8373_v38 = vsel %vm14685_vm5, %v8371_v43, %v8372_v23  ;;  %v8378_v37 = vrot.slane %v8376_v26, 4  ;;  %v8379_v45 = vrot.slane %v13895_v61, 5  ;;  %v13732_v29 = vld [vmem:[#allocation2 + $0xf0] sm:$0xff]   ;;  %v13733_v2 = vld [vmem:[#allocation2 + $0xfc] sm:$0xff]   ;;  %v8246_v43 = vld [vmem:[#allocation2 + $0x6c] sm:$0xe] }
 0x2b7   : > { %v11657_v17 = vcombine.low %v7679_v11, %v7689_v30  ;;  %v11715_v35 = vcombine.low %v8370_v47, %v8373_v38  ;;  %v11668_v51 = vrot.slane %v8241_v27, 9  ;;  %v8385_v21 = vrot.slane %v8383_v62, 4  ;;  %v13905_v58 = vld [vmem:[#allocation2 + $0x70] sm:$0xf]  ;;  %v8247_v47 = vld [vmem:[#allocation2 + $0x78] sm:$0xe] }
 0x2b8   : > { %12898 = vmatmul.mubr.bf16.gmra.mrb[52].mxu0 %v11653_v13  ;;  %v8386_v22 = vrot.slane %v13896_v48, 5  ;;  %v8377_v16 = vsel %vm14685_vm5, %v11667_v63, %v8376_v26  ;;  %v8380_v5 = vsel %vm14685_vm5, %v8378_v37, %v8379_v45  ;;  %v13897_v13 = vld [vmem:[#allocation2 + $0x40] sm:$0xf]  ;;  %v8397_v60 = vrot.slane %v13898_v53, 5  ;;  %v8248_v38 = vld [vmem:[#allocation2 + $0x84] sm:$0xe] }
 0x2b9   : > { %12546 = vmatmul.mubr.bf16.gmra.mrb[20].mxu1 %v13725_v28  ;;  %12901 = vmatprep.mubr.bf16.mxu0 %v11654_v14  ;;  %v8390_v14 = vrot.slane %v13897_v13, 5  ;;  %v8244_v28 = vld [vmem:[#allocation2 + $0x54] sm:$0xe]  ;;  %v8404_v32 = vrot.slane %v13899_v24, 5  ;;  %v8384_v4 = vsel %vm14685_vm5, %v11668_v51, %v8383_v62  ;;  %v8411_v0 = vrot.slane %v13900_v7, 5 }
 0x2ba   : > { %12549 = vmatprep.mubr.bf16.mxu1 %v13726_v41  ;;  %v8387_v20 = vsel %vm14685_vm5, %v8385_v21, %v8386_v22  ;;  %v8245_v41 = vld [vmem:[#allocation2 + $0x60] sm:$0xe]  ;;  %v11716_v46 = vcombine.low %v8377_v16, %v8380_v5  ;;  %v11669_v19 = vrot.slane %v8242_v15, 9  ;;  %v8393_v54 = vrot.slane %v13901_v36, 5  ;;  %v13907_v45 = vld [vmem:[#allocation2 + $0x74] sm:$0x1] }
 0x2bb   : > { %v11670_v42 = vrot.slane %v8243_v34, 9  ;;  %v8392_v56 = vrot.slane %v8390_v14, 4  ;;  %v8399_v44 = vrot.slane %v8397_v60, 4  ;;  %v8400_v25 = vrot.slane %v13902_v59, 5  ;;  %v8249_v5 = vld [vmem:[#allocation2 + $0x90] sm:$0xe] }
 0x2bc   : > { %v11671_v52 = vrot.slane %v8244_v28, 9  ;;  %v11717_v55 = vcombine.low %v8384_v4, %v8387_v20  ;;  %v11672_v6 = vrot.slane %v8245_v41, 9  ;;  %v8413_v8 = vrot.slane %v8411_v0, 4  ;;  %v13734_v15 = vld [vmem:[#allocation2 + $0x108] sm:$0xff]   ;;  %v13909_v53 = vld [vmem:[#allocation2 + $0x80] sm:$0x1] }
 0x2bd   : > { %v8418_v23 = vrot.slane %v13905_v58, 5  ;;  %v8391_v31 = vsel %vm14685_vm5, %v11669_v19, %v8390_v14  ;;  %v8394_v26 = vsel %vm14685_vm5, %v8392_v56, %v8393_v54  ;;  %v8398_v11 = vsel %vm14685_vm5, %v11670_v42, %v8397_v60  ;;  %v3882_v28 = vld [vmem:[#allocation2 + $0xe4] sm:$0xf]  ;;  %v13735_v24 = vld [vmem:[#allocation2 + $0x114] sm:$0xff]   ;;  %v13910_v20 = vld [vmem:[#allocation2 + $0x8c] sm:$0x1] }
 0x2be   : > { %v8401_v30 = vsel %vm14685_vm5, %v8399_v44, %v8400_v25  ;;  %v15890_v12 = vsel %vm14685_vm5, %v11671_v52, %v8404_v32  ;;  %v15898_v62 = vsel %vm14685_vm5, %v11672_v6, %v8411_v0  ;;  %v11673_v27 = vrot.slane %v8246_v43, 9  ;;  %v13911_v7 = vld [vmem:[#allocation2 + $0x94] sm:$0xf]  ;;  %v8250_v54 = vld [vmem:[#allocation2 + $0x9c] sm:$0xe] }
 0x2bf   : > { %v8420_v61 = vrot.slane %v8418_v23, 4  ;;  %v11674_v51 = vrot.slane %v8247_v47, 9  ;;  %v11675_v21 = vrot.slane %v8248_v38, 9  ;;  %v11718_v48 = vcombine.low %v8391_v31, %v8394_v26  ;;  %v13912_v42 = vld [vmem:[#allocation2 + $0xa0] sm:$0xf] }
 0x2c0   : > { %12902 = vmatmul.mubr.bf16.gmra.mrb[56].mxu0 %v11655_v50  ;;  %v8406_v50 = vrot.slane %v8404_v32, 4  ;;  %v11719_v22 = vcombine.low %v8398_v11, %v8401_v30  ;;  %v15910_v14 = vsel %vm14685_vm5, %v11673_v27, %v8418_v23  ;;  %v8428_v60 = vrot.slane %v13909_v53, 5  ;;  %v8251_v44 = vld [vmem:[#allocation2 + $0xa8] sm:$0xe]  ;;  %v8252_v59 = vld [vmem:[#allocation2 + $0xb4] sm:$0xe] }
 0x2c1   : > { %12550 = vmatmul.mubr.bf16.gmra.mrb[24].mxu1 %v13727_v49  ;;  %12905 = vmatprep.mubr.bf16.mxu0 %v11656_v1  ;;  %v13903_v49 = vld [vmem:[#allocation2 + $0x5c] sm:$0x1]  ;;  %v8435_v41 = vrot.slane %v13910_v20, 5  ;;  %v8439_v0 = vrot.slane %v13911_v7, 5  ;;  %v11676_v36 = vrot.slane %v8249_v5, 9  ;;  %v8446_v56 = vrot.slane %v13912_v42, 5 }
 0x2c2   : > { %12553 = vmatprep.mubr.bf16.mxu1 %v13729_v40  ;;  %v8407_v1 = vrot.slane %v13903_v49, 5  ;;  %v13904_v40 = vld [vmem:[#allocation2 + $0x68] sm:$0x1]  ;;  %v4315_v25 = vshrl.u32 %v3882_v28, 16  ;;  %v4318_v52 = vshll.u32 %v3882_v28, 16  ;;  %v11677_v58 = vrot.slane %v8250_v54, 9 }
 0x2c3   : > { %v8414_v33 = vrot.slane %v13904_v40, 5  ;;  %v13914_v6 = vld [vmem:[#allocation2 + $0x98] sm:$0x1]  ;;  %v8441_v43 = vrot.slane %v8439_v0, 4  ;;  %v8448_v26 = vrot.slane %v8446_v56, 4  ;;  %v11678_v47 = vrot.slane %v8251_v44, 9 }
 0x2c4   : > { %v15894_v39 = vsel %vm14685_vm5, %v8406_v50, %v8407_v1  ;;  %v13916_v23 = vld [vmem:[#allocation2 + $0xb8] sm:$0xf]  ;;  %v13917_v11 = vld [vmem:[#allocation2 + $0xa4] sm:$0x1]  ;;  %v11679_v38 = vrot.slane %v8252_v59, 9  ;;  %v4317_v27 = vrot.slane %v4315_v25, 4 }
 0x2c5   : > { %v15902_v37 = vsel %vm14685_vm5, %v8413_v8, %v8414_v33  ;;  %v11720_v16 = vcombine.low %v15890_v12, %v15894_v39  ;;  %v13915_v8 = vld [vmem:[#allocation2 + $0xac] sm:$0xf]  ;;  %v8460_v31 = vrot.slane %v13916_v23, 5  ;;  %v8449_v30 = vrot.slane %v13917_v11, 5  ;;  %v13921_v28 = vld [vmem:[#allocation2 + $0xd0] sm:$0xf] }
 0x2c6   : > { %v11721_v13 = vcombine.low %v15898_v62, %v15902_v37  ;;  %v8453_v40 = vrot.slane %v13915_v8, 5  ;;  %v8254_v7 = vld [vmem:[#allocation2 + $0xcc] sm:$0xe]  ;;  %v13923_v44 = vld [vmem:[#allocation2 + $0xec] sm:$0x1] }
 0x2c7   : > { %v15950_v20 = vsel %vm14685_vm5, %v8448_v26, %v8449_v30  ;;  %v15961_v54 = vsel %vm14685_vm5, %v11679_v38, %v8460_v31  ;;  %v4334_v59 = vshll.u32 %v13923_v44, 16  ;;  %v8255_v25 = vld [vmem:[#allocation2 + $0xf0] sm:$0xe]  ;;  %v3888_v11 = vld [vmem:[#allocation2 + $0xfc] sm:$0xf] }
 0x2c8   : > { %12906 = vmatmul.mubr.bf16.gmra.mrb[60].mxu0 %v11657_v17  ;;  %v13906_v17 = vld [vmem:[#allocation2 + $0x7c] sm:$0xf]  ;;  %v11682_v37 = vrot.slane %v8255_v25, 9  ;;  %v13930_v25 = vld [vmem:[#allocation2 + $0x104] sm:$0x1] }
 0x2c9   : > { %12554 = vmatmul.mubr.bf16.gmra.mrb[28].mxu1 %v13730_v18  ;;  %12925 = vmatprep.mubr.bf16.mxu0 %v11715_v35  ;;  %v8425_v63 = vrot.slane %v13906_v17, 5  ;;  %v8421_v18 = vrot.slane %v13907_v45, 5  ;;  %v13908_v35 = vld [vmem:[#allocation2 + $0x88] sm:$0xf]  ;;  %v4320_v17 = vrot.slane %v4318_v52, 5  ;;  %v13736_v45 = vld [vmem:[#allocation2 + $0x120] sm:$0xff]  }
 0x2ca   : > { %12557 = vmatprep.mubr.bf16.mxu1 %v13731_v9  ;;  %v8432_v9 = vrot.slane %v13908_v35, 5  ;;  %v8455_v35 = vrot.slane %v8453_v40, 4  ;;  %v4336_v26 = vrot.slane %v4334_v59, 5  ;;  %v13738_v30 = vld [vmem:[#allocation2 + $0x138] sm:$0xff]  }
 0x2cb   : > { %v8427_v34 = vrot.slane %v8425_v63, 4  ;;  %v15914_v32 = vsel %vm14685_vm5, %v8420_v61, %v8421_v18  ;;  %v15938_v18 = vsel %vm14685_vm5, %v11676_v36, %v8439_v0  ;;  %v13922_v0 = vld [vmem:[#allocation2 + $0xf4] sm:$0xf]  ;;  %v4321_v42 = vor.u32 %v4320_v17, %v4317_v27  ;;  %v13739_v27 = vld [vmem:[#allocation2 + $0x144] sm:$0xff]  }
 0x2cc   : > { %v8434_v4 = vrot.slane %v8432_v9, 4  ;;  %v15922_v19 = vsel %vm14685_vm5, %v11675_v21, %v8432_v9  ;;  %v11722_v49 = vcombine.low %v15910_v14, %v15914_v32  ;;  %v13918_v9 = vld [vmem:[#allocation2 + $0xb0] sm:$0x1]  ;;  %v13919_v21 = vld [vmem:[#allocation2 + $0xc4] sm:$0xf]  ;;  %v8481_v36 = vrot.slane %v13922_v0, 5 }
 0x2cd   : > { %v15928_v1 = vsel %vm14685_vm5, %v8427_v34, %v8428_v60  ;;  %v13920_v34 = vld [vmem:[#allocation2 + $0xbc] sm:$0x1]  ;;  %v8253_v60 = vld [vmem:[#allocation2 + $0xc0] sm:$0xe]  ;;  %v4322_v23 = vrot.slane %v4321_v42, 4 }
 0x2ce   : > { %v15932_v33 = vsel %vm14685_vm5, %v8434_v4, %v8435_v41  ;;  %v8463_v53 = vrot.slane %v13920_v34, 5  ;;  %v15946_v4 = vsel %vm14685_vm5, %v11677_v58, %v8446_v56  ;;  %v15954_v41 = vsel %vm14685_vm5, %v11678_v47, %v8453_v40  ;;  %v13926_v40 = vld [vmem:[#allocation2 + $0xf8] sm:$0x1] }
 0x2cf   : > { %v11680_v12 = vrot.slane %v8253_v60, 9  ;;  %v11724_v58 = vcombine.low %v15922_v19, %v15932_v33  ;;  %v11726_v38 = vcombine.low %v15946_v4, %v15950_v20  ;;  %v13927_v60 = vld [vmem:[#allocation2 + $0x100] sm:$0xf]  ;;  %v13936_v33 = vld [vmem:[#allocation2 + $0x110] sm:$0x1] }
 0x2d0   : > { %12926 = vmatmul.mubr.bf16.vlgmr.msra.gmra.mrb[0].mxu0 %v11716_v46  ;;  %v15918_v46 = vsel %vm14685_vm5, %v11674_v51, %v8425_v63  ;;  %v8456_v51 = vrot.slane %v13918_v9, 5  ;;  %v3891_v9 = vld [vmem:[#allocation2 + $0x108] sm:$0xf] }
 0x2d1   : > { %12558 = vmatmul.mubr.bf16.gmra.mrb[32].mxu1 %v13732_v29  ;;  %12929 = vmatprep.mubr.bf16.mxu0 %v11717_v55  ;;  %v13913_v29 = vld [vmem:[#allocation2 + $0xe8] sm:$0xf]  ;;  %v11723_v62 = vcombine.low %v15918_v46, %v15928_v1  ;;  %v4390_v0 = vshll.u32 %v3891_v9, 16 }
 0x2d2   : > { %12561 = vmatprep.mubr.bf16.mxu1 %v13733_v2  ;;  %v4324_v55 = vshll.u32 %v13913_v29, 16  ;;  %v4328_v50 = vshrl.u32 %v13913_v29, 16  ;;  %v8442_v2 = vrot.slane %v13914_v6, 5  ;;  %v15969_v52 = vsel %vm14685_vm5, %v8455_v35, %v8456_v51 }
 0x2d3   : > { %v11727_v46 = vcombine.low %v15954_v41, %v15969_v52  ;;  %v16005_v51 = vsel %vm14685_vm5, %v11682_v37, %v8481_v36 }
 0x2d4   : > { %v15934_v63 = vrot.slane %v4324_v55, 5  ;;  %v4330_v61 = vrot.slane %v4328_v50, 4  ;;  %v15942_v5 = vsel %vm14685_vm5, %v8441_v43, %v8442_v2  ;;  %v11681_v50 = vrot.slane %v8254_v7, 9  ;;  %v13925_v2 = vld [vmem:[#allocation2 + $0xd4] sm:$0x1] }
 0x2d5   : > { %v8477_v8 = vrot.slane %v13925_v2, 5  ;;  %v8484_v43 = vrot.slane %v13926_v40, 5  ;;  %v11725_v47 = vcombine.low %v15938_v18, %v15942_v5  ;;  %v4387_v7 = vshrl.u32 %v3891_v9, 16 }
 0x2d6   : > { %v4331_v56 = vor.u32 %v4330_v61, %v15934_v63  ;;  %v4327_v34 = vsel %vm14502_vm2, %v4322_v23, %v15934_v63  ;;  %v13929_v63 = vld [vmem:[#allocation2 + $0x100] sm:$0xf] }
 0x2d7   : > { %v8488_v44 = vrot.slane %v13929_v63, 5  ;;  %v4389_v40 = vrot.slane %v4387_v7, 4 }
 0x2d8   : > { %12930 = vmatmul.mubr.bf16.gmra.mrb[4].mxu0 %v11718_v48  ;;  %v8467_v48 = vrot.slane %v13919_v21, 5 }
 0x2d9   : > { %12562 = vmatmul.mubr.bf16.gmra.mrb[36].mxu1 %v13734_v15  ;;  %12933 = vmatprep.mubr.bf16.mxu0 %v11719_v22  ;;  %v13737_v22 = vld [vmem:[#allocation2 + $0x12c] sm:$0xff]   ;;  %v8462_v15 = vrot.slane %v8460_v31, 4  ;;  %v4332_v31 = vrot.slane %v4331_v56, 4 }
 0x2da   : > { %12565 = vmatprep.mubr.bf16.mxu1 %v13735_v24  ;;  %v8474_v24 = vrot.slane %v13921_v28, 5  ;;  %v8469_v39 = vrot.slane %v8467_v48, 4  ;;  %v15989_v17 = vsel %vm14685_vm5, %v11680_v12, %v8467_v48  ;;  %v8256_v48 = vld [vmem:[#allocation2 + $0xfc] sm:$0xe]  ;;  %v4372_v28 = vshll.u32 %v13927_v60, 16 }
 0x2db   : > { %v15973_v55 = vsel %vm14685_vm5, %v8462_v15, %v8463_v53  ;;  %v4366_v15 = vshll.u32 %v3888_v11, 16  ;;  %v4337_v53 = vsel %vm14502_vm2, %v4332_v31, %v4336_v26  ;;  %v8491_v12 = vrot.slane %v13930_v25, 5  ;;  %v13741_v26 = vld [vmem:[#allocation2 + $0x15c] sm:$0xff]   ;;  %v8258_v25 = vld [vmem:[#allocation2 + $0x114] sm:$0xe] }
 0x2dc   : > { %v8476_v6 = vrot.slane %v8474_v24, 4  ;;  %v11728_v1 = vcombine.low %v15961_v54, %v15973_v55 }
 0x2de   : > { %v16001_v35 = vsel %vm14685_vm5, %v8476_v6, %v8477_v8  ;;  %v16027_v6 = vrot.slane %v4372_v28, 5  ;;  %v8257_v8 = vld [vmem:[#allocation2 + $0x108] sm:$0xe] }
 0x2e0   : > { %12934 = vmatmul.mubr.bf16.gmra.mrb[8].mxu0 %v11720_v16  ;;  %v13924_v16 = vld [vmem:[#allocation2 + $0xc8] sm:$0x1] }
 0x2e1   : > { %12566 = vmatmul.mubr.bf16.gmra.mrb[40].mxu1 %v13736_v45  ;;  %12937 = vmatprep.mubr.bf16.mxu0 %v11721_v13  ;;  %v8470_v29 = vrot.slane %v13924_v16, 5  ;;  %v8483_v13 = vrot.slane %v8481_v36, 4  ;;  %v15997_v45 = vsel %vm14685_vm5, %v11681_v50, %v8474_v24  ;;  %v4376_v24 = vshrl.u32 %v13927_v60, 16  ;;  %v13928_v36 = vld [vmem:[#allocation2 + $0x10c] sm:$0xf] }
 0x2e2   : > { %12569 = vmatprep.mubr.bf16.mxu1 %v13737_v22  ;;  %v4363_v22 = vshrl.u32 %v3888_v11, 16  ;;  %v4396_v42 = vshll.u32 %v13928_v36, 16  ;;  %v4400_v56 = vshrl.u32 %v13928_v36, 16  ;;  %v11730_v32 = vcombine.low %v15997_v45, %v16001_v35 }
 0x2e3   : > { %v15993_v61 = vsel %vm14685_vm5, %v8469_v39, %v8470_v29  ;;  %v16009_v21 = vsel %vm14685_vm5, %v8483_v13, %v8484_v43  ;;  %v4368_v16 = vrot.slane %v4366_v15, 5  ;;  %v3894_v29 = vld [vmem:[#allocation2 + $0x114] sm:$0xf]  ;;  %v16025_v50 = vcombine.low %v4327_v34, %v4337_v53  ;;  %v13933_v34 = vld [vmem:[#allocation2 + $0x118] sm:$0xf] }
 0x2e4   : > { %v11729_v14 = vcombine.low %v15989_v17, %v15993_v61  ;;  %v11731_v59 = vcombine.low %v16005_v51, %v16009_v21  ;;  %v4365_v39 = vrot.slane %v4363_v22, 4  ;;  %v4378_v2 = vrot.slane %v4376_v24, 4  ;;  %v13740_v13 = vld [vmem:[#allocation2 + $0x150] sm:$0xff]  }
 0x2e5   : > { %v4392_v43 = vrot.slane %v4390_v0, 5  ;;  %v16029_v23 = vrot.slane %v4396_v42, 5  ;;  %v4402_v31 = vrot.slane %v4400_v56, 4  ;;  %v8490_v11 = vrot.slane %v8488_v44, 4  ;;  %v13934_v0 = vld [vmem:[#allocation2 + $0x118] sm:$0xf] }
 0x2e6   : > { %v4411_v9 = vshrl.u32 %v3894_v29, 16  ;;  %v4369_v22 = vor.u32 %v4368_v16, %v4365_v39  ;;  %v11684_v15 = vrot.slane %v8257_v8, 9  ;;  %v4420_v53 = vshll.u32 %v13933_v34, 16  ;;  %v13935_v42 = vld [vmem:[#allocation2 + $0x110] sm:$0x1] }
 0x2e7   : > { %v4424_v60 = vshrl.u32 %v13933_v34, 16  ;;  %v4379_v24 = vor.u32 %v4378_v2, %v16027_v6  ;;  %v8502_v36 = vrot.slane %v13934_v0, 5  ;;  %v8498_v56 = vrot.slane %v13935_v42, 5  ;;  %v3897_v2 = vld [vmem:[#allocation2 + $0x120] sm:$0xf] }
 0x2e8   : > { %12938 = vmatmul.mubr.bf16.gmra.mrb[12].mxu0 %v11722_v49  ;;  %v11683_v49 = vrot.slane %v8256_v48, 9  ;;  %v4414_v48 = vshll.u32 %v3894_v29, 16  ;;  %v4393_v63 = vor.u32 %v4392_v43, %v4389_v40  ;;  %v4403_v19 = vor.u32 %v4402_v31, %v16029_v23  ;;  %v13937_v40 = vld [vmem:[#allocation2 + $0x11c] sm:$0x1]  ;;  %v13742_v31 = vld [vmem:[#allocation2 + $0x168] sm:$0xff]  }
 0x2e9   : > { %12570 = vmatmul.mubr.bf16.gmra.mrb[44].mxu1 %v13738_v30  ;;  %12941 = vmatprep.mubr.bf16.mxu0 %v11723_v62  ;;  %v13931_v62 = vld [vmem:[#allocation2 + $0x10c] sm:$0xf]  ;;  %v13932_v30 = vld [vmem:[#allocation2 + $0x104] sm:$0x1]  ;;  %v4413_v39 = vrot.slane %v4411_v9, 4  ;;  %v4370_v29 = vrot.slane %v4369_v22, 4 }
 0x2ea   : > { %12573 = vmatprep.mubr.bf16.mxu1 %v13739_v27  ;;  %v8495_v37 = vrot.slane %v13931_v62, 5  ;;  %v4382_v27 = vshll.u32 %v13932_v30, 16  ;;  %v16036_v28 = vsel %vm14685_vm5, %v11683_v49, %v8488_v44  ;;  %v16045_v49 = vsel %vm14685_vm5, %v8490_v11, %v8491_v12  ;;  %v8259_v9 = vld [vmem:[#allocation2 + $0x120] sm:$0xe]  ;;  %v13940_v0 = vld [vmem:[#allocation2 + $0x124] sm:$0xf] }
 0x2eb   : > { %v4416_v16 = vrot.slane %v4414_v48, 5  ;;  %v16051_v5 = vrot.slane %v4420_v53, 5  ;;  %v4380_v8 = vrot.slane %v4379_v24, 4  ;;  %v11685_v62 = vrot.slane %v8258_v25, 9  ;;  %v13938_v48 = vld [vmem:[#allocation2 + $0x124] sm:$0xf] }
 0x2ec   : > { %v8497_v7 = vrot.slane %v8495_v37, 4  ;;  %v4384_v44 = vrot.slane %v4382_v27, 5  ;;  %v16049_v18 = vsel %vm14685_vm5, %v11684_v15, %v8495_v37  ;;  %v8505_v43 = vrot.slane %v13937_v40, 5  ;;  %v13743_v27 = vld [vmem:[#allocation2 + $0x174] sm:$0xff]  }
 0x2ed   : > { %v4404_v11 = vrot.slane %v4403_v19, 4  ;;  %v4417_v37 = vor.u32 %v4416_v16, %v4413_v39  ;;  %v8509_v22 = vrot.slane %v13938_v48, 5  ;;  %v4435_v15 = vshrl.u32 %v3897_v2, 16  ;;  %v3900_v16 = vld [vmem:[#allocation2 + $0x12c] sm:$0xf] }
 0x2ee   : > { %v16055_v12 = vsel %vm14685_vm5, %v8497_v7, %v8498_v56  ;;  %v4438_v34 = vshll.u32 %v3897_v2, 16  ;;  %v4444_v42 = vshll.u32 %v13940_v0, 16  ;;  %v4375_v7 = vsel %vm14502_vm2, %v4370_v29, %v16027_v6  ;;  %v13941_v6 = vld [vmem:[#allocation2 + $0x128] sm:$0x1] }
 0x2ef   : > { %v4385_v56 = vsel %vm14502_vm2, %v4380_v8, %v4384_v44  ;;  %v8511_v25 = vrot.slane %v8509_v22, 4  ;;  %v4437_v44 = vrot.slane %v4435_v15, 4  ;;  %v11733_v2 = vcombine.low %v16049_v18, %v16055_v12  ;;  %v16105_v15 = vld [vmem:[#allocation2 + $0x12c] sm:$0xe] }
 0x2f0   : > { %12942 = vmatmul.mubr.bf16.gmra.mrb[16].mxu0 %v11724_v58  ;;  %v4406_v58 = vshll.u32 %v13936_v33, 16  ;;  %v4448_v33 = vshrl.u32 %v13940_v0, 16  ;;  %v4440_v39 = vrot.slane %v4438_v34, 5  ;;  %v16082_v41 = vrot.slane %v4444_v42, 5  ;;  %v13944_v42 = vld [vmem:[#allocation2 + $0x13c] sm:$0xf] }
 0x2f1   : > { %12574 = vmatmul.mubr.bf16.gmra.mrb[48].mxu1 %v13740_v13  ;;  %12945 = vmatprep.mubr.bf16.mxu0 %v11725_v47  ;;  %v4426_v47 = vrot.slane %v4424_v60, 4  ;;  %v8504_v13 = vrot.slane %v8502_v36, 4  ;;  %v13939_v60 = vld [vmem:[#allocation2 + $0x11c] sm:$0x1] }
 0x2f2   : > { %12577 = vmatprep.mubr.bf16.mxu1 %v13741_v26  ;;  %v4394_v26 = vrot.slane %v4393_v63, 4  ;;  %v4408_v30 = vrot.slane %v4406_v58, 5  ;;  %v4430_v24 = vshll.u32 %v13939_v60, 16  ;;  %v16068_v63 = vsel %vm14685_vm5, %v11685_v62, %v8502_v36  ;;  %v13744_v62 = vld [vmem:[#allocation2 + $0x180] sm:$0xff]  }
 0x2f3   : > { %v4427_v53 = vor.u32 %v4426_v47, %v16051_v5  ;;  %v16072_v19 = vsel %vm14685_vm5, %v8504_v13, %v8505_v43  ;;  %v8512_v36 = vrot.slane %v13941_v6, 5  ;;  %v4418_v58 = vrot.slane %v4417_v37, 4  ;;  %v13945_v6 = vld [vmem:[#allocation2 + $0x130] sm:$0xf] }
 0x2f4   : > { %v4399_v4 = vsel %vm14502_vm2, %v4394_v26, %v16029_v23  ;;  %v4409_v20 = vsel %vm14502_vm2, %v4404_v11, %v4408_v30  ;;  %v4432_v47 = vrot.slane %v4430_v24, 5  ;;  %v4450_v52 = vrot.slane %v4448_v33, 4  ;;  %v3903_v26 = vld [vmem:[#allocation2 + $0x138] sm:$0xf]  ;;  %v13745_v11 = vld [vmem:[#allocation2 + $0x18c] sm:$0xff]  }
 0x2f5   : > { %v4428_v29 = vrot.slane %v4427_v53, 4  ;;  %v16086_v23 = vcombine.low %v4375_v7, %v4385_v56  ;;  %v11734_v8 = vcombine.low %v16068_v63, %v16072_v19  ;;  %v16092_v13 = vcombine.low %v4399_v4, %v4409_v20  ;;  %v13943_v53 = vld [vmem:[#allocation2 + $0x130] sm:$0xf] }
 0x2f6   : > { %v4459_v43 = vshrl.u32 %v3900_v16, 16  ;;  %v4423_v30 = vsel %vm14502_vm2, %v4418_v58, %v16051_v5  ;;  %v4441_v37 = vor.u32 %v4440_v39, %v4437_v44  ;;  %v4451_v34 = vor.u32 %v4450_v52, %v16082_v41  ;;  %v3906_v58 = vld [vmem:[#allocation2 + $0x144] sm:$0xf]  ;;  %v13946_v44 = vld [vmem:[#allocation2 + $0x134] sm:$0x1] }
 0x2f7   : > { %v4468_v60 = vshll.u32 %v13943_v53, 16  ;;  %v4472_v24 = vshrl.u32 %v13943_v53, 16  ;;  %v4483_v5 = vshrl.u32 %v3903_v26, 16  ;;  %v4486_v0 = vshll.u32 %v3903_v26, 16 }
 0x2f8   : > { %12946 = vmatmul.mubr.bf16.gmra.mrb[20].mxu0 %v11726_v38  ;;  %v11686_v38 = vrot.slane %v8259_v9, 9  ;;  %v13942_v9 = vld [vmem:[#allocation2 + $0x128] sm:$0x1]  ;;  %v4492_v33 = vshll.u32 %v13944_v42, 16  ;;  %v4496_v7 = vshrl.u32 %v13944_v42, 16  ;;  %v11687_v4 = vrot.slane %v16105_v15, 9 }
 0x2f9   : > { %12578 = vmatmul.mubr.bf16.gmra.mrb[52].mxu1 %v13742_v31  ;;  %12949 = vmatprep.mubr.bf16.mxu0 %v11727_v46  ;;  %v11732_v46 = vcombine.low %v16036_v28, %v16045_v49  ;;  %v4462_v31 = vshll.u32 %v3900_v16, 16  ;;  %v4454_v48 = vshll.u32 %v13942_v9, 16  ;;  %v4461_v20 = vrot.slane %v4459_v43, 4  ;;  %v13957_v49 = vld [vmem:[#allocation2 + $0x158] sm:$0x1] }
 0x2fa   : > { %12581 = vmatprep.mubr.bf16.mxu1 %v13743_v27  ;;  %v16096_v40 = vsel %vm14685_vm5, %v11686_v38, %v8509_v22  ;;  %v16103_v27 = vsel %vm14685_vm5, %v8511_v25, %v8512_v36  ;;  %v4433_v22 = vsel %vm14502_vm2, %v4428_v29, %v4432_v47  ;;  %v4442_v55 = vrot.slane %v4441_v37, 4 }
 0x2fb   : > { %v11735_v56 = vcombine.low %v16096_v40, %v16103_v27  ;;  %v4464_v38 = vrot.slane %v4462_v31, 5  ;;  %v16119_v54 = vcombine.low %v4423_v30, %v4433_v22  ;;  %v8516_v36 = vrot.slane %v13945_v6, 5  ;;  %v13947_v31 = vld [vmem:[#allocation2 + $0x13c] sm:$0xf] }
 0x2fc   : > { %v4452_v25 = vrot.slane %v4451_v34, 4  ;;  %v8519_v39 = vrot.slane %v13946_v44, 5  ;;  %v16121_v17 = vrot.slane %v4468_v60, 5  ;;  %v4474_v61 = vrot.slane %v4472_v24, 4  ;;  %v13949_v60 = vld [vmem:[#allocation2 + $0x134] sm:$0x1] }
 0x2fd   : > { %v4485_v16 = vrot.slane %v4483_v5, 4  ;;  %v4488_v29 = vrot.slane %v4486_v0, 5  ;;  %v16123_v47 = vrot.slane %v4492_v33, 5  ;;  %v4498_v52 = vrot.slane %v4496_v7, 4  ;;  %v13950_v0 = vld [vmem:[#allocation2 + $0x140] sm:$0x1] }
 0x2fe   : > { %v4465_v43 = vor.u32 %v4464_v38, %v4461_v20  ;;  %v8523_v26 = vrot.slane %v13947_v31, 5  ;;  %v4510_v30 = vshll.u32 %v3906_v58, 16  ;;  %v4447_v37 = vsel %vm14502_vm2, %v4442_v55, %v16082_v41  ;;  %v13951_v7 = vld [vmem:[#allocation2 + $0x140] sm:$0x1] }
 0x2ff   : > { %v8518_v9 = vrot.slane %v8516_v36, 4  ;;  %v4475_v53 = vor.u32 %v4474_v61, %v16121_v17  ;;  %v4478_v24 = vshll.u32 %v13949_v60, 16  ;;  %v8526_v42 = vrot.slane %v13950_v0, 5  ;;  %v3909_v61 = vld [vmem:[#allocation2 + $0x150] sm:$0xf] }
 0x300   : > { %12950 = vmatmul.mubr.bf16.gmra.mrb[24].mxu0 %v11728_v1  ;;  %v4456_v1 = vrot.slane %v4454_v48, 5  ;;  %v13948_v48 = vld [vmem:[#allocation2 + $0x148] sm:$0xf]  ;;  %v4489_v33 = vor.u32 %v4488_v29, %v4485_v16  ;;  %v4499_v41 = vor.u32 %v4498_v52, %v16123_v47  ;;  %v4502_v20 = vshll.u32 %v13951_v7, 16  ;;  %v8262_v16 = vld [vmem:[#allocation2 + $0x144] sm:$0xe] }
 0x301   : > { %12582 = vmatmul.mubr.bf16.gmra.mrb[56].mxu1 %v13744_v62  ;;  %12953 = vmatprep.mubr.bf16.mxu0 %v11729_v14  ;;  %v8261_v14 = vld [vmem:[#allocation2 + $0x138] sm:$0xe]  ;;  %v4516_v15 = vshll.u32 %v13948_v48, 16  ;;  %v4520_v22 = vshrl.u32 %v13948_v48, 16  ;;  %v4466_v38 = vrot.slane %v4465_v43, 4  ;;  %v8525_v55 = vrot.slane %v8523_v26, 4 }
 0x302   : > { %12585 = vmatprep.mubr.bf16.mxu1 %v13745_v11  ;;  %v13746_v62 = vld [vmem:[#allocation2 + $0x198] sm:$0xff]   ;;  %v4507_v11 = vshrl.u32 %v3906_v58, 16  ;;  %v4457_v34 = vsel %vm14502_vm2, %v4452_v25, %v4456_v1  ;;  %v11688_v5 = vrot.slane %v8261_v14, 9  ;;  %v4512_v6 = vrot.slane %v4510_v30, 5 }
 0x303   : > { %v16141_v45 = vsel %vm14685_vm5, %v11687_v4, %v8516_v36  ;;  %v16145_v35 = vsel %vm14685_vm5, %v8518_v9, %v8519_v39  ;;  %v4522_v58 = vrot.slane %v4520_v22, 4  ;;  %v16149_v25 = vcombine.low %v4447_v37, %v4457_v34 }
 0x304   : > { %v4509_v1 = vrot.slane %v4507_v11, 4  ;;  %v4476_v51 = vrot.slane %v4475_v53, 4  ;;  %v4480_v21 = vrot.slane %v4478_v24, 5  ;;  %v4490_v4 = vrot.slane %v4489_v33, 4  ;;  %v8263_v11 = vld [vmem:[#allocation2 + $0x150] sm:$0xe] }
 0x305   : > { %v4500_v36 = vrot.slane %v4499_v41, 4  ;;  %v4504_v14 = vrot.slane %v4502_v20, 5  ;;  %v4471_v39 = vsel %vm14502_vm2, %v4466_v38, %v16121_v17  ;;  %v16160_v29 = vsel %vm14685_vm5, %v8525_v55, %v8526_v42  ;;  %v13955_v17 = vld [vmem:[#allocation2 + $0x14c] sm:$0x1]  ;;  %v13956_v24 = vld [vmem:[#allocation2 + $0x154] sm:$0xf] }
 0x306   : > { %v4513_v52 = vor.u32 %v4512_v6, %v4509_v1  ;;  %v4531_v37 = vshrl.u32 %v3909_v61, 16  ;;  %v4534_v9 = vshll.u32 %v3909_v61, 16  ;;  %v4481_v48 = vsel %vm14502_vm2, %v4476_v51, %v4480_v21  ;;  %v3912_v38 = vld [vmem:[#allocation2 + $0x15c] sm:$0xf] }
 0x307   : > { %v8533_v34 = vrot.slane %v13955_v17, 5  ;;  %v4495_v53 = vsel %vm14502_vm2, %v4490_v4, %v16123_v47  ;;  %v4505_v60 = vsel %vm14502_vm2, %v4500_v36, %v4504_v14  ;;  %v4544_v0 = vshrl.u32 %v13956_v24, 16 }
 0x308   : > { %12954 = vmatmul.mubr.bf16.gmra.mrb[28].mxu0 %v11730_v32  ;;  %v16147_v32 = vrot.slane %v4516_v15, 5  ;;  %v11689_v15 = vrot.slane %v8262_v16, 9  ;;  %v4514_v42 = vrot.slane %v4513_v52, 4  ;;  %v11690_v28 = vrot.slane %v8263_v11, 9  ;;  %v13958_v16 = vld [vmem:[#allocation2 + $0x158] sm:$0x1] }
 0x309   : > { %12586 = vmatmul.mubr.bf16.gmra.mrb[60].mxu1 %v13746_v62  ;;  %12957 = vmatprep.mubr.bf16.mxu0 %v11731_v59  ;;  %v13952_v59 = vld [vmem:[#allocation2 + $0x148] sm:$0xf]  ;;  %v13953_v62 = vld [vmem:[#allocation2 + $0x14c] sm:$0x1]  ;;  %v4533_v7 = vrot.slane %v4531_v37, 4  ;;  %v4536_v20 = vrot.slane %v4534_v9, 5  ;;  %v11736_v55 = vcombine.low %v16141_v45, %v16145_v35 }
 0x30a   : > { %12637 = vmatprep.mubr.bf16.mxu1 %v16025_v50  ;;  %v8530_v44 = vrot.slane %v13952_v59, 5  ;;  %v16153_v50 = vsel %vm14685_vm5, %v11688_v5, %v8523_v26  ;;  %v4526_v43 = vshll.u32 %v13953_v62, 16  ;;  %v4523_v31 = vor.u32 %v4522_v58, %v16147_v32  ;;  %v13954_v26 = vld [vmem:[#allocation2 + $0x154] sm:$0xf]  ;;  %v3915_v58 = vld [vmem:[#allocation2 + $0x168] sm:$0xf] }
 0x30b   : > { %v8537_v30 = vrot.slane %v13954_v26, 5  ;;  %v4540_v5 = vshll.u32 %v13956_v24, 16  ;;  %v11737_v18 = vcombine.low %v16153_v50, %v16160_v29  ;;  %v4546_v6 = vrot.slane %v4544_v0, 4  ;;  %v8264_v59 = vld [vmem:[#allocation2 + $0x15c] sm:$0xe] }
 0x30c   : > { %v8532_v22 = vrot.slane %v8530_v44, 4  ;;  %v4528_v33 = vrot.slane %v4526_v43, 5  ;;  %v4524_v47 = vrot.slane %v4523_v31, 4  ;;  %v16186_v12 = vsel %vm14685_vm5, %v11689_v15, %v8530_v44  ;;  %v13959_v52 = vld [vmem:[#allocation2 + $0x160] sm:$0xf] }
 0x30d   : > { %v8539_v41 = vrot.slane %v8537_v30, 4  ;;  %v16194_v1 = vrot.slane %v4540_v5, 5  ;;  %v4519_v51 = vsel %vm14502_vm2, %v4514_v42, %v16147_v32  ;;  %v16201_v21 = vsel %vm14685_vm5, %v11690_v28, %v8537_v30  ;;  %v13960_v37 = vld [vmem:[#allocation2 + $0x160] sm:$0xf]  ;;  %v13962_v0 = vld [vmem:[#allocation2 + $0x164] sm:$0x1] }
 0x30e   : > { %v4555_v44 = vshrl.u32 %v3912_v38, 16  ;;  %v4558_v61 = vshll.u32 %v3912_v38, 16  ;;  %v4529_v4 = vsel %vm14502_vm2, %v4524_v47, %v4528_v33  ;;  %v4537_v14 = vor.u32 %v4536_v20, %v4533_v7  ;;  %v13963_v42 = vld [vmem:[#allocation2 + $0x164] sm:$0x1]  ;;  %v13964_v38 = vld [vmem:[#allocation2 + $0x178] sm:$0xf] }
 0x30f   : > { %v4564_v62 = vshll.u32 %v13959_v52, 16  ;;  %v4568_v32 = vshrl.u32 %v13959_v52, 16  ;;  %v4579_v43 = vshrl.u32 %v3915_v58, 16  ;;  %v4582_v31 = vshll.u32 %v3915_v58, 16  ;;  %v13966_v52 = vld [vmem:[#allocation2 + $0x170] sm:$0x1] }
 0x310   : > { %12958 = vmatmul.mubr.bf16.gmra.mrb[32].mxu0 %v11732_v46  ;;  %v8540_v46 = vrot.slane %v13957_v49, 5  ;;  %v4547_v26 = vor.u32 %v4546_v6, %v16194_v1  ;;  %v11691_v30 = vrot.slane %v8264_v59, 9  ;;  %v8544_v9 = vrot.slane %v13960_v37, 5  ;;  %v13967_v45 = vld [vmem:[#allocation2 + $0x170] sm:$0x1] }
 0x311   : > { %12638 = vmatmul.mubr.bf16.vlgmr.msra.gmra.mrb[32].mxu1 %v15780_v10  ;;  %12961 = vmatprep.mubr.bf16.mxu0 %v11733_v2  ;;  %v16180_v10 = vcombine.low %v4471_v39, %v4481_v48  ;;  %v16188_v2 = vcombine.low %v4495_v53, %v4505_v60  ;;  %v4550_v39 = vshll.u32 %v13958_v16, 16  ;;  %v4557_v48 = vrot.slane %v4555_v44, 4  ;;  %v3918_v60 = vld [vmem:[#allocation2 + $0x174] sm:$0xf]  ;;  %v13965_v44 = vld [vmem:[#allocation2 + $0x16c] sm:$0xf] }
 0x312   : > { %12641 = vmatprep.mubr.bf16.mxu1 %v16086_v23  ;;  %v16192_v23 = vsel %vm14685_vm5, %v8532_v22, %v8533_v34  ;;  %v16207_v36 = vsel %vm14685_vm5, %v8539_v41, %v8540_v46  ;;  %v4560_v15 = vrot.slane %v4558_v61, 5  ;;  %v13961_v22 = vld [vmem:[#allocation2 + $0x16c] sm:$0xf]  ;;  %v16220_v19 = vcombine.low %v4519_v51, %v4529_v4  ;;  %v8265_v46 = vld [vmem:[#allocation2 + $0x168] sm:$0xe] }
 0x313   : > { %v11738_v11 = vcombine.low %v16186_v12, %v16192_v23  ;;  %v4588_v17 = vshll.u32 %v13961_v22, 16  ;;  %v4592_v63 = vshrl.u32 %v13961_v22, 16  ;;  %v16224_v34 = vrot.slane %v4537_v14, 4 }
 0x314   : > { %v16226_v53 = vrot.slane %v4550_v39, 5  ;;  %v4570_v40 = vrot.slane %v4568_v32, 4  ;;  %v4581_v27 = vrot.slane %v4579_v43, 4  ;;  %v16230_v24 = vrot.slane %v4547_v26, 4  ;;  %v8266_v32 = vld [vmem:[#allocation2 + $0x174] sm:$0xe] }
 0x315   : > { %v8546_v5 = vrot.slane %v8544_v9, 4  ;;  %v4574_v33 = vshll.u32 %v13963_v42, 16  ;;  %v16234_v28 = vsel %vm14685_vm5, %v11691_v30, %v8544_v9  ;;  %v4561_v49 = vor.u32 %v4560_v15, %v4557_v48  ;;  %v8267_v42 = vld [vmem:[#allocation2 + $0x180] sm:$0xe] }
 0x316   : > { %v16236_v47 = vrot.slane %v4588_v17, 5  ;;  %v4594_v41 = vrot.slane %v4592_v63, 4  ;;  %v4603_v7 = vshrl.u32 %v3918_v60, 16  ;;  %v4606_v20 = vshll.u32 %v3918_v60, 16  ;;  %v13970_v60 = vld [vmem:[#allocation2 + $0x17c] sm:$0x1] }
 0x317   : > { %v4612_v6 = vshll.u32 %v13964_v38, 16  ;;  %v4616_v58 = vshrl.u32 %v13964_v38, 16  ;;  %v4543_v51 = vsel %vm14502_vm2, %v16224_v34, %v16194_v1  ;;  %v8551_v61 = vrot.slane %v13965_v44, 5  ;;  %v13972_v38 = vld [vmem:[#allocation2 + $0x184] sm:$0xf] }
 0x318   : > { %12962 = vmatmul.mubr.bf16.gmra.mrb[36].mxu0 %v11734_v8  ;;  %v11739_v8 = vcombine.low %v16201_v21, %v16207_v36  ;;  %v16250_v16 = vrot.slane %v4574_v33, 5  ;;  %v11692_v39 = vrot.slane %v8265_v46, 9  ;;  %v16256_v43 = vrot.slane %v4561_v49, 4  ;;  %v13971_v33 = vld [vmem:[#allocation2 + $0x184] sm:$0xf] }
 0x319   : > { %12642 = vmatmul.mubr.bf16.gmra.mrb[36].mxu1 %v16092_v13  ;;  %12965 = vmatprep.mubr.bf16.mxu0 %v11735_v56  ;;  %v16228_v13 = vrot.slane %v4564_v62, 5  ;;  %v4584_v56 = vrot.slane %v4582_v31, 5  ;;  %v4598_v62 = vshll.u32 %v13966_v52, 16  ;;  %v8554_v35 = vrot.slane %v13967_v45, 5  ;;  %v13968_v31 = vld [vmem:[#allocation2 + $0x178] sm:$0xf] }
 0x31a   : > { %12645 = vmatprep.mubr.bf16.mxu1 %v16119_v54  ;;  %v8547_v54 = vrot.slane %v13962_v0, 5  ;;  %v8558_v26 = vrot.slane %v13968_v31, 5  ;;  %v4605_v30 = vrot.slane %v4603_v7, 4  ;;  %v4608_v37 = vrot.slane %v4606_v20, 5  ;;  %v3921_v0 = vld [vmem:[#allocation2 + $0x180] sm:$0xf] }
 0x31b   : > { %v4571_v59 = vor.u32 %v4570_v40, %v16228_v13  ;;  %v4585_v4 = vor.u32 %v4584_v56, %v4581_v27  ;;  %v16260_v9 = vrot.slane %v4612_v6, 5  ;;  %v4618_v48 = vrot.slane %v4616_v58, 4  ;;  %v13969_v27 = vld [vmem:[#allocation2 + $0x17c] sm:$0x1]  ;;  %v13974_v21 = vld [vmem:[#allocation2 + $0x190] sm:$0xf] }
 0x31c   : > { %v16248_v14 = vsel %vm14685_vm5, %v8546_v5, %v8547_v54  ;;  %v8553_v15 = vrot.slane %v8551_v61, 4  ;;  %v11693_v50 = vrot.slane %v8266_v32, 9  ;;  %v4553_v29 = vsel %vm14502_vm2, %v16230_v24, %v16226_v53 }
 0x31d   : > { %v4586_v22 = vrot.slane %v4585_v4, 4  ;;  %v4600_v17 = vrot.slane %v4598_v62, 5  ;;  %v8560_v40 = vrot.slane %v8558_v26, 4  ;;  %v8561_v56 = vrot.slane %v13969_v27, 5 }
 0x31e   : > { %v4622_v5 = vshll.u32 %v13970_v60, 16  ;;  %v4567_v53 = vsel %vm14502_vm2, %v16256_v43, %v16228_v13  ;;  %v4609_v24 = vor.u32 %v4608_v37, %v4605_v30  ;;  %v4619_v54 = vor.u32 %v4618_v48, %v16260_v9  ;;  %v8268_v48 = vld [vmem:[#allocation2 + $0x18c] sm:$0xe] }
 0x31f   : > { %v8555_v46 = vsel %vm14685_vm5, %v8553_v15, %v8554_v35  ;;  %v16287_v13 = vsel %vm14685_vm5, %v11693_v50, %v8558_v26  ;;  %v4627_v7 = vshrl.u32 %v3921_v0, 16  ;;  %v4630_v20 = vshll.u32 %v3921_v0, 16  ;;  %v3927_v15 = vld [vmem:[#allocation2 + $0x198] sm:$0xf] }
 0x320   : > { %12966 = vmatmul.mubr.bf16.gmra.mrb[40].mxu0 %v11736_v55  ;;  %v4595_v55 = vor.u32 %v4594_v41, %v16236_v47  ;;  %v4591_v41 = vsel %vm14502_vm2, %v4586_v22, %v16236_v47  ;;  %v4636_v6 = vshll.u32 %v13972_v38, 16  ;;  %v4640_v58 = vshrl.u32 %v13972_v38, 16 }
 0x321   : > { %12646 = vmatmul.mubr.bf16.gmra.mrb[40].mxu1 %v16149_v25  ;;  %12969 = vmatprep.mubr.bf16.mxu0 %v11737_v18  ;;  %v4572_v25 = vrot.slane %v4571_v59, 4  ;;  %v11740_v18 = vcombine.low %v16234_v28, %v16248_v14  ;;  %v8565_v28 = vrot.slane %v13971_v33, 5  ;;  %v3924_v59 = vld [vmem:[#allocation2 + $0x18c] sm:$0xf]  ;;  %v16300_v44 = vsel %vm14685_vm5, %v8560_v40, %v8561_v56  ;;  %v13973_v14 = vld [vmem:[#allocation2 + $0x188] sm:$0x1] }
 0x322   : > { %12649 = vmatprep.mubr.bf16.mxu1 %v16180_v10  ;;  %v16270_v10 = vsel %vm14685_vm5, %v11692_v39, %v8551_v61  ;;  %v4596_v63 = vrot.slane %v4595_v55, 4  ;;  %v4624_v12 = vrot.slane %v4622_v5, 5  ;;  %v11694_v23 = vrot.slane %v8267_v42, 9  ;;  %v13976_v40 = vld [vmem:[#allocation2 + $0x190] sm:$0xf] }
 0x323   : > { %v4577_v49 = vsel %vm14502_vm2, %v4572_v25, %v16250_v16  ;;  %v4620_v61 = vrot.slane %v4619_v54, 4  ;;  %v8567_v4 = vrot.slane %v8565_v28, 4  ;;  %v4651_v16 = vshrl.u32 %v3924_v59, 16  ;;  %v13977_v56 = vld [vmem:[#allocation2 + $0x19c] sm:$0xf] }
 0x324   : > { %v4601_v47 = vsel %vm14502_vm2, %v4596_v63, %v4600_v17  ;;  %v4654_v39 = vshll.u32 %v3924_v59, 16  ;;  %v4660_v36 = vshll.u32 %v13974_v21, 16  ;;  %v4629_v52 = vrot.slane %v4627_v7, 4  ;;  %v8269_v5 = vld [vmem:[#allocation2 + $0x198] sm:$0xe] }
 0x325   : > { %v4632_v62 = vrot.slane %v4630_v20, 5  ;;  %v16303_v32 = vrot.slane %v4636_v6, 5  ;;  %v4642_v43 = vrot.slane %v4640_v58, 4  ;;  %v11449_v45 = vcombine.low %v4567_v53, %v4577_v49  ;;  %v13978_v53 = vld [vmem:[#allocation2 + $0x19c] sm:$0xf] }
 0x326   : > { %v11741_v35 = vcombine.low %v16270_v10, %v8555_v46  ;;  %v11450_v55 = vcombine.low %v4591_v41, %v4601_v47  ;;  %v11742_v31 = vcombine.low %v16287_v13, %v16300_v44  ;;  %v8566_v30 = vsel %vm14685_vm5, %v11694_v23, %v8565_v28  ;;  %v13979_v49 = vld [vmem:[#allocation2 + $0x194] sm:$0x1]  ;;  %v13981_v47 = vld [vmem:[#allocation2 + $0x1a0] sm:$0x1] }
 0x327   : > { %v4653_v1 = vrot.slane %v4651_v16, 4  ;;  %v4656_v34 = vrot.slane %v4654_v39, 5  ;;  %v4625_v22 = vsel %vm14502_vm2, %v4620_v61, %v4624_v12  ;;  %v4633_v50 = vor.u32 %v4632_v62, %v4629_v52  ;;  %v13980_v20 = vld [vmem:[#allocation2 + $0x194] sm:$0x1]  ;;  %v13982_v52 = vld [vmem:[#allocation2 + $0x1a8] sm:$0xf] }
 0x328   : > { %12970 = vmatmul.mubr.bf16.gmra.mrb[44].mxu0 %v11738_v11  ;;  %v4610_v11 = vrot.slane %v4609_v24, 4  ;;  %v11695_v63 = vrot.slane %v8268_v48, 9  ;;  %v8572_v27 = vrot.slane %v13976_v40, 5  ;;  %v8579_v60 = vrot.slane %v13977_v56, 5 }
 0x329   : > { %12650 = vmatmul.mubr.bf16.gmra.mrb[44].mxu1 %v16188_v2  ;;  %12973 = vmatprep.mubr.bf16.mxu0 %v11739_v8  ;;  %v8568_v2 = vrot.slane %v13973_v14, 5  ;;  %v4664_v8 = vshrl.u32 %v13974_v21, 16  ;;  %v4675_v0 = vshrl.u32 %v3927_v15, 16  ;;  %v4684_v24 = vshll.u32 %v13978_v53, 16 }
 0x32a   : > { %12653 = vmatprep.mubr.bf16.mxu1 %v16220_v19  ;;  %v11448_v19 = vcombine.low %v4543_v51, %v4553_v29  ;;  %v4615_v26 = vsel %vm14502_vm2, %v4610_v11, %v16260_v9  ;;  %v16320_v51 = vrot.slane %v4660_v36, 5  ;;  %v4643_v9 = vor.u32 %v4642_v43, %v16303_v32  ;;  %v13975_v29 = vld [vmem:[#allocation2 + $0x188] sm:$0x1] }
 0x32b   : > { %v8569_v37 = vsel %vm14685_vm5, %v8567_v4, %v8568_v2  ;;  %v4666_v25 = vrot.slane %v4664_v8, 4  ;;  %v4646_v10 = vshll.u32 %v13975_v29, 16  ;;  %v4688_v54 = vshrl.u32 %v13978_v53, 16 }
 0x32c   : > { %v11743_v17 = vcombine.low %v8566_v30, %v8569_v37  ;;  %v11451_v42 = vcombine.low %v4615_v26, %v4625_v22  ;;  %v4657_v33 = vor.u32 %v4656_v34, %v4653_v1  ;;  %v4670_v46 = vshll.u32 %v13979_v49, 16 }
 0x32d   : > { %v4667_v28 = vor.u32 %v4666_v25, %v16320_v51  ;;  %v4634_v41 = vrot.slane %v4633_v50, 4  ;;  %v4644_v13 = vrot.slane %v4643_v9, 4  ;;  %v4648_v7 = vrot.slane %v4646_v10, 5  ;;  %v13984_v25 = vld [vmem:[#allocation2 + $0x1ac] sm:$0x1] }
 0x32e   : > { %v8575_v38 = vrot.slane %v13980_v20, 5  ;;  %v8574_v6 = vrot.slane %v8572_v27, 4  ;;  %v11696_v58 = vrot.slane %v8269_v5, 9  ;;  %v8581_v59 = vrot.slane %v8579_v60, 4 }
 0x32f   : > { %v8582_v44 = vrot.slane %v13981_v47, 5  ;;  %v4677_v12 = vrot.slane %v4675_v0, 4  ;;  %v4686_v11 = vrot.slane %v4684_v24, 5  ;;  %v4690_v61 = vrot.slane %v4688_v54, 4 }
 0x330   : > { %12974 = vmatmul.mubr.bf16.gmra.mrb[48].mxu0 %v11740_v18  ;;  %v4678_v18 = vshll.u32 %v3927_v15, 16  ;;  %v4658_v4 = vrot.slane %v4657_v33, 4  ;;  %v4668_v14 = vrot.slane %v4667_v28, 4  ;;  %v4672_v2 = vrot.slane %v4670_v46, 5 }
 0x331   : > { %12654 = vmatmul.mubr.bf16.gmra.mrb[48].mxu1 %v11448_v19  ;;  %12977 = vmatprep.mubr.bf16.mxu0 %v11741_v35  ;;  %v4639_v16 = vsel %vm14502_vm2, %v4634_v41, %v16303_v32  ;;  %v8573_v39 = vsel %vm14685_vm5, %v11695_v63, %v8572_v27  ;;  %v4649_v21 = vsel %vm14502_vm2, %v4644_v13, %v4648_v7  ;;  %v8586_v62 = vrot.slane %v13982_v52, 5 }
 0x332   : > { %12657 = vmatprep.mubr.bf16.mxu1 %v11449_v45  ;;  %v4680_v23 = vrot.slane %v4678_v18, 5  ;;  %v8576_v36 = vsel %vm14685_vm5, %v8574_v6, %v8575_v38  ;;  %v8580_v8 = vsel %vm14685_vm5, %v11696_v58, %v8579_v60  ;;  %v8583_v32 = vsel %vm14685_vm5, %v8581_v59, %v8582_v44  ;;  %v13983_v45 = vld [vmem:[#allocation2 + $0x1a0] sm:$0x1] }
 0x333   : > { %v4691_v19 = vor.u32 %v4690_v61, %v4686_v11  ;;  %v4694_v35 = vshll.u32 %v13983_v45, 16  ;;  %v4673_v26 = vsel %vm14502_vm2, %v4668_v14, %v4672_v2  ;;  %v11452_v30 = vcombine.low %v4639_v16, %v4649_v21 }
 0x334   : > { %v4681_v43 = vor.u32 %v4680_v23, %v4677_v12  ;;  %v11744_v37 = vcombine.low %v8573_v39, %v8576_v36  ;;  %v11745_v48 = vcombine.low %v8580_v8, %v8583_v32  ;;  %v8588_v34 = vrot.slane %v8586_v62, 4 }
 0x335   : > { %v8589_v15 = vrot.slane %v13984_v25, 5  ;;  %v4692_v9 = vrot.slane %v4691_v19, 4  ;;  %v4696_v29 = vrot.slane %v4694_v35, 5 }
 0x336   : > { %v4682_v50 = vrot.slane %v4681_v43, 4 }
 0x337   : > { %v8590_v10 = vsel %vm14685_vm5, %v8588_v34, %v8589_v15  ;;  %v4697_v63 = vsel %vm14502_vm2, %v4692_v9, %v4696_v29 }
 0x338   : > { %12978 = vmatmul.mubr.bf16.gmra.mrb[52].mxu0 %v11742_v31  ;;  %v4663_v31 = vsel %vm14502_vm2, %v4658_v4, %v16320_v51 }
 0x339   : > { %12658 = vmatmul.mubr.bf16.gmra.mrb[52].mxu1 %v11450_v55  ;;  %12981 = vmatprep.mubr.bf16.mxu0 %v11743_v17  ;;  %v8270_v55 = vld [vmem:[#allocation2 + $0x1a4] sm:$0xe]  ;;  %v11453_v22 = vcombine.low %v4663_v31, %v4673_v26  ;;  %v4687_v17 = vsel %vm14502_vm2, %v4682_v50, %v4686_v11  ;;  %vm16818_vm2 = vmor (!%p11755_p1), %vm10009_vm8, %vm10010_vm9 }
 0x33a   : > { %12661 = vmatprep.mubr.bf16.mxu1 %v11451_v42  ;;  %v11697_v1 = vrot.slane %v8270_v55, 9  ;;  %v11454_v27 = vcombine.low %v4687_v17, %v4697_v63 }
 0x33c   : > { %v8587_v51 = vsel %vm14685_vm5, %v11697_v1, %v8586_v62 }
 0x33d   : > { %v11746_v40 = vcombine.low %v8587_v51, %v8590_v10 }
 0x340   : > { %12982 = vmatmul.mubr.bf16.gmra.mrb[56].mxu0 %v11744_v37 }
 0x341   : > { %12662 = vmatmul.mubr.bf16.gmra.mrb[56].mxu1 %v11452_v30  ;;  %12985 = vmatprep.mubr.bf16.mxu0 %v11745_v48 }
 0x342   : > { %12665 = vmatprep.mubr.bf16.mxu1 %v11453_v22 }
 0x348   : > { %12986 = vmatmul.mubr.bf16.gmra.mrb[60].mxu0 %v11746_v40 }
 0x349   : > { %12666 = vmatmul.mubr.bf16.gmra.mrb[60].mxu1 %v11454_v27 }
 0x364   : > { %v12527_v56 = vpop.f32.mrb[0].mxu1 }
 0x365   : > { %v3515_v60 = vpop.f32.mrb[1].mxu1 }
 0x366   : > { %v12528_v5 = vpop.f32.mrb[2].mxu1 }
 0x367   : > { %v3518_v0 = vpop.f32.mrb[3].mxu1 }
 0x36c   : > { %v12531_v18 = vpop.f32.mrb[4].mxu1 }
 0x36d   : > { %v3531_v53 = vpop.f32.mrb[5].mxu1 }
 0x36e   : > { %v12532_v24 = vpop.f32.mrb[6].mxu1 }
 0x36f   : > { %v3534_v3 = vpop.f32.mrb[7].mxu1 }
 0x374   : > { %v12535_v54 = vpop.f32.mrb[8].mxu1 }
 0x375   : > { %v3547_v42 = vpop.f32.mrb[9].mxu1 }
 0x376   : > { %v12536_v33 = vpop.f32.mrb[10].mxu1 }
 0x377   : > { %v3550_v28 = vpop.f32.mrb[11].mxu1 }
 0x37c   : > { %v12539_v49 = vpop.f32.mrb[12].mxu1 }
 0x37d   : > { %v3563_v46 = vpop.f32.mrb[13].mxu1 }
 0x37e   : > { %v12540_v57 = vpop.f32.mrb[14].mxu1 }
 0x37f   : > { %v3566_v41 = vpop.f32.mrb[15].mxu1 }
 0x384   : > { %v12543_v13 = vpop.f32.mrb[16].mxu1 }
 0x385   : > { %v3579_v7 = vpop.f32.mrb[17].mxu1 }
 0x386   : > { %v12544_v20 = vpop.f32.mrb[18].mxu1 }
 0x387   : > { %v3582_v38 = vpop.f32.mrb[19].mxu1 }
 0x38c   : > { %v12547_v6 = vpop.f32.mrb[20].mxu1 }
 0x38d   : > { %v3595_v58 = vpop.f32.mrb[21].mxu1 }
 0x38e   : > { %v12548_v59 = vpop.f32.mrb[22].mxu1 }
 0x38f   : > { %v3598_v47 = vpop.f32.mrb[23].mxu1 }
 0x394   : > { %v12551_v44 = vpop.f32.mrb[24].mxu1 }
 0x395   : > { %v3611_v12 = vpop.f32.mrb[25].mxu1 }
 0x396   : > { %v12552_v23 = vpop.f32.mrb[26].mxu1 }
 0x397   : > { %v3614_v11 = vpop.f32.mrb[27].mxu1 }
 0x39c   : > { %v12555_v61 = vpop.f32.mrb[28].mxu1 }
 0x39d   : > { %v3627_v4 = vpop.f32.mrb[29].mxu1 }
 0x39e   : > { %v16352_v14 = vpop.f32.mrb[30].mxu1 }
 0x39f   : > { %v16354_v2 = vpop.f32.mrb[31].mxu1 }
 0x3a3   : > { %v12927_v16 = vpop.f32.mrb[0].mxu0 }
 0x3a4   : > { %v16356_v39 = vadd.f32 %v12927_v16, %v12527_v56  ;;  %v8821_v21 = vpop.f32.mrb[1].mxu0 }
 0x3a5   : > { %v16358_v36 = vadd.f32 %v8821_v21, %v3515_v60  ;;  %v12928_v8 = vpop.f32.mrb[2].mxu0 }
 0x3a6   : > { %17650 = vst [vmem:[#allocation24_spill] sm:$0xff] %v16356_v39  ;;  %v16360_v52 = vadd.f32 %v12928_v8, %v12528_v5  ;;  %v8824_v62 = vpop.f32.mrb[3].mxu0 }
 0x3a7   : > { %17651 = vst [vmem:[#allocation19_spill] sm:$0xff] %v16358_v36  ;;  %v16362_v32 = vadd.f32 %v8824_v62, %v3518_v0 }
 0x3a8   : > { %17652 = vst [vmem:[#allocation20_spill] sm:$0xff] %v16360_v52 }
 0x3a9   : > { %17653 = vst [vmem:[#allocation21_spill] sm:$0xff] %v16362_v32 }
 0x3ab   : > { %v12931_v43 = vpop.f32.mrb[4].mxu0 }
 0x3ac   : > { %v16364_v19 = vadd.f32 %v12931_v43, %v12531_v18  ;;  %v8837_v45 = vpop.f32.mrb[5].mxu0 }
 0x3ad   : > { %v16366_v35 = vadd.f32 %v8837_v45, %v3531_v53  ;;  %v12932_v55 = vpop.f32.mrb[6].mxu0 }
 0x3ae   : > { %17654 = vst [vmem:[#allocation25_spill] sm:$0xff] %v16364_v19  ;;  %v16368_v31 = vadd.f32 %v12932_v55, %v12532_v24  ;;  %v8840_v26 = vpop.f32.mrb[7].mxu0 }
 0x3af   : > { %17655 = vst [vmem:[#allocation26_spill] sm:$0xff] %v16366_v35  ;;  %v16370_v30 = vadd.f32 %v8840_v26, %v3534_v3 }
 0x3b0   : > { %17656 = vst [vmem:[#allocation27_spill] sm:$0xff] %v16368_v31 }
 0x3b1   : > { %17657 = vst [vmem:[#allocation23_spill] sm:$0xff] %v16370_v30 }
 0x3b3   : > { %v12935_v37 = vpop.f32.mrb[8].mxu0 }
 0x3b4   : > { %v16372_v48 = vadd.f32 %v12935_v37, %v12535_v54  ;;  %v8853_v1 = vpop.f32.mrb[9].mxu0 }
 0x3b5   : > { %v16374_v34 = vadd.f32 %v8853_v1, %v3547_v42  ;;  %v12936_v25 = vpop.f32.mrb[10].mxu0 }
 0x3b6   : > { %v16376_v15 = vadd.f32 %v12936_v25, %v12536_v33  ;;  %v8856_v22 = vpop.f32.mrb[11].mxu0 }
 0x3b7   : > { %v16378_v50 = vadd.f32 %v8856_v22, %v3550_v28 }
 0x3bb   : > { %v12939_v9 = vpop.f32.mrb[12].mxu0 }
 0x3bc   : > { %v16380_v29 = vadd.f32 %v12939_v9, %v12539_v49  ;;  %v8869_v51 = vpop.f32.mrb[13].mxu0 }
 0x3bd   : > { %v16382_v10 = vadd.f32 %v8869_v51, %v3563_v46  ;;  %v12940_v17 = vpop.f32.mrb[14].mxu0 }
 0x3be   : > { %v16384_v63 = vadd.f32 %v12940_v17, %v12540_v57  ;;  %v8872_v40 = vpop.f32.mrb[15].mxu0 }
 0x3bf   : > { %v16386_v27 = vadd.f32 %v8872_v40, %v3566_v41 }
 0x3c3   : > { %v12943_v56 = vpop.f32.mrb[16].mxu0 }
 0x3c4   : > { %v16388_v60 = vadd.f32 %v12943_v56, %v12543_v13  ;;  %v8885_v5 = vpop.f32.mrb[17].mxu0 }
 0x3c5   : > { %v16390_v0 = vadd.f32 %v8885_v5, %v3579_v7  ;;  %v12944_v18 = vpop.f32.mrb[18].mxu0 }
 0x3c6   : > { %v16392_v53 = vadd.f32 %v12944_v18, %v12544_v20  ;;  %v8888_v24 = vpop.f32.mrb[19].mxu0 }
 0x3c7   : > { %v16394_v3 = vadd.f32 %v8888_v24, %v3582_v38 }
 0x3cb   : > { %v12947_v54 = vpop.f32.mrb[20].mxu0 }
 0x3cc   : > { %v16396_v42 = vadd.f32 %v12947_v54, %v12547_v6  ;;  %v8901_v33 = vpop.f32.mrb[21].mxu0 }
 0x3cd   : > { %v16398_v28 = vadd.f32 %v8901_v33, %v3595_v58  ;;  %v12948_v49 = vpop.f32.mrb[22].mxu0 }
 0x3ce   : > { %v16400_v46 = vadd.f32 %v12948_v49, %v12548_v59  ;;  %v8904_v57 = vpop.f32.mrb[23].mxu0 }
 0x3cf   : > { %v16402_v41 = vadd.f32 %v8904_v57, %v3598_v47 }
 0x3d3   : > { %v12951_v13 = vpop.f32.mrb[24].mxu0 }
 0x3d4   : > { %v16404_v7 = vadd.f32 %v12951_v13, %v12551_v44  ;;  %v8917_v20 = vpop.f32.mrb[25].mxu0 }
 0x3d5   : > { %v16406_v16 = vadd.f32 %v8917_v20, %v3611_v12  ;;  %v12952_v38 = vpop.f32.mrb[26].mxu0 }
 0x3d6   : > { %v16408_v21 = vadd.f32 %v12952_v38, %v12552_v23  ;;  %v8920_v6 = vpop.f32.mrb[27].mxu0 }
 0x3d7   : > { %v16410_v8 = vadd.f32 %v8920_v6, %v3614_v11 }
 0x3db   : > { %v12955_v58 = vpop.f32.mrb[28].mxu0 }
 0x3dc   : > { %v16412_v62 = vadd.f32 %v12955_v58, %v12555_v61  ;;  %v8933_v59 = vpop.f32.mrb[29].mxu0 }
 0x3dd   : > { %v16414_v43 = vadd.f32 %v8933_v59, %v3627_v4  ;;  %v12956_v47 = vpop.f32.mrb[30].mxu0 }
 0x3de   : > { %v16417_v45 = vadd.f32 %v12956_v47, %v16352_v14  ;;  %v8936_v44 = vpop.f32.mrb[31].mxu0 }
 0x3df   : > { %v16420_v12 = vadd.f32 %v8936_v44, %v16354_v2 }
 0x3e3   : > { %v12959_v55 = vpop.f32.mrb[32].mxu0 }
 0x3e4   : > { %v12639_v23 = vpop.f32.mrb[32].mxu1  ;;  %v8949_v26 = vpop.f32.mrb[33].mxu0 }
 0x3e5   : > { %v16422_v37 = vadd.f32 %v12959_v55, %v12639_v23  ;;  %v5056_v11 = vpop.f32.mrb[33].mxu1  ;;  %v12960_v1 = vpop.f32.mrb[34].mxu0 }
 0x3e6   : > { %v16424_v61 = vadd.f32 %v8949_v26, %v5056_v11  ;;  %v12640_v25 = vpop.f32.mrb[34].mxu1  ;;  %v8952_v4 = vpop.f32.mrb[35].mxu0 }
 0x3e7   : > { %v16426_v22 = vadd.f32 %v12960_v1, %v12640_v25  ;;  %v5059_v9 = vpop.f32.mrb[35].mxu1 }
 0x3e8   : > { %v16428_v14 = vadd.f32 %v8952_v4, %v5059_v9 }
 0x3e9   : > { %17658 = vst [vmem:[#allocation22_spill] sm:$0xff] %v16426_v22 }
 0x3eb   : > { %v12963_v51 = vpop.f32.mrb[36].mxu0 }
 0x3ec   : > { %v12643_v17 = vpop.f32.mrb[36].mxu1  ;;  %v8965_v2 = vpop.f32.mrb[37].mxu0 }
 0x3ed   : > { %v16430_v40 = vadd.f32 %v12963_v51, %v12643_v17  ;;  %v5072_v56 = vpop.f32.mrb[37].mxu1  ;;  %v12964_v5 = vpop.f32.mrb[38].mxu0 }
 0x3ee   : > { %v16432_v18 = vadd.f32 %v8965_v2, %v5072_v56  ;;  %v12644_v24 = vpop.f32.mrb[38].mxu1  ;;  %v8968_v54 = vpop.f32.mrb[39].mxu0 }
 0x3ef   : > { %17659 = vst [vmem:[#allocation28_spill] sm:$0xff] %v16430_v40  ;;  %v16434_v33 = vadd.f32 %v12964_v5, %v12644_v24  ;;  %v5075_v49 = vpop.f32.mrb[39].mxu1 }
 0x3f0   : > { %17660 = vst [vmem:[#allocation29_spill] sm:$0xff] %v16432_v18  ;;  %v16436_v57 = vadd.f32 %v8968_v54, %v5075_v49 }
 0x3f1   : > { %17661 = vst [vmem:[#allocation30_spill] sm:$0xff] %v16434_v33 }
 0x3f2   : > { %17662 = vst [vmem:[#allocation31_spill] sm:$0xff] %v16436_v57 }
 0x3f3   : > { %v12967_v13 = vpop.f32.mrb[40].mxu0 }
 0x3f4   : > { %v12647_v20 = vpop.f32.mrb[40].mxu1  ;;  %v8981_v38 = vpop.f32.mrb[41].mxu0 }
 0x3f5   : > { %v16438_v6 = vadd.f32 %v12967_v13, %v12647_v20  ;;  %v5088_v58 = vpop.f32.mrb[41].mxu1  ;;  %v12968_v59 = vpop.f32.mrb[42].mxu0 }
 0x3f6   : > { %v16440_v47 = vadd.f32 %v8981_v38, %v5088_v58  ;;  %v12648_v44 = vpop.f32.mrb[42].mxu1  ;;  %v8984_v55 = vpop.f32.mrb[43].mxu0 }
 0x3f7   : > { %17663 = vst [vmem:[#allocation32_spill] sm:$0xff] %v16438_v6  ;;  %v16442_v23 = vadd.f32 %v12968_v59, %v12648_v44  ;;  %v5091_v26 = vpop.f32.mrb[43].mxu1 }
 0x3f8   : > { %17664 = vst [vmem:[#allocation33_spill] sm:$0xff] %v16440_v47  ;;  %v16444_v11 = vadd.f32 %v8984_v55, %v5091_v26 }
 0x3f9   : > { %17665 = vst [vmem:[#allocation34_spill] sm:$0xff] %v16442_v23 }
 0x3fa   : > { %17666 = vst [vmem:[#allocation35_spill] sm:$0xff] %v16444_v11 }
 0x3fb   : > { %v12971_v1 = vpop.f32.mrb[44].mxu0 }
 0x3fc   : > { %v12651_v25 = vpop.f32.mrb[44].mxu1  ;;  %v8997_v4 = vpop.f32.mrb[45].mxu0 }
 0x3fd   : > { %v16446_v9 = vadd.f32 %v12971_v1, %v12651_v25  ;;  %v5104_v51 = vpop.f32.mrb[45].mxu1  ;;  %v12972_v17 = vpop.f32.mrb[46].mxu0 }
 0x3fe   : > { %v16448_v2 = vadd.f32 %v8997_v4, %v5104_v51  ;;  %v12652_v56 = vpop.f32.mrb[46].mxu1  ;;  %v9000_v5 = vpop.f32.mrb[47].mxu0 }
 0x3ff   : > { %17667 = vst [vmem:[#allocation36_spill] sm:$0xff] %v16446_v9  ;;  %v16450_v24 = vadd.f32 %v12972_v17, %v12652_v56  ;;  %v5107_v54 = vpop.f32.mrb[47].mxu1 }
 0x400   : > { %17668 = vst [vmem:[#allocation37_spill] sm:$0xff] %v16448_v2  ;;  %v16452_v49 = vadd.f32 %v9000_v5, %v5107_v54 }
 0x401   : > { %17669 = vst [vmem:[#allocation38_spill] sm:$0xff] %v16450_v24 }
 0x402   : > { %17670 = vst [vmem:[#allocation39_spill] sm:$0xff] %v16452_v49 }
 0x403   : > { %v12975_v13 = vpop.f32.mrb[48].mxu0 }
 0x404   : > { %v12655_v20 = vpop.f32.mrb[48].mxu1  ;;  %v9013_v38 = vpop.f32.mrb[49].mxu0 }
 0x405   : > { %v16454_v58 = vadd.f32 %v12975_v13, %v12655_v20  ;;  %v5120_v59 = vpop.f32.mrb[49].mxu1  ;;  %v12976_v44 = vpop.f32.mrb[50].mxu0 }
 0x406   : > { %v16456_v55 = vadd.f32 %v9013_v38, %v5120_v59  ;;  %v12656_v26 = vpop.f32.mrb[50].mxu1  ;;  %v9016_v1 = vpop.f32.mrb[51].mxu0 }
 0x407   : > { %17671 = vst [vmem:[#allocation40_spill] sm:$0xff] %v16454_v58  ;;  %v16458_v25 = vadd.f32 %v12976_v44, %v12656_v26  ;;  %v5123_v4 = vpop.f32.mrb[51].mxu1 }
 0x408   : > { %17672 = vst [vmem:[#allocation41_spill] sm:$0xff] %v16456_v55  ;;  %v16460_v51 = vadd.f32 %v9016_v1, %v5123_v4 }
 0x409   : > { %17673 = vst [vmem:[#allocation42_spill] sm:$0xff] %v16458_v25 }
 0x40a   : > { %17674 = vst [vmem:[#allocation43_spill] sm:$0xff] %v16460_v51 }
 0x40b   : > { %v12979_v17 = vpop.f32.mrb[52].mxu0 }
 0x40c   : > { %v12659_v56 = vpop.f32.mrb[52].mxu1  ;;  %v9029_v5 = vpop.f32.mrb[53].mxu0 }
 0x40d   : > { %v16462_v54 = vadd.f32 %v12979_v17, %v12659_v56  ;;  %v5136_v24 = vpop.f32.mrb[53].mxu1  ;;  %v12980_v9 = vpop.f32.mrb[54].mxu0 }
 0x40e   : > { %v16464_v13 = vadd.f32 %v9029_v5, %v5136_v24  ;;  %v12660_v20 = vpop.f32.mrb[54].mxu1  ;;  %v9032_v58 = vpop.f32.mrb[55].mxu0 }
 0x40f   : > { %17675 = vst [vmem:[#allocation44_spill] sm:$0xff] %v16462_v54  ;;  %v16466_v38 = vadd.f32 %v12980_v9, %v12660_v20  ;;  %v5139_v59 = vpop.f32.mrb[55].mxu1 }
 0x410   : > { %17676 = vst [vmem:[#allocation45_spill] sm:$0xff] %v16464_v13  ;;  %v16468_v55 = vadd.f32 %v9032_v58, %v5139_v59 }
 0x411   : > { %17677 = vst [vmem:[#allocation46_spill] sm:$0xff] %v16466_v38 }
 0x412   : > { %17678 = vst [vmem:[#allocation47_spill] sm:$0xff] %v16468_v55 }
 0x413   : > { %v12983_v44 = vpop.f32.mrb[56].mxu0 }
 0x414   : > { %v12663_v26 = vpop.f32.mrb[56].mxu1  ;;  %v9045_v1 = vpop.f32.mrb[57].mxu0 }
 0x415   : > { %v16470_v4 = vadd.f32 %v12983_v44, %v12663_v26  ;;  %v5152_v25 = vpop.f32.mrb[57].mxu1  ;;  %v12984_v51 = vpop.f32.mrb[58].mxu0 }
 0x416   : > { %v16472_v17 = vadd.f32 %v9045_v1, %v5152_v25  ;;  %v12664_v56 = vpop.f32.mrb[58].mxu1  ;;  %v9048_v54 = vpop.f32.mrb[59].mxu0 }
 0x417   : > { %17679 = vst [vmem:[#allocation48_spill] sm:$0xff] %v16470_v4  ;;  %v16474_v24 = vadd.f32 %v12984_v51, %v12664_v56  ;;  %v5155_v5 = vpop.f32.mrb[59].mxu1  ;;  %v9144_v51 = vadd.f32 (!%p11755_p1), %v16362_v32, %v16358_v36 }
 0x418   : > { %17680 = vst [vmem:[#allocation49_spill] sm:$0xff] %v16472_v17  ;;  %v16476_v13 = vadd.f32 %v9048_v54, %v5155_v5 }
 0x419   : > { %17681 = vst [vmem:[#allocation50_spill] sm:$0xff] %v16474_v24  ;;  %v9145_v54 = vadd.f32 (!%p11755_p1), %v16356_v39, %v9144_v51 }
 0x41a   : > { %17682 = vst [vmem:[#allocation51_spill] sm:$0xff] %v16476_v13 }
 0x41b   : > { %v12987_v9 = vpop.f32.mrb[60].mxu0  ;;  %v9146_v56 = vadd.f32 (!%p11755_p1), %v16360_v52, %v9145_v54  ;;  %v9217_v54 = vmul.f32 (!%p11755_p1), %v16360_v52, %v16360_v52 }
 0x41c   : > { %v12667_v20 = vpop.f32.mrb[60].mxu1  ;;  %v9061_v58 = vpop.f32.mrb[61].mxu0  ;;  %9143 = sbr.rel (%p11755_p1) target bundleno = 1457 (0x5b1), region = 94 }
 0x41d   : > { %v16478_v59 = vadd.f32 %v12987_v9, %v12667_v20  ;;  %v5168_v38 = vpop.f32.mrb[61].mxu1  ;;  %v12988_v55 = vpop.f32.mrb[62].mxu0  ;;  %v9214_v20 = vmul.f32 (!%p11755_p1), %v16358_v36, %v16358_v36 }
 0x41e   : > { %v16480_v44 = vadd.f32 %v9061_v58, %v5168_v38  ;;  %v12668_v26 = vpop.f32.mrb[62].mxu1  ;;  %v9064_v4 = vpop.f32.mrb[63].mxu0  ;;  %v9147_v38 = vadd.f32 (!%p11755_p1), %v16366_v35, %v9146_v56  ;;  %v9215_v58 = vmul.f32 (!%p11755_p1), %v16362_v32, %v16362_v32 }
 0x41f   : > { %17683 = vst [vmem:[#allocation52_spill] sm:$0xff] %v16478_v59  ;;  %v16482_v25 = vadd.f32 %v12988_v55, %v12668_v26  ;;  %v5171_v1 = vpop.f32.mrb[63].mxu1 }
 0x420   : > { %17684 = vst [vmem:[#allocation53_spill] sm:$0xff] %v16480_v44  ;;  %v16484_v17 = vadd.f32 %v9064_v4, %v5171_v1  ;;  %v9148_v5 = vadd.f32 (!%p11755_p1), %v16370_v30, %v9147_v38  ;;  %v9216_v1 = vmul.f32 (!%p11755_p1), %v16356_v39, %v16356_v39  ;;  %v9278_v56 = vadd.f32 (!%p11755_p1), %v9215_v58, %v9214_v20 }
 0x421   : > { %17685 = vst [vmem:[#allocation54_spill] sm:$0xff] %v16482_v25  ;;  %v9221_v58 = vmul.f32 (!%p11755_p1), %v16368_v31, %v16368_v31 }
 0x422   : > { %17686 = vst [vmem:[#allocation55_spill] sm:$0xff] %v16484_v17  ;;  %v9149_v55 = vadd.f32 (!%p11755_p1), %v16364_v19, %v9148_v5  ;;  %v9218_v5 = vmul.f32 (!%p11755_p1), %v16366_v35, %v16366_v35 }
 0x424   : > { %v9150_v9 = vadd.f32 %v16368_v31, %v9149_v55  ;;  %v9279_v55 = vadd.f32 %v9278_v56, %v9216_v1  ;;  %v9222_v56 = vmul.f32 %v16374_v34, %v16374_v34 }
 0x426   : > { %v9151_v4 = vadd.f32 %v16374_v34, %v9150_v9  ;;  %v9280_v32 = vadd.f32 %v9279_v55, %v9217_v54  ;;  %v9223_v55 = vmul.f32 %v16378_v50, %v16378_v50 }
 0x428   : > { %v9152_v26 = vadd.f32 %v16378_v50, %v9151_v4  ;;  %v9219_v4 = vmul.f32 %v16370_v30, %v16370_v30  ;;  %v9281_v36 = vadd.f32 %v9280_v32, %v9218_v5 }
 0x42a   : > { %v9153_v51 = vadd.f32 %v16372_v48, %v9152_v26  ;;  %v9220_v26 = vmul.f32 %v16364_v19, %v16364_v19 }
 0x42c   : > { %v9154_v38 = vadd.f32 %v16376_v15, %v9153_v51  ;;  %v9282_v51 = vadd.f32 %v9281_v36, %v9219_v4  ;;  %v9225_v4 = vmul.f32 %v16376_v15, %v16376_v15 }
 0x42e   : > { %v9155_v9 = vadd.f32 %v16382_v10, %v9154_v38  ;;  %v9283_v38 = vadd.f32 %v9282_v51, %v9220_v26  ;;  %v9226_v51 = vmul.f32 %v16382_v10, %v16382_v10 }
 0x430   : > { %v9156_v39 = vadd.f32 %v16386_v27, %v9155_v9  ;;  %v9284_v9 = vadd.f32 %v9283_v38, %v9221_v58  ;;  %v9227_v38 = vmul.f32 %v16386_v27, %v16386_v27 }
 0x432   : > { %v9157_v20 = vadd.f32 %v16380_v29, %v9156_v39  ;;  %v9224_v39 = vmul.f32 %v16372_v48, %v16372_v48  ;;  %v9285_v5 = vadd.f32 %v9284_v9, %v9222_v56  ;;  %v9228_v9 = vmul.f32 %v16380_v29, %v16380_v29 }
 0x434   : > { %v9158_v1 = vadd.f32 %v16384_v63, %v9157_v20  ;;  %v9286_v20 = vadd.f32 %v9285_v5, %v9223_v55  ;;  %v9229_v5 = vmul.f32 %v16384_v63, %v16384_v63 }
 0x436   : > { %v9159_v54 = vadd.f32 %v16390_v0, %v9158_v1  ;;  %v9287_v1 = vadd.f32 %v9286_v20, %v9224_v39  ;;  %v9230_v20 = vmul.f32 %v16390_v0, %v16390_v0 }
 0x438   : > { %v9160_v32 = vadd.f32 %v16394_v3, %v9159_v54  ;;  %v9288_v54 = vadd.f32 %v9287_v1, %v9225_v4  ;;  %v9231_v1 = vmul.f32 %v16394_v3, %v16394_v3 }
 0x43a   : > { %v9161_v36 = vadd.f32 %v16388_v60, %v9160_v32  ;;  %v9289_v32 = vadd.f32 %v9288_v54, %v9226_v51  ;;  %v9232_v54 = vmul.f32 %v16388_v60, %v16388_v60 }
 0x43c   : > { %v9162_v26 = vadd.f32 %v16392_v53, %v9161_v36  ;;  %v9290_v36 = vadd.f32 %v9289_v32, %v9227_v38  ;;  %v9233_v32 = vmul.f32 %v16392_v53, %v16392_v53 }
 0x43e   : > { %v9163_v58 = vadd.f32 %v16398_v28, %v9162_v26  ;;  %v9291_v26 = vadd.f32 %v9290_v36, %v9228_v9  ;;  %v9234_v36 = vmul.f32 %v16398_v28, %v16398_v28 }
 0x440   : > { %v9164_v56 = vadd.f32 %v16402_v41, %v9163_v58  ;;  %v9292_v58 = vadd.f32 %v9291_v26, %v9229_v5  ;;  %v9235_v26 = vmul.f32 %v16402_v41, %v16402_v41 }
 0x442   : > { %v9165_v55 = vadd.f32 %v16396_v42, %v9164_v56  ;;  %v9293_v56 = vadd.f32 %v9292_v58, %v9230_v20  ;;  %v9236_v58 = vmul.f32 %v16396_v42, %v16396_v42 }
 0x444   : > { %v9166_v39 = vadd.f32 %v16400_v46, %v9165_v55  ;;  %v9294_v55 = vadd.f32 %v9293_v56, %v9231_v1  ;;  %v9237_v56 = vmul.f32 %v16400_v46, %v16400_v46 }
 0x446   : > { %v9167_v4 = vadd.f32 %v16406_v16, %v9166_v39  ;;  %v9295_v39 = vadd.f32 %v9294_v55, %v9232_v54  ;;  %v9238_v55 = vmul.f32 %v16406_v16, %v16406_v16 }
 0x448   : > { %v9168_v51 = vadd.f32 %v16410_v8, %v9167_v4  ;;  %v9296_v4 = vadd.f32 %v9295_v39, %v9233_v32  ;;  %v9239_v39 = vmul.f32 %v16410_v8, %v16410_v8 }
 0x44a   : > { %v9169_v38 = vadd.f32 %v16404_v7, %v9168_v51  ;;  %v9297_v51 = vadd.f32 %v9296_v4, %v9234_v36  ;;  %v9240_v4 = vmul.f32 %v16404_v7, %v16404_v7 }
 0x44c   : > { %v9170_v9 = vadd.f32 %v16408_v21, %v9169_v38  ;;  %v9298_v38 = vadd.f32 %v9297_v51, %v9235_v26  ;;  %v9241_v51 = vmul.f32 %v16408_v21, %v16408_v21 }
 0x44e   : > { %v9171_v5 = vadd.f32 %v16414_v43, %v9170_v9  ;;  %v9299_v9 = vadd.f32 %v9298_v38, %v9236_v58  ;;  %v9242_v38 = vmul.f32 %v16414_v43, %v16414_v43 }
 0x450   : > { %v9172_v20 = vadd.f32 %v16420_v12, %v9171_v5  ;;  %v9300_v5 = vadd.f32 %v9299_v9, %v9237_v56  ;;  %v9243_v9 = vmul.f32 %v16420_v12, %v16420_v12 }
 0x452   : > { %v9173_v1 = vadd.f32 %v16412_v62, %v9172_v20  ;;  %v9301_v20 = vadd.f32 %v9300_v5, %v9238_v55  ;;  %v9244_v5 = vmul.f32 %v16412_v62, %v16412_v62 }
 0x454   : > { %v9174_v54 = vadd.f32 %v16417_v45, %v9173_v1  ;;  %v9302_v1 = vadd.f32 %v9301_v20, %v9239_v39  ;;  %v9245_v20 = vmul.f32 %v16417_v45, %v16417_v45 }
 0x456   : > { %v9175_v32 = vadd.f32 %v16424_v61, %v9174_v54  ;;  %v9303_v54 = vadd.f32 %v9302_v1, %v9240_v4  ;;  %v9246_v1 = vmul.f32 %v16424_v61, %v16424_v61 }
 0x458   : > { %v9176_v36 = vadd.f32 %v16428_v14, %v9175_v32  ;;  %v9304_v32 = vadd.f32 %v9303_v54, %v9241_v51  ;;  %v9247_v54 = vmul.f32 %v16428_v14, %v16428_v14 }
 0x45a   : > { %v9177_v26 = vadd.f32 %v16422_v37, %v9176_v36  ;;  %v9305_v36 = vadd.f32 %v9304_v32, %v9242_v38  ;;  %v9248_v32 = vmul.f32 %v16422_v37, %v16422_v37 }
 0x45c   : > { %v9178_v58 = vadd.f32 %v16426_v22, %v9177_v26  ;;  %v9306_v26 = vadd.f32 %v9305_v36, %v9243_v9  ;;  %v9249_v36 = vmul.f32 %v16426_v22, %v16426_v22  ;;  %v17687_v22 = vld [vmem:[#allocation36_spill] sm:$0xff] }
 0x45e   : > { %v9179_v56 = vadd.f32 %v16432_v18, %v9178_v58  ;;  %v9307_v58 = vadd.f32 %v9306_v26, %v9244_v5  ;;  %v9250_v26 = vmul.f32 %v16432_v18, %v16432_v18  ;;  %v17688_v18 = vld [vmem:[#allocation38_spill] sm:$0xff] }
 0x460   : > { %v9180_v55 = vadd.f32 %v16436_v57, %v9179_v56  ;;  %v9308_v56 = vadd.f32 %v9307_v58, %v9245_v20  ;;  %v9251_v58 = vmul.f32 %v16436_v57, %v16436_v57  ;;  %v17689_v57 = vld [vmem:[#allocation41_spill] sm:$0xff] }
 0x462   : > { %v9181_v39 = vadd.f32 %v16430_v40, %v9180_v55  ;;  %v9309_v55 = vadd.f32 %v9308_v56, %v9246_v1  ;;  %v9252_v56 = vmul.f32 %v16430_v40, %v16430_v40  ;;  %v17690_v40 = vld [vmem:[#allocation43_spill] sm:$0xff] }
 0x464   : > { %v9182_v4 = vadd.f32 %v16434_v33, %v9181_v39  ;;  %v9310_v39 = vadd.f32 %v9309_v55, %v9247_v54  ;;  %v9253_v55 = vmul.f32 %v16434_v33, %v16434_v33  ;;  %v17691_v33 = vld [vmem:[#allocation40_spill] sm:$0xff] }
 0x466   : > { %v9183_v51 = vadd.f32 %v16440_v47, %v9182_v4  ;;  %v9311_v4 = vadd.f32 %v9310_v39, %v9248_v32  ;;  %v9254_v39 = vmul.f32 %v16440_v47, %v16440_v47  ;;  %v17692_v47 = vld [vmem:[#allocation42_spill] sm:$0xff] }
 0x468   : > { %v9184_v38 = vadd.f32 %v16444_v11, %v9183_v51  ;;  %v9312_v51 = vadd.f32 %v9311_v4, %v9249_v36  ;;  %v9255_v4 = vmul.f32 %v16444_v11, %v16444_v11  ;;  %v17693_v11 = vld [vmem:[#allocation45_spill] sm:$0xff] }
 0x46a   : > { %v9185_v9 = vadd.f32 %v16438_v6, %v9184_v38  ;;  %v9313_v38 = vadd.f32 %v9312_v51, %v9250_v26  ;;  %v9256_v51 = vmul.f32 %v16438_v6, %v16438_v6  ;;  %v17694_v6 = vld [vmem:[#allocation47_spill] sm:$0xff] }
 0x46c   : > { %v9186_v5 = vadd.f32 %v16442_v23, %v9185_v9  ;;  %v9314_v9 = vadd.f32 %v9313_v38, %v9251_v58  ;;  %v9257_v38 = vmul.f32 %v16442_v23, %v16442_v23  ;;  %v17695_v23 = vld [vmem:[#allocation44_spill] sm:$0xff] }
 0x46e   : > { %v9187_v20 = vadd.f32 %v16448_v2, %v9186_v5  ;;  %v9315_v5 = vadd.f32 %v9314_v9, %v9252_v56  ;;  %v9258_v9 = vmul.f32 %v16448_v2, %v16448_v2  ;;  %v17696_v2 = vld [vmem:[#allocation46_spill] sm:$0xff] }
 0x470   : > { %v9188_v1 = vadd.f32 %v16452_v49, %v9187_v20  ;;  %v9316_v20 = vadd.f32 %v9315_v5, %v9253_v55  ;;  %v9259_v5 = vmul.f32 %v16452_v49, %v16452_v49  ;;  %v17697_v49 = vld [vmem:[#allocation49_spill] sm:$0xff] }
 0x472   : > { %v9189_v54 = vadd.f32 %v17687_v22, %v9188_v1  ;;  %v9317_v1 = vadd.f32 %v9316_v20, %v9254_v39  ;;  %v9260_v20 = vmul.f32 %v17687_v22, %v17687_v22 }
 0x474   : > { %v9190_v32 = vadd.f32 %v17688_v18, %v9189_v54  ;;  %v9318_v54 = vadd.f32 %v9317_v1, %v9255_v4  ;;  %v9261_v1 = vmul.f32 %v17688_v18, %v17688_v18  ;;  %v17698_v18 = vld [vmem:[#allocation48_spill] sm:$0xff] }
 0x476   : > { %v9191_v36 = vadd.f32 %v17689_v57, %v9190_v32  ;;  %v9319_v32 = vadd.f32 %v9318_v54, %v9256_v51  ;;  %v9262_v54 = vmul.f32 %v17689_v57, %v17689_v57 }
 0x478   : > { %v9192_v26 = vadd.f32 %v17690_v40, %v9191_v36  ;;  %v9320_v36 = vadd.f32 %v9319_v32, %v9257_v38  ;;  %v9263_v32 = vmul.f32 %v17690_v40, %v17690_v40 }
 0x47a   : > { %v9193_v58 = vadd.f32 %v17691_v33, %v9192_v26  ;;  %v9321_v26 = vadd.f32 %v9320_v36, %v9258_v9  ;;  %v9264_v36 = vmul.f32 %v17691_v33, %v17691_v33 }
 0x47c   : > { %v9194_v56 = vadd.f32 %v17692_v47, %v9193_v58  ;;  %v9322_v58 = vadd.f32 %v9321_v26, %v9259_v5  ;;  %v9265_v26 = vmul.f32 %v17692_v47, %v17692_v47 }
 0x47e   : > { %v9195_v55 = vadd.f32 %v17693_v11, %v9194_v56  ;;  %v9323_v56 = vadd.f32 %v9322_v58, %v9260_v20  ;;  %v9266_v58 = vmul.f32 %v17693_v11, %v17693_v11 }
 0x480   : > { %v9196_v39 = vadd.f32 %v17694_v6, %v9195_v55  ;;  %v9324_v55 = vadd.f32 %v9323_v56, %v9261_v1  ;;  %v9267_v56 = vmul.f32 %v17694_v6, %v17694_v6 }
 0x482   : > { %v9197_v4 = vadd.f32 %v17695_v23, %v9196_v39  ;;  %v9325_v39 = vadd.f32 %v9324_v55, %v9262_v54  ;;  %v9268_v55 = vmul.f32 %v17695_v23, %v17695_v23 }
 0x484   : > { %v9198_v51 = vadd.f32 %v17696_v2, %v9197_v4  ;;  %v9326_v4 = vadd.f32 %v9325_v39, %v9263_v32  ;;  %v9269_v39 = vmul.f32 %v17696_v2, %v17696_v2 }
 0x486   : > { %v9199_v38 = vadd.f32 %v17697_v49, %v9198_v51  ;;  %v9327_v51 = vadd.f32 %v9326_v4, %v9264_v36  ;;  %v9270_v4 = vmul.f32 %v17697_v49, %v17697_v49 }
 0x488   : > { %v9200_v9 = vadd.f32 %v16476_v13, %v9199_v38  ;;  %v9328_v38 = vadd.f32 %v9327_v51, %v9265_v26  ;;  %v9271_v26 = vmul.f32 %v16476_v13, %v16476_v13 }
 0x48a   : > { %v9201_v5 = vadd.f32 %v17698_v18, %v9200_v9  ;;  %v9329_v9 = vadd.f32 %v9328_v38, %v9266_v58  ;;  %v9272_v58 = vmul.f32 %v17698_v18, %v17698_v18 }
 0x48c   : > { %v9202_v20 = vadd.f32 %v16474_v24, %v9201_v5  ;;  %v9330_v5 = vadd.f32 %v9329_v9, %v9267_v56  ;;  %v9274_v9 = vmul.f32 %v16480_v44, %v16480_v44 }
 0x48e   : > { %v9203_v1 = vadd.f32 %v16480_v44, %v9202_v20  ;;  %v9331_v20 = vadd.f32 %v9330_v5, %v9268_v55  ;;  %v9275_v55 = vmul.f32 %v16484_v17, %v16484_v17 }
 0x490   : > { %v9204_v54 = vadd.f32 %v16484_v17, %v9203_v1  ;;  %v9332_v51 = vadd.f32 %v9331_v20, %v9269_v39  ;;  %v9276_v39 = vmul.f32 %v16478_v59, %v16478_v59 }
 0x492   : > { %v9205_v32 = vadd.f32 %v16478_v59, %v9204_v54  ;;  %v9333_v1 = vadd.f32 %v9332_v51, %v9270_v4  ;;  %v9273_v54 = vmul.f32 %v16474_v24, %v16474_v24 }
 0x494   : > { %v9206_v36 = vadd.f32 %v16482_v25, %v9205_v32  ;;  %v9334_v56 = vadd.f32 %v9333_v1, %v9271_v26 }
 0x496   : > { %v9207_v6 = vrot.slane %v9206_v36, 4  ;;  %v9335_v32 = vadd.f32 %v9334_v56, %v9272_v58 }
 0x498   : > { %v9208_v38 = vadd.f32 %v9207_v6, %v9206_v36  ;;  %v9336_v5 = vadd.f32 %v9335_v32, %v9273_v54  ;;  %v9277_v6 = vmul.f32 %v16482_v25, %v16482_v25 }
 0x49a   : > { %v9209_v49 = vrot.slane %v9208_v38, 2  ;;  %v9337_v20 = vadd.f32 %v9336_v5, %v9274_v9 }
 0x49c   : > { %v9210_v18 = vadd.f32 %v9209_v49, %v9208_v38  ;;  %v9338_v36 = vadd.f32 %v9337_v20, %v9275_v55  ;;  %v17699_v55 = vld [vmem:[#allocation19_spill] sm:$0xff] }
 0x49e   : > { %v9339_v4 = vadd.f32 %v9338_v36, %v9276_v39  ;;  %v9211_v26 = vrot.slane %v9210_v18, 1 }
 0x4a0   : > { %v9340_v51 = vadd.f32 %v9339_v4, %v9277_v6  ;;  %v9212_v44 = vadd.f32 %v9211_v26, %v9210_v18  ;;  %v17700_v18 = vld [vmem:[#allocation21_spill] sm:$0xff] }
 0x4a2   : > { %v9341_v1 = vrot.slane %v9340_v51, 4  ;;  %v16679_v24 = vmul.f32 0.001953125, %v9212_v44  ;;  %v17701_v44 = vld [vmem:[#allocation24_spill] sm:$0xff] }
 0x4a4   : > { %v9342_v58 = vadd.f32 %v9341_v1, %v9340_v51  ;;  %v9348_v9 = vmul.f32 %v16679_v24, %v16679_v24  ;;  %v9351_v39 = vsub.f32 %v17699_v55, %v16679_v24  ;;  %v9352_v20 = vsub.f32 %v17700_v18, %v16679_v24  ;;  %v16764_v18 = vld [vmem:[%s11833_s16 - $0x1] ss:$0 sm:$0xff]  ;;  %v10664_v55 = vld [vmem:[#allocation2 + $0x18] sm:$0xf] }
 0x4a5   : > { %v9353_v6 = vsub.f32 %v17701_v44, %v16679_v24  ;;  %v9355_v36 = vsub.f32 %v16366_v35, %v16679_v24  ;;  %v9356_v4 = vsub.f32 %v16370_v30, %v16679_v24  ;;  %v9357_v26 = vsub.f32 %v16364_v19, %v16679_v24 }
 0x4a6   : > { %v9343_v56 = vrot.slane %v9342_v58, 2 }
 0x4a8   : > { %v9344_v17 = vadd.f32 %v9343_v56, %v9342_v58  ;;  %v16781_v58 = vld [vmem:[%s11837_s17 - $0x1] ss:$0 sm:$0xff] }
 0x4aa   : > { %v9345_v54 = vrot.slane %v9344_v17, 1 }
 0x4ac   : > { %v9346_v32 = vadd.f32 %v9345_v54, %v9344_v17  ;;  %v9354_v17 = vsub.f32 %v16360_v52, %v16679_v24 }
 0x4ae   : > { %v9347_v49 = vmul.f32 0.001953125, %v9346_v32 }
 0x4b0   : > { %v9349_v38 = vsub.f32 %v9347_v49, %v9348_v9 }
 0x4b2   : > { %v9350_v5 = vmax.f32 %v9349_v38, 0.0 }
 0x4b4   : > { %v9415_v25 = vadd.f32 1e-05, %v9350_v5 }
 0x4b6   : > { %13985 = vrsqrt.f32 %v9415_v25  ;;  %v9358_v25 = vsub.f32 %v16368_v31, %v16679_v24 }
 0x4c0   : > { %v16759_v56 = vpop.eup %13985 }
 0x4c1   : > { %v9417_v5 = vmul.f32 %v16759_v56, %v9351_v39  ;;  %v9418_v19 = vmul.f32 %v16759_v56, %v9352_v20  ;;  %v9419_v30 = vmul.f32 %v16759_v56, %v9353_v6  ;;  %v9420_v35 = vmul.f32 %v16759_v56, %v9354_v17 }
 0x4c2   : > { %v9421_v1 = vmul.f32 %v16759_v56, %v9355_v36  ;;  %v9422_v51 = vmul.f32 %v16759_v56, %v9356_v4  ;;  %v9423_v31 = vmul.f32 %v16759_v56, %v9357_v26  ;;  %v9424_v39 = vmul.f32 %v16759_v56, %v9358_v25 }
 0x4c3   : > { %v9489_v20 = vmul.f32 %v16764_v18, %v9417_v5  ;;  %v9490_v6 = vmul.f32 %v16764_v18, %v9418_v19  ;;  %v9491_v17 = vmul.f32 %v16764_v18, %v9419_v30  ;;  %v9492_v52 = vmul.f32 %v16764_v18, %v9420_v35 }
 0x4c4   : > { %v9493_v59 = vmul.f32 %v16764_v18, %v9421_v1  ;;  %v9494_v36 = vmul.f32 %v16764_v18, %v9422_v51  ;;  %v9495_v4 = vmul.f32 %v16764_v18, %v9423_v31  ;;  %v9496_v26 = vmul.f32 %v16764_v18, %v9424_v39 }
 0x4c5   : > { %v9561_v25 = vadd.f32 %v16781_v58, %v9489_v20  ;;  %v9562_v5 = vadd.f32 %v16781_v58, %v9490_v6  ;;  %v9563_v19 = vadd.f32 %v16781_v58, %v9491_v17  ;;  %v9564_v13 = vadd.f32 %v16781_v58, %v9492_v52 }
 0x4c6   : > { %v9565_v30 = vadd.f32 %v16781_v58, %v9493_v59  ;;  %v16801_v35 = vadd.f32 %v16781_v58, %v9494_v36  ;;  %v16804_v1 = vadd.f32 %v16781_v58, %v9495_v4  ;;  %v16807_v31 = vadd.f32 %v16781_v58, %v9496_v26 }
 0x4c7   : > { %vm9625_vm11 = vcmp.ge.f32.partialorder %v9561_v25, 0.0  ;;  %v9689_v51 = vmul.f32 0.2, %v9561_v25  ;;  %vm9626_vm12 = vcmp.ge.f32.partialorder %v9562_v5, 0.0  ;;  %v9690_v39 = vmul.f32 0.2, %v9562_v5 }
 0x4c8   : > { %vm9627_vm13 = vcmp.ge.f32.partialorder %v9563_v19, 0.0  ;;  %v9691_v20 = vmul.f32 0.2, %v9563_v19  ;;  %vm9628_vm14 = vcmp.ge.f32.partialorder %v9564_v13, 0.0  ;;  %v9692_v6 = vmul.f32 0.2, %v9564_v13 }
 0x4c9   : > { %v9753_v52 = vsel %vm9625_vm11, %v9561_v25, %v9689_v51  ;;  %v9754_v17 = vsel %vm9626_vm12, %v9562_v5, %v9690_v39  ;;  %vm9629_vm15 = vcmp.ge.f32.partialorder %v9565_v30, 0.0  ;;  %v9693_v59 = vmul.f32 0.2, %v9565_v30  ;;  %v10655_v5 = vld [vmem:[#allocation2 + $0xc] sm:$0xf] }
 0x4ca   : > { %v11841_v36 = vpack.c.bf16 %v9753_v52, %v9753_v52  ;;  %v11842_v2 = vpack.c.bf16 %v9754_v17, %v9754_v17  ;;  %v9755_v23 = vsel %vm9627_vm13, %v9563_v19, %v9691_v20  ;;  %v9756_v4 = vsel %vm9628_vm14, %v9564_v13, %v9692_v6 }
 0x4cb   : > { %v11843_v11 = vpack.c.bf16 %v9755_v23, %v9755_v23  ;;  %v11844_v47 = vpack.c.bf16 %v9756_v4, %v9756_v4  ;;  %v9757_v26 = vsel %vm9629_vm15, %v9565_v30, %v9693_v59  ;;  %vm9630_vm0 = vcmp.ge.f32.partialorder %v16801_v35, 0.0 }
 0x4cc   : > { %v10013_v33 = vshrl.u32 %v11841_v36, 16  ;;  %v10016_v40 = vshll.u32 %v11841_v36, 16  ;;  %v10021_v57 = vshrl.u32 %v11842_v2, 16  ;;  %v10024_v22 = vshll.u32 %v11842_v2, 16  ;;  %v10661_v2 = vld [vmem:[#allocation2 + $0x14] sm:$0x1] }
 0x4cd   : > { %v10030_v51 = vshrl.u32 %v11843_v11, 16  ;;  %v10033_v39 = vshll.u32 %v11843_v11, 16  ;;  %v10038_v19 = vshrl.u32 %v11844_v47, 16  ;;  %v10041_v13 = vshll.u32 %v11844_v47, 16 }
 0x4ce   : > { %v10015_v23 = vrot.slane %v10013_v33, 7  ;;  %v10023_v20 = vrot.slane %v10021_v57, 7  ;;  %v11845_v6 = vpack.c.bf16 %v9757_v26, %v9757_v26  ;;  %v9694_v52 = vmul.f32 0.2, %v16801_v35  ;;  %v10668_v26 = vld [vmem:[#allocation2 + $0x20] sm:$0x1] }
 0x4cf   : > { %v10032_v11 = vrot.slane %v10030_v51, 7  ;;  %v10040_v47 = vrot.slane %v10038_v19, 7  ;;  %vm9631_vm4 = vcmp.ge.f32.partialorder %v16804_v1, 0.0  ;;  %v9695_v33 = vmul.f32 0.2, %v16804_v1 }
 0x4d0   : > { %v10018_v59 = vor.u32 %v10016_v40, %v10015_v23  ;;  %v10019_v36 = vrot.slane %v10015_v23, 4  ;;  %v10026_v4 = vor.u32 %v10024_v22, %v10023_v20  ;;  %v10028_v57 = vrot.slane %v10023_v20, 4 }
 0x4d1   : > { %v10035_v38 = vor.u32 %v10033_v39, %v10032_v11  ;;  %v10036_v9 = vrot.slane %v10032_v11, 4  ;;  %v10043_v44 = vor.u32 %v10041_v13, %v10040_v47  ;;  %v10045_v54 = vrot.slane %v10040_v47, 4 }
 0x4d2   : > { %v10656_v32 = vsel %vm16812_vm1, %v10018_v59, %v10655_v5  ;;  %v10027_v51 = vsel %vm16818_vm2, %v10019_v36, %v10026_v4  ;;  %v10662_v19 = vsel %vm16825_vm3, %v10028_v57, %v10661_v2  ;;  %v10047_v49 = vshrl.u32 %v11845_v6, 16 }
 0x4d3   : > { %10657 = vst [vmem:[#allocation2 + $0xc] sm:$0xf] %v10656_v32  ;;  %10658 = vst [vmem:[#allocation2 + $0x10] sm:$0xf] %v10027_v51  ;;  %v10665_v22 = vsel %vm16812_vm1, %v10035_v38, %v10664_v55  ;;  %v10044_v40 = vsel %vm16818_vm2, %v10036_v9, %v10043_v44  ;;  %v10669_v39 = vsel %vm16825_vm3, %v10045_v54, %v10668_v26  ;;  %v10050_v5 = vshll.u32 %v11845_v6, 16 }
 0x4d4   : > { %10663 = vst [vmem:[#allocation2 + $0x14] sm:$0x1] %v10662_v19  ;;  %10666 = vst [vmem:[#allocation2 + $0x18] sm:$0xf] %v10665_v22  ;;  %v10049_v13 = vrot.slane %v10047_v49, 7  ;;  %v9758_v32 = vsel %vm9630_vm0, %v16801_v35, %v9694_v52  ;;  %v9759_v23 = vsel %vm9631_vm4, %v16804_v1, %v9695_v33  ;;  %vm9632_vm5 = vcmp.ge.f32.partialorder %v16807_v31, 0.0 }
 0x4d5   : > { %10667 = vst [vmem:[#allocation2 + $0x1c] sm:$0xf] %v10044_v40  ;;  %10670 = vst [vmem:[#allocation2 + $0x20] sm:$0x1] %v10669_v39  ;;  %v10671_v38 = vld [vmem:[#allocation2 + $0x24] sm:$0xf]  ;;  %v11846_v9 = vpack.c.bf16 %v9758_v32, %v9758_v32  ;;  %v11847_v55 = vpack.c.bf16 %v9759_v23, %v9759_v23  ;;  %v17715_v44 = vsub.f32 %v16374_v34, %v16679_v24 }
 0x4d6   : > { %v9696_v54 = vmul.f32 0.2, %v16807_v31  ;;  %v10052_v20 = vor.u32 %v10050_v5, %v10049_v13  ;;  %v10053_v2 = vrot.slane %v10049_v13, 4  ;;  %v17716_v35 = vsub.f32 %v16378_v50, %v16679_v24  ;;  %v10675_v39 = vld [vmem:[#allocation2 + $0x2c] sm:$0x1] }
 0x4d7   : > { %v9425_v49 = vmul.f32 %v16759_v56, %v17715_v44  ;;  %v17717_v1 = vsub.f32 %v16372_v48, %v16679_v24  ;;  %v10055_v11 = vshrl.u32 %v11846_v9, 16  ;;  %v10058_v47 = vshll.u32 %v11846_v9, 16  ;;  %v10678_v5 = vld [vmem:[#allocation2 + $0x30] sm:$0xf] }
 0x4d8   : > { %v9426_v6 = vmul.f32 %v16759_v56, %v17716_v35  ;;  %v10064_v33 = vshrl.u32 %v11847_v55, 16  ;;  %v10067_v59 = vshll.u32 %v11847_v55, 16  ;;  %v10672_v36 = vsel %vm16812_vm1, %v10052_v20, %v10671_v38 }
 0x4d9   : > { %v9427_v52 = vmul.f32 %v16759_v56, %v17717_v1  ;;  %v9760_v4 = vsel %vm9632_vm5, %v16807_v31, %v9696_v54  ;;  %v9497_v57 = vmul.f32 %v16764_v18, %v9425_v49  ;;  %10673 = vst [vmem:[#allocation2 + $0x24] sm:$0xf] %v10672_v36  ;;  %v10057_v51 = vrot.slane %v10055_v11, 7 }
 0x4da   : > { %v9498_v26 = vmul.f32 %v16764_v18, %v9426_v6  ;;  %v10066_v19 = vrot.slane %v10064_v33, 7  ;;  %v11848_v22 = vpack.c.bf16 %v9760_v4, %v9760_v4  ;;  %v17718_v23 = vsub.f32 %v16376_v15, %v16679_v24  ;;  %v10682_v4 = vld [vmem:[#allocation2 + $0x38] sm:$0x1] }
 0x4db   : > { %v9499_v40 = vmul.f32 %v16764_v18, %v9427_v52  ;;  %v9569_v13 = vadd.f32 %v16781_v58, %v9497_v57  ;;  %v17719_v38 = vsub.f32 %v16382_v10, %v16679_v24  ;;  %v10060_v55 = vor.u32 %v10058_v47, %v10057_v51 }
 0x4dc   : > { %v9570_v32 = vadd.f32 %v16781_v58, %v9498_v26  ;;  %v9428_v31 = vmul.f32 %v16759_v56, %v17718_v23  ;;  %v10062_v54 = vrot.slane %v10057_v51, 4  ;;  %v10069_v44 = vor.u32 %v10067_v59, %v10066_v19 }
 0x4dd   : > { %v9429_v9 = vmul.f32 %v16759_v56, %v17719_v38  ;;  %v10070_v49 = vrot.slane %v10066_v19, 4  ;;  %v10072_v20 = vshrl.u32 %v11848_v22, 16  ;;  %v10075_v35 = vshll.u32 %v11848_v22, 16 }
 0x4de   : > { %vm9633_vm6 = vcmp.ge.f32.partialorder %v9569_v13, 0.0  ;;  %v9697_v6 = vmul.f32 0.2, %v9569_v13  ;;  %v10061_v1 = vsel %vm16818_vm2, %v10053_v2, %v10060_v55  ;;  %v10676_v52 = vsel %vm16825_vm3, %v10062_v54, %v10675_v39 }
 0x4df   : > { %v10679_v11 = vsel %vm16812_vm1, %v10069_v44, %v10678_v5  ;;  %vm9634_vm7 = vcmp.ge.f32.partialorder %v9570_v32, 0.0  ;;  %10674 = vst [vmem:[#allocation2 + $0x28] sm:$0xf] %v10061_v1  ;;  %10677 = vst [vmem:[#allocation2 + $0x2c] sm:$0x1] %v10676_v52  ;;  %v10074_v47 = vrot.slane %v10072_v20, 7  ;;  %v9571_v36 = vadd.f32 %v16781_v58, %v9499_v40 }
 0x4e0   : > { %10680 = vst [vmem:[#allocation2 + $0x30] sm:$0xf] %v10679_v11  ;;  %v9761_v33 = vsel %vm9633_vm6, %v9569_v13, %v9697_v6  ;;  %v9698_v59 = vmul.f32 0.2, %v9570_v32  ;;  %v9500_v26 = vmul.f32 %v16764_v18, %v9428_v31  ;;  %v9501_v2 = vmul.f32 %v16764_v18, %v9429_v9  ;;  %v10685_v6 = vld [vmem:[#allocation2 + $0x3c] sm:$0xf] }
 0x4e1   : > { %v11849_v57 = vpack.c.bf16 %v9761_v33, %v9761_v33  ;;  %v17720_v51 = vsub.f32 %v16386_v27, %v16679_v24  ;;  %v10077_v22 = vor.u32 %v10075_v35, %v10074_v47  ;;  %v10079_v39 = vrot.slane %v10074_v47, 4 }
 0x4e2   : > { %v9762_v5 = vsel %vm9634_vm7, %v9570_v32, %v9698_v59  ;;  %vm9635_vm8 = vcmp.ge.f32.partialorder %v9571_v36, 0.0  ;;  %v9699_v55 = vmul.f32 0.2, %v9571_v36  ;;  %v9572_v9 = vadd.f32 %v16781_v58, %v9500_v26  ;;  %v10689_v59 = vld [vmem:[#allocation2 + $0x44] sm:$0x1] }
 0x4e3   : > { %v9430_v19 = vmul.f32 %v16759_v56, %v17720_v51  ;;  %v10081_v23 = vshrl.u32 %v11849_v57, 16  ;;  %v10084_v13 = vshll.u32 %v11849_v57, 16  ;;  %v11850_v38 = vpack.c.bf16 %v9762_v5, %v9762_v5 }
 0x4e4   : > { %v10078_v40 = vsel %vm16818_vm2, %v10070_v49, %v10077_v22  ;;  %v10683_v31 = vsel %vm16825_vm3, %v10079_v39, %v10682_v4  ;;  %v9573_v54 = vadd.f32 %v16781_v58, %v9501_v2  ;;  %v9763_v35 = vsel %vm9635_vm8, %v9571_v36, %v9699_v55 }
 0x4e5   : > { %10681 = vst [vmem:[#allocation2 + $0x34] sm:$0xf] %v10078_v40  ;;  %10684 = vst [vmem:[#allocation2 + $0x38] sm:$0x1] %v10683_v31  ;;  %v10083_v44 = vrot.slane %v10081_v23, 7  ;;  %v10089_v20 = vshrl.u32 %v11850_v38, 16  ;;  %v11851_v1 = vpack.c.bf16 %v9763_v35, %v9763_v35  ;;  %v9502_v2 = vmul.f32 %v16764_v18, %v9430_v19 }
 0x4e6   : > { %v10092_v32 = vshll.u32 %v11850_v38, 16  ;;  %vm9636_vm9 = vcmp.ge.f32.partialorder %v9572_v9, 0.0  ;;  %v9700_v52 = vmul.f32 0.2, %v9572_v9  ;;  %vm9637_vm10 = vcmp.ge.f32.partialorder %v9573_v54, 0.0 }
 0x4e7   : > { %v10086_v11 = vor.u32 %v10084_v13, %v10083_v44  ;;  %v10087_v49 = vrot.slane %v10083_v44, 4  ;;  %v10091_v47 = vrot.slane %v10089_v20, 7  ;;  %v9701_v33 = vmul.f32 0.2, %v9573_v54  ;;  %v10692_v31 = vld [vmem:[#allocation2 + $0x48] sm:$0xf] }
 0x4e8   : > { %v10098_v4 = vshrl.u32 %v11851_v1, 16  ;;  %v10101_v57 = vshll.u32 %v11851_v1, 16  ;;  %v9764_v26 = vsel %vm9636_vm9, %v9572_v9, %v9700_v52  ;;  %v9574_v13 = vadd.f32 %v16781_v58, %v9502_v2 }
 0x4e9   : > { %v10686_v51 = vsel %vm16812_vm1, %v10086_v11, %v10685_v6  ;;  %v10094_v22 = vor.u32 %v10092_v32, %v10091_v47  ;;  %v10096_v36 = vrot.slane %v10091_v47, 4  ;;  %v11852_v39 = vpack.c.bf16 %v9764_v26, %v9764_v26  ;;  %v10696_v47 = vld [vmem:[#allocation2 + $0x50] sm:$0x1] }
 0x4ea   : > { %10687 = vst [vmem:[#allocation2 + $0x3c] sm:$0xf] %v10686_v51  ;;  %v10100_v5 = vrot.slane %v10098_v4, 7  ;;  %v9765_v23 = vsel %vm9637_vm10, %v9573_v54, %v9701_v33  ;;  %v17721_v38 = vsub.f32 %v16380_v29, %v16679_v24  ;;  %vm9638_vm11 = vcmp.ge.f32.partialorder %v9574_v13, 0.0 }
 0x4eb   : > { %v10095_v19 = vsel %vm16818_vm2, %v10087_v49, %v10094_v22  ;;  %v10690_v40 = vsel %vm16825_vm3, %v10096_v36, %v10689_v59  ;;  %v10106_v9 = vshrl.u32 %v11852_v39, 16  ;;  %v10109_v44 = vshll.u32 %v11852_v39, 16 }
 0x4ec   : > { %v9431_v55 = vmul.f32 %v16759_v56, %v17721_v38  ;;  %10688 = vst [vmem:[#allocation2 + $0x40] sm:$0xf] %v10095_v19  ;;  %10691 = vst [vmem:[#allocation2 + $0x44] sm:$0x1] %v10690_v40  ;;  %v10103_v20 = vor.u32 %v10101_v57, %v10100_v5  ;;  %v10104_v54 = vrot.slane %v10100_v5, 4  ;;  %v11853_v32 = vpack.c.bf16 %v9765_v23, %v9765_v23 }
 0x4ed   : > { %v10108_v35 = vrot.slane %v10106_v9, 7  ;;  %v9702_v6 = vmul.f32 0.2, %v9574_v13  ;;  %v17722_v52 = vsub.f32 %v16384_v63, %v16679_v24  ;;  %v17723_v4 = vsub.f32 %v16390_v0, %v16679_v24  ;;  %v10699_v19 = vld [vmem:[#allocation2 + $0x54] sm:$0xf] }
 0x4ee   : > { %v9503_v1 = vmul.f32 %v16764_v18, %v9431_v55  ;;  %v10693_v49 = vsel %vm16812_vm1, %v10103_v20, %v10692_v31  ;;  %v10115_v33 = vshrl.u32 %v11853_v32, 16  ;;  %v10118_v59 = vshll.u32 %v11853_v32, 16 }
 0x4ef   : > { %v9432_v11 = vmul.f32 %v16759_v56, %v17722_v52  ;;  %v9433_v57 = vmul.f32 %v16759_v56, %v17723_v4  ;;  %10694 = vst [vmem:[#allocation2 + $0x48] sm:$0xf] %v10693_v49  ;;  %v10111_v26 = vor.u32 %v10109_v44, %v10108_v35  ;;  %v10113_v2 = vrot.slane %v10108_v35, 4 }
 0x4f0   : > { %v9766_v51 = vsel %vm9638_vm11, %v9574_v13, %v9702_v6  ;;  %v9575_v22 = vadd.f32 %v16781_v58, %v9503_v1  ;;  %v10117_v36 = vrot.slane %v10115_v33, 7 }
 0x4f1   : > { %v11854_v39 = vpack.c.bf16 %v9766_v51, %v9766_v51  ;;  %v9504_v5 = vmul.f32 %v16764_v18, %v9432_v11  ;;  %v9505_v23 = vmul.f32 %v16764_v18, %v9433_v57  ;;  %v10112_v38 = vsel %vm16818_vm2, %v10104_v54, %v10111_v26  ;;  %v10703_v11 = vld [vmem:[#allocation2 + $0x5c] sm:$0x1] }
 0x4f2   : > { %v10697_v55 = vsel %vm16825_vm3, %v10113_v2, %v10696_v47  ;;  %vm9639_vm12 = vcmp.ge.f32.partialorder %v9575_v22, 0.0  ;;  %v9703_v40 = vmul.f32 0.2, %v9575_v22  ;;  %10695 = vst [vmem:[#allocation2 + $0x4c] sm:$0xf] %v10112_v38  ;;  %v10120_v13 = vor.u32 %v10118_v59, %v10117_v36 }
 0x4f3   : > { %10698 = vst [vmem:[#allocation2 + $0x50] sm:$0x1] %v10697_v55  ;;  %v10121_v31 = vrot.slane %v10117_v36, 4  ;;  %v10123_v9 = vshrl.u32 %v11854_v39, 16  ;;  %v10126_v44 = vshll.u32 %v11854_v39, 16  ;;  %v9576_v32 = vadd.f32 %v16781_v58, %v9504_v5 }
 0x4f4   : > { %v9767_v20 = vsel %vm9639_vm12, %v9575_v22, %v9703_v40  ;;  %v9577_v35 = vadd.f32 %v16781_v58, %v9505_v23  ;;  %v17724_v54 = vsub.f32 %v16394_v3, %v16679_v24  ;;  %v10700_v1 = vsel %vm16812_vm1, %v10120_v13, %v10699_v19  ;;  %v10706_v40 = vld [vmem:[#allocation2 + $0x60] sm:$0xf] }
 0x4f5   : > { %v10125_v52 = vrot.slane %v10123_v9, 7  ;;  %v11855_v49 = vpack.c.bf16 %v9767_v20, %v9767_v20  ;;  %v17725_v47 = vsub.f32 %v16388_v60, %v16679_v24  ;;  %10701 = vst [vmem:[#allocation2 + $0x54] sm:$0xf] %v10700_v1  ;;  %vm9640_vm13 = vcmp.ge.f32.partialorder %v9576_v32, 0.0 }
 0x4f6   : > { %v9434_v6 = vmul.f32 %v16759_v56, %v17724_v54  ;;  %v9704_v59 = vmul.f32 0.2, %v9576_v32  ;;  %vm9641_vm14 = vcmp.ge.f32.partialorder %v9577_v35, 0.0  ;;  %v9705_v4 = vmul.f32 0.2, %v9577_v35 }
 0x4f7   : > { %v9435_v33 = vmul.f32 %v16759_v56, %v17725_v47  ;;  %v10128_v57 = vor.u32 %v10126_v44, %v10125_v52  ;;  %v10130_v26 = vrot.slane %v10125_v52, 4  ;;  %v10132_v2 = vshrl.u32 %v11855_v49, 16 }
 0x4f8   : > { %v10135_v51 = vshll.u32 %v11855_v49, 16  ;;  %v9768_v22 = vsel %vm9640_vm13, %v9576_v32, %v9704_v59  ;;  %v9769_v36 = vsel %vm9641_vm14, %v9577_v35, %v9705_v4  ;;  %v9506_v39 = vmul.f32 %v16764_v18, %v9434_v6  ;;  %v10710_v59 = vld [vmem:[#allocation2 + $0x68] sm:$0x1] }
 0x4f9   : > { %v9507_v5 = vmul.f32 %v16764_v18, %v9435_v33  ;;  %v10129_v23 = vsel %vm16818_vm2, %v10121_v31, %v10128_v57  ;;  %v10704_v38 = vsel %vm16825_vm3, %v10130_v26, %v10703_v11  ;;  %v10134_v55 = vrot.slane %v10132_v2, 7 }
 0x4fa   : > { %v11856_v19 = vpack.c.bf16 %v9768_v22, %v9768_v22  ;;  %10702 = vst [vmem:[#allocation2 + $0x58] sm:$0xf] %v10129_v23  ;;  %10705 = vst [vmem:[#allocation2 + $0x5c] sm:$0x1] %v10704_v38  ;;  %v11857_v13 = vpack.c.bf16 %v9769_v36, %v9769_v36  ;;  %v9578_v9 = vadd.f32 %v16781_v58, %v9506_v39  ;;  %v10713_v39 = vld [vmem:[#allocation2 + $0x6c] sm:$0xf] }
 0x4fb   : > { %v9579_v44 = vadd.f32 %v16781_v58, %v9507_v5  ;;  %v17726_v20 = vsub.f32 %v16392_v53, %v16679_v24  ;;  %v10137_v35 = vor.u32 %v10135_v51, %v10134_v55  ;;  %v10138_v31 = vrot.slane %v10134_v55, 4 }
 0x4fc   : > { %v10140_v54 = vshrl.u32 %v11856_v19, 16  ;;  %v10143_v6 = vshll.u32 %v11856_v19, 16  ;;  %v10149_v1 = vshrl.u32 %v11857_v13, 16  ;;  %v10152_v52 = vshll.u32 %v11857_v13, 16 }
 0x4fd   : > { %v9436_v32 = vmul.f32 %v16759_v56, %v17726_v20  ;;  %vm9642_vm15 = vcmp.ge.f32.partialorder %v9578_v9, 0.0  ;;  %v9706_v11 = vmul.f32 0.2, %v9578_v9  ;;  %v10707_v49 = vsel %vm16812_vm1, %v10137_v35, %v10706_v40 }
 0x4fe   : > { %v10142_v47 = vrot.slane %v10140_v54, 7  ;;  %vm9643_vm0 = vcmp.ge.f32.partialorder %v9579_v44, 0.0  ;;  %v9707_v33 = vmul.f32 0.2, %v9579_v44  ;;  %10708 = vst [vmem:[#allocation2 + $0x60] sm:$0xf] %v10707_v49  ;;  %v17727_v2 = vsub.f32 %v16398_v28, %v16679_v24 }
 0x4ff   : > { %v10151_v4 = vrot.slane %v10149_v1, 7  ;;  %v9770_v57 = vsel %vm9642_vm15, %v9578_v9, %v9706_v11  ;;  %v9508_v26 = vmul.f32 %v16764_v18, %v9436_v32  ;;  %v10717_v49 = vld [vmem:[#allocation2 + $0x74] sm:$0x1] }
 0x500   : > { %v9437_v51 = vmul.f32 %v16759_v56, %v17727_v2  ;;  %v10145_v22 = vor.u32 %v10143_v6, %v10142_v47  ;;  %v10147_v36 = vrot.slane %v10142_v47, 4  ;;  %v11858_v5 = vpack.c.bf16 %v9770_v57, %v9770_v57 }
 0x501   : > { %v9771_v23 = vsel %vm9643_vm0, %v9579_v44, %v9707_v33  ;;  %v10154_v38 = vor.u32 %v10152_v52, %v10151_v4  ;;  %v10155_v55 = vrot.slane %v10151_v4, 4  ;;  %v9580_v40 = vadd.f32 %v16781_v58, %v9508_v26 }
 0x502   : > { %v11859_v19 = vpack.c.bf16 %v9771_v23, %v9771_v23  ;;  %v10146_v13 = vsel %vm16818_vm2, %v10138_v31, %v10145_v22  ;;  %v10711_v9 = vsel %vm16825_vm3, %v10147_v36, %v10710_v59  ;;  %v10157_v20 = vshrl.u32 %v11858_v5, 16  ;;  %v10720_v36 = vld [vmem:[#allocation2 + $0x78] sm:$0xf] }
 0x503   : > { %v10160_v32 = vshll.u32 %v11858_v5, 16  ;;  %10709 = vst [vmem:[#allocation2 + $0x64] sm:$0xf] %v10146_v13  ;;  %10712 = vst [vmem:[#allocation2 + $0x68] sm:$0x1] %v10711_v9  ;;  %v10714_v35 = vsel %vm16812_vm1, %v10154_v38, %v10713_v39  ;;  %vm9644_vm4 = vcmp.ge.f32.partialorder %v9580_v40, 0.0  ;;  %v9509_v52 = vmul.f32 %v16764_v18, %v9437_v51 }
 0x504   : > { %v10166_v54 = vshrl.u32 %v11859_v19, 16  ;;  %v10169_v44 = vshll.u32 %v11859_v19, 16  ;;  %10715 = vst [vmem:[#allocation2 + $0x6c] sm:$0xf] %v10714_v35  ;;  %v10159_v6 = vrot.slane %v10157_v20, 7  ;;  %v17728_v31 = vsub.f32 %v16402_v41, %v16679_v24 }
 0x505   : > { %v9708_v1 = vmul.f32 0.2, %v9580_v40  ;;  %v17729_v33 = vsub.f32 %v16396_v42, %v16679_v24  ;;  %v17730_v4 = vsub.f32 %v16400_v46, %v16679_v24  ;;  %v17731_v26 = vsub.f32 %v16406_v16, %v16679_v24 }
 0x506   : > { %v9438_v11 = vmul.f32 %v16759_v56, %v17728_v31  ;;  %v10168_v47 = vrot.slane %v10166_v54, 7  ;;  %v10162_v51 = vor.u32 %v10160_v32, %v10159_v6  ;;  %v10164_v22 = vrot.slane %v10159_v6, 4 }
 0x507   : > { %v9439_v59 = vmul.f32 %v16759_v56, %v17729_v33  ;;  %v9440_v57 = vmul.f32 %v16759_v56, %v17730_v4  ;;  %v9441_v2 = vmul.f32 %v16759_v56, %v17731_v26  ;;  %v9772_v39 = vsel %vm9644_vm4, %v9580_v40, %v9708_v1 }
 0x508   : > { %v9581_v5 = vadd.f32 %v16781_v58, %v9509_v52  ;;  %v10171_v23 = vor.u32 %v10169_v44, %v10168_v47  ;;  %v11860_v38 = vpack.c.bf16 %v9772_v39, %v9772_v39  ;;  %v10172_v19 = vrot.slane %v10168_v47, 4  ;;  %v10724_v47 = vld [vmem:[#allocation2 + $0x80] sm:$0x1] }
 0x509   : > { %v9510_v13 = vmul.f32 %v16764_v18, %v9438_v11  ;;  %v10163_v9 = vsel %vm16818_vm2, %v10155_v55, %v10162_v51  ;;  %v10718_v20 = vsel %vm16825_vm3, %v10164_v22, %v10717_v49  ;;  %v9511_v1 = vmul.f32 %v16764_v18, %v9439_v59 }
 0x50a   : > { %vm9645_vm5 = vcmp.ge.f32.partialorder %v9581_v5, 0.0  ;;  %v9709_v35 = vmul.f32 0.2, %v9581_v5  ;;  %10716 = vst [vmem:[#allocation2 + $0x70] sm:$0xf] %v10163_v9  ;;  %v10721_v40 = vsel %vm16812_vm1, %v10171_v23, %v10720_v36  ;;  %v10174_v32 = vshrl.u32 %v11860_v38, 16 }
 0x50b   : > { %10719 = vst [vmem:[#allocation2 + $0x74] sm:$0x1] %v10718_v20  ;;  %v10177_v54 = vshll.u32 %v11860_v38, 16  ;;  %v9582_v44 = vadd.f32 %v16781_v58, %v9510_v13  ;;  %10722 = vst [vmem:[#allocation2 + $0x78] sm:$0xf] %v10721_v40  ;;  %v9512_v55 = vmul.f32 %v16764_v18, %v9440_v57  ;;  %v9513_v52 = vmul.f32 %v16764_v18, %v9441_v2 }
 0x50c   : > { %v9773_v6 = vsel %vm9645_vm5, %v9581_v5, %v9709_v35  ;;  %v10176_v31 = vrot.slane %v10174_v32, 7  ;;  %v9583_v33 = vadd.f32 %v16781_v58, %v9511_v1  ;;  %v17732_v51 = vsub.f32 %v16410_v8, %v16679_v24  ;;  %v10727_v9 = vld [vmem:[#allocation2 + $0x84] sm:$0xf] }
 0x50d   : > { %v11861_v11 = vpack.c.bf16 %v9773_v6, %v9773_v6  ;;  %vm9646_vm6 = vcmp.ge.f32.partialorder %v9582_v44, 0.0  ;;  %v9710_v49 = vmul.f32 0.2, %v9582_v44  ;;  %v9584_v4 = vadd.f32 %v16781_v58, %v9512_v55 }
 0x50e   : > { %v9585_v26 = vadd.f32 %v16781_v58, %v9513_v52  ;;  %v9442_v59 = vmul.f32 %v16759_v56, %v17732_v51  ;;  %v10179_v22 = vor.u32 %v10177_v54, %v10176_v31  ;;  %v10181_v57 = vrot.slane %v10176_v31, 4 }
 0x50f   : > { %v10183_v36 = vshrl.u32 %v11861_v11, 16  ;;  %v10186_v2 = vshll.u32 %v11861_v11, 16  ;;  %v9774_v39 = vsel %vm9646_vm6, %v9582_v44, %v9710_v49  ;;  %vm9647_vm7 = vcmp.ge.f32.partialorder %v9583_v33, 0.0 }
 0x510   : > { %v9711_v5 = vmul.f32 0.2, %v9583_v33  ;;  %vm9648_vm8 = vcmp.ge.f32.partialorder %v9584_v4, 0.0  ;;  %v10180_v23 = vsel %vm16818_vm2, %v10172_v19, %v10179_v22  ;;  %v10725_v38 = vsel %vm16825_vm3, %v10181_v57, %v10724_v47 }
 0x511   : > { %v10185_v13 = vrot.slane %v10183_v36, 7  ;;  %v11862_v20 = vpack.c.bf16 %v9774_v39, %v9774_v39  ;;  %10723 = vst [vmem:[#allocation2 + $0x7c] sm:$0xf] %v10180_v23  ;;  %10726 = vst [vmem:[#allocation2 + $0x80] sm:$0x1] %v10725_v38  ;;  %vm9649_vm9 = vcmp.ge.f32.partialorder %v9585_v26, 0.0  ;;  %v9514_v31 = vmul.f32 %v16764_v18, %v9442_v59 }
 0x512   : > { %v9775_v35 = vsel %vm9647_vm7, %v9583_v33, %v9711_v5  ;;  %v9712_v40 = vmul.f32 0.2, %v9584_v4  ;;  %v9713_v32 = vmul.f32 0.2, %v9585_v26  ;;  %v10731_v33 = vld [vmem:[#allocation2 + $0x8c] sm:$0x1] }
 0x513   : > { %v10188_v54 = vor.u32 %v10186_v2, %v10185_v13  ;;  %v10189_v44 = vrot.slane %v10185_v13, 4  ;;  %v10191_v6 = vshrl.u32 %v11862_v20, 16  ;;  %v10194_v1 = vshll.u32 %v11862_v20, 16 }
 0x514   : > { %v11863_v55 = vpack.c.bf16 %v9775_v35, %v9775_v35  ;;  %v9776_v52 = vsel %vm9648_vm8, %v9584_v4, %v9712_v40  ;;  %v9777_v19 = vsel %vm9649_vm9, %v9585_v26, %v9713_v32  ;;  %v9586_v36 = vadd.f32 %v16781_v58, %v9514_v31  ;;  %v10734_v35 = vld [vmem:[#allocation2 + $0x90] sm:$0xf] }
 0x515   : > { %v10728_v11 = vsel %vm16812_vm1, %v10188_v54, %v10727_v9  ;;  %v10193_v49 = vrot.slane %v10191_v6, 7  ;;  %v11864_v47 = vpack.c.bf16 %v9776_v52, %v9776_v52  ;;  %v11865_v51 = vpack.c.bf16 %v9777_v19, %v9777_v19 }
 0x516   : > { %10729 = vst [vmem:[#allocation2 + $0x84] sm:$0xf] %v10728_v11  ;;  %v10200_v22 = vshrl.u32 %v11863_v55, 16  ;;  %v10203_v57 = vshll.u32 %v11863_v55, 16  ;;  %v17733_v2 = vsub.f32 %v16404_v7, %v16679_v24  ;;  %vm9650_vm10 = vcmp.ge.f32.partialorder %v9586_v36, 0.0 }
 0x517   : > { %v10196_v26 = vor.u32 %v10194_v1, %v10193_v49  ;;  %v10198_v39 = vrot.slane %v10193_v49, 4  ;;  %v10208_v59 = vshrl.u32 %v11864_v47, 16  ;;  %v10211_v5 = vshll.u32 %v11864_v47, 16  ;;  %v10738_v1 = vld [vmem:[#allocation2 + $0x98] sm:$0x1] }
 0x518   : > { %v9443_v4 = vmul.f32 %v16759_v56, %v17733_v2  ;;  %v10202_v23 = vrot.slane %v10200_v22, 7  ;;  %v10217_v38 = vshrl.u32 %v11865_v51, 16  ;;  %v10220_v13 = vshll.u32 %v11865_v51, 16  ;;  %v10741_v11 = vld [vmem:[#allocation2 + $0x9c] sm:$0xf] }
 0x519   : > { %v10197_v9 = vsel %vm16818_vm2, %v10189_v44, %v10196_v26  ;;  %v10732_v20 = vsel %vm16825_vm3, %v10198_v39, %v10731_v33  ;;  %v10210_v40 = vrot.slane %v10208_v59, 7  ;;  %v9714_v32 = vmul.f32 0.2, %v9586_v36 }
 0x51a   : > { %10730 = vst [vmem:[#allocation2 + $0x88] sm:$0xf] %v10197_v9  ;;  %10733 = vst [vmem:[#allocation2 + $0x8c] sm:$0x1] %v10732_v20  ;;  %v10205_v54 = vor.u32 %v10203_v57, %v10202_v23  ;;  %v10206_v6 = vrot.slane %v10202_v23, 4  ;;  %v10219_v55 = vrot.slane %v10217_v38, 7  ;;  %v9515_v52 = vmul.f32 %v16764_v18, %v9443_v4 }
 0x51b   : > { %v10213_v19 = vor.u32 %v10211_v5, %v10210_v40  ;;  %v10215_v31 = vrot.slane %v10210_v40, 4  ;;  %v9778_v49 = vsel %vm9650_vm10, %v9586_v36, %v9714_v32  ;;  %v17734_v44 = vsub.f32 %v16408_v21, %v16679_v24 }
 0x51c   : > { %v10735_v51 = vsel %vm16812_vm1, %v10205_v54, %v10734_v35  ;;  %v10222_v33 = vor.u32 %v10220_v13, %v10219_v55  ;;  %v11866_v22 = vpack.c.bf16 %v9778_v49, %v9778_v49  ;;  %v10223_v57 = vrot.slane %v10219_v55, 4 }
 0x51d   : > { %v9444_v47 = vmul.f32 %v16759_v56, %v17734_v44  ;;  %10736 = vst [vmem:[#allocation2 + $0x90] sm:$0xf] %v10735_v51  ;;  %v10214_v2 = vsel %vm16818_vm2, %v10206_v6, %v10213_v19  ;;  %v10739_v4 = vsel %vm16825_vm3, %v10215_v31, %v10738_v1  ;;  %v9587_v36 = vadd.f32 %v16781_v58, %v9515_v52  ;;  %v10745_v52 = vld [vmem:[#allocation2 + $0xa4] sm:$0x1] }
 0x51e   : > { %10737 = vst [vmem:[#allocation2 + $0x94] sm:$0xf] %v10214_v2  ;;  %10740 = vst [vmem:[#allocation2 + $0x98] sm:$0x1] %v10739_v4  ;;  %v10742_v39 = vsel %vm16812_vm1, %v10222_v33, %v10741_v11  ;;  %v10225_v59 = vshrl.u32 %v11866_v22, 16  ;;  %v10228_v5 = vshll.u32 %v11866_v22, 16  ;;  %v17735_v23 = vsub.f32 %v16414_v43, %v16679_v24 }
 0x51f   : > { %v9516_v26 = vmul.f32 %v16764_v18, %v9444_v47  ;;  %10743 = vst [vmem:[#allocation2 + $0x9c] sm:$0xf] %v10742_v39  ;;  %vm9651_vm11 = vcmp.ge.f32.partialorder %v9587_v36, 0.0  ;;  %v9715_v13 = vmul.f32 0.2, %v9587_v36  ;;  %v17736_v20 = vsub.f32 %v16420_v12, %v16679_v24 }
 0x520   : > { %v9445_v38 = vmul.f32 %v16759_v56, %v17735_v23  ;;  %v10227_v40 = vrot.slane %v10225_v59, 7  ;;  %v17737_v54 = vsub.f32 %v16412_v62, %v16679_v24  ;;  %v17738_v1 = vsub.f32 %v16417_v45, %v16679_v24 }
 0x521   : > { %v9588_v9 = vadd.f32 %v16781_v58, %v9516_v26  ;;  %v9446_v35 = vmul.f32 %v16759_v56, %v17736_v20  ;;  %v9779_v19 = vsel %vm9651_vm11, %v9587_v36, %v9715_v13 }
 0x522   : > { %v9517_v32 = vmul.f32 %v16764_v18, %v9445_v38  ;;  %v9447_v6 = vmul.f32 %v16759_v56, %v17737_v54  ;;  %v9448_v55 = vmul.f32 %v16759_v56, %v17738_v1  ;;  %v10230_v49 = vor.u32 %v10228_v5, %v10227_v40 }
 0x523   : > { %vm9652_vm12 = vcmp.ge.f32.partialorder %v9588_v9, 0.0  ;;  %v9716_v31 = vmul.f32 0.2, %v9588_v9  ;;  %v9518_v11 = vmul.f32 %v16764_v18, %v9446_v35  ;;  %v10232_v44 = vrot.slane %v10227_v40, 4  ;;  %v10748_v35 = vld [vmem:[#allocation2 + $0xa8] sm:$0xf] }
 0x524   : > { %v11867_v47 = vpack.c.bf16 %v9779_v19, %v9779_v19  ;;  %v9589_v51 = vadd.f32 %v16781_v58, %v9517_v32  ;;  %v9519_v2 = vmul.f32 %v16764_v18, %v9447_v6  ;;  %v9520_v4 = vmul.f32 %v16764_v18, %v9448_v55 }
 0x525   : > { %v9780_v33 = vsel %vm9652_vm12, %v9588_v9, %v9716_v31  ;;  %v9590_v22 = vadd.f32 %v16781_v58, %v9518_v11  ;;  %v10231_v26 = vsel %vm16818_vm2, %v10223_v57, %v10230_v49  ;;  %v10746_v36 = vsel %vm16825_vm3, %v10232_v44, %v10745_v52 }
 0x526   : > { %v10234_v39 = vshrl.u32 %v11867_v47, 16  ;;  %v10237_v59 = vshll.u32 %v11867_v47, 16  ;;  %10744 = vst [vmem:[#allocation2 + $0xa0] sm:$0xf] %v10231_v26  ;;  %10747 = vst [vmem:[#allocation2 + $0xa4] sm:$0x1] %v10746_v36  ;;  %v11868_v5 = vpack.c.bf16 %v9780_v33, %v9780_v33  ;;  %v9591_v9 = vadd.f32 %v16781_v58, %v9519_v2 }
 0x527   : > { %vm9653_vm13 = vcmp.ge.f32.partialorder %v9589_v51, 0.0  ;;  %v9717_v23 = vmul.f32 0.2, %v9589_v51  ;;  %vm9654_vm14 = vcmp.ge.f32.partialorder %v9590_v22, 0.0  ;;  %v9718_v13 = vmul.f32 0.2, %v9590_v22 }
 0x528   : > { %v10236_v38 = vrot.slane %v10234_v39, 7  ;;  %v9592_v20 = vadd.f32 %v16781_v58, %v9520_v4  ;;  %v10242_v40 = vshrl.u32 %v11868_v5, 16  ;;  %v10245_v57 = vshll.u32 %v11868_v5, 16  ;;  %v10752_v47 = vld [vmem:[#allocation2 + $0xb0] sm:$0x1] }
 0x529   : > { %v9781_v32 = vsel %vm9653_vm13, %v9589_v51, %v9717_v23  ;;  %v17739_v54 = vsub.f32 %v16424_v61, %v16679_v24  ;;  %v9782_v19 = vsel %vm9654_vm14, %v9590_v22, %v9718_v13  ;;  %vm9655_vm15 = vcmp.ge.f32.partialorder %v9591_v9, 0.0  ;;  %v10755_v13 = vld [vmem:[#allocation2 + $0xb4] sm:$0xf] }
 0x52a   : > { %v10239_v1 = vor.u32 %v10237_v59, %v10236_v38  ;;  %v10240_v55 = vrot.slane %v10236_v38, 4  ;;  %v11869_v52 = vpack.c.bf16 %v9781_v32, %v9781_v32  ;;  %v10244_v31 = vrot.slane %v10242_v40, 7 }
 0x52b   : > { %v9449_v6 = vmul.f32 %v16759_v56, %v17739_v54  ;;  %v11870_v11 = vpack.c.bf16 %v9782_v19, %v9782_v19  ;;  %v9719_v49 = vmul.f32 0.2, %v9591_v9  ;;  %vm9656_vm0 = vcmp.ge.f32.partialorder %v9592_v20, 0.0  ;;  %v10759_v54 = vld [vmem:[#allocation2 + $0xbc] sm:$0x1] }
 0x52c   : > { %v10749_v44 = vsel %vm16812_vm1, %v10239_v1, %v10748_v35  ;;  %v10251_v33 = vshrl.u32 %v11869_v52, 16  ;;  %v10254_v2 = vshll.u32 %v11869_v52, 16  ;;  %v10247_v51 = vor.u32 %v10245_v57, %v10244_v31 }
 0x52d   : > { %10750 = vst [vmem:[#allocation2 + $0xa8] sm:$0xf] %v10749_v44  ;;  %v10249_v4 = vrot.slane %v10244_v31, 4  ;;  %v10259_v26 = vshrl.u32 %v11870_v11, 16  ;;  %v10262_v36 = vshll.u32 %v11870_v11, 16  ;;  %v9783_v59 = vsel %vm9655_vm15, %v9591_v9, %v9719_v49 }
 0x52e   : > { %v10253_v39 = vrot.slane %v10251_v33, 7  ;;  %v9720_v5 = vmul.f32 0.2, %v9592_v20  ;;  %v9521_v22 = vmul.f32 %v16764_v18, %v9449_v6  ;;  %v10248_v23 = vsel %vm16818_vm2, %v10240_v55, %v10247_v51  ;;  %v10762_v33 = vld [vmem:[#allocation2 + $0xc0] sm:$0xf] }
 0x52f   : > { %v10753_v38 = vsel %vm16825_vm3, %v10249_v4, %v10752_v47  ;;  %v10261_v35 = vrot.slane %v10259_v26, 7  ;;  %v11871_v40 = vpack.c.bf16 %v9783_v59, %v9783_v59  ;;  %10751 = vst [vmem:[#allocation2 + $0xac] sm:$0xf] %v10248_v23  ;;  %v17741_v26 = vsub.f32 %v16422_v37, %v16679_v24 }
 0x530   : > { %10754 = vst [vmem:[#allocation2 + $0xb0] sm:$0x1] %v10753_v38  ;;  %v10256_v57 = vor.u32 %v10254_v2, %v10253_v39  ;;  %v10257_v32 = vrot.slane %v10253_v39, 4  ;;  %v9784_v1 = vsel %vm9656_vm0, %v9592_v20, %v9720_v5  ;;  %v9593_v9 = vadd.f32 %v16781_v58, %v9521_v22  ;;  %v17094_v22 = vld [vmem:[%s11833_s16 - $0x1] ss:$0 sm:$0xff] }
 0x531   : > { %v10264_v52 = vor.u32 %v10262_v36, %v10261_v35  ;;  %v10266_v18 = vrot.slane %v10261_v35, 4  ;;  %v10268_v6 = vshrl.u32 %v11871_v40, 16  ;;  %v10271_v19 = vshll.u32 %v11871_v40, 16  ;;  %v17742_v35 = vld [vmem:[#allocation22_spill] sm:$0xff] }
 0x532   : > { %v10756_v55 = vsel %vm16812_vm1, %v10256_v57, %v10755_v13  ;;  %v11872_v31 = vpack.c.bf16 %v9784_v1, %v9784_v1  ;;  %vm9657_vm4 = vcmp.ge.f32.partialorder %v9593_v9, 0.0  ;;  %v9721_v11 = vmul.f32 0.2, %v9593_v9 }
 0x533   : > { %10757 = vst [vmem:[#allocation2 + $0xb4] sm:$0xf] %v10756_v55  ;;  %v10265_v49 = vsel %vm16818_vm2, %v10257_v32, %v10264_v52  ;;  %v10760_v20 = vsel %vm16825_vm3, %v10266_v18, %v10759_v54  ;;  %v10270_v44 = vrot.slane %v10268_v6, 7  ;;  %v17740_v58 = vsub.f32 %v16428_v14, %v16679_v24  ;;  %v17744_v32 = vld [vmem:[#allocation29_spill] sm:$0xff]  ;;  %v10766_v52 = vld [vmem:[#allocation2 + $0xc8] sm:$0x1] }
 0x534   : > { %10758 = vst [vmem:[#allocation2 + $0xb8] sm:$0xf] %v10265_v49  ;;  %10761 = vst [vmem:[#allocation2 + $0xbc] sm:$0x1] %v10760_v20  ;;  %v10276_v2 = vshrl.u32 %v11872_v31, 16  ;;  %v10279_v51 = vshll.u32 %v11872_v31, 16  ;;  %v9785_v4 = vsel %vm9657_vm4, %v9593_v9, %v9721_v11  ;;  %v9451_v36 = vmul.f32 %v16759_v56, %v17741_v26 }
 0x535   : > { %v9450_v47 = vmul.f32 %v16759_v56, %v17740_v58  ;;  %v10273_v39 = vor.u32 %v10271_v19, %v10270_v44  ;;  %v10274_v59 = vrot.slane %v10270_v44, 4  ;;  %v11873_v5 = vpack.c.bf16 %v9785_v4, %v9785_v4  ;;  %v17110_v19 = vld [vmem:[%s11837_s17 - $0x1] ss:$0 sm:$0xff]  ;;  %v10769_v4 = vld [vmem:[#allocation2 + $0xe4] sm:$0xf] }
 0x536   : > { %v10278_v38 = vrot.slane %v10276_v2, 7  ;;  %v9523_v13 = vmul.f32 %v17094_v22, %v9451_v36  ;;  %v17743_v40 = vsub.f32 %v17742_v35, %v16679_v24  ;;  %v17745_v54 = vsub.f32 %v17744_v32, %v16679_v24  ;;  %v17746_v35 = vld [vmem:[#allocation31_spill] sm:$0xff] }
 0x537   : > { %v9522_v23 = vmul.f32 %v17094_v22, %v9450_v47  ;;  %v10763_v9 = vsel %vm16812_vm1, %v10273_v39, %v10762_v33  ;;  %v10285_v18 = vshrl.u32 %v11873_v5, 16  ;;  %v10288_v6 = vshll.u32 %v11873_v5, 16 }
 0x538   : > { %v9452_v57 = vmul.f32 %v16759_v56, %v17743_v40  ;;  %v9453_v1 = vmul.f32 %v16759_v56, %v17745_v54  ;;  %10764 = vst [vmem:[#allocation2 + $0xc0] sm:$0xf] %v10763_v9  ;;  %v10281_v31 = vor.u32 %v10279_v51, %v10278_v38  ;;  %v10283_v11 = vrot.slane %v10278_v38, 4 }
 0x539   : > { %v9594_v55 = vadd.f32 %v17110_v19, %v9522_v23  ;;  %v9595_v49 = vadd.f32 %v17110_v19, %v9523_v13  ;;  %v10287_v44 = vrot.slane %v10285_v18, 7 }
 0x53a   : > { %v9524_v20 = vmul.f32 %v17094_v22, %v9452_v57  ;;  %v9525_v47 = vmul.f32 %v17094_v22, %v9453_v1  ;;  %v10282_v33 = vsel %vm16818_vm2, %v10274_v59, %v10281_v31  ;;  %v10767_v2 = vsel %vm16825_vm3, %v10283_v11, %v10766_v52 }
 0x53b   : > { %vm9658_vm5 = vcmp.ge.f32.partialorder %v9594_v55, 0.0  ;;  %v9722_v58 = vmul.f32 0.2, %v9594_v55  ;;  %vm9659_vm6 = vcmp.ge.f32.partialorder %v9595_v49, 0.0  ;;  %v9723_v26 = vmul.f32 0.2, %v9595_v49 }
 0x53c   : > { %10765 = vst [vmem:[#allocation2 + $0xc4] sm:$0xf] %v10282_v33  ;;  %10768 = vst [vmem:[#allocation2 + $0xc8] sm:$0x1] %v10767_v2  ;;  %v10290_v51 = vor.u32 %v10288_v6, %v10287_v44  ;;  %v10291_v39 = vrot.slane %v10287_v44, 4  ;;  %v9596_v5 = vadd.f32 %v17110_v19, %v9524_v20  ;;  %v9597_v13 = vadd.f32 %v17110_v19, %v9525_v47  ;;  %v17748_v44 = vld [vmem:[#allocation28_spill] sm:$0xff] }
 0x53d   : > { %v9786_v36 = vsel %vm9658_vm5, %v9594_v55, %v9722_v58  ;;  %v9787_v38 = vsel %vm9659_vm6, %v9595_v49, %v9723_v26  ;;  %v17747_v59 = vsub.f32 %v17746_v35, %v16679_v24  ;;  %v17749_v58 = vsub.f32 %v17748_v44, %v16679_v24  ;;  %v10773_v33 = vld [vmem:[#allocation2 + $0xec] sm:$0x1]  ;;  %v10776_v35 = vld [vmem:[#allocation2 + $0xf0] sm:$0xf]  ;;  %v10783_v44 = vld [vmem:[#allocation2 + $0xfc] sm:$0xf] }
 0x53e   : > { %v11874_v23 = vpack.c.bf16 %v9786_v36, %v9786_v36  ;;  %v10770_v57 = vsel %vm16812_vm1, %v10290_v51, %v10769_v4  ;;  %v11875_v32 = vpack.c.bf16 %v9787_v38, %v9787_v38  ;;  %vm9660_vm7 = vcmp.ge.f32.partialorder %v9596_v5, 0.0  ;;  %v17750_v51 = vld [vmem:[#allocation30_spill] sm:$0xff] }
 0x53f   : > { %v9454_v40 = vmul.f32 %v16759_v56, %v17747_v59  ;;  %v9724_v54 = vmul.f32 0.2, %v9596_v5  ;;  %10771 = vst [vmem:[#allocation2 + $0xe4] sm:$0xf] %v10770_v57  ;;  %vm9661_vm8 = vcmp.ge.f32.partialorder %v9597_v13, 0.0  ;;  %v9455_v47 = vmul.f32 %v16759_v56, %v17749_v58  ;;  %v17752_v58 = vld [vmem:[#allocation33_spill] sm:$0xff] }
 0x540   : > { %v10293_v1 = vshrl.u32 %v11874_v23, 16  ;;  %v10296_v9 = vshll.u32 %v11874_v23, 16  ;;  %v9725_v52 = vmul.f32 0.2, %v9597_v13  ;;  %v10302_v18 = vshrl.u32 %v11875_v32, 16 }
 0x541   : > { %v10305_v6 = vshll.u32 %v11875_v32, 16  ;;  %v9788_v55 = vsel %vm9660_vm7, %v9596_v5, %v9724_v54  ;;  %v9526_v31 = vmul.f32 %v17094_v22, %v9454_v40  ;;  %v17751_v36 = vsub.f32 %v17750_v51, %v16679_v24 }
 0x542   : > { %v10295_v11 = vrot.slane %v10293_v1, 7  ;;  %v11876_v49 = vpack.c.bf16 %v9788_v55, %v9788_v55  ;;  %v9789_v20 = vsel %vm9661_vm8, %v9597_v13, %v9725_v52  ;;  %v10304_v2 = vrot.slane %v10302_v18, 7  ;;  %v10780_v55 = vld [vmem:[#allocation2 + $0xf8] sm:$0x1] }
 0x543   : > { %v11877_v4 = vpack.c.bf16 %v9789_v20, %v9789_v20  ;;  %v9598_v26 = vadd.f32 %v17110_v19, %v9526_v31  ;;  %v9456_v5 = vmul.f32 %v16759_v56, %v17751_v36 }
 0x544   : > { %v10298_v23 = vor.u32 %v10296_v9, %v10295_v11  ;;  %v10300_v38 = vrot.slane %v10295_v11, 4  ;;  %v10310_v59 = vshrl.u32 %v11876_v49, 16  ;;  %v10313_v13 = vshll.u32 %v11876_v49, 16 }
 0x545   : > { %v10307_v40 = vor.u32 %v10305_v6, %v10304_v2  ;;  %v10308_v57 = vrot.slane %v10304_v2, 4  ;;  %v10319_v32 = vshrl.u32 %v11877_v4, 16  ;;  %v10322_v54 = vshll.u32 %v11877_v4, 16 }
 0x546   : > { %v10299_v1 = vsel %vm16818_vm2, %v10291_v39, %v10298_v23  ;;  %v10774_v52 = vsel %vm16825_vm3, %v10300_v38, %v10773_v33  ;;  %v10312_v18 = vrot.slane %v10310_v59, 7  ;;  %vm9662_vm9 = vcmp.ge.f32.partialorder %v9598_v26, 0.0 }
 0x547   : > { %10772 = vst [vmem:[#allocation2 + $0xe8] sm:$0xf] %v10299_v1  ;;  %10775 = vst [vmem:[#allocation2 + $0xec] sm:$0x1] %v10774_v52  ;;  %v10777_v9 = vsel %vm16812_vm1, %v10307_v40, %v10776_v35  ;;  %v10321_v31 = vrot.slane %v10319_v32, 7  ;;  %v9527_v6 = vmul.f32 %v17094_v22, %v9455_v47  ;;  %v9528_v39 = vmul.f32 %v17094_v22, %v9456_v5  ;;  %v17754_v52 = vld [vmem:[#allocation35_spill] sm:$0xff] }
 0x548   : > { %v9726_v11 = vmul.f32 0.2, %v9598_v26  ;;  %10778 = vst [vmem:[#allocation2 + $0xf0] sm:$0xf] %v10777_v9  ;;  %v10315_v49 = vor.u32 %v10313_v13, %v10312_v18  ;;  %v10317_v20 = vrot.slane %v10312_v18, 4  ;;  %v17753_v33 = vsub.f32 %v17752_v58, %v16679_v24 }
 0x549   : > { %v10324_v4 = vor.u32 %v10322_v54, %v10321_v31  ;;  %v10325_v36 = vrot.slane %v10321_v31, 4  ;;  %v9599_v23 = vadd.f32 %v17110_v19, %v9527_v6  ;;  %v9600_v59 = vadd.f32 %v17110_v19, %v9528_v39  ;;  %v10787_v39 = vld [vmem:[#allocation2 + $0x104] sm:$0x1] }
 0x54a   : > { %v9457_v2 = vmul.f32 %v16759_v56, %v17753_v33  ;;  %v9790_v51 = vsel %vm9662_vm9, %v9598_v26, %v9726_v11  ;;  %v10316_v38 = vsel %vm16818_vm2, %v10308_v57, %v10315_v49  ;;  %v10781_v47 = vsel %vm16825_vm3, %v10317_v20, %v10780_v55  ;;  %v17756_v55 = vld [vmem:[#allocation32_spill] sm:$0xff]  ;;  %v17757_v20 = vld [vmem:[#allocation34_spill] sm:$0xff] }
 0x54b   : > { %v11878_v35 = vpack.c.bf16 %v9790_v51, %v9790_v51  ;;  %10779 = vst [vmem:[#allocation2 + $0xf4] sm:$0xf] %v10316_v38  ;;  %10782 = vst [vmem:[#allocation2 + $0xf8] sm:$0x1] %v10781_v47  ;;  %v10784_v5 = vsel %vm16812_vm1, %v10324_v4, %v10783_v44  ;;  %vm9663_vm10 = vcmp.ge.f32.partialorder %v9599_v23, 0.0  ;;  %vm9664_vm11 = vcmp.ge.f32.partialorder %v9600_v59, 0.0 }
 0x54c   : > { %v9727_v13 = vmul.f32 0.2, %v9599_v23  ;;  %v9529_v26 = vmul.f32 %v17094_v22, %v9457_v2  ;;  %10785 = vst [vmem:[#allocation2 + $0xfc] sm:$0xf] %v10784_v5  ;;  %v9728_v57 = vmul.f32 0.2, %v9600_v59  ;;  %v17755_v18 = vsub.f32 %v17754_v52, %v16679_v24 }
 0x54d   : > { %v10327_v40 = vshrl.u32 %v11878_v35, 16  ;;  %v10330_v32 = vshll.u32 %v11878_v35, 16  ;;  %v9393_v31 = vsub.f32 %v17756_v55, %v16679_v24  ;;  %v9394_v44 = vsub.f32 %v17757_v20, %v16679_v24  ;;  %v10794_v55 = vld [vmem:[#allocation2 + $0x110] sm:$0x1] }
 0x54e   : > { %v9791_v54 = vsel %vm9663_vm10, %v9599_v23, %v9727_v13  ;;  %v9601_v1 = vadd.f32 %v17110_v19, %v9529_v26  ;;  %v9458_v9 = vmul.f32 %v16759_v56, %v17755_v18  ;;  %v9792_v49 = vsel %vm9664_vm11, %v9600_v59, %v9728_v57 }
 0x54f   : > { %v10329_v11 = vrot.slane %v10327_v40, 7  ;;  %v11879_v6 = vpack.c.bf16 %v9791_v54, %v9791_v54  ;;  %v11880_v58 = vpack.c.bf16 %v9792_v49, %v9792_v49  ;;  %v10790_v54 = vld [vmem:[#allocation2 + $0x108] sm:$0xf]  ;;  %v9459_v18 = vmul.f32 %v16759_v56, %v9393_v31 }
 0x550   : > { %vm9665_vm12 = vcmp.ge.f32.partialorder %v9601_v1, 0.0  ;;  %v9729_v33 = vmul.f32 0.2, %v9601_v1  ;;  %v9530_v2 = vmul.f32 %v17094_v22, %v9458_v9 }
 0x551   : > { %v10332_v4 = vor.u32 %v10330_v32, %v10329_v11  ;;  %v10334_v51 = vrot.slane %v10329_v11, 4  ;;  %v10336_v23 = vshrl.u32 %v11879_v6, 16  ;;  %v10339_v38 = vshll.u32 %v11879_v6, 16 }
 0x552   : > { %v10344_v47 = vshrl.u32 %v11880_v58, 16  ;;  %v10347_v35 = vshll.u32 %v11880_v58, 16  ;;  %v9793_v5 = vsel %vm9665_vm12, %v9601_v1, %v9729_v33  ;;  %v9602_v13 = vadd.f32 %v17110_v19, %v9530_v2 }
 0x553   : > { %v10333_v59 = vsel %vm16818_vm2, %v10325_v36, %v10332_v4  ;;  %v10788_v26 = vsel %vm16825_vm3, %v10334_v51, %v10787_v39  ;;  %v10338_v40 = vrot.slane %v10336_v23, 7  ;;  %v11881_v57 = vpack.c.bf16 %v9793_v5, %v9793_v5  ;;  %v10797_v23 = vld [vmem:[#allocation2 + $0x114] sm:$0xf] }
 0x554   : > { %10786 = vst [vmem:[#allocation2 + $0x100] sm:$0xf] %v10333_v59  ;;  %10789 = vst [vmem:[#allocation2 + $0x104] sm:$0x1] %v10788_v26  ;;  %v10346_v32 = vrot.slane %v10344_v47, 7  ;;  %vm9666_vm13 = vcmp.ge.f32.partialorder %v9602_v13, 0.0  ;;  %v9531_v39 = vmul.f32 %v17094_v22, %v9459_v18  ;;  %v9460_v4 = vmul.f32 %v16759_v56, %v9394_v44 }
 0x555   : > { %v9730_v52 = vmul.f32 0.2, %v9602_v13  ;;  %v10341_v9 = vor.u32 %v10339_v38, %v10338_v40  ;;  %v10342_v1 = vrot.slane %v10338_v40, 4  ;;  %v10353_v11 = vshrl.u32 %v11881_v57, 16  ;;  %v17758_v47 = vld [vmem:[#allocation37_spill] sm:$0xff] }
 0x556   : > { %v10356_v6 = vshll.u32 %v11881_v57, 16  ;;  %v10349_v49 = vor.u32 %v10347_v35, %v10346_v32  ;;  %v10351_v36 = vrot.slane %v10346_v32, 4  ;;  %v9603_v38 = vadd.f32 %v17110_v19, %v9531_v39 }
 0x557   : > { %v9794_v20 = vsel %vm9666_vm13, %v9602_v13, %v9730_v52  ;;  %v10791_v58 = vsel %vm16812_vm1, %v10341_v9, %v10790_v54  ;;  %v10355_v33 = vrot.slane %v10353_v11, 7  ;;  %v9395_v35 = vsub.f32 %v17758_v47, %v16679_v24  ;;  %v17759_v52 = vld [vmem:[#allocation39_spill] sm:$0xff]  ;;  %v17760_v9 = vld [vmem:[#allocation36_spill] sm:$0xff] }
 0x558   : > { %v11882_v2 = vpack.c.bf16 %v9794_v20, %v9794_v20  ;;  %10792 = vst [vmem:[#allocation2 + $0x108] sm:$0xf] %v10791_v58  ;;  %v10350_v31 = vsel %vm16818_vm2, %v10342_v1, %v10349_v49  ;;  %v10795_v51 = vsel %vm16825_vm3, %v10351_v36, %v10794_v55  ;;  %vm9667_vm14 = vcmp.ge.f32.partialorder %v9603_v38, 0.0  ;;  %v10801_v55 = vld [vmem:[#allocation2 + $0x11c] sm:$0x1] }
 0x559   : > { %10793 = vst [vmem:[#allocation2 + $0x10c] sm:$0xf] %v10350_v31  ;;  %10796 = vst [vmem:[#allocation2 + $0x110] sm:$0x1] %v10795_v51  ;;  %v10358_v5 = vor.u32 %v10356_v6, %v10355_v33  ;;  %v10359_v13 = vrot.slane %v10355_v33, 4  ;;  %v9532_v40 = vmul.f32 %v17094_v22, %v9460_v4  ;;  %v9461_v57 = vmul.f32 %v16759_v56, %v9395_v35  ;;  %v17761_v36 = vld [vmem:[#allocation38_spill] sm:$0xff] }
 0x55a   : > { %v10361_v59 = vshrl.u32 %v11882_v2, 16  ;;  %v10364_v26 = vshll.u32 %v11882_v2, 16  ;;  %v9731_v44 = vmul.f32 0.2, %v9603_v38  ;;  %v9396_v18 = vsub.f32 %v17759_v52, %v16679_v24 }
 0x55b   : > { %v10798_v54 = vsel %vm16812_vm1, %v10358_v5, %v10797_v23  ;;  %v9397_v1 = vsub.f32 %v17760_v9, %v16679_v24  ;;  %v9604_v6 = vadd.f32 %v17110_v19, %v9532_v40  ;;  %v9533_v49 = vmul.f32 %v17094_v22, %v9461_v57 }
 0x55c   : > { %v10363_v32 = vrot.slane %v10361_v59, 7  ;;  %10799 = vst [vmem:[#allocation2 + $0x114] sm:$0xf] %v10798_v54  ;;  %v9795_v11 = vsel %vm9667_vm14, %v9603_v38, %v9731_v44  ;;  %v9398_v20 = vsub.f32 %v17761_v36, %v16679_v24  ;;  %v9462_v2 = vmul.f32 %v16759_v56, %v9396_v18  ;;  %v17762_v18 = vld [vmem:[#allocation41_spill] sm:$0xff] }
 0x55d   : > { %v11883_v33 = vpack.c.bf16 %v9795_v11, %v9795_v11  ;;  %vm9668_vm15 = vcmp.ge.f32.partialorder %v9604_v6, 0.0  ;;  %v9732_v4 = vmul.f32 0.2, %v9604_v6  ;;  %v9605_v31 = vadd.f32 %v17110_v19, %v9533_v49 }
 0x55e   : > { %v10366_v39 = vor.u32 %v10364_v26, %v10363_v32  ;;  %v10368_v58 = vrot.slane %v10363_v32, 4  ;;  %v9463_v51 = vmul.f32 %v16759_v56, %v9397_v1  ;;  %v9534_v26 = vmul.f32 %v17094_v22, %v9462_v2  ;;  %v10804_v32 = vld [vmem:[#allocation2 + $0x120] sm:$0xf] }
 0x55f   : > { %v10370_v47 = vshrl.u32 %v11883_v33, 16  ;;  %v10373_v35 = vshll.u32 %v11883_v33, 16  ;;  %v9796_v5 = vsel %vm9668_vm15, %v9604_v6, %v9732_v4  ;;  %vm9669_vm0 = vcmp.ge.f32.partialorder %v9605_v31, 0.0  ;;  %v17763_v1 = vld [vmem:[#allocation43_spill] sm:$0xff] }
 0x560   : > { %v10367_v23 = vsel %vm16818_vm2, %v10359_v13, %v10366_v39  ;;  %v10802_v38 = vsel %vm16825_vm3, %v10368_v58, %v10801_v55  ;;  %v9733_v59 = vmul.f32 0.2, %v9605_v31  ;;  %v11884_v40 = vpack.c.bf16 %v9796_v5, %v9796_v5 }
 0x561   : > { %10800 = vst [vmem:[#allocation2 + $0x118] sm:$0xf] %v10367_v23  ;;  %10803 = vst [vmem:[#allocation2 + $0x11c] sm:$0x1] %v10802_v38  ;;  %v10372_v44 = vrot.slane %v10370_v47, 7  ;;  %v9535_v57 = vmul.f32 %v17094_v22, %v9463_v51  ;;  %v9464_v54 = vmul.f32 %v16759_v56, %v9398_v20  ;;  %v9606_v52 = vadd.f32 %v17110_v19, %v9534_v26 }
 0x562   : > { %v9797_v13 = vsel %vm9669_vm0, %v9605_v31, %v9733_v59  ;;  %v9399_v9 = vsub.f32 %v17762_v18, %v16679_v24  ;;  %v9400_v55 = vsub.f32 %v17763_v1, %v16679_v24  ;;  %v10378_v49 = vshrl.u32 %v11884_v40, 16  ;;  %v10808_v51 = vld [vmem:[#allocation2 + $0x128] sm:$0x1]  ;;  %v10811_v18 = vld [vmem:[#allocation2 + $0x12c] sm:$0xf] }
 0x563   : > { %v10375_v11 = vor.u32 %v10373_v35, %v10372_v44  ;;  %v10376_v6 = vrot.slane %v10372_v44, 4  ;;  %v10381_v36 = vshll.u32 %v11884_v40, 16  ;;  %v11885_v39 = vpack.c.bf16 %v9797_v13, %v9797_v13 }
 0x564   : > { %vm9670_vm4 = vcmp.ge.f32.partialorder %v9606_v52, 0.0  ;;  %v9734_v58 = vmul.f32 0.2, %v9606_v52  ;;  %v9607_v33 = vadd.f32 %v17110_v19, %v9535_v57  ;;  %v10380_v2 = vrot.slane %v10378_v49, 7 }
 0x565   : > { %v10805_v20 = vsel %vm16812_vm1, %v10375_v11, %v10804_v32  ;;  %v9536_v4 = vmul.f32 %v17094_v22, %v9464_v54  ;;  %v9465_v31 = vmul.f32 %v16759_v56, %v9399_v9  ;;  %v10387_v23 = vshrl.u32 %v11885_v39, 16 }
 0x566   : > { %10806 = vst [vmem:[#allocation2 + $0x120] sm:$0xf] %v10805_v20  ;;  %v10390_v38 = vshll.u32 %v11885_v39, 16  ;;  %v9798_v47 = vsel %vm9670_vm4, %v9606_v52, %v9734_v58  ;;  %vm9671_vm5 = vcmp.ge.f32.partialorder %v9607_v33, 0.0  ;;  %v10383_v35 = vor.u32 %v10381_v36, %v10380_v2  ;;  %v10815_v20 = vld [vmem:[#allocation2 + $0x134] sm:$0x1] }
 0x567   : > { %v10385_v5 = vrot.slane %v10380_v2, 4  ;;  %v11886_v59 = vpack.c.bf16 %v9798_v47, %v9798_v47  ;;  %v9735_v26 = vmul.f32 0.2, %v9607_v33  ;;  %v10389_v44 = vrot.slane %v10387_v23, 7 }
 0x568   : > { %v9608_v40 = vadd.f32 %v17110_v19, %v9536_v4  ;;  %v9537_v57 = vmul.f32 %v17094_v22, %v9465_v31  ;;  %v9466_v32 = vmul.f32 %v16759_v56, %v9400_v55  ;;  %v10384_v54 = vsel %vm16818_vm2, %v10376_v6, %v10383_v35  ;;  %v17764_v4 = vld [vmem:[#allocation40_spill] sm:$0xff] }
 0x569   : > { %v10809_v13 = vsel %vm16825_vm3, %v10385_v5, %v10808_v51  ;;  %v10395_v52 = vshrl.u32 %v11886_v59, 16  ;;  %v10398_v9 = vshll.u32 %v11886_v59, 16  ;;  %10807 = vst [vmem:[#allocation2 + $0x124] sm:$0xf] %v10384_v54  ;;  %v10392_v1 = vor.u32 %v10390_v38, %v10389_v44  ;;  %v17765_v51 = vld [vmem:[#allocation42_spill] sm:$0xff] }
 0x56a   : > { %10810 = vst [vmem:[#allocation2 + $0x128] sm:$0x1] %v10809_v13  ;;  %v10393_v11 = vrot.slane %v10389_v44, 4  ;;  %v9799_v49 = vsel %vm9671_vm5, %v9607_v33, %v9735_v26  ;;  %vm9672_vm6 = vcmp.ge.f32.partialorder %v9608_v40, 0.0  ;;  %v9736_v58 = vmul.f32 0.2, %v9608_v40 }
 0x56b   : > { %v10397_v36 = vrot.slane %v10395_v52, 7  ;;  %v11887_v39 = vpack.c.bf16 %v9799_v49, %v9799_v49  ;;  %v9609_v55 = vadd.f32 %v17110_v19, %v9537_v57  ;;  %v10812_v6 = vsel %vm16812_vm1, %v10392_v1, %v10811_v18  ;;  %v10818_v13 = vld [vmem:[#allocation2 + $0x138] sm:$0xf] }
 0x56c   : > { %v9538_v2 = vmul.f32 %v17094_v22, %v9466_v32  ;;  %v9401_v31 = vsub.f32 %v17764_v4, %v16679_v24  ;;  %v9402_v23 = vsub.f32 %v17765_v51, %v16679_v24  ;;  %10813 = vst [vmem:[#allocation2 + $0x12c] sm:$0xf] %v10812_v6  ;;  %v9800_v5 = vsel %vm9672_vm6, %v9608_v40, %v9736_v58 }
 0x56d   : > { %v10400_v33 = vor.u32 %v10398_v9, %v10397_v36  ;;  %v10402_v38 = vrot.slane %v10397_v36, 4  ;;  %v10404_v47 = vshrl.u32 %v11887_v39, 16  ;;  %v10407_v35 = vshll.u32 %v11887_v39, 16 }
 0x56e   : > { %vm9673_vm7 = vcmp.ge.f32.partialorder %v9609_v55, 0.0  ;;  %v9737_v59 = vmul.f32 0.2, %v9609_v55  ;;  %v9610_v26 = vadd.f32 %v17110_v19, %v9538_v2  ;;  %v11888_v54 = vpack.c.bf16 %v9800_v5, %v9800_v5 }
 0x56f   : > { %v10401_v44 = vsel %vm16818_vm2, %v10393_v11, %v10400_v33  ;;  %v10816_v57 = vsel %vm16825_vm3, %v10402_v38, %v10815_v20  ;;  %v10406_v32 = vrot.slane %v10404_v47, 7  ;;  %v9467_v40 = vmul.f32 %v16759_v56, %v9401_v31  ;;  %v10822_v31 = vld [vmem:[#allocation2 + $0x140] sm:$0x1] }
 0x570   : > { %10814 = vst [vmem:[#allocation2 + $0x130] sm:$0xf] %v10401_v44  ;;  %10817 = vst [vmem:[#allocation2 + $0x134] sm:$0x1] %v10816_v57  ;;  %v9801_v18 = vsel %vm9673_vm7, %v9609_v55, %v9737_v59  ;;  %vm9674_vm8 = vcmp.ge.f32.partialorder %v9610_v26, 0.0  ;;  %v10412_v49 = vshrl.u32 %v11888_v54, 16  ;;  %v9468_v6 = vmul.f32 %v16759_v56, %v9402_v23 }
 0x571   : > { %v9738_v52 = vmul.f32 0.2, %v9610_v26  ;;  %v10409_v9 = vor.u32 %v10407_v35, %v10406_v32  ;;  %v10410_v1 = vrot.slane %v10406_v32, 4  ;;  %v10415_v36 = vshll.u32 %v11888_v54, 16  ;;  %v17766_v55 = vld [vmem:[#allocation45_spill] sm:$0xff] }
 0x572   : > { %v11889_v39 = vpack.c.bf16 %v9801_v18, %v9801_v18  ;;  %v9539_v11 = vmul.f32 %v17094_v22, %v9467_v40  ;;  %v10414_v2 = vrot.slane %v10412_v49, 7  ;;  %v9403_v51 = vsub.f32 %v17766_v55, %v16679_v24  ;;  %v10825_v18 = vld [vmem:[#allocation2 + $0x144] sm:$0xf] }
 0x573   : > { %v9802_v58 = vsel %vm9674_vm8, %v9610_v26, %v9738_v52  ;;  %v10819_v20 = vsel %vm16812_vm1, %v10409_v9, %v10818_v13  ;;  %v9540_v35 = vmul.f32 %v17094_v22, %v9468_v6 }
 0x574   : > { %v11890_v4 = vpack.c.bf16 %v9802_v58, %v9802_v58  ;;  %10820 = vst [vmem:[#allocation2 + $0x138] sm:$0xf] %v10819_v20  ;;  %v10421_v33 = vshrl.u32 %v11889_v39, 16  ;;  %v10424_v38 = vshll.u32 %v11889_v39, 16  ;;  %v9611_v47 = vadd.f32 %v17110_v19, %v9539_v11 }
 0x575   : > { %v10417_v5 = vor.u32 %v10415_v36, %v10414_v2  ;;  %v10419_v59 = vrot.slane %v10414_v2, 4  ;;  %v9612_v32 = vadd.f32 %v17110_v19, %v9540_v35  ;;  %v9469_v40 = vmul.f32 %v16759_v56, %v9403_v51  ;;  %v10829_v36 = vld [vmem:[#allocation2 + $0x14c] sm:$0x1] }
 0x576   : > { %v10429_v26 = vshrl.u32 %v11890_v4, 16  ;;  %v10432_v23 = vshll.u32 %v11890_v4, 16  ;;  %v10423_v44 = vrot.slane %v10421_v33, 7  ;;  %vm9675_vm9 = vcmp.ge.f32.partialorder %v9611_v47, 0.0  ;;  %v17767_v4 = vld [vmem:[#allocation47_spill] sm:$0xff]  ;;  %v17768_v51 = vld [vmem:[#allocation44_spill] sm:$0xff] }
 0x577   : > { %v9739_v57 = vmul.f32 0.2, %v9611_v47  ;;  %v10418_v54 = vsel %vm16818_vm2, %v10410_v1, %v10417_v5  ;;  %v10823_v13 = vsel %vm16825_vm3, %v10419_v59, %v10822_v31  ;;  %vm9676_vm10 = vcmp.ge.f32.partialorder %v9612_v32, 0.0 }
 0x578   : > { %v10431_v52 = vrot.slane %v10429_v26, 7  ;;  %10821 = vst [vmem:[#allocation2 + $0x13c] sm:$0xf] %v10418_v54  ;;  %10824 = vst [vmem:[#allocation2 + $0x140] sm:$0x1] %v10823_v13  ;;  %v10426_v9 = vor.u32 %v10424_v38, %v10423_v44  ;;  %v10427_v49 = vrot.slane %v10423_v44, 4  ;;  %v9541_v2 = vmul.f32 %v17094_v22, %v9469_v40 }
 0x579   : > { %v9803_v39 = vsel %vm9675_vm9, %v9611_v47, %v9739_v57  ;;  %v9740_v20 = vmul.f32 0.2, %v9612_v32  ;;  %v9404_v55 = vsub.f32 %v17767_v4, %v16679_v24  ;;  %v9405_v31 = vsub.f32 %v17768_v51, %v16679_v24  ;;  %v17769_v54 = vld [vmem:[#allocation46_spill] sm:$0xff]  ;;  %v10832_v40 = vld [vmem:[#allocation2 + $0x150] sm:$0xf] }
 0x57a   : > { %v10434_v58 = vor.u32 %v10432_v23, %v10431_v52  ;;  %v10436_v11 = vrot.slane %v10431_v52, 4  ;;  %v11891_v6 = vpack.c.bf16 %v9803_v39, %v9803_v39  ;;  %v10826_v1 = vsel %vm16812_vm1, %v10426_v9, %v10825_v18  ;;  %v17770_v18 = vld [vmem:[#allocation49_spill] sm:$0xff] }
 0x57b   : > { %10827 = vst [vmem:[#allocation2 + $0x144] sm:$0xf] %v10826_v1  ;;  %v9804_v5 = vsel %vm9676_vm10, %v9612_v32, %v9740_v20  ;;  %v9613_v59 = vadd.f32 %v17110_v19, %v9541_v2  ;;  %v9470_v26 = vmul.f32 %v16759_v56, %v9404_v55  ;;  %v9471_v23 = vmul.f32 %v16759_v56, %v9405_v31  ;;  %v10836_v51 = vld [vmem:[#allocation2 + $0x158] sm:$0x1] }
 0x57c   : > { %v10435_v33 = vsel %vm16818_vm2, %v10427_v49, %v10434_v58  ;;  %v10830_v38 = vsel %vm16825_vm3, %v10436_v11, %v10829_v36  ;;  %v10438_v47 = vshrl.u32 %v11891_v6, 16  ;;  %v10441_v35 = vshll.u32 %v11891_v6, 16 }
 0x57d   : > { %10828 = vst [vmem:[#allocation2 + $0x148] sm:$0xf] %v10435_v33  ;;  %10831 = vst [vmem:[#allocation2 + $0x14c] sm:$0x1] %v10830_v38  ;;  %v11892_v57 = vpack.c.bf16 %v9804_v5, %v9804_v5  ;;  %v9406_v13 = vsub.f32 %v17769_v54, %v16679_v24  ;;  %v9407_v52 = vsub.f32 %v17770_v18, %v16679_v24  ;;  %vm9677_vm11 = vcmp.ge.f32.partialorder %v9613_v59, 0.0 }
 0x57e   : > { %v10440_v44 = vrot.slane %v10438_v47, 7  ;;  %v9741_v9 = vmul.f32 0.2, %v9613_v59  ;;  %v9542_v49 = vmul.f32 %v17094_v22, %v9470_v26  ;;  %v9543_v32 = vmul.f32 %v17094_v22, %v9471_v23 }
 0x57f   : > { %v10446_v58 = vshrl.u32 %v11892_v57, 16  ;;  %v10449_v11 = vshll.u32 %v11892_v57, 16  ;;  %v9472_v2 = vmul.f32 %v16759_v56, %v9406_v13  ;;  %v9473_v33 = vmul.f32 %v16759_v56, %v9407_v52 }
 0x580   : > { %v10443_v36 = vor.u32 %v10441_v35, %v10440_v44  ;;  %v10444_v39 = vrot.slane %v10440_v44, 4  ;;  %v9805_v6 = vsel %vm9677_vm11, %v9613_v59, %v9741_v9  ;;  %v9614_v20 = vadd.f32 %v17110_v19, %v9542_v49  ;;  %v10839_v9 = vld [vmem:[#allocation2 + $0x15c] sm:$0xf] }
 0x581   : > { %v9615_v1 = vadd.f32 %v17110_v19, %v9543_v32  ;;  %v10448_v55 = vrot.slane %v10446_v58, 7  ;;  %v11893_v31 = vpack.c.bf16 %v9805_v6, %v9805_v6  ;;  %v9544_v57 = vmul.f32 %v17094_v22, %v9472_v2  ;;  %v17771_v58 = vld [vmem:[#allocation51_spill] sm:$0xff] }
 0x582   : > { %v10833_v4 = vsel %vm16812_vm1, %v10443_v36, %v10832_v40  ;;  %vm9678_vm12 = vcmp.ge.f32.partialorder %v9614_v20, 0.0  ;;  %v9742_v38 = vmul.f32 0.2, %v9614_v20  ;;  %v9545_v54 = vmul.f32 %v17094_v22, %v9473_v33 }
 0x583   : > { %10834 = vst [vmem:[#allocation2 + $0x150] sm:$0xf] %v10833_v4  ;;  %vm9679_vm13 = vcmp.ge.f32.partialorder %v9615_v1, 0.0  ;;  %v9743_v47 = vmul.f32 0.2, %v9615_v1  ;;  %v10451_v35 = vor.u32 %v10449_v11, %v10448_v55  ;;  %v10453_v5 = vrot.slane %v10448_v55, 4 }
 0x584   : > { %v10455_v59 = vshrl.u32 %v11893_v31, 16  ;;  %v10458_v26 = vshll.u32 %v11893_v31, 16  ;;  %v9806_v23 = vsel %vm9678_vm12, %v9614_v20, %v9742_v38  ;;  %v9616_v32 = vadd.f32 %v17110_v19, %v9544_v57  ;;  %v10843_v38 = vld [vmem:[#allocation2 + $0x164] sm:$0x1]  ;;  %v10846_v57 = vld [vmem:[#allocation2 + $0x168] sm:$0xf] }
 0x585   : > { %v9807_v44 = vsel %vm9679_vm13, %v9615_v1, %v9743_v47  ;;  %v10452_v13 = vsel %vm16818_vm2, %v10444_v39, %v10451_v35  ;;  %v10837_v18 = vsel %vm16825_vm3, %v10453_v5, %v10836_v51  ;;  %v11894_v40 = vpack.c.bf16 %v9806_v23, %v9806_v23 }
 0x586   : > { %v10457_v52 = vrot.slane %v10455_v59, 7  ;;  %10835 = vst [vmem:[#allocation2 + $0x154] sm:$0xf] %v10452_v13  ;;  %10838 = vst [vmem:[#allocation2 + $0x158] sm:$0x1] %v10837_v18  ;;  %v11895_v49 = vpack.c.bf16 %v9807_v44, %v9807_v44  ;;  %v9617_v36 = vadd.f32 %v17110_v19, %v9545_v54  ;;  %v9408_v11 = vsub.f32 %v17771_v58, %v16679_v24  ;;  %v17772_v59 = vld [vmem:[#allocation48_spill] sm:$0xff] }
 0x587   : > { %v10463_v1 = vshrl.u32 %v11894_v40, 16  ;;  %v10466_v39 = vshll.u32 %v11894_v40, 16  ;;  %vm9680_vm14 = vcmp.ge.f32.partialorder %v9616_v32, 0.0  ;;  %v9744_v55 = vmul.f32 0.2, %v9616_v32 }
 0x588   : > { %v10460_v6 = vor.u32 %v10458_v26, %v10457_v52  ;;  %v10461_v20 = vrot.slane %v10457_v52, 4  ;;  %v10472_v2 = vshrl.u32 %v11895_v49, 16  ;;  %v10475_v4 = vshll.u32 %v11895_v49, 16 }
 0x589   : > { %v10465_v31 = vrot.slane %v10463_v1, 7  ;;  %vm9681_vm15 = vcmp.ge.f32.partialorder %v9617_v36, 0.0  ;;  %v9745_v33 = vmul.f32 0.2, %v9617_v36  ;;  %v9808_v35 = vsel %vm9680_vm14, %v9616_v32, %v9744_v55 }
 0x58a   : > { %v10840_v51 = vsel %vm16812_vm1, %v10460_v6, %v10839_v9  ;;  %v10474_v47 = vrot.slane %v10472_v2, 7  ;;  %v9474_v5 = vmul.f32 %v16759_v56, %v9408_v11  ;;  %v9409_v26 = vsub.f32 %v17772_v59, %v16679_v24 }
 0x58b   : > { %10841 = vst [vmem:[#allocation2 + $0x15c] sm:$0xf] %v10840_v51  ;;  %v10468_v23 = vor.u32 %v10466_v39, %v10465_v31  ;;  %v10470_v44 = vrot.slane %v10465_v31, 4  ;;  %v11896_v54 = vpack.c.bf16 %v9808_v35, %v9808_v35  ;;  %v9809_v13 = vsel %vm9681_vm15, %v9617_v36, %v9745_v33  ;;  %v17774_v51 = vld [vmem:[#allocation53_spill] sm:$0xff]  ;;  %v10850_v33 = vld [vmem:[#allocation2 + $0x170] sm:$0x1] }
 0x58c   : > { %v10477_v18 = vor.u32 %v10475_v4, %v10474_v47  ;;  %v10478_v52 = vrot.slane %v10474_v47, 4  ;;  %v11897_v40 = vpack.c.bf16 %v9809_v13, %v9809_v13  ;;  %v9546_v9 = vmul.f32 %v17094_v22, %v9474_v5  ;;  %v17775_v35 = vld [vmem:[#allocation55_spill] sm:$0xff] }
 0x58d   : > { %v10469_v49 = vsel %vm16818_vm2, %v10461_v20, %v10468_v23  ;;  %v10844_v32 = vsel %vm16825_vm3, %v10470_v44, %v10843_v38  ;;  %v10480_v58 = vshrl.u32 %v11896_v54, 16  ;;  %v10483_v11 = vshll.u32 %v11896_v54, 16  ;;  %v17773_v20 = vld [vmem:[#allocation50_spill] sm:$0xff]  ;;  %v10853_v44 = vld [vmem:[#allocation2 + $0x174] sm:$0xf] }
 0x58e   : > { %10842 = vst [vmem:[#allocation2 + $0x160] sm:$0xf] %v10469_v49  ;;  %10845 = vst [vmem:[#allocation2 + $0x164] sm:$0x1] %v10844_v32  ;;  %v10847_v6 = vsel %vm16812_vm1, %v10477_v18, %v10846_v57  ;;  %v10489_v1 = vshrl.u32 %v11897_v40, 16  ;;  %v10492_v36 = vshll.u32 %v11897_v40, 16  ;;  %v9618_v39 = vadd.f32 %v17110_v19, %v9546_v9 }
 0x58f   : > { %10848 = vst [vmem:[#allocation2 + $0x168] sm:$0xf] %v10847_v6  ;;  %v10482_v2 = vrot.slane %v10480_v58, 7  ;;  %v9475_v4 = vmul.f32 %v16759_v56, %v9409_v26  ;;  %v9410_v55 = vsub.f32 %v17773_v20, %v16679_v24  ;;  %v9411_v31 = vsub.f32 %v17774_v51, %v16679_v24 }
 0x590   : > { %v10491_v38 = vrot.slane %v10489_v1, 7  ;;  %vm9682_vm0 = vcmp.ge.f32.partialorder %v9618_v39, 0.0  ;;  %v9746_v47 = vmul.f32 0.2, %v9618_v39  ;;  %v9412_v5 = vsub.f32 %v17775_v35, %v16679_v24  ;;  %v17777_v35 = vld [vmem:[#allocation54_spill] sm:$0xff] }
 0x591   : > { %v10485_v59 = vor.u32 %v10483_v11, %v10482_v2  ;;  %v10487_v23 = vrot.slane %v10482_v2, 4  ;;  %v9547_v57 = vmul.f32 %v17094_v22, %v9475_v4  ;;  %v9476_v26 = vmul.f32 %v16759_v56, %v9410_v55  ;;  %v17776_v55 = vld [vmem:[#allocation52_spill] sm:$0xff] }
 0x592   : > { %v10494_v54 = vor.u32 %v10492_v36, %v10491_v38  ;;  %v9810_v13 = vsel %vm9682_vm0, %v9618_v39, %v9746_v47  ;;  %v9477_v18 = vmul.f32 %v16759_v56, %v9411_v31  ;;  %v9478_v1 = vmul.f32 %v16759_v56, %v9412_v5 }
 0x593   : > { %v10486_v40 = vsel %vm16818_vm2, %v10478_v52, %v10485_v59  ;;  %v10851_v9 = vsel %vm16825_vm3, %v10487_v23, %v10850_v33  ;;  %v11898_v49 = vpack.c.bf16 %v9810_v13, %v9810_v13  ;;  %v9619_v32 = vadd.f32 %v17110_v19, %v9547_v57  ;;  %v10857_v59 = vld [vmem:[#allocation2 + $0x17c] sm:$0x1] }
 0x594   : > { %10849 = vst [vmem:[#allocation2 + $0x16c] sm:$0xf] %v10486_v40  ;;  %10852 = vst [vmem:[#allocation2 + $0x170] sm:$0x1] %v10851_v9  ;;  %v10854_v58 = vsel %vm16812_vm1, %v10494_v54, %v10853_v44  ;;  %v9548_v11 = vmul.f32 %v17094_v22, %v9476_v26  ;;  %v9549_v6 = vmul.f32 %v17094_v22, %v9477_v18  ;;  %v10495_v31 = vrot.slane %v10491_v38, 4 }
 0x595   : > { %10855 = vst [vmem:[#allocation2 + $0x174] sm:$0xf] %v10854_v58  ;;  %v10497_v36 = vshrl.u32 %v11898_v49, 16  ;;  %v10500_v52 = vshll.u32 %v11898_v49, 16  ;;  %vm9683_vm4 = vcmp.ge.f32.partialorder %v9619_v32, 0.0  ;;  %v9550_v20 = vmul.f32 %v17094_v22, %v9478_v1 }
 0x596   : > { %v9747_v39 = vmul.f32 0.2, %v9619_v32  ;;  %v9620_v2 = vadd.f32 %v17110_v19, %v9548_v11  ;;  %v9621_v4 = vadd.f32 %v17110_v19, %v9549_v6  ;;  %v9413_v51 = vsub.f32 %v17776_v55, %v16679_v24 }
 0x597   : > { %v10499_v33 = vrot.slane %v10497_v36, 7  ;;  %v9414_v5 = vsub.f32 %v17777_v35, %v16679_v24  ;;  %v9622_v13 = vadd.f32 %v17110_v19, %v9550_v20  ;;  %v10860_v36 = vld [vmem:[#allocation2 + $0x180] sm:$0xf] }
 0x598   : > { %v9811_v47 = vsel %vm9683_vm4, %v9619_v32, %v9747_v39  ;;  %vm9684_vm5 = vcmp.ge.f32.partialorder %v9620_v2, 0.0  ;;  %v9748_v44 = vmul.f32 0.2, %v9620_v2  ;;  %vm9685_vm6 = vcmp.ge.f32.partialorder %v9621_v4, 0.0 }
 0x599   : > { %v11899_v23 = vpack.c.bf16 %v9811_v47, %v9811_v47  ;;  %v10502_v57 = vor.u32 %v10500_v52, %v10499_v33  ;;  %v10504_v26 = vrot.slane %v10499_v33, 4  ;;  %v9749_v54 = vmul.f32 0.2, %v9621_v4 }
 0x59a   : > { %v9812_v9 = vsel %vm9684_vm5, %v9620_v2, %v9748_v44  ;;  %v9479_v38 = vmul.f32 %v16759_v56, %v9413_v51  ;;  %vm9686_vm7 = vcmp.ge.f32.partialorder %v9622_v13, 0.0  ;;  %v9750_v1 = vmul.f32 0.2, %v9622_v13  ;;  %v10864_v44 = vld [vmem:[#allocation2 + $0x188] sm:$0x1] }
 0x59b   : > { %v10506_v18 = vshrl.u32 %v11899_v23, 16  ;;  %v10509_v40 = vshll.u32 %v11899_v23, 16  ;;  %v10503_v49 = vsel %vm16818_vm2, %v10495_v31, %v10502_v57  ;;  %v10858_v24 = vsel %vm16825_vm3, %v10504_v26, %v10857_v59 }
 0x59c   : > { %v11900_v32 = vpack.c.bf16 %v9812_v9, %v9812_v9  ;;  %v9813_v58 = vsel %vm9685_vm6, %v9621_v4, %v9749_v54  ;;  %10856 = vst [vmem:[#allocation2 + $0x178] sm:$0xf] %v10503_v49  ;;  %10859 = vst [vmem:[#allocation2 + $0x17c] sm:$0x1] %v10858_v24  ;;  %v9551_v2 = vmul.f32 %v17094_v22, %v9479_v38 }
 0x59d   : > { %v10508_v11 = vrot.slane %v10506_v18, 7  ;;  %v11901_v6 = vpack.c.bf16 %v9813_v58, %v9813_v58  ;;  %v9480_v20 = vmul.f32 %v16759_v56, %v9414_v5  ;;  %v9814_v35 = vsel %vm9686_vm7, %v9622_v13, %v9750_v1  ;;  %v10867_v56 = vld [vmem:[#allocation2 + $0x18c] sm:$0xf]  ;;  %v10871_v1 = vld [vmem:[#allocation2 + $0x194] sm:$0x1] }
 0x59e   : > { %v10514_v52 = vshrl.u32 %v11900_v32, 16  ;;  %v10517_v39 = vshll.u32 %v11900_v32, 16  ;;  %v9623_v4 = vadd.f32 %v17110_v19, %v9551_v2  ;;  %v11902_v26 = vpack.c.bf16 %v9814_v35, %v9814_v35 }
 0x59f   : > { %v10511_v55 = vor.u32 %v10509_v40, %v10508_v11  ;;  %v10512_v51 = vrot.slane %v10508_v11, 4  ;;  %v10523_v31 = vshrl.u32 %v11901_v6, 16  ;;  %v10526_v33 = vshll.u32 %v11901_v6, 16 }
 0x5a0   : > { %v10516_v47 = vrot.slane %v10514_v52, 7  ;;  %v9552_v59 = vmul.f32 %v17094_v22, %v9480_v20  ;;  %vm9687_vm8 = vcmp.ge.f32.partialorder %v9623_v4, 0.0  ;;  %v9751_v5 = vmul.f32 0.2, %v9623_v4 }
 0x5a1   : > { %v10861_v23 = vsel %vm16812_vm1, %v10511_v55, %v10860_v36  ;;  %v10525_v57 = vrot.slane %v10523_v31, 7  ;;  %v10531_v9 = vshrl.u32 %v11902_v26, 16  ;;  %v10534_v38 = vshll.u32 %v11902_v26, 16  ;;  %v10878_v26 = vld [vmem:[#allocation2 + $0x1a0] sm:$0x1] }
 0x5a2   : > { %10862 = vst [vmem:[#allocation2 + $0x180] sm:$0xf] %v10861_v23  ;;  %v10519_v54 = vor.u32 %v10517_v39, %v10516_v47  ;;  %v10521_v18 = vrot.slane %v10516_v47, 4  ;;  %v9815_v49 = vsel %vm9687_vm8, %v9623_v4, %v9751_v5  ;;  %v9624_v24 = vadd.f32 %v17110_v19, %v9552_v59  ;;  %v10874_v47 = vld [vmem:[#allocation2 + $0x198] sm:$0xf] }
 0x5a3   : > { %v10528_v40 = vor.u32 %v10526_v33, %v10525_v57  ;;  %v10529_v58 = vrot.slane %v10525_v57, 4  ;;  %v10533_v11 = vrot.slane %v10531_v9, 7  ;;  %v11903_v6 = vpack.c.bf16 %v9815_v49, %v9815_v49 }
 0x5a4   : > { %v10520_v13 = vsel %vm16818_vm2, %v10512_v51, %v10519_v54  ;;  %v10865_v22 = vsel %vm16825_vm3, %v10521_v18, %v10864_v44  ;;  %vm9688_vm9 = vcmp.ge.f32.partialorder %v9624_v24, 0.0  ;;  %v9752_v36 = vmul.f32 0.2, %v9624_v24 }
 0x5a5   : > { %10863 = vst [vmem:[#allocation2 + $0x184] sm:$0xf] %v10520_v13  ;;  %10866 = vst [vmem:[#allocation2 + $0x188] sm:$0x1] %v10865_v22  ;;  %v10868_v32 = vsel %vm16812_vm1, %v10528_v40, %v10867_v56  ;;  %v10536_v52 = vor.u32 %v10534_v38, %v10533_v11  ;;  %v10538_v39 = vrot.slane %v10533_v11, 4  ;;  %v10540_v2 = vshrl.u32 %v11903_v6, 16 }
 0x5a6   : > { %10869 = vst [vmem:[#allocation2 + $0x18c] sm:$0xf] %v10868_v32  ;;  %v10543_v20 = vshll.u32 %v11903_v6, 16  ;;  %v9816_v55 = vsel %vm9688_vm9, %v9624_v24, %v9752_v36 }
 0x5a7   : > { %v10537_v19 = vsel %vm16818_vm2, %v10529_v58, %v10536_v52  ;;  %v10872_v51 = vsel %vm16825_vm3, %v10538_v39, %v10871_v1  ;;  %v10542_v31 = vrot.slane %v10540_v2, 7  ;;  %v11904_v33 = vpack.c.bf16 %v9816_v55, %v9816_v55 }
 0x5a8   : > { %10870 = vst [vmem:[#allocation2 + $0x190] sm:$0xf] %v10537_v19  ;;  %10873 = vst [vmem:[#allocation2 + $0x194] sm:$0x1] %v10872_v51 }
 0x5a9   : > { %v10545_v35 = vor.u32 %v10543_v20, %v10542_v31  ;;  %v10548_v4 = vshrl.u32 %v11904_v33, 16  ;;  %v10551_v59 = vshll.u32 %v11904_v33, 16  ;;  %v10546_v44 = vrot.slane %v10542_v31, 4 }
 0x5ab   : > { %v10875_v23 = vsel %vm16812_vm1, %v10545_v35, %v10874_v47  ;;  %v10550_v57 = vrot.slane %v10548_v4, 7 }
 0x5ac   : > { %10876 = vst [vmem:[#allocation2 + $0x198] sm:$0xf] %v10875_v23 }
 0x5ad   : > { %v10553_v54 = vor.u32 %v10551_v59, %v10550_v57  ;;  %v10555_v18 = vrot.slane %v10550_v57, 4 }
 0x5af   : > { %v10554_v56 = vsel %vm16818_vm2, %v10546_v44, %v10553_v54  ;;  %v10879_v5 = vsel %vm16825_vm3, %v10555_v18, %v10878_v26 }
 0x5b0   : > { %10877 = vst [vmem:[#allocation2 + $0x19c] sm:$0xf] %v10554_v56  ;;  %10880 = vst [vmem:[#allocation2 + $0x1a0] sm:$0x1] %v10879_v5 }
 0x5b1 PF: > { %p11824_p5 = scmp.ne.s32.totalorder %s14200_s21, 4 }
 0x5b2   : > { %s11905_s27 = scalar_lea.vmem (!%p11824_p5), [#allocation7], %s14151_s18  ;;  %v17778_v40 = vld [vmem:[#allocation19_spill] sm:$0xff] (!%p11824_p5)  ;;  %v17779_v38 = vld [vmem:[#allocation21_spill] sm:$0xff] (!%p11824_p5)  ;;  %v17780_v13 = vld [vmem:[#allocation24_spill] sm:$0xff] (!%p11824_p5) }
 0x5b3   : > { %10884 = sbr.rel (%p11824_p5) target bundleno = 1494 (0x5d6), region = 98  ;;  %v17362_v25 = vld [vmem:[%s11905_s27 - $0x1] ss:$0 sm:$0xff] (!%p11824_p5)  ;;  %v17781_v22 = vld [vmem:[#allocation20_spill] sm:$0xff] (!%p11824_p5)  ;;  %v17783_v58 = vld [vmem:[#allocation23_spill] sm:$0xff] (!%p11824_p5) }
 0x5b4   : > { %v10893_v9 = vadd.f32 (!%p11824_p5), %v17778_v40, %v17362_v25  ;;  %v10894_v30 = vadd.f32 (!%p11824_p5), %v17779_v38, %v17362_v25  ;;  %v10895_v17 = vadd.f32 (!%p11824_p5), %v17780_v13, %v17362_v25  ;;  %v10896_v49 = vadd.f32 (!%p11824_p5), %v17781_v22, %v17362_v25  ;;  %v17782_v24 = vld [vmem:[#allocation26_spill] sm:$0xff] (!%p11824_p5)  ;;  %v17784_v6 = vld [vmem:[#allocation25_spill] sm:$0xff] (!%p11824_p5)  ;;  %v17785_v36 = vld [vmem:[#allocation27_spill] sm:$0xff] (!%p11824_p5) }
 0x5b5   : > { %v10897_v32 = vadd.f32 (!%p11824_p5), %v17782_v24, %v17362_v25  ;;  %v10898_v11 = vadd.f32 (!%p11824_p5), %v17783_v58, %v17362_v25  ;;  %v10899_v1 = vadd.f32 (!%p11824_p5), %v17784_v6, %v17362_v25  ;;  %v10900_v52 = vadd.f32 (!%p11824_p5), %v17785_v36, %v17362_v25  ;;  %v17788_v33 = vld [vmem:[#allocation31_spill] sm:$0xff] (!%p11824_p5)  ;;  %v17793_v57 = vld [vmem:[#allocation32_spill] sm:$0xff] (!%p11824_p5)  ;;  %v17794_v54 = vld [vmem:[#allocation34_spill] sm:$0xff] (!%p11824_p5) }
 0x5b6   : > { %10957 = vst [vmem:[#allocation12] sm:$0xff] (!%p11824_p5), %v10893_v9  ;;  %10958 = vst [vmem:[#allocation12 + $0x8] sm:$0xff] (!%p11824_p5), %v10894_v30  ;;  %v10901_v39 = vadd.f32 (!%p11824_p5), %v16374_v34, %v17362_v25  ;;  %v10902_v2 = vadd.f32 (!%p11824_p5), %v16378_v50, %v17362_v25  ;;  %v10903_v20 = vadd.f32 (!%p11824_p5), %v16372_v48, %v17362_v25  ;;  %v17792_v23 = vld [vmem:[#allocation35_spill] sm:$0xff] (!%p11824_p5)  ;;  %v17795_v56 = vld [vmem:[#allocation37_spill] sm:$0xff] (!%p11824_p5) }
 0x5b7   : > { %10959 = vst [vmem:[#allocation12 + $0x10] sm:$0xff] (!%p11824_p5), %v10895_v17  ;;  %10960 = vst [vmem:[#allocation12 + $0x18] sm:$0xff] (!%p11824_p5), %v10896_v49  ;;  %v10904_v55 = vadd.f32 (!%p11824_p5), %v16376_v15, %v17362_v25  ;;  %v10905_v19 = vadd.f32 (!%p11824_p5), %v16382_v10, %v17362_v25  ;;  %v10906_v51 = vadd.f32 (!%p11824_p5), %v16386_v27, %v17362_v25  ;;  %v17796_v40 = vld [vmem:[#allocation39_spill] sm:$0xff] (!%p11824_p5)  ;;  %v17797_v38 = vld [vmem:[#allocation36_spill] sm:$0xff] (!%p11824_p5) }
 0x5b8   : > { %10961 = vst [vmem:[#allocation12 + $0x20] sm:$0xff] (!%p11824_p5), %v10897_v32  ;;  %10962 = vst [vmem:[#allocation12 + $0x28] sm:$0xff] (!%p11824_p5), %v10898_v11  ;;  %v10907_v34 = vadd.f32 (!%p11824_p5), %v16380_v29, %v17362_v25  ;;  %v10908_v50 = vadd.f32 (!%p11824_p5), %v16384_v63, %v17362_v25  ;;  %v10909_v48 = vadd.f32 (!%p11824_p5), %v16390_v0, %v17362_v25  ;;  %v17798_v13 = vld [vmem:[#allocation38_spill] sm:$0xff] (!%p11824_p5)  ;;  %v17799_v22 = vld [vmem:[#allocation41_spill] sm:$0xff] (!%p11824_p5) }
 0x5b9   : > { %10963 = vst [vmem:[#allocation12 + $0x30] sm:$0xff] (!%p11824_p5), %v10899_v1  ;;  %10964 = vst [vmem:[#allocation12 + $0x38] sm:$0xff] (!%p11824_p5), %v10900_v52  ;;  %v10910_v15 = vadd.f32 (!%p11824_p5), %v16394_v3, %v17362_v25  ;;  %v10911_v10 = vadd.f32 (!%p11824_p5), %v16388_v60, %v17362_v25  ;;  %v10912_v27 = vadd.f32 (!%p11824_p5), %v16392_v53, %v17362_v25  ;;  %v17800_v24 = vld [vmem:[#allocation43_spill] sm:$0xff] (!%p11824_p5)  ;;  %v17801_v58 = vld [vmem:[#allocation40_spill] sm:$0xff] (!%p11824_p5) }
 0x5ba   : > { %10965 = vst [vmem:[#allocation12 + $0x40] sm:$0xff] %v10901_v39  ;;  %10966 = vst [vmem:[#allocation12 + $0x48] sm:$0xff] %v10902_v2  ;;  %v10913_v29 = vadd.f32 %v16398_v28, %v17362_v25  ;;  %v10914_v63 = vadd.f32 %v16402_v41, %v17362_v25  ;;  %v10915_v0 = vadd.f32 %v16396_v42, %v17362_v25  ;;  %v17802_v6 = vld [vmem:[#allocation42_spill] sm:$0xff]  ;;  %v17803_v36 = vld [vmem:[#allocation45_spill] sm:$0xff] }
 0x5bb   : > { %10967 = vst [vmem:[#allocation12 + $0x50] sm:$0xff] %v10903_v20  ;;  %10968 = vst [vmem:[#allocation12 + $0x58] sm:$0xff] %v10904_v55  ;;  %v10916_v3 = vadd.f32 %v16400_v46, %v17362_v25  ;;  %v10917_v60 = vadd.f32 %v16406_v16, %v17362_v25  ;;  %v10918_v53 = vadd.f32 %v16410_v8, %v17362_v25  ;;  %v17804_v39 = vld [vmem:[#allocation47_spill] sm:$0xff]  ;;  %v17805_v20 = vld [vmem:[#allocation44_spill] sm:$0xff] }
 0x5bc   : > { %10969 = vst [vmem:[#allocation12 + $0x60] sm:$0xff] %v10905_v19  ;;  %10970 = vst [vmem:[#allocation12 + $0x68] sm:$0xff] %v10906_v51  ;;  %v10919_v28 = vadd.f32 %v16404_v7, %v17362_v25  ;;  %v10920_v41 = vadd.f32 %v16408_v21, %v17362_v25  ;;  %v10921_v42 = vadd.f32 %v16414_v43, %v17362_v25  ;;  %v17806_v19 = vld [vmem:[#allocation46_spill] sm:$0xff] }
 0x5bd   : > { %10971 = vst [vmem:[#allocation12 + $0x70] sm:$0xff] %v10907_v34  ;;  %10972 = vst [vmem:[#allocation12 + $0x78] sm:$0xff] %v10908_v50  ;;  %v10922_v46 = vadd.f32 %v16420_v12, %v17362_v25  ;;  %v10923_v16 = vadd.f32 %v16412_v62, %v17362_v25  ;;  %v10924_v8 = vadd.f32 %v16417_v45, %v17362_v25  ;;  %v17786_v12 = vld [vmem:[#allocation22_spill] sm:$0xff]  ;;  %v17787_v62 = vld [vmem:[#allocation29_spill] sm:$0xff] }
 0x5be   : > { %10973 = vst [vmem:[#allocation12 + $0x80] sm:$0xff] %v10909_v48  ;;  %10974 = vst [vmem:[#allocation12 + $0x88] sm:$0xff] %v10910_v15  ;;  %v10925_v7 = vadd.f32 %v16424_v61, %v17362_v25  ;;  %v10926_v21 = vadd.f32 %v16428_v14, %v17362_v25  ;;  %v10927_v43 = vadd.f32 %v16422_v37, %v17362_v25  ;;  %v17789_v61 = vld [vmem:[#allocation28_spill] sm:$0xff]  ;;  %v17790_v14 = vld [vmem:[#allocation30_spill] sm:$0xff] }
 0x5bf   : > { %10975 = vst [vmem:[#allocation12 + $0x90] sm:$0xff] %v10911_v10  ;;  %10976 = vst [vmem:[#allocation12 + $0x98] sm:$0xff] %v10912_v27  ;;  %v10928_v31 = vadd.f32 %v17786_v12, %v17362_v25  ;;  %v10929_v45 = vadd.f32 %v17787_v62, %v17362_v25  ;;  %v10930_v47 = vadd.f32 %v17788_v33, %v17362_v25  ;;  %v17791_v37 = vld [vmem:[#allocation33_spill] sm:$0xff]  ;;  %v17808_v48 = vld [vmem:[#allocation51_spill] sm:$0xff] }
 0x5c0   : > { %10977 = vst [vmem:[#allocation12 + $0xa0] sm:$0xff] %v10913_v29  ;;  %10978 = vst [vmem:[#allocation12 + $0xa8] sm:$0xff] %v10914_v63  ;;  %v10931_v35 = vadd.f32 %v17789_v61, %v17362_v25  ;;  %v10932_v4 = vadd.f32 %v17790_v14, %v17362_v25  ;;  %v10933_v59 = vadd.f32 %v17791_v37, %v17362_v25  ;;  %v17807_v34 = vld [vmem:[#allocation49_spill] sm:$0xff]  ;;  %v17809_v10 = vld [vmem:[#allocation48_spill] sm:$0xff] }
 0x5c1   : > { %10979 = vst [vmem:[#allocation12 + $0xb0] sm:$0xff] %v10915_v0  ;;  %10980 = vst [vmem:[#allocation12 + $0xb8] sm:$0xff] %v10916_v3  ;;  %v10934_v44 = vadd.f32 %v17792_v23, %v17362_v25  ;;  %v10935_v26 = vadd.f32 %v17793_v57, %v17362_v25  ;;  %v10936_v18 = vadd.f32 %v17794_v54, %v17362_v25  ;;  %v17810_v29 = vld [vmem:[#allocation50_spill] sm:$0xff]  ;;  %v17811_v0 = vld [vmem:[#allocation53_spill] sm:$0xff] }
 0x5c2   : > { %10981 = vst [vmem:[#allocation12 + $0xc0] sm:$0xff] %v10917_v60  ;;  %10982 = vst [vmem:[#allocation12 + $0xc8] sm:$0xff] %v10918_v53  ;;  %v10937_v5 = vadd.f32 %v17795_v56, %v17362_v25  ;;  %v10938_v9 = vadd.f32 %v17796_v40, %v17362_v25  ;;  %v10939_v30 = vadd.f32 %v17797_v38, %v17362_v25  ;;  %v17812_v60 = vld [vmem:[#allocation55_spill] sm:$0xff] }
 0x5c3   : > { %10983 = vst [vmem:[#allocation12 + $0xd0] sm:$0xff] %v10919_v28  ;;  %10984 = vst [vmem:[#allocation12 + $0xd8] sm:$0xff] %v10920_v41  ;;  %v10940_v17 = vadd.f32 %v17798_v13, %v17362_v25  ;;  %v10941_v49 = vadd.f32 %v17799_v22, %v17362_v25  ;;  %v10942_v32 = vadd.f32 %v17800_v24, %v17362_v25  ;;  %v17813_v28 = vld [vmem:[#allocation52_spill] sm:$0xff] }
 0x5c4   : > { %10985 = vst [vmem:[#allocation12 + $0xe0] sm:$0xff] %v10921_v42  ;;  %10986 = vst [vmem:[#allocation12 + $0xe8] sm:$0xff] %v10922_v46  ;;  %v10943_v11 = vadd.f32 %v17801_v58, %v17362_v25  ;;  %v10944_v1 = vadd.f32 %v17802_v6, %v17362_v25  ;;  %v10945_v52 = vadd.f32 %v17803_v36, %v17362_v25  ;;  %v17814_v42 = vld [vmem:[#allocation54_spill] sm:$0xff] }
 0x5c5   : > { %10987 = vst [vmem:[#allocation12 + $0xf0] sm:$0xff] %v10923_v16  ;;  %10988 = vst [vmem:[#allocation12 + $0xf8] sm:$0xff] %v10924_v8  ;;  %v10946_v2 = vadd.f32 %v17804_v39, %v17362_v25  ;;  %v10947_v55 = vadd.f32 %v17805_v20, %v17362_v25  ;;  %v10948_v51 = vadd.f32 %v17806_v19, %v17362_v25 }
 0x5c6   : > { %10989 = vst [vmem:[#allocation12 + $0x100] sm:$0xff] %v10925_v7  ;;  %10990 = vst [vmem:[#allocation12 + $0x108] sm:$0xff] %v10926_v21  ;;  %v10949_v50 = vadd.f32 %v17807_v34, %v17362_v25  ;;  %v10950_v15 = vadd.f32 %v17808_v48, %v17362_v25  ;;  %v10951_v27 = vadd.f32 %v17809_v10, %v17362_v25 }
 0x5c7   : > { %10991 = vst [vmem:[#allocation12 + $0x110] sm:$0xff] %v10927_v43  ;;  %10992 = vst [vmem:[#allocation12 + $0x118] sm:$0xff] %v10928_v31  ;;  %v10952_v63 = vadd.f32 %v17810_v29, %v17362_v25  ;;  %v10953_v3 = vadd.f32 %v17811_v0, %v17362_v25  ;;  %v10954_v53 = vadd.f32 %v17812_v60, %v17362_v25 }
 0x5c8   : > { %10993 = vst [vmem:[#allocation12 + $0x120] sm:$0xff] %v10929_v45  ;;  %10994 = vst [vmem:[#allocation12 + $0x128] sm:$0xff] %v10930_v47  ;;  %v10955_v41 = vadd.f32 %v17813_v28, %v17362_v25  ;;  %v10956_v46 = vadd.f32 %v17814_v42, %v17362_v25 }
 0x5c9   : > { %10995 = vst [vmem:[#allocation12 + $0x130] sm:$0xff] %v10931_v35  ;;  %10996 = vst [vmem:[#allocation12 + $0x138] sm:$0xff] %v10932_v4 }
 0x5ca   : > { %10997 = vst [vmem:[#allocation12 + $0x140] sm:$0xff] %v10933_v59  ;;  %10998 = vst [vmem:[#allocation12 + $0x148] sm:$0xff] %v10934_v44 }
 0x5cb   : > { %10999 = vst [vmem:[#allocation12 + $0x150] sm:$0xff] %v10935_v26  ;;  %11000 = vst [vmem:[#allocation12 + $0x158] sm:$0xff] %v10936_v18 }
 0x5cc   : > { %11001 = vst [vmem:[#allocation12 + $0x160] sm:$0xff] %v10937_v5  ;;  %11002 = vst [vmem:[#allocation12 + $0x168] sm:$0xff] %v10938_v9 }
 0x5cd   : > { %11003 = vst [vmem:[#allocation12 + $0x170] sm:$0xff] %v10939_v30  ;;  %11004 = vst [vmem:[#allocation12 + $0x178] sm:$0xff] %v10940_v17 }
 0x5ce   : > { %11005 = vst [vmem:[#allocation12 + $0x180] sm:$0xff] %v10941_v49  ;;  %11006 = vst [vmem:[#allocation12 + $0x188] sm:$0xff] %v10942_v32 }
 0x5cf   : > { %11007 = vst [vmem:[#allocation12 + $0x190] sm:$0xff] %v10943_v11  ;;  %11008 = vst [vmem:[#allocation12 + $0x198] sm:$0xff] %v10944_v1 }
 0x5d0   : > { %11009 = vst [vmem:[#allocation12 + $0x1a0] sm:$0xff] %v10945_v52  ;;  %11010 = vst [vmem:[#allocation12 + $0x1a8] sm:$0xff] %v10946_v2 }
 0x5d1   : > { %11011 = vst [vmem:[#allocation12 + $0x1b0] sm:$0xff] %v10947_v55  ;;  %11012 = vst [vmem:[#allocation12 + $0x1b8] sm:$0xff] %v10948_v51 }
 0x5d2   : > { %11013 = vst [vmem:[#allocation12 + $0x1c0] sm:$0xff] %v10949_v50  ;;  %11014 = vst [vmem:[#allocation12 + $0x1c8] sm:$0xff] %v10950_v15 }
 0x5d3   : > { %11015 = vst [vmem:[#allocation12 + $0x1d0] sm:$0xff] %v10951_v27  ;;  %11016 = vst [vmem:[#allocation12 + $0x1d8] sm:$0xff] %v10952_v63 }
 0x5d4   : > { %11017 = vst [vmem:[#allocation12 + $0x1e0] sm:$0xff] %v10953_v3  ;;  %11018 = vst [vmem:[#allocation12 + $0x1e8] sm:$0xff] %v10954_v53 }
 0x5d5   : > { %11019 = vst [vmem:[#allocation12 + $0x1f0] sm:$0xff] %v10955_v41  ;;  %11020 = vst [vmem:[#allocation12 + $0x1f8] sm:$0xff] %v10956_v46 }
 0x5d6 PF: > { %p13558_p7 = scmp.eq.s32.totalorder %s14200_s21, 4  ;;  %s14161_s19 = smov [#allocation12]  }
 0x5d7   : > { %s11027_s23 = sshll.u32 %s14161_s19, 4  ;;  %s11028_s23 = int_to_ptr.vmem [resolvable:$true] %s11027_s23 }
 0x5d8   : > { %s14101_s22 = scalar_lea.vmem %s11028_s23, 8192  ;;  %p14108_p3 = scmp.lt.s32.totalorder %s11028_s23, %s11028_s23 }
 0x5d9   : > { %p14102_p9 = scmp.ne.s32.totalorder %s11028_s23, %s14101_s22  ;;  %p14109_p8 = scmp.lt.s32.totalorder %s14101_s22, %s14101_s22 }
 0x5db   : > { %p14103_p2 = pnand %p14102_p9, %p13558_p7  ;;  %p14110_p4 = por %p14109_p8, %p14108_p3 }
 0x5dd   : > { %p14104_p10 = pneg %p14103_p2 }
 0x5df   : > { %p14111_p11 = pnand %p14110_p4, %p14104_p10 }
 0x5e1   : > { %14114 = shalt.err (!%p14111_p11)
}
 0x5e2   : > { %s14115_s13 = scalar_lea.hbm %s17523_s5, 8192 }
 0x5e3   : > { %p14116_p12 = scmp.ne.s32.totalorder %s17523_s5, %s14115_s13  ;;  %p14121_p0 = scmp.lt.u32.totalorder %s14115_s13, %s17523_s5 }
 0x5e5   : > { %p14117_p13 = pnand %p14116_p12, %p13558_p7 }
 0x5e7   : > { %p14118_p6 = pneg %p14117_p13 }
 0x5e9   : > { %p14123_p1 = pnand %p14121_p0, %p14118_p6 }
 0x5eb   : > { %14126 = shalt.err (!%p14123_p1)
}
 0x5ec   : > { %s14162_s24 = smov 128   ;;  %s14163_s29 = smov 8  }
 0x5ed   : > { %13534 = dma.vmem_to_hbm [thread:$0]  (%p13558_p7), %s11028_s23, 8192, %s17523_s5, [#allocation6], %s14162_s24, %s14162_s24, %s14163_s29  }
 0x5ee   : > { %14146 = dma.done.wait (%p13558_p7), [#allocation6], 8192  }
 0x5ef   : > { %14148 = vsyncadd (%p13558_p7), [#allocation6], 4294959104 }
 0x5f0 PF: > { %s19_s18 = sadd.s32 1, %s14151_s18  }
 0x5f1   : > { %p16_p5 = scmp.ge.s32.totalorder %s19_s18, 7  }
 0x5f3   :  { %18 = sbr.rel (!%p16_p5) target bundleno = 4 (0x4), region = 145 }
 0x5fa   :  { %11043 = vsyncpa [#allocation5], 1 }
 0x5fb   :  { %11045 = vsyncpa [#allocation5 + $0x1], 1 }
 0x5fc   :  { %11046 = vsyncpa [#allocation8], 1 }
 0x5fd   :  { %11047 = vsyncpa [#allocation11], 1 }
 0x5fe   :  { %11048 = vsyncpa [#allocation6], 1 }
 0x5ff   :  { %11050 = vsyncpa [#allocation6 + $0x1], 1 }
 0x600   :  { %11051 = vsyncmov [#allocation3] }
 0x603   :  { %s11052_s6 = vpop.sfrf %11051 }
 0x604   :  { %p11831_p9 = scmp.ne.s32.totalorder %s11052_s6, 0 }
 0x606   :  { %11056 = shalt.err (%p11831_p9)  }

</bundles_post_ra>
